<compile_context>
chip_gen: v7x
topology: tpu7x:2x2x1
jax: 0.10.0
libtpu: 0.0.40
codegen_flags: <defaults>
</compile_context>

<pallas_src>
import functools

import jax
import jax.numpy as jnp
from jax.experimental import pallas as pl
from jax.experimental.pallas import tpu as pltpu


# ----------------------------------------------------------------------------
# Fused kernel: GRU layer 1 + GRU layer 2 + attention/pooling/MLP head
# PyTorch GRU gate order: r, z, n
#   r = sig(Wir x + bir + Whr h + bhr)
#   z = sig(Wiz x + biz + Whz h + bhz)
#   n = tanh(Win x + bin + r*(Whn h + bhn))
#   h = (1-z)*n + z*h
# ----------------------------------------------------------------------------
def fused_net_kernel(
    x_ref,                                    # (T*B, E) f32 embedded input
    wih1_ref, whh1_ref, bi1_ref, bhn1_ref,    # layer-1 GRU (both directions)
    wih2_ref, whh2_ref, bi2_ref, bhn2_ref,    # layer-2 GRU (both directions)
    aw1_ref, ab1_ref, aw2_ref, ab2_ref,       # attention weights / biases
    w1_ref, b1_ref, w2_ref, b2_ref,           # MLP head
    out_ref,                                  # (B, output_size)
    gi_scr, h1_scr, h2_scr,                   # VMEM scratch
    *, T, B, H):
  F = 2 * H

  # ---------------- bidirectional GRU layer (hoisted projection) ------------
  def bidir_gru_layer(x_val, wih_ref, whh_ref, bi_ref, bhn_ref, h_out_scr):
    # 1) Hoisted input projection for ALL timesteps & both directions:
    #    one well-shaped bf16 matmul; r/z biases are pre-merged into bi.
    gi_all = jnp.dot(x_val.astype(jnp.bfloat16), wih_ref[...],
                     preferred_element_type=jnp.float32) + bi_ref[...]
    # One-time split of (T*B, 6H) into six lane-aligned gate slabs so the
    # serial loop below never does 32-lane extractions of a 6H-wide tensor.
    for k in range(6):
      gi_scr[k] = gi_all[:, k * H:(k + 1) * H]

    bhn_f = bhn_ref[0:1, :]
    bhn_b = bhn_ref[1:2, :]
    h_f = jnp.zeros((B, H), jnp.float32)
    h_b = jnp.zeros((B, H), jnp.float32)

    def gru_step(h_prev, t, g0, bhn):
      row = slice(t * B, (t + 1) * B)
      gh_r = jnp.dot(h_prev, whh_ref[g0 + 0], preferred_element_type=jnp.float32)
      gh_z = jnp.dot(h_prev, whh_ref[g0 + 1], preferred_element_type=jnp.float32)
      gh_n = jnp.dot(h_prev, whh_ref[g0 + 2], preferred_element_type=jnp.float32)
      r = jax.nn.sigmoid(gi_scr[g0 + 0, row, :] + gh_r)
      z = jax.nn.sigmoid(gi_scr[g0 + 1, row, :] + gh_z)
      n = jnp.tanh(gi_scr[g0 + 2, row, :] + r * (gh_n + bhn))
      return (1.0 - z) * n + z * h_prev

    # 2) Statically unrolled time loop; fwd and bwd recurrences interleaved
    #    (independent chains -> scheduler overlaps MXU/EUP/VPU work).
    for i in range(T):
      tf, tb = i, T - 1 - i
      h_f = gru_step(h_f, tf, 0, bhn_f)
      h_out_scr[tf * B:(tf + 1) * B, 0:H] = h_f
      h_b = gru_step(h_b, tb, 3, bhn_b)
      h_out_scr[tb * B:(tb + 1) * B, H:F] = h_b

  # ---------------- run the two GRU layers ----------------------------------
  bidir_gru_layer(x_ref[...], wih1_ref, whh1_ref, bi1_ref, bhn1_ref, h1_scr)
  bidir_gru_layer(h1_scr[...], wih2_ref, whh2_ref, bi2_ref, bhn2_ref, h2_scr)

  # ---------------- attention / pooling / MLP head ---------------------------
  def attention(h_all, aw_ref, ab_ref):
    # eij for every (t, b) row at once; step bias pre-broadcast per row.
    eij = jnp.sum(h_all * aw_ref[...], axis=1, keepdims=True)       # (T*B, 1)
    a = jnp.exp(jnp.tanh(eij + ab_ref[...]))
    denom = a[0:B, :]
    for t in range(1, T):
      denom = denom + a[t * B:(t + 1) * B, :]
    inv = pl.reciprocal(denom, approx=True)                         # EUP slot
    att = jnp.zeros((B, F), jnp.float32)
    for t in range(T):
      # epsilon added AFTER division -> matches the PyTorch Attention module.
      w_t = a[t * B:(t + 1) * B, :] * inv + 1e-10
      att = att + h_all[t * B:(t + 1) * B, :] * w_t
    return att

  h1 = h1_scr[...]
  h2 = h2_scr[...]
  att_lstm = attention(h1, aw1_ref, ab1_ref)
  att_gru = attention(h2, aw2_ref, ab2_ref)

  s = h2[0:B, :]
  m = h2[0:B, :]
  for t in range(1, T):
    blk = h2[t * B:(t + 1) * B, :]
    s = s + blk
    m = jnp.maximum(m, blk)
  avg_pool = s * (1.0 / T)              # constant scale, no runtime divide
  max_pool = m

  # Concat-free first Linear: W1 row-blocks in torch concat order
  # [att_lstm, att_gru, avg_pool, max_pool].
  hid = (jnp.dot(att_lstm, w1_ref[0 * F:1 * F, :], preferred_element_type=jnp.float32)
         + jnp.dot(att_gru, w1_ref[1 * F:2 * F, :], preferred_element_type=jnp.float32)
         + jnp.dot(avg_pool, w1_ref[2 * F:3 * F, :], preferred_element_type=jnp.float32)
         + jnp.dot(max_pool, w1_ref[3 * F:4 * F, :], preferred_element_type=jnp.float32)
         + b1_ref[...])
  hid = jnp.maximum(hid, 0.0)           # ReLU; dropout(0.1) = identity (eval)
  logits = jnp.dot(hid, w2_ref[...], preferred_element_type=jnp.float32) + b2_ref[...]
  out_ref[...] = jax.nn.sigmoid(logits)


# ----------------------------------------------------------------------------
# Forward wrapper (NeuralNet.forward equivalent, eval mode)
# ----------------------------------------------------------------------------
def neural_net_forward(params, x_ids, *, hidden_dim_1, output_size):
  H = hidden_dim_1
  B, T = x_ids.shape

  # TODO(synk): embedding gather (nn.Embedding lookup) stays in plain JAX;
  # data-dependent gather has no clean/worthwhile Pallas mapping here.
  embedded = params['emb'][x_ids]                               # (B, T, E)
  x_flat = jnp.transpose(embedded, (1, 0, 2)).reshape(T * B, embedded.shape[-1])

  # step bias broadcast to one value per (t, b) row (row = t*B + b)
  ab1 = jnp.repeat(params['ab1'], B).reshape(T * B, 1)
  ab2 = jnp.repeat(params['ab2'], B).reshape(T * B, 1)

  kernel = functools.partial(fused_net_kernel, T=T, B=B, H=H)
  vmem = pl.BlockSpec(memory_space=pltpu.MemorySpace.VMEM)
  return pl.pallas_call(
      kernel,
      out_shape=jax.ShapeDtypeStruct((B, output_size), jnp.float32),
      in_specs=[vmem] * 17,
      out_specs=vmem,
      scratch_shapes=[
          pltpu.VMEM((6, T * B, H), jnp.float32),    # gate slabs (reused by both layers)
          pltpu.VMEM((T * B, 2 * H), jnp.float32),   # h_lstm
          pltpu.VMEM((T * B, 2 * H), jnp.float32),   # h_gru
      ],
  )(x_flat,
    params['wih1'], params['whh1'], params['bi1'], params['bhn1'],
    params['wih2'], params['whh2'], params['bi2'], params['bhn2'],
    params['aw1'], ab1, params['aw2'], ab2,
    params['w_lin1'], params['bias1'], params['w_lin2'], params['bias2'])


# ----------------------------------------------------------------------------
# Parameter construction (deterministic, mirrors the PyTorch __init__ shapes,
# stored in the kernel-friendly layouts described above)
# ----------------------------------------------------------------------------
def init_params(key, input_dim, emb_dim, hidden_dim_1, hidden_dim_2,
                output_size, maxlen):
  H = hidden_dim_1
  F = 2 * H
  keys = jax.random.split(key, 32)
  ki = iter(range(32))

  def uniform(k, shape, bound):
    return jax.random.uniform(k, shape, jnp.float32, -bound, bound)

  # Embedding: N(0, 1), like torch.nn.Embedding default
  emb = jax.random.normal(keys[next(ki)], (input_dim, emb_dim), jnp.float32)

  def gru_layer_params(in_dim):
    bound = 1.0 / (H ** 0.5)

    def one_dir():
      wih_t = uniform(keys[next(ki)], (in_dim, 3 * H), bound)   # Wih^T, gates r,z,n
      whh_t = uniform(keys[next(ki)], (3, H, H), bound)         # Whh^T per gate
      bih = uniform(keys[next(ki)], (3 * H,), bound)
      bhh = uniform(keys[next(ki)], (3 * H,), bound)
      return wih_t, whh_t, bih, bhh

    wf, whf, bif, bhf = one_dir()
    wb, whb, bib, bhb = one_dir()
    wih = jnp.concatenate([wf, wb], axis=1).astype(jnp.bfloat16)   # (in, 6H) bf16
    whh = jnp.concatenate([whf, whb], axis=0)                      # (6, H, H) f32

    def merged_bias(bi, bh):
      # merge only the r and z biases; bhn must stay inside r*(Whn h + bhn)
      return jnp.concatenate([bi[0:H] + bh[0:H],
                              bi[H:2 * H] + bh[H:2 * H],
                              bi[2 * H:3 * H]])

    bi = jnp.concatenate([merged_bias(bif, bhf),
                          merged_bias(bib, bhb)]).reshape(1, 6 * H)
    bhn = jnp.stack([bhf[2 * H:3 * H], bhb[2 * H:3 * H]])          # (2, H)
    return wih, whh, bi, bhn

  wih1, whh1, bi1, bhn1 = gru_layer_params(emb_dim)
  wih2, whh2, bi2, bhn2 = gru_layer_params(F)

  def attn_params():
    bound = (6.0 / (F + 1)) ** 0.5            # xavier_uniform for (F, 1) weight
    w = uniform(keys[next(ki)], (1, F), bound)    # stored transposed
    b = jnp.zeros((maxlen,), jnp.float32)         # step bias (zeros at init)
    return w, b

  aw1, ab1 = attn_params()
  aw2, ab2 = attn_params()

  b1_bound = 1.0 / ((4 * F) ** 0.5)
  w_lin1 = uniform(keys[next(ki)], (4 * F, hidden_dim_2), b1_bound)
  bias1 = uniform(keys[next(ki)], (1, hidden_dim_2), b1_bound)
  b2_bound = 1.0 / (hidden_dim_2 ** 0.5)
  w_lin2 = uniform(keys[next(ki)], (hidden_dim_2, output_size), b2_bound)
  bias2 = uniform(keys[next(ki)], (1, output_size), b2_bound)

  return dict(emb=emb,
              wih1=wih1, whh1=whh1, bi1=bi1, bhn1=bhn1,
              wih2=wih2, whh2=whh2, bi2=bi2, bhn2=bhn2,
              aw1=aw1, ab1=ab1, aw2=aw2, ab2=ab2,
              w_lin1=w_lin1, bias1=bias1, w_lin2=w_lin2, bias2=bias2)


if __name__ == "__main__":
  # Small shapes consistent with the module
  input_dim = 50      # vocab size
  emb_dim = 32
  hidden_dim_1 = 32
  hidden_dim_2 = 16
  output_size = 1
  maxlen = 8
  batch = 2

  key = jax.random.PRNGKey(0)
  k_param, k_data = jax.random.split(key)

  params = init_params(k_param, input_dim, emb_dim, hidden_dim_1,
                       hidden_dim_2, output_size, maxlen)
  x_ids = jax.random.randint(k_data, (batch, maxlen), 0, input_dim, jnp.int32)

  fwd = jax.jit(functools.partial(neural_net_forward,
                                  hidden_dim_1=hidden_dim_1,
                                  output_size=output_size))
  out = fwd(params, x_ids)
  out = jax.block_until_ready(out)
  assert out.shape == (batch, output_size)
  print("KERNEL_OK")
</pallas_src>

<mosaic_0001>
module attributes {stable_mosaic.version = 11 : i64} {
  func.func @fused_net_kernel(%arg0: memref<16x32xf32, #tpu.memory_space<vmem>>, %arg1: memref<32x192xbf16, #tpu.memory_space<vmem>>, %arg2: memref<6x32x32xf32, #tpu.memory_space<vmem>>, %arg3: memref<1x192xf32, #tpu.memory_space<vmem>>, %arg4: memref<2x32xf32, #tpu.memory_space<vmem>>, %arg5: memref<64x192xbf16, #tpu.memory_space<vmem>>, %arg6: memref<6x32x32xf32, #tpu.memory_space<vmem>>, %arg7: memref<1x192xf32, #tpu.memory_space<vmem>>, %arg8: memref<2x32xf32, #tpu.memory_space<vmem>>, %arg9: memref<1x64xf32, #tpu.memory_space<vmem>>, %arg10: memref<16x1xf32, #tpu.memory_space<vmem>>, %arg11: memref<1x64xf32, #tpu.memory_space<vmem>>, %arg12: memref<16x1xf32, #tpu.memory_space<vmem>>, %arg13: memref<256x16xf32, #tpu.memory_space<vmem>>, %arg14: memref<1x16xf32, #tpu.memory_space<vmem>>, %arg15: memref<16x1xf32, #tpu.memory_space<vmem>>, %arg16: memref<1x1xf32, #tpu.memory_space<vmem>>, %arg17: memref<2x1xf32, #tpu.memory_space<vmem>>, %arg18: memref<6x16x32xf32, #tpu.memory_space<vmem>>, %arg19: memref<16x64xf32, #tpu.memory_space<vmem>>, %arg20: memref<16x64xf32, #tpu.memory_space<vmem>>) attributes {dimension_semantics = [], scalar_prefetch = 0 : i64, scratch_operands = 3 : i64, tpu.core_type = #tpu.core_type<tc>} {
    %c0 = arith.constant 0 : index
    %c0_0 = arith.constant 0 : index
    %0 = vector.load %arg0[%c0, %c0_0] : memref<16x32xf32, #tpu.memory_space<vmem>>, vector<16x32xf32>
    %1 = arith.truncf %0 : vector<16x32xf32> to vector<16x32xbf16>
    %c0_1 = arith.constant 0 : index
    %c0_2 = arith.constant 0 : index
    %2 = vector.load %arg1[%c0_1, %c0_2] : memref<32x192xbf16, #tpu.memory_space<vmem>>, vector<32x192xbf16>
    %cst = arith.constant dense<0.000000e+00> : vector<16x192xf32>
    %3 = tpu.matmul %1, %2, %cst {dimension_numbers = #tpu.dot_dimension_numbers<[1], [0], [0], [1], [0, 0, 1, 1], [], []>} : vector<16x32xbf16>, vector<32x192xbf16>, vector<16x192xf32> -> vector<16x192xf32>
    %c0_3 = arith.constant 0 : index
    %c0_4 = arith.constant 0 : index
    %4 = vector.load %arg3[%c0_3, %c0_4] : memref<1x192xf32, #tpu.memory_space<vmem>>, vector<1x192xf32>
    %5 = vector.broadcast %4 : vector<1x192xf32> to vector<16x192xf32>
    %6 = arith.addf %3, %5 : vector<16x192xf32>
    %7 = vector.extract_strided_slice %6 {offsets = [0, 0], sizes = [16, 32], strides = [1, 1]} : vector<16x192xf32> to vector<16x32xf32>
    %c0_5 = arith.constant 0 : index
    %c0_6 = arith.constant 0 : index
    %c0_7 = arith.constant 0 : index
    %8 = vector.load %arg18[%c0_5, %c0_6, %c0_7] : memref<6x16x32xf32, #tpu.memory_space<vmem>>, vector<1x16x32xf32>
    %9 = vector.shape_cast %8 : vector<1x16x32xf32> to vector<16x32xf32>
    %10 = vector.shape_cast %7 : vector<16x32xf32> to vector<1x16x32xf32>
    tpu.vector_store %arg18[%c0_5, %c0_6, %c0_7], %10 {strides = array<i32>} : memref<6x16x32xf32, #tpu.memory_space<vmem>>, vector<1x16x32xf32>,
    %11 = vector.extract_strided_slice %6 {offsets = [0, 32], sizes = [16, 32], strides = [1, 1]} : vector<16x192xf32> to vector<16x32xf32>
    %c1 = arith.constant 1 : index
    %c0_8 = arith.constant 0 : index
    %c0_9 = arith.constant 0 : index
    %12 = vector.load %arg18[%c1, %c0_8, %c0_9] : memref<6x16x32xf32, #tpu.memory_space<vmem>>, vector<1x16x32xf32>
    %13 = vector.shape_cast %12 : vector<1x16x32xf32> to vector<16x32xf32>
    %14 = vector.shape_cast %11 : vector<16x32xf32> to vector<1x16x32xf32>
    tpu.vector_store %arg18[%c1, %c0_8, %c0_9], %14 {strides = array<i32>} : memref<6x16x32xf32, #tpu.memory_space<vmem>>, vector<1x16x32xf32>,
    %15 = vector.extract_strided_slice %6 {offsets = [0, 64], sizes = [16, 32], strides = [1, 1]} : vector<16x192xf32> to vector<16x32xf32>
    %c2 = arith.constant 2 : index
    %c0_10 = arith.constant 0 : index
    %c0_11 = arith.constant 0 : index
    %16 = vector.load %arg18[%c2, %c0_10, %c0_11] : memref<6x16x32xf32, #tpu.memory_space<vmem>>, vector<1x16x32xf32>
    %17 = vector.shape_cast %16 : vector<1x16x32xf32> to vector<16x32xf32>
    %18 = vector.shape_cast %15 : vector<16x32xf32> to vector<1x16x32xf32>
    tpu.vector_store %arg18[%c2, %c0_10, %c0_11], %18 {strides = array<i32>} : memref<6x16x32xf32, #tpu.memory_space<vmem>>, vector<1x16x32xf32>,
    %19 = vector.extract_strided_slice %6 {offsets = [0, 96], sizes = [16, 32], strides = [1, 1]} : vector<16x192xf32> to vector<16x32xf32>
    %c3 = arith.constant 3 : index
    %c0_12 = arith.constant 0 : index
    %c0_13 = arith.constant 0 : index
    %20 = vector.load %arg18[%c3, %c0_12, %c0_13] : memref<6x16x32xf32, #tpu.memory_space<vmem>>, vector<1x16x32xf32>
    %21 = vector.shape_cast %20 : vector<1x16x32xf32> to vector<16x32xf32>
    %22 = vector.shape_cast %19 : vector<16x32xf32> to vector<1x16x32xf32>
    tpu.vector_store %arg18[%c3, %c0_12, %c0_13], %22 {strides = array<i32>} : memref<6x16x32xf32, #tpu.memory_space<vmem>>, vector<1x16x32xf32>,
    %23 = vector.extract_strided_slice %6 {offsets = [0, 128], sizes = [16, 32], strides = [1, 1]} : vector<16x192xf32> to vector<16x32xf32>
    %c4 = arith.constant 4 : index
    %c0_14 = arith.constant 0 : index
    %c0_15 = arith.constant 0 : index
    %24 = vector.load %arg18[%c4, %c0_14, %c0_15] : memref<6x16x32xf32, #tpu.memory_space<vmem>>, vector<1x16x32xf32>
    %25 = vector.shape_cast %24 : vector<1x16x32xf32> to vector<16x32xf32>
    %26 = vector.shape_cast %23 : vector<16x32xf32> to vector<1x16x32xf32>
    tpu.vector_store %arg18[%c4, %c0_14, %c0_15], %26 {strides = array<i32>} : memref<6x16x32xf32, #tpu.memory_space<vmem>>, vector<1x16x32xf32>,
    %27 = vector.extract_strided_slice %6 {offsets = [0, 160], sizes = [16, 32], strides = [1, 1]} : vector<16x192xf32> to vector<16x32xf32>
    %c5 = arith.constant 5 : index
    %c0_16 = arith.constant 0 : index
    %c0_17 = arith.constant 0 : index
    %28 = vector.load %arg18[%c5, %c0_16, %c0_17] : memref<6x16x32xf32, #tpu.memory_space<vmem>>, vector<1x16x32xf32>
    %29 = vector.shape_cast %28 : vector<1x16x32xf32> to vector<16x32xf32>
    %30 = vector.shape_cast %27 : vector<16x32xf32> to vector<1x16x32xf32>
    tpu.vector_store %arg18[%c5, %c0_16, %c0_17], %30 {strides = array<i32>} : memref<6x16x32xf32, #tpu.memory_space<vmem>>, vector<1x16x32xf32>,
    %c0_18 = arith.constant 0 : index
    %c0_19 = arith.constant 0 : index
    %31 = vector.load %arg4[%c0_18, %c0_19] : memref<2x32xf32, #tpu.memory_space<vmem>>, vector<1x32xf32>
    %c1_20 = arith.constant 1 : index
    %c0_21 = arith.constant 0 : index
    %32 = vector.load %arg4[%c1_20, %c0_21] : memref<2x32xf32, #tpu.memory_space<vmem>>, vector<1x32xf32>
    %cst_22 = arith.constant 0.000000e+00 : f32
    %33 = vector.broadcast %cst_22 : f32 to vector<2x32xf32>
    %cst_23 = arith.constant 0.000000e+00 : f32
    %34 = vector.broadcast %cst_23 : f32 to vector<2x32xf32>
    %c0_24 = arith.constant 0 : index
    %c0_25 = arith.constant 0 : index
    %c0_26 = arith.constant 0 : index
    %35 = vector.load %arg2[%c0_24, %c0_25, %c0_26] : memref<6x32x32xf32, #tpu.memory_space<vmem>>, vector<1x32x32xf32>
    %36 = vector.shape_cast %35 : vector<1x32x32xf32> to vector<32x32xf32>
    %cst_27 = arith.constant dense<0.000000e+00> : vector<2x32xf32>
    %37 = tpu.matmul %33, %36, %cst_27 {dimension_numbers = #tpu.dot_dimension_numbers<[1], [0], [0], [1], [0, 0, 1, 1], [], []>} : vector<2x32xf32>, vector<32x32xf32>, vector<2x32xf32> -> vector<2x32xf32>
    %c1_28 = arith.constant 1 : index
    %c0_29 = arith.constant 0 : index
    %c0_30 = arith.constant 0 : index
    %38 = vector.load %arg2[%c1_28, %c0_29, %c0_30] : memref<6x32x32xf32, #tpu.memory_space<vmem>>, vector<1x32x32xf32>
    %39 = vector.shape_cast %38 : vector<1x32x32xf32> to vector<32x32xf32>
    %cst_31 = arith.constant dense<0.000000e+00> : vector<2x32xf32>
    %40 = tpu.matmul %33, %39, %cst_31 {dimension_numbers = #tpu.dot_dimension_numbers<[1], [0], [0], [1], [0, 0, 1, 1], [], []>} : vector<2x32xf32>, vector<32x32xf32>, vector<2x32xf32> -> vector<2x32xf32>
    %c2_32 = arith.constant 2 : index
    %c0_33 = arith.constant 0 : index
    %c0_34 = arith.constant 0 : index
    %41 = vector.load %arg2[%c2_32, %c0_33, %c0_34] : memref<6x32x32xf32, #tpu.memory_space<vmem>>, vector<1x32x32xf32>
    %42 = vector.shape_cast %41 : vector<1x32x32xf32> to vector<32x32xf32>
    %cst_35 = arith.constant dense<0.000000e+00> : vector<2x32xf32>
    %43 = tpu.matmul %33, %42, %cst_35 {dimension_numbers = #tpu.dot_dimension_numbers<[1], [0], [0], [1], [0, 0, 1, 1], [], []>} : vector<2x32xf32>, vector<32x32xf32>, vector<2x32xf32> -> vector<2x32xf32>
    %c0_36 = arith.constant 0 : index
    %c0_37 = arith.constant 0 : index
    %c0_38 = arith.constant 0 : index
    %44 = vector.load %arg18[%c0_36, %c0_37, %c0_38] : memref<6x16x32xf32, #tpu.memory_space<vmem>>, vector<1x2x32xf32>
    %45 = vector.shape_cast %44 : vector<1x2x32xf32> to vector<2x32xf32>
    %46 = arith.addf %45, %37 : vector<2x32xf32>
    %47 = arith.negf %46 : vector<2x32xf32>
    %48 = math.exp %47 : vector<2x32xf32>
    %cst_39 = arith.constant 1.000000e+00 : f32
    %49 = vector.broadcast %cst_39 : f32 to vector<2x32xf32>
    %50 = arith.addf %49, %48 : vector<2x32xf32>
    %51 = arith.divf %49, %50 : vector<2x32xf32>
    %c1_40 = arith.constant 1 : index
    %c0_41 = arith.constant 0 : index
    %c0_42 = arith.constant 0 : index
    %52 = vector.load %arg18[%c1_40, %c0_41, %c0_42] : memref<6x16x32xf32, #tpu.memory_space<vmem>>, vector<1x2x32xf32>
    %53 = vector.shape_cast %52 : vector<1x2x32xf32> to vector<2x32xf32>
    %54 = arith.addf %53, %40 : vector<2x32xf32>
    %55 = arith.negf %54 : vector<2x32xf32>
    %56 = math.exp %55 : vector<2x32xf32>
    %cst_43 = arith.constant 1.000000e+00 : f32
    %57 = vector.broadcast %cst_43 : f32 to vector<2x32xf32>
    %58 = arith.addf %57, %56 : vector<2x32xf32>
    %59 = arith.divf %57, %58 : vector<2x32xf32>
    %c2_44 = arith.constant 2 : index
    %c0_45 = arith.constant 0 : index
    %c0_46 = arith.constant 0 : index
    %60 = vector.load %arg18[%c2_44, %c0_45, %c0_46] : memref<6x16x32xf32, #tpu.memory_space<vmem>>, vector<1x2x32xf32>
    %61 = vector.shape_cast %60 : vector<1x2x32xf32> to vector<2x32xf32>
    %62 = vector.broadcast %31 : vector<1x32xf32> to vector<2x32xf32>
    %63 = arith.addf %43, %62 : vector<2x32xf32>
    %64 = arith.mulf %51, %63 : vector<2x32xf32>
    %65 = arith.addf %61, %64 : vector<2x32xf32>
    %66 = math.tanh %65 : vector<2x32xf32>
    %cst_47 = arith.constant 1.000000e+00 : f32
    %67 = vector.broadcast %cst_47 : f32 to vector<2x32xf32>
    %68 = arith.subf %67, %59 : vector<2x32xf32>
    %69 = arith.mulf %68, %66 : vector<2x32xf32>
    %70 = arith.mulf %59, %33 : vector<2x32xf32>
    %71 = arith.addf %69, %70 : vector<2x32xf32>
    %c0_48 = arith.constant 0 : index
    %c0_49 = arith.constant 0 : index
    %72 = vector.load %arg19[%c0_48, %c0_49] : memref<16x64xf32, #tpu.memory_space<vmem>>, vector<2x32xf32>
    tpu.vector_store %arg19[%c0_48, %c0_49], %71 {strides = array<i32>} : memref<16x64xf32, #tpu.memory_space<vmem>>, vector<2x32xf32>,
    %c3_50 = arith.constant 3 : index
    %c0_51 = arith.constant 0 : index
    %c0_52 = arith.constant 0 : index
    %73 = vector.load %arg2[%c3_50, %c0_51, %c0_52] : memref<6x32x32xf32, #tpu.memory_space<vmem>>, vector<1x32x32xf32>
    %74 = vector.shape_cast %73 : vector<1x32x32xf32> to vector<32x32xf32>
    %cst_53 = arith.constant dense<0.000000e+00> : vector<2x32xf32>
    %75 = tpu.matmul %34, %74, %cst_53 {dimension_numbers = #tpu.dot_dimension_numbers<[1], [0], [0], [1], [0, 0, 1, 1], [], []>} : vector<2x32xf32>, vector<32x32xf32>, vector<2x32xf32> -> vector<2x32xf32>
    %c4_54 = arith.constant 4 : index
    %c0_55 = arith.constant 0 : index
    %c0_56 = arith.constant 0 : index
    %76 = vector.load %arg2[%c4_54, %c0_55, %c0_56] : memref<6x32x32xf32, #tpu.memory_space<vmem>>, vector<1x32x32xf32>
    %77 = vector.shape_cast %76 : vector<1x32x32xf32> to vector<32x32xf32>
    %cst_57 = arith.constant dense<0.000000e+00> : vector<2x32xf32>
    %78 = tpu.matmul %34, %77, %cst_57 {dimension_numbers = #tpu.dot_dimension_numbers<[1], [0], [0], [1], [0, 0, 1, 1], [], []>} : vector<2x32xf32>, vector<32x32xf32>, vector<2x32xf32> -> vector<2x32xf32>
    %c5_58 = arith.constant 5 : index
    %c0_59 = arith.constant 0 : index
    %c0_60 = arith.constant 0 : index
    %79 = vector.load %arg2[%c5_58, %c0_59, %c0_60] : memref<6x32x32xf32, #tpu.memory_space<vmem>>, vector<1x32x32xf32>
    %80 = vector.shape_cast %79 : vector<1x32x32xf32> to vector<32x32xf32>
    %cst_61 = arith.constant dense<0.000000e+00> : vector<2x32xf32>
    %81 = tpu.matmul %34, %80, %cst_61 {dimension_numbers = #tpu.dot_dimension_numbers<[1], [0], [0], [1], [0, 0, 1, 1], [], []>} : vector<2x32xf32>, vector<32x32xf32>, vector<2x32xf32> -> vector<2x32xf32>
    %c3_62 = arith.constant 3 : index
    %c14 = arith.constant 14 : index
    %c0_63 = arith.constant 0 : index
    %82 = vector.load %arg18[%c3_62, %c14, %c0_63] : memref<6x16x32xf32, #tpu.memory_space<vmem>>, vector<1x2x32xf32>
    %83 = vector.shape_cast %82 : vector<1x2x32xf32> to vector<2x32xf32>
    %84 = arith.addf %83, %75 : vector<2x32xf32>
    %85 = arith.negf %84 : vector<2x32xf32>
    %86 = math.exp %85 : vector<2x32xf32>
    %cst_64 = arith.constant 1.000000e+00 : f32
    %87 = vector.broadcast %cst_64 : f32 to vector<2x32xf32>
    %88 = arith.addf %87, %86 : vector<2x32xf32>
    %89 = arith.divf %87, %88 : vector<2x32xf32>
    %c4_65 = arith.constant 4 : index
    %c14_66 = arith.constant 14 : index
    %c0_67 = arith.constant 0 : index
    %90 = vector.load %arg18[%c4_65, %c14_66, %c0_67] : memref<6x16x32xf32, #tpu.memory_space<vmem>>, vector<1x2x32xf32>
    %91 = vector.shape_cast %90 : vector<1x2x32xf32> to vector<2x32xf32>
    %92 = arith.addf %91, %78 : vector<2x32xf32>
    %93 = arith.negf %92 : vector<2x32xf32>
    %94 = math.exp %93 : vector<2x32xf32>
    %cst_68 = arith.constant 1.000000e+00 : f32
    %95 = vector.broadcast %cst_68 : f32 to vector<2x32xf32>
    %96 = arith.addf %95, %94 : vector<2x32xf32>
    %97 = arith.divf %95, %96 : vector<2x32xf32>
    %c5_69 = arith.constant 5 : index
    %c14_70 = arith.constant 14 : index
    %c0_71 = arith.constant 0 : index
    %98 = vector.load %arg18[%c5_69, %c14_70, %c0_71] : memref<6x16x32xf32, #tpu.memory_space<vmem>>, vector<1x2x32xf32>
    %99 = vector.shape_cast %98 : vector<1x2x32xf32> to vector<2x32xf32>
    %100 = vector.broadcast %32 : vector<1x32xf32> to vector<2x32xf32>
    %101 = arith.addf %81, %100 : vector<2x32xf32>
    %102 = arith.mulf %89, %101 : vector<2x32xf32>
    %103 = arith.addf %99, %102 : vector<2x32xf32>
    %104 = math.tanh %103 : vector<2x32xf32>
    %cst_72 = arith.constant 1.000000e+00 : f32
    %105 = vector.broadcast %cst_72 : f32 to vector<2x32xf32>
    %106 = arith.subf %105, %97 : vector<2x32xf32>
    %107 = arith.mulf %106, %104 : vector<2x32xf32>
    %108 = arith.mulf %97, %34 : vector<2x32xf32>
    %109 = arith.addf %107, %108 : vector<2x32xf32>
    %c14_73 = arith.constant 14 : index
    %c32 = arith.constant 32 : index
    %110 = vector.load %arg19[%c14_73, %c32] : memref<16x64xf32, #tpu.memory_space<vmem>>, vector<2x32xf32>
    tpu.vector_store %arg19[%c14_73, %c32], %109 {strides = array<i32>} : memref<16x64xf32, #tpu.memory_space<vmem>>, vector<2x32xf32>,
    %c0_74 = arith.constant 0 : index
    %c0_75 = arith.constant 0 : index
    %c0_76 = arith.constant 0 : index
    %111 = vector.load %arg2[%c0_74, %c0_75, %c0_76] : memref<6x32x32xf32, #tpu.memory_space<vmem>>, vector<1x32x32xf32>
    %112 = vector.shape_cast %111 : vector<1x32x32xf32> to vector<32x32xf32>
    %cst_77 = arith.constant dense<0.000000e+00> : vector<2x32xf32>
    %113 = tpu.matmul %71, %112, %cst_77 {dimension_numbers = #tpu.dot_dimension_numbers<[1], [0], [0], [1], [0, 0, 1, 1], [], []>} : vector<2x32xf32>, vector<32x32xf32>, vector<2x32xf32> -> vector<2x32xf32>
    %c1_78 = arith.constant 1 : index
    %c0_79 = arith.constant 0 : index
    %c0_80 = arith.constant 0 : index
    %114 = vector.load %arg2[%c1_78, %c0_79, %c0_80] : memref<6x32x32xf32, #tpu.memory_space<vmem>>, vector<1x32x32xf32>
    %115 = vector.shape_cast %114 : vector<1x32x32xf32> to vector<32x32xf32>
    %cst_81 = arith.constant dense<0.000000e+00> : vector<2x32xf32>
    %116 = tpu.matmul %71, %115, %cst_81 {dimension_numbers = #tpu.dot_dimension_numbers<[1], [0], [0], [1], [0, 0, 1, 1], [], []>} : vector<2x32xf32>, vector<32x32xf32>, vector<2x32xf32> -> vector<2x32xf32>
    %c2_82 = arith.constant 2 : index
    %c0_83 = arith.constant 0 : index
    %c0_84 = arith.constant 0 : index
    %117 = vector.load %arg2[%c2_82, %c0_83, %c0_84] : memref<6x32x32xf32, #tpu.memory_space<vmem>>, vector<1x32x32xf32>
    %118 = vector.shape_cast %117 : vector<1x32x32xf32> to vector<32x32xf32>
    %cst_85 = arith.constant dense<0.000000e+00> : vector<2x32xf32>
    %119 = tpu.matmul %71, %118, %cst_85 {dimension_numbers = #tpu.dot_dimension_numbers<[1], [0], [0], [1], [0, 0, 1, 1], [], []>} : vector<2x32xf32>, vector<32x32xf32>, vector<2x32xf32> -> vector<2x32xf32>
    %c0_86 = arith.constant 0 : index
    %c2_87 = arith.constant 2 : index
    %c0_88 = arith.constant 0 : index
    %120 = vector.load %arg18[%c0_86, %c2_87, %c0_88] : memref<6x16x32xf32, #tpu.memory_space<vmem>>, vector<1x2x32xf32>
    %121 = vector.shape_cast %120 : vector<1x2x32xf32> to vector<2x32xf32>
    %122 = arith.addf %121, %113 : vector<2x32xf32>
    %123 = arith.negf %122 : vector<2x32xf32>
    %124 = math.exp %123 : vector<2x32xf32>
    %cst_89 = arith.constant 1.000000e+00 : f32
    %125 = vector.broadcast %cst_89 : f32 to vector<2x32xf32>
    %126 = arith.addf %125, %124 : vector<2x32xf32>
    %127 = arith.divf %125, %126 : vector<2x32xf32>
    %c1_90 = arith.constant 1 : index
    %c2_91 = arith.constant 2 : index
    %c0_92 = arith.constant 0 : index
    %128 = vector.load %arg18[%c1_90, %c2_91, %c0_92] : memref<6x16x32xf32, #tpu.memory_space<vmem>>, vector<1x2x32xf32>
    %129 = vector.shape_cast %128 : vector<1x2x32xf32> to vector<2x32xf32>
    %130 = arith.addf %129, %116 : vector<2x32xf32>
    %131 = arith.negf %130 : vector<2x32xf32>
    %132 = math.exp %131 : vector<2x32xf32>
    %cst_93 = arith.constant 1.000000e+00 : f32
    %133 = vector.broadcast %cst_93 : f32 to vector<2x32xf32>
    %134 = arith.addf %133, %132 : vector<2x32xf32>
    %135 = arith.divf %133, %134 : vector<2x32xf32>
    %c2_94 = arith.constant 2 : index
    %c2_95 = arith.constant 2 : index
    %c0_96 = arith.constant 0 : index
    %136 = vector.load %arg18[%c2_94, %c2_95, %c0_96] : memref<6x16x32xf32, #tpu.memory_space<vmem>>, vector<1x2x32xf32>
    %137 = vector.shape_cast %136 : vector<1x2x32xf32> to vector<2x32xf32>
    %138 = vector.broadcast %31 : vector<1x32xf32> to vector<2x32xf32>
    %139 = arith.addf %119, %138 : vector<2x32xf32>
    %140 = arith.mulf %127, %139 : vector<2x32xf32>
    %141 = arith.addf %137, %140 : vector<2x32xf32>
    %142 = math.tanh %141 : vector<2x32xf32>
    %cst_97 = arith.constant 1.000000e+00 : f32
    %143 = vector.broadcast %cst_97 : f32 to vector<2x32xf32>
    %144 = arith.subf %143, %135 : vector<2x32xf32>
    %145 = arith.mulf %144, %142 : vector<2x32xf32>
    %146 = arith.mulf %135, %71 : vector<2x32xf32>
    %147 = arith.addf %145, %146 : vector<2x32xf32>
    %c2_98 = arith.constant 2 : index
    %c0_99 = arith.constant 0 : index
    %148 = vector.load %arg19[%c2_98, %c0_99] : memref<16x64xf32, #tpu.memory_space<vmem>>, vector<2x32xf32>
    tpu.vector_store %arg19[%c2_98, %c0_99], %147 {strides = array<i32>} : memref<16x64xf32, #tpu.memory_space<vmem>>, vector<2x32xf32>,
    %c3_100 = arith.constant 3 : index
    %c0_101 = arith.constant 0 : index
    %c0_102 = arith.constant 0 : index
    %149 = vector.load %arg2[%c3_100, %c0_101, %c0_102] : memref<6x32x32xf32, #tpu.memory_space<vmem>>, vector<1x32x32xf32>
    %150 = vector.shape_cast %149 : vector<1x32x32xf32> to vector<32x32xf32>
    %cst_103 = arith.constant dense<0.000000e+00> : vector<2x32xf32>
    %151 = tpu.matmul %109, %150, %cst_103 {dimension_numbers = #tpu.dot_dimension_numbers<[1], [0], [0], [1], [0, 0, 1, 1], [], []>} : vector<2x32xf32>, vector<32x32xf32>, vector<2x32xf32> -> vector<2x32xf32>
    %c4_104 = arith.constant 4 : index
    %c0_105 = arith.constant 0 : index
    %c0_106 = arith.constant 0 : index
    %152 = vector.load %arg2[%c4_104, %c0_105, %c0_106] : memref<6x32x32xf32, #tpu.memory_space<vmem>>, vector<1x32x32xf32>
    %153 = vector.shape_cast %152 : vector<1x32x32xf32> to vector<32x32xf32>
    %cst_107 = arith.constant dense<0.000000e+00> : vector<2x32xf32>
    %154 = tpu.matmul %109, %153, %cst_107 {dimension_numbers = #tpu.dot_dimension_numbers<[1], [0], [0], [1], [0, 0, 1, 1], [], []>} : vector<2x32xf32>, vector<32x32xf32>, vector<2x32xf32> -> vector<2x32xf32>
    %c5_108 = arith.constant 5 : index
    %c0_109 = arith.constant 0 : index
    %c0_110 = arith.constant 0 : index
    %155 = vector.load %arg2[%c5_108, %c0_109, %c0_110] : memref<6x32x32xf32, #tpu.memory_space<vmem>>, vector<1x32x32xf32>
    %156 = vector.shape_cast %155 : vector<1x32x32xf32> to vector<32x32xf32>
    %cst_111 = arith.constant dense<0.000000e+00> : vector<2x32xf32>
    %157 = tpu.matmul %109, %156, %cst_111 {dimension_numbers = #tpu.dot_dimension_numbers<[1], [0], [0], [1], [0, 0, 1, 1], [], []>} : vector<2x32xf32>, vector<32x32xf32>, vector<2x32xf32> -> vector<2x32xf32>
    %c3_112 = arith.constant 3 : index
    %c12 = arith.constant 12 : index
    %c0_113 = arith.constant 0 : index
    %158 = vector.load %arg18[%c3_112, %c12, %c0_113] : memref<6x16x32xf32, #tpu.memory_space<vmem>>, vector<1x2x32xf32>
    %159 = vector.shape_cast %158 : vector<1x2x32xf32> to vector<2x32xf32>
    %160 = arith.addf %159, %151 : vector<2x32xf32>
    %161 = arith.negf %160 : vector<2x32xf32>
    %162 = math.exp %161 : vector<2x32xf32>
    %cst_114 = arith.constant 1.000000e+00 : f32
    %163 = vector.broadcast %cst_114 : f32 to vector<2x32xf32>
    %164 = arith.addf %163, %162 : vector<2x32xf32>
    %165 = arith.divf %163, %164 : vector<2x32xf32>
    %c4_115 = arith.constant 4 : index
    %c12_116 = arith.constant 12 : index
    %c0_117 = arith.constant 0 : index
    %166 = vector.load %arg18[%c4_115, %c12_116, %c0_117] : memref<6x16x32xf32, #tpu.memory_space<vmem>>, vector<1x2x32xf32>
    %167 = vector.shape_cast %166 : vector<1x2x32xf32> to vector<2x32xf32>
    %168 = arith.addf %167, %154 : vector<2x32xf32>
    %169 = arith.negf %168 : vector<2x32xf32>
    %170 = math.exp %169 : vector<2x32xf32>
    %cst_118 = arith.constant 1.000000e+00 : f32
    %171 = vector.broadcast %cst_118 : f32 to vector<2x32xf32>
    %172 = arith.addf %171, %170 : vector<2x32xf32>
    %173 = arith.divf %171, %172 : vector<2x32xf32>
    %c5_119 = arith.constant 5 : index
    %c12_120 = arith.constant 12 : index
    %c0_121 = arith.constant 0 : index
    %174 = vector.load %arg18[%c5_119, %c12_120, %c0_121] : memref<6x16x32xf32, #tpu.memory_space<vmem>>, vector<1x2x32xf32>
    %175 = vector.shape_cast %174 : vector<1x2x32xf32> to vector<2x32xf32>
    %176 = vector.broadcast %32 : vector<1x32xf32> to vector<2x32xf32>
    %177 = arith.addf %157, %176 : vector<2x32xf32>
    %178 = arith.mulf %165, %177 : vector<2x32xf32>
    %179 = arith.addf %175, %178 : vector<2x32xf32>
    %180 = math.tanh %179 : vector<2x32xf32>
    %cst_122 = arith.constant 1.000000e+00 : f32
    %181 = vector.broadcast %cst_122 : f32 to vector<2x32xf32>
    %182 = arith.subf %181, %173 : vector<2x32xf32>
    %183 = arith.mulf %182, %180 : vector<2x32xf32>
    %184 = arith.mulf %173, %109 : vector<2x32xf32>
    %185 = arith.addf %183, %184 : vector<2x32xf32>
    %c12_123 = arith.constant 12 : index
    %c32_124 = arith.constant 32 : index
    %186 = vector.load %arg19[%c12_123, %c32_124] : memref<16x64xf32, #tpu.memory_space<vmem>>, vector<2x32xf32>
    tpu.vector_store %arg19[%c12_123, %c32_124], %185 {strides = array<i32>} : memref<16x64xf32, #tpu.memory_space<vmem>>, vector<2x32xf32>,
    %c0_125 = arith.constant 0 : index
    %c0_126 = arith.constant 0 : index
    %c0_127 = arith.constant 0 : index
    %187 = vector.load %arg2[%c0_125, %c0_126, %c0_127] : memref<6x32x32xf32, #tpu.memory_space<vmem>>, vector<1x32x32xf32>
    %188 = vector.shape_cast %187 : vector<1x32x32xf32> to vector<32x32xf32>
    %cst_128 = arith.constant dense<0.000000e+00> : vector<2x32xf32>
    %189 = tpu.matmul %147, %188, %cst_128 {dimension_numbers = #tpu.dot_dimension_numbers<[1], [0], [0], [1], [0, 0, 1, 1], [], []>} : vector<2x32xf32>, vector<32x32xf32>, vector<2x32xf32> -> vector<2x32xf32>
    %c1_129 = arith.constant 1 : index
    %c0_130 = arith.constant 0 : index
    %c0_131 = arith.constant 0 : index
    %190 = vector.load %arg2[%c1_129, %c0_130, %c0_131] : memref<6x32x32xf32, #tpu.memory_space<vmem>>, vector<1x32x32xf32>
    %191 = vector.shape_cast %190 : vector<1x32x32xf32> to vector<32x32xf32>
    %cst_132 = arith.constant dense<0.000000e+00> : vector<2x32xf32>
    %192 = tpu.matmul %147, %191, %cst_132 {dimension_numbers = #tpu.dot_dimension_numbers<[1], [0], [0], [1], [0, 0, 1, 1], [], []>} : vector<2x32xf32>, vector<32x32xf32>, vector<2x32xf32> -> vector<2x32xf32>
    %c2_133 = arith.constant 2 : index
    %c0_134 = arith.constant 0 : index
    %c0_135 = arith.constant 0 : index
    %193 = vector.load %arg2[%c2_133, %c0_134, %c0_135] : memref<6x32x32xf32, #tpu.memory_space<vmem>>, vector<1x32x32xf32>
    %194 = vector.shape_cast %193 : vector<1x32x32xf32> to vector<32x32xf32>
    %cst_136 = arith.constant dense<0.000000e+00> : vector<2x32xf32>
    %195 = tpu.matmul %147, %194, %cst_136 {dimension_numbers = #tpu.dot_dimension_numbers<[1], [0], [0], [1], [0, 0, 1, 1], [], []>} : vector<2x32xf32>, vector<32x32xf32>, vector<2x32xf32> -> vector<2x32xf32>
    %c0_137 = arith.constant 0 : index
    %c4_138 = arith.constant 4 : index
    %c0_139 = arith.constant 0 : index
    %196 = vector.load %arg18[%c0_137, %c4_138, %c0_139] : memref<6x16x32xf32, #tpu.memory_space<vmem>>, vector<1x2x32xf32>
    %197 = vector.shape_cast %196 : vector<1x2x32xf32> to vector<2x32xf32>
    %198 = arith.addf %197, %189 : vector<2x32xf32>
    %199 = arith.negf %198 : vector<2x32xf32>
    %200 = math.exp %199 : vector<2x32xf32>
    %cst_140 = arith.constant 1.000000e+00 : f32
    %201 = vector.broadcast %cst_140 : f32 to vector<2x32xf32>
    %202 = arith.addf %201, %200 : vector<2x32xf32>
    %203 = arith.divf %201, %202 : vector<2x32xf32>
    %c1_141 = arith.constant 1 : index
    %c4_142 = arith.constant 4 : index
    %c0_143 = arith.constant 0 : index
    %204 = vector.load %arg18[%c1_141, %c4_142, %c0_143] : memref<6x16x32xf32, #tpu.memory_space<vmem>>, vector<1x2x32xf32>
    %205 = vector.shape_cast %204 : vector<1x2x32xf32> to vector<2x32xf32>
    %206 = arith.addf %205, %192 : vector<2x32xf32>
    %207 = arith.negf %206 : vector<2x32xf32>
    %208 = math.exp %207 : vector<2x32xf32>
    %cst_144 = arith.constant 1.000000e+00 : f32
    %209 = vector.broadcast %cst_144 : f32 to vector<2x32xf32>
    %210 = arith.addf %209, %208 : vector<2x32xf32>
    %211 = arith.divf %209, %210 : vector<2x32xf32>
    %c2_145 = arith.constant 2 : index
    %c4_146 = arith.constant 4 : index
    %c0_147 = arith.constant 0 : index
    %212 = vector.load %arg18[%c2_145, %c4_146, %c0_147] : memref<6x16x32xf32, #tpu.memory_space<vmem>>, vector<1x2x32xf32>
    %213 = vector.shape_cast %212 : vector<1x2x32xf32> to vector<2x32xf32>
    %214 = vector.broadcast %31 : vector<1x32xf32> to vector<2x32xf32>
    %215 = arith.addf %195, %214 : vector<2x32xf32>
    %216 = arith.mulf %203, %215 : vector<2x32xf32>
    %217 = arith.addf %213, %216 : vector<2x32xf32>
    %218 = math.tanh %217 : vector<2x32xf32>
    %cst_148 = arith.constant 1.000000e+00 : f32
    %219 = vector.broadcast %cst_148 : f32 to vector<2x32xf32>
    %220 = arith.subf %219, %211 : vector<2x32xf32>
    %221 = arith.mulf %220, %218 : vector<2x32xf32>
    %222 = arith.mulf %211, %147 : vector<2x32xf32>
    %223 = arith.addf %221, %222 : vector<2x32xf32>
    %c4_149 = arith.constant 4 : index
    %c0_150 = arith.constant 0 : index
    %224 = vector.load %arg19[%c4_149, %c0_150] : memref<16x64xf32, #tpu.memory_space<vmem>>, vector<2x32xf32>
    tpu.vector_store %arg19[%c4_149, %c0_150], %223 {strides = array<i32>} : memref<16x64xf32, #tpu.memory_space<vmem>>, vector<2x32xf32>,
    %c3_151 = arith.constant 3 : index
    %c0_152 = arith.constant 0 : index
    %c0_153 = arith.constant 0 : index
    %225 = vector.load %arg2[%c3_151, %c0_152, %c0_153] : memref<6x32x32xf32, #tpu.memory_space<vmem>>, vector<1x32x32xf32>
    %226 = vector.shape_cast %225 : vector<1x32x32xf32> to vector<32x32xf32>
    %cst_154 = arith.constant dense<0.000000e+00> : vector<2x32xf32>
    %227 = tpu.matmul %185, %226, %cst_154 {dimension_numbers = #tpu.dot_dimension_numbers<[1], [0], [0], [1], [0, 0, 1, 1], [], []>} : vector<2x32xf32>, vector<32x32xf32>, vector<2x32xf32> -> vector<2x32xf32>
    %c4_155 = arith.constant 4 : index
    %c0_156 = arith.constant 0 : index
    %c0_157 = arith.constant 0 : index
    %228 = vector.load %arg2[%c4_155, %c0_156, %c0_157] : memref<6x32x32xf32, #tpu.memory_space<vmem>>, vector<1x32x32xf32>
    %229 = vector.shape_cast %228 : vector<1x32x32xf32> to vector<32x32xf32>
    %cst_158 = arith.constant dense<0.000000e+00> : vector<2x32xf32>
    %230 = tpu.matmul %185, %229, %cst_158 {dimension_numbers = #tpu.dot_dimension_numbers<[1], [0], [0], [1], [0, 0, 1, 1], [], []>} : vector<2x32xf32>, vector<32x32xf32>, vector<2x32xf32> -> vector<2x32xf32>
    %c5_159 = arith.constant 5 : index
    %c0_160 = arith.constant 0 : index
    %c0_161 = arith.constant 0 : index
    %231 = vector.load %arg2[%c5_159, %c0_160, %c0_161] : memref<6x32x32xf32, #tpu.memory_space<vmem>>, vector<1x32x32xf32>
    %232 = vector.shape_cast %231 : vector<1x32x32xf32> to vector<32x32xf32>
    %cst_162 = arith.constant dense<0.000000e+00> : vector<2x32xf32>
    %233 = tpu.matmul %185, %232, %cst_162 {dimension_numbers = #tpu.dot_dimension_numbers<[1], [0], [0], [1], [0, 0, 1, 1], [], []>} : vector<2x32xf32>, vector<32x32xf32>, vector<2x32xf32> -> vector<2x32xf32>
    %c3_163 = arith.constant 3 : index
    %c10 = arith.constant 10 : index
    %c0_164 = arith.constant 0 : index
    %234 = vector.load %arg18[%c3_163, %c10, %c0_164] : memref<6x16x32xf32, #tpu.memory_space<vmem>>, vector<1x2x32xf32>
    %235 = vector.shape_cast %234 : vector<1x2x32xf32> to vector<2x32xf32>
    %236 = arith.addf %235, %227 : vector<2x32xf32>
    %237 = arith.negf %236 : vector<2x32xf32>
    %238 = math.exp %237 : vector<2x32xf32>
    %cst_165 = arith.constant 1.000000e+00 : f32
    %239 = vector.broadcast %cst_165 : f32 to vector<2x32xf32>
    %240 = arith.addf %239, %238 : vector<2x32xf32>
    %241 = arith.divf %239, %240 : vector<2x32xf32>
    %c4_166 = arith.constant 4 : index
    %c10_167 = arith.constant 10 : index
    %c0_168 = arith.constant 0 : index
    %242 = vector.load %arg18[%c4_166, %c10_167, %c0_168] : memref<6x16x32xf32, #tpu.memory_space<vmem>>, vector<1x2x32xf32>
    %243 = vector.shape_cast %242 : vector<1x2x32xf32> to vector<2x32xf32>
    %244 = arith.addf %243, %230 : vector<2x32xf32>
    %245 = arith.negf %244 : vector<2x32xf32>
    %246 = math.exp %245 : vector<2x32xf32>
    %cst_169 = arith.constant 1.000000e+00 : f32
    %247 = vector.broadcast %cst_169 : f32 to vector<2x32xf32>
    %248 = arith.addf %247, %246 : vector<2x32xf32>
    %249 = arith.divf %247, %248 : vector<2x32xf32>
    %c5_170 = arith.constant 5 : index
    %c10_171 = arith.constant 10 : index
    %c0_172 = arith.constant 0 : index
    %250 = vector.load %arg18[%c5_170, %c10_171, %c0_172] : memref<6x16x32xf32, #tpu.memory_space<vmem>>, vector<1x2x32xf32>
    %251 = vector.shape_cast %250 : vector<1x2x32xf32> to vector<2x32xf32>
    %252 = vector.broadcast %32 : vector<1x32xf32> to vector<2x32xf32>
    %253 = arith.addf %233, %252 : vector<2x32xf32>
    %254 = arith.mulf %241, %253 : vector<2x32xf32>
    %255 = arith.addf %251, %254 : vector<2x32xf32>
    %256 = math.tanh %255 : vector<2x32xf32>
    %cst_173 = arith.constant 1.000000e+00 : f32
    %257 = vector.broadcast %cst_173 : f32 to vector<2x32xf32>
    %258 = arith.subf %257, %249 : vector<2x32xf32>
    %259 = arith.mulf %258, %256 : vector<2x32xf32>
    %260 = arith.mulf %249, %185 : vector<2x32xf32>
    %261 = arith.addf %259, %260 : vector<2x32xf32>
    %c10_174 = arith.constant 10 : index
    %c32_175 = arith.constant 32 : index
    %262 = vector.load %arg19[%c10_174, %c32_175] : memref<16x64xf32, #tpu.memory_space<vmem>>, vector<2x32xf32>
    tpu.vector_store %arg19[%c10_174, %c32_175], %261 {strides = array<i32>} : memref<16x64xf32, #tpu.memory_space<vmem>>, vector<2x32xf32>,
    %c0_176 = arith.constant 0 : index
    %c0_177 = arith.constant 0 : index
    %c0_178 = arith.constant 0 : index
    %263 = vector.load %arg2[%c0_176, %c0_177, %c0_178] : memref<6x32x32xf32, #tpu.memory_space<vmem>>, vector<1x32x32xf32>
    %264 = vector.shape_cast %263 : vector<1x32x32xf32> to vector<32x32xf32>
    %cst_179 = arith.constant dense<0.000000e+00> : vector<2x32xf32>
    %265 = tpu.matmul %223, %264, %cst_179 {dimension_numbers = #tpu.dot_dimension_numbers<[1], [0], [0], [1], [0, 0, 1, 1], [], []>} : vector<2x32xf32>, vector<32x32xf32>, vector<2x32xf32> -> vector<2x32xf32>
    %c1_180 = arith.constant 1 : index
    %c0_181 = arith.constant 0 : index
    %c0_182 = arith.constant 0 : index
    %266 = vector.load %arg2[%c1_180, %c0_181, %c0_182] : memref<6x32x32xf32, #tpu.memory_space<vmem>>, vector<1x32x32xf32>
    %267 = vector.shape_cast %266 : vector<1x32x32xf32> to vector<32x32xf32>
    %cst_183 = arith.constant dense<0.000000e+00> : vector<2x32xf32>
    %268 = tpu.matmul %223, %267, %cst_183 {dimension_numbers = #tpu.dot_dimension_numbers<[1], [0], [0], [1], [0, 0, 1, 1], [], []>} : vector<2x32xf32>, vector<32x32xf32>, vector<2x32xf32> -> vector<2x32xf32>
    %c2_184 = arith.constant 2 : index
    %c0_185 = arith.constant 0 : index
    %c0_186 = arith.constant 0 : index
    %269 = vector.load %arg2[%c2_184, %c0_185, %c0_186] : memref<6x32x32xf32, #tpu.memory_space<vmem>>, vector<1x32x32xf32>
    %270 = vector.shape_cast %269 : vector<1x32x32xf32> to vector<32x32xf32>
    %cst_187 = arith.constant dense<0.000000e+00> : vector<2x32xf32>
    %271 = tpu.matmul %223, %270, %cst_187 {dimension_numbers = #tpu.dot_dimension_numbers<[1], [0], [0], [1], [0, 0, 1, 1], [], []>} : vector<2x32xf32>, vector<32x32xf32>, vector<2x32xf32> -> vector<2x32xf32>
    %c0_188 = arith.constant 0 : index
    %c6 = arith.constant 6 : index
    %c0_189 = arith.constant 0 : index
    %272 = vector.load %arg18[%c0_188, %c6, %c0_189] : memref<6x16x32xf32, #tpu.memory_space<vmem>>, vector<1x2x32xf32>
    %273 = vector.shape_cast %272 : vector<1x2x32xf32> to vector<2x32xf32>
    %274 = arith.addf %273, %265 : vector<2x32xf32>
    %275 = arith.negf %274 : vector<2x32xf32>
    %276 = math.exp %275 : vector<2x32xf32>
    %cst_190 = arith.constant 1.000000e+00 : f32
    %277 = vector.broadcast %cst_190 : f32 to vector<2x32xf32>
    %278 = arith.addf %277, %276 : vector<2x32xf32>
    %279 = arith.divf %277, %278 : vector<2x32xf32>
    %c1_191 = arith.constant 1 : index
    %c6_192 = arith.constant 6 : index
    %c0_193 = arith.constant 0 : index
    %280 = vector.load %arg18[%c1_191, %c6_192, %c0_193] : memref<6x16x32xf32, #tpu.memory_space<vmem>>, vector<1x2x32xf32>
    %281 = vector.shape_cast %280 : vector<1x2x32xf32> to vector<2x32xf32>
    %282 = arith.addf %281, %268 : vector<2x32xf32>
    %283 = arith.negf %282 : vector<2x32xf32>
    %284 = math.exp %283 : vector<2x32xf32>
    %cst_194 = arith.constant 1.000000e+00 : f32
    %285 = vector.broadcast %cst_194 : f32 to vector<2x32xf32>
    %286 = arith.addf %285, %284 : vector<2x32xf32>
    %287 = arith.divf %285, %286 : vector<2x32xf32>
    %c2_195 = arith.constant 2 : index
    %c6_196 = arith.constant 6 : index
    %c0_197 = arith.constant 0 : index
    %288 = vector.load %arg18[%c2_195, %c6_196, %c0_197] : memref<6x16x32xf32, #tpu.memory_space<vmem>>, vector<1x2x32xf32>
    %289 = vector.shape_cast %288 : vector<1x2x32xf32> to vector<2x32xf32>
    %290 = vector.broadcast %31 : vector<1x32xf32> to vector<2x32xf32>
    %291 = arith.addf %271, %290 : vector<2x32xf32>
    %292 = arith.mulf %279, %291 : vector<2x32xf32>
    %293 = arith.addf %289, %292 : vector<2x32xf32>
    %294 = math.tanh %293 : vector<2x32xf32>
    %cst_198 = arith.constant 1.000000e+00 : f32
    %295 = vector.broadcast %cst_198 : f32 to vector<2x32xf32>
    %296 = arith.subf %295, %287 : vector<2x32xf32>
    %297 = arith.mulf %296, %294 : vector<2x32xf32>
    %298 = arith.mulf %287, %223 : vector<2x32xf32>
    %299 = arith.addf %297, %298 : vector<2x32xf32>
    %c6_199 = arith.constant 6 : index
    %c0_200 = arith.constant 0 : index
    %300 = vector.load %arg19[%c6_199, %c0_200] : memref<16x64xf32, #tpu.memory_space<vmem>>, vector<2x32xf32>
    tpu.vector_store %arg19[%c6_199, %c0_200], %299 {strides = array<i32>} : memref<16x64xf32, #tpu.memory_space<vmem>>, vector<2x32xf32>,
    %c3_201 = arith.constant 3 : index
    %c0_202 = arith.constant 0 : index
    %c0_203 = arith.constant 0 : index
    %301 = vector.load %arg2[%c3_201, %c0_202, %c0_203] : memref<6x32x32xf32, #tpu.memory_space<vmem>>, vector<1x32x32xf32>
    %302 = vector.shape_cast %301 : vector<1x32x32xf32> to vector<32x32xf32>
    %cst_204 = arith.constant dense<0.000000e+00> : vector<2x32xf32>
    %303 = tpu.matmul %261, %302, %cst_204 {dimension_numbers = #tpu.dot_dimension_numbers<[1], [0], [0], [1], [0, 0, 1, 1], [], []>} : vector<2x32xf32>, vector<32x32xf32>, vector<2x32xf32> -> vector<2x32xf32>
    %c4_205 = arith.constant 4 : index
    %c0_206 = arith.constant 0 : index
    %c0_207 = arith.constant 0 : index
    %304 = vector.load %arg2[%c4_205, %c0_206, %c0_207] : memref<6x32x32xf32, #tpu.memory_space<vmem>>, vector<1x32x32xf32>
    %305 = vector.shape_cast %304 : vector<1x32x32xf32> to vector<32x32xf32>
    %cst_208 = arith.constant dense<0.000000e+00> : vector<2x32xf32>
    %306 = tpu.matmul %261, %305, %cst_208 {dimension_numbers = #tpu.dot_dimension_numbers<[1], [0], [0], [1], [0, 0, 1, 1], [], []>} : vector<2x32xf32>, vector<32x32xf32>, vector<2x32xf32> -> vector<2x32xf32>
    %c5_209 = arith.constant 5 : index
    %c0_210 = arith.constant 0 : index
    %c0_211 = arith.constant 0 : index
    %307 = vector.load %arg2[%c5_209, %c0_210, %c0_211] : memref<6x32x32xf32, #tpu.memory_space<vmem>>, vector<1x32x32xf32>
    %308 = vector.shape_cast %307 : vector<1x32x32xf32> to vector<32x32xf32>
    %cst_212 = arith.constant dense<0.000000e+00> : vector<2x32xf32>
    %309 = tpu.matmul %261, %308, %cst_212 {dimension_numbers = #tpu.dot_dimension_numbers<[1], [0], [0], [1], [0, 0, 1, 1], [], []>} : vector<2x32xf32>, vector<32x32xf32>, vector<2x32xf32> -> vector<2x32xf32>
    %c3_213 = arith.constant 3 : index
    %c8 = arith.constant 8 : index
    %c0_214 = arith.constant 0 : index
    %310 = vector.load %arg18[%c3_213, %c8, %c0_214] : memref<6x16x32xf32, #tpu.memory_space<vmem>>, vector<1x2x32xf32>
    %311 = vector.shape_cast %310 : vector<1x2x32xf32> to vector<2x32xf32>
    %312 = arith.addf %311, %303 : vector<2x32xf32>
    %313 = arith.negf %312 : vector<2x32xf32>
    %314 = math.exp %313 : vector<2x32xf32>
    %cst_215 = arith.constant 1.000000e+00 : f32
    %315 = vector.broadcast %cst_215 : f32 to vector<2x32xf32>
    %316 = arith.addf %315, %314 : vector<2x32xf32>
    %317 = arith.divf %315, %316 : vector<2x32xf32>
    %c4_216 = arith.constant 4 : index
    %c8_217 = arith.constant 8 : index
    %c0_218 = arith.constant 0 : index
    %318 = vector.load %arg18[%c4_216, %c8_217, %c0_218] : memref<6x16x32xf32, #tpu.memory_space<vmem>>, vector<1x2x32xf32>
    %319 = vector.shape_cast %318 : vector<1x2x32xf32> to vector<2x32xf32>
    %320 = arith.addf %319, %306 : vector<2x32xf32>
    %321 = arith.negf %320 : vector<2x32xf32>
    %322 = math.exp %321 : vector<2x32xf32>
    %cst_219 = arith.constant 1.000000e+00 : f32
    %323 = vector.broadcast %cst_219 : f32 to vector<2x32xf32>
    %324 = arith.addf %323, %322 : vector<2x32xf32>
    %325 = arith.divf %323, %324 : vector<2x32xf32>
    %c5_220 = arith.constant 5 : index
    %c8_221 = arith.constant 8 : index
    %c0_222 = arith.constant 0 : index
    %326 = vector.load %arg18[%c5_220, %c8_221, %c0_222] : memref<6x16x32xf32, #tpu.memory_space<vmem>>, vector<1x2x32xf32>
    %327 = vector.shape_cast %326 : vector<1x2x32xf32> to vector<2x32xf32>
    %328 = vector.broadcast %32 : vector<1x32xf32> to vector<2x32xf32>
    %329 = arith.addf %309, %328 : vector<2x32xf32>
    %330 = arith.mulf %317, %329 : vector<2x32xf32>
    %331 = arith.addf %327, %330 : vector<2x32xf32>
    %332 = math.tanh %331 : vector<2x32xf32>
    %cst_223 = arith.constant 1.000000e+00 : f32
    %333 = vector.broadcast %cst_223 : f32 to vector<2x32xf32>
    %334 = arith.subf %333, %325 : vector<2x32xf32>
    %335 = arith.mulf %334, %332 : vector<2x32xf32>
    %336 = arith.mulf %325, %261 : vector<2x32xf32>
    %337 = arith.addf %335, %336 : vector<2x32xf32>
    %c8_224 = arith.constant 8 : index
    %c32_225 = arith.constant 32 : index
    %338 = vector.load %arg19[%c8_224, %c32_225] : memref<16x64xf32, #tpu.memory_space<vmem>>, vector<2x32xf32>
    tpu.vector_store %arg19[%c8_224, %c32_225], %337 {strides = array<i32>} : memref<16x64xf32, #tpu.memory_space<vmem>>, vector<2x32xf32>,
    %c0_226 = arith.constant 0 : index
    %c0_227 = arith.constant 0 : index
    %c0_228 = arith.constant 0 : index
    %339 = vector.load %arg2[%c0_226, %c0_227, %c0_228] : memref<6x32x32xf32, #tpu.memory_space<vmem>>, vector<1x32x32xf32>
    %340 = vector.shape_cast %339 : vector<1x32x32xf32> to vector<32x32xf32>
    %cst_229 = arith.constant dense<0.000000e+00> : vector<2x32xf32>
    %341 = tpu.matmul %299, %340, %cst_229 {dimension_numbers = #tpu.dot_dimension_numbers<[1], [0], [0], [1], [0, 0, 1, 1], [], []>} : vector<2x32xf32>, vector<32x32xf32>, vector<2x32xf32> -> vector<2x32xf32>
    %c1_230 = arith.constant 1 : index
    %c0_231 = arith.constant 0 : index
    %c0_232 = arith.constant 0 : index
    %342 = vector.load %arg2[%c1_230, %c0_231, %c0_232] : memref<6x32x32xf32, #tpu.memory_space<vmem>>, vector<1x32x32xf32>
    %343 = vector.shape_cast %342 : vector<1x32x32xf32> to vector<32x32xf32>
    %cst_233 = arith.constant dense<0.000000e+00> : vector<2x32xf32>
    %344 = tpu.matmul %299, %343, %cst_233 {dimension_numbers = #tpu.dot_dimension_numbers<[1], [0], [0], [1], [0, 0, 1, 1], [], []>} : vector<2x32xf32>, vector<32x32xf32>, vector<2x32xf32> -> vector<2x32xf32>
    %c2_234 = arith.constant 2 : index
    %c0_235 = arith.constant 0 : index
    %c0_236 = arith.constant 0 : index
    %345 = vector.load %arg2[%c2_234, %c0_235, %c0_236] : memref<6x32x32xf32, #tpu.memory_space<vmem>>, vector<1x32x32xf32>
    %346 = vector.shape_cast %345 : vector<1x32x32xf32> to vector<32x32xf32>
    %cst_237 = arith.constant dense<0.000000e+00> : vector<2x32xf32>
    %347 = tpu.matmul %299, %346, %cst_237 {dimension_numbers = #tpu.dot_dimension_numbers<[1], [0], [0], [1], [0, 0, 1, 1], [], []>} : vector<2x32xf32>, vector<32x32xf32>, vector<2x32xf32> -> vector<2x32xf32>
    %c0_238 = arith.constant 0 : index
    %c8_239 = arith.constant 8 : index
    %c0_240 = arith.constant 0 : index
    %348 = vector.load %arg18[%c0_238, %c8_239, %c0_240] : memref<6x16x32xf32, #tpu.memory_space<vmem>>, vector<1x2x32xf32>
    %349 = vector.shape_cast %348 : vector<1x2x32xf32> to vector<2x32xf32>
    %350 = arith.addf %349, %341 : vector<2x32xf32>
    %351 = arith.negf %350 : vector<2x32xf32>
    %352 = math.exp %351 : vector<2x32xf32>
    %cst_241 = arith.constant 1.000000e+00 : f32
    %353 = vector.broadcast %cst_241 : f32 to vector<2x32xf32>
    %354 = arith.addf %353, %352 : vector<2x32xf32>
    %355 = arith.divf %353, %354 : vector<2x32xf32>
    %c1_242 = arith.constant 1 : index
    %c8_243 = arith.constant 8 : index
    %c0_244 = arith.constant 0 : index
    %356 = vector.load %arg18[%c1_242, %c8_243, %c0_244] : memref<6x16x32xf32, #tpu.memory_space<vmem>>, vector<1x2x32xf32>
    %357 = vector.shape_cast %356 : vector<1x2x32xf32> to vector<2x32xf32>
    %358 = arith.addf %357, %344 : vector<2x32xf32>
    %359 = arith.negf %358 : vector<2x32xf32>
    %360 = math.exp %359 : vector<2x32xf32>
    %cst_245 = arith.constant 1.000000e+00 : f32
    %361 = vector.broadcast %cst_245 : f32 to vector<2x32xf32>
    %362 = arith.addf %361, %360 : vector<2x32xf32>
    %363 = arith.divf %361, %362 : vector<2x32xf32>
    %c2_246 = arith.constant 2 : index
    %c8_247 = arith.constant 8 : index
    %c0_248 = arith.constant 0 : index
    %364 = vector.load %arg18[%c2_246, %c8_247, %c0_248] : memref<6x16x32xf32, #tpu.memory_space<vmem>>, vector<1x2x32xf32>
    %365 = vector.shape_cast %364 : vector<1x2x32xf32> to vector<2x32xf32>
    %366 = vector.broadcast %31 : vector<1x32xf32> to vector<2x32xf32>
    %367 = arith.addf %347, %366 : vector<2x32xf32>
    %368 = arith.mulf %355, %367 : vector<2x32xf32>
    %369 = arith.addf %365, %368 : vector<2x32xf32>
    %370 = math.tanh %369 : vector<2x32xf32>
    %cst_249 = arith.constant 1.000000e+00 : f32
    %371 = vector.broadcast %cst_249 : f32 to vector<2x32xf32>
    %372 = arith.subf %371, %363 : vector<2x32xf32>
    %373 = arith.mulf %372, %370 : vector<2x32xf32>
    %374 = arith.mulf %363, %299 : vector<2x32xf32>
    %375 = arith.addf %373, %374 : vector<2x32xf32>
    %c8_250 = arith.constant 8 : index
    %c0_251 = arith.constant 0 : index
    %376 = vector.load %arg19[%c8_250, %c0_251] : memref<16x64xf32, #tpu.memory_space<vmem>>, vector<2x32xf32>
    tpu.vector_store %arg19[%c8_250, %c0_251], %375 {strides = array<i32>} : memref<16x64xf32, #tpu.memory_space<vmem>>, vector<2x32xf32>,
    %c3_252 = arith.constant 3 : index
    %c0_253 = arith.constant 0 : index
    %c0_254 = arith.constant 0 : index
    %377 = vector.load %arg2[%c3_252, %c0_253, %c0_254] : memref<6x32x32xf32, #tpu.memory_space<vmem>>, vector<1x32x32xf32>
    %378 = vector.shape_cast %377 : vector<1x32x32xf32> to vector<32x32xf32>
    %cst_255 = arith.constant dense<0.000000e+00> : vector<2x32xf32>
    %379 = tpu.matmul %337, %378, %cst_255 {dimension_numbers = #tpu.dot_dimension_numbers<[1], [0], [0], [1], [0, 0, 1, 1], [], []>} : vector<2x32xf32>, vector<32x32xf32>, vector<2x32xf32> -> vector<2x32xf32>
    %c4_256 = arith.constant 4 : index
    %c0_257 = arith.constant 0 : index
    %c0_258 = arith.constant 0 : index
    %380 = vector.load %arg2[%c4_256, %c0_257, %c0_258] : memref<6x32x32xf32, #tpu.memory_space<vmem>>, vector<1x32x32xf32>
    %381 = vector.shape_cast %380 : vector<1x32x32xf32> to vector<32x32xf32>
    %cst_259 = arith.constant dense<0.000000e+00> : vector<2x32xf32>
    %382 = tpu.matmul %337, %381, %cst_259 {dimension_numbers = #tpu.dot_dimension_numbers<[1], [0], [0], [1], [0, 0, 1, 1], [], []>} : vector<2x32xf32>, vector<32x32xf32>, vector<2x32xf32> -> vector<2x32xf32>
    %c5_260 = arith.constant 5 : index
    %c0_261 = arith.constant 0 : index
    %c0_262 = arith.constant 0 : index
    %383 = vector.load %arg2[%c5_260, %c0_261, %c0_262] : memref<6x32x32xf32, #tpu.memory_space<vmem>>, vector<1x32x32xf32>
    %384 = vector.shape_cast %383 : vector<1x32x32xf32> to vector<32x32xf32>
    %cst_263 = arith.constant dense<0.000000e+00> : vector<2x32xf32>
    %385 = tpu.matmul %337, %384, %cst_263 {dimension_numbers = #tpu.dot_dimension_numbers<[1], [0], [0], [1], [0, 0, 1, 1], [], []>} : vector<2x32xf32>, vector<32x32xf32>, vector<2x32xf32> -> vector<2x32xf32>
    %c3_264 = arith.constant 3 : index
    %c6_265 = arith.constant 6 : index
    %c0_266 = arith.constant 0 : index
    %386 = vector.load %arg18[%c3_264, %c6_265, %c0_266] : memref<6x16x32xf32, #tpu.memory_space<vmem>>, vector<1x2x32xf32>
    %387 = vector.shape_cast %386 : vector<1x2x32xf32> to vector<2x32xf32>
    %388 = arith.addf %387, %379 : vector<2x32xf32>
    %389 = arith.negf %388 : vector<2x32xf32>
    %390 = math.exp %389 : vector<2x32xf32>
    %cst_267 = arith.constant 1.000000e+00 : f32
    %391 = vector.broadcast %cst_267 : f32 to vector<2x32xf32>
    %392 = arith.addf %391, %390 : vector<2x32xf32>
    %393 = arith.divf %391, %392 : vector<2x32xf32>
    %c4_268 = arith.constant 4 : index
    %c6_269 = arith.constant 6 : index
    %c0_270 = arith.constant 0 : index
    %394 = vector.load %arg18[%c4_268, %c6_269, %c0_270] : memref<6x16x32xf32, #tpu.memory_space<vmem>>, vector<1x2x32xf32>
    %395 = vector.shape_cast %394 : vector<1x2x32xf32> to vector<2x32xf32>
    %396 = arith.addf %395, %382 : vector<2x32xf32>
    %397 = arith.negf %396 : vector<2x32xf32>
    %398 = math.exp %397 : vector<2x32xf32>
    %cst_271 = arith.constant 1.000000e+00 : f32
    %399 = vector.broadcast %cst_271 : f32 to vector<2x32xf32>
    %400 = arith.addf %399, %398 : vector<2x32xf32>
    %401 = arith.divf %399, %400 : vector<2x32xf32>
    %c5_272 = arith.constant 5 : index
    %c6_273 = arith.constant 6 : index
    %c0_274 = arith.constant 0 : index
    %402 = vector.load %arg18[%c5_272, %c6_273, %c0_274] : memref<6x16x32xf32, #tpu.memory_space<vmem>>, vector<1x2x32xf32>
    %403 = vector.shape_cast %402 : vector<1x2x32xf32> to vector<2x32xf32>
    %404 = vector.broadcast %32 : vector<1x32xf32> to vector<2x32xf32>
    %405 = arith.addf %385, %404 : vector<2x32xf32>
    %406 = arith.mulf %393, %405 : vector<2x32xf32>
    %407 = arith.addf %403, %406 : vector<2x32xf32>
    %408 = math.tanh %407 : vector<2x32xf32>
    %cst_275 = arith.constant 1.000000e+00 : f32
    %409 = vector.broadcast %cst_275 : f32 to vector<2x32xf32>
    %410 = arith.subf %409, %401 : vector<2x32xf32>
    %411 = arith.mulf %410, %408 : vector<2x32xf32>
    %412 = arith.mulf %401, %337 : vector<2x32xf32>
    %413 = arith.addf %411, %412 : vector<2x32xf32>
    %c6_276 = arith.constant 6 : index
    %c32_277 = arith.constant 32 : index
    %414 = vector.load %arg19[%c6_276, %c32_277] : memref<16x64xf32, #tpu.memory_space<vmem>>, vector<2x32xf32>
    tpu.vector_store %arg19[%c6_276, %c32_277], %413 {strides = array<i32>} : memref<16x64xf32, #tpu.memory_space<vmem>>, vector<2x32xf32>,
    %c0_278 = arith.constant 0 : index
    %c0_279 = arith.constant 0 : index
    %c0_280 = arith.constant 0 : index
    %415 = vector.load %arg2[%c0_278, %c0_279, %c0_280] : memref<6x32x32xf32, #tpu.memory_space<vmem>>, vector<1x32x32xf32>
    %416 = vector.shape_cast %415 : vector<1x32x32xf32> to vector<32x32xf32>
    %cst_281 = arith.constant dense<0.000000e+00> : vector<2x32xf32>
    %417 = tpu.matmul %375, %416, %cst_281 {dimension_numbers = #tpu.dot_dimension_numbers<[1], [0], [0], [1], [0, 0, 1, 1], [], []>} : vector<2x32xf32>, vector<32x32xf32>, vector<2x32xf32> -> vector<2x32xf32>
    %c1_282 = arith.constant 1 : index
    %c0_283 = arith.constant 0 : index
    %c0_284 = arith.constant 0 : index
    %418 = vector.load %arg2[%c1_282, %c0_283, %c0_284] : memref<6x32x32xf32, #tpu.memory_space<vmem>>, vector<1x32x32xf32>
    %419 = vector.shape_cast %418 : vector<1x32x32xf32> to vector<32x32xf32>
    %cst_285 = arith.constant dense<0.000000e+00> : vector<2x32xf32>
    %420 = tpu.matmul %375, %419, %cst_285 {dimension_numbers = #tpu.dot_dimension_numbers<[1], [0], [0], [1], [0, 0, 1, 1], [], []>} : vector<2x32xf32>, vector<32x32xf32>, vector<2x32xf32> -> vector<2x32xf32>
    %c2_286 = arith.constant 2 : index
    %c0_287 = arith.constant 0 : index
    %c0_288 = arith.constant 0 : index
    %421 = vector.load %arg2[%c2_286, %c0_287, %c0_288] : memref<6x32x32xf32, #tpu.memory_space<vmem>>, vector<1x32x32xf32>
    %422 = vector.shape_cast %421 : vector<1x32x32xf32> to vector<32x32xf32>
    %cst_289 = arith.constant dense<0.000000e+00> : vector<2x32xf32>
    %423 = tpu.matmul %375, %422, %cst_289 {dimension_numbers = #tpu.dot_dimension_numbers<[1], [0], [0], [1], [0, 0, 1, 1], [], []>} : vector<2x32xf32>, vector<32x32xf32>, vector<2x32xf32> -> vector<2x32xf32>
    %c0_290 = arith.constant 0 : index
    %c10_291 = arith.constant 10 : index
    %c0_292 = arith.constant 0 : index
    %424 = vector.load %arg18[%c0_290, %c10_291, %c0_292] : memref<6x16x32xf32, #tpu.memory_space<vmem>>, vector<1x2x32xf32>
    %425 = vector.shape_cast %424 : vector<1x2x32xf32> to vector<2x32xf32>
    %426 = arith.addf %425, %417 : vector<2x32xf32>
    %427 = arith.negf %426 : vector<2x32xf32>
    %428 = math.exp %427 : vector<2x32xf32>
    %cst_293 = arith.constant 1.000000e+00 : f32
    %429 = vector.broadcast %cst_293 : f32 to vector<2x32xf32>
    %430 = arith.addf %429, %428 : vector<2x32xf32>
    %431 = arith.divf %429, %430 : vector<2x32xf32>
    %c1_294 = arith.constant 1 : index
    %c10_295 = arith.constant 10 : index
    %c0_296 = arith.constant 0 : index
    %432 = vector.load %arg18[%c1_294, %c10_295, %c0_296] : memref<6x16x32xf32, #tpu.memory_space<vmem>>, vector<1x2x32xf32>
    %433 = vector.shape_cast %432 : vector<1x2x32xf32> to vector<2x32xf32>
    %434 = arith.addf %433, %420 : vector<2x32xf32>
    %435 = arith.negf %434 : vector<2x32xf32>
    %436 = math.exp %435 : vector<2x32xf32>
    %cst_297 = arith.constant 1.000000e+00 : f32
    %437 = vector.broadcast %cst_297 : f32 to vector<2x32xf32>
    %438 = arith.addf %437, %436 : vector<2x32xf32>
    %439 = arith.divf %437, %438 : vector<2x32xf32>
    %c2_298 = arith.constant 2 : index
    %c10_299 = arith.constant 10 : index
    %c0_300 = arith.constant 0 : index
    %440 = vector.load %arg18[%c2_298, %c10_299, %c0_300] : memref<6x16x32xf32, #tpu.memory_space<vmem>>, vector<1x2x32xf32>
    %441 = vector.shape_cast %440 : vector<1x2x32xf32> to vector<2x32xf32>
    %442 = vector.broadcast %31 : vector<1x32xf32> to vector<2x32xf32>
    %443 = arith.addf %423, %442 : vector<2x32xf32>
    %444 = arith.mulf %431, %443 : vector<2x32xf32>
    %445 = arith.addf %441, %444 : vector<2x32xf32>
    %446 = math.tanh %445 : vector<2x32xf32>
    %cst_301 = arith.constant 1.000000e+00 : f32
    %447 = vector.broadcast %cst_301 : f32 to vector<2x32xf32>
    %448 = arith.subf %447, %439 : vector<2x32xf32>
    %449 = arith.mulf %448, %446 : vector<2x32xf32>
    %450 = arith.mulf %439, %375 : vector<2x32xf32>
    %451 = arith.addf %449, %450 : vector<2x32xf32>
    %c10_302 = arith.constant 10 : index
    %c0_303 = arith.constant 0 : index
    %452 = vector.load %arg19[%c10_302, %c0_303] : memref<16x64xf32, #tpu.memory_space<vmem>>, vector<2x32xf32>
    tpu.vector_store %arg19[%c10_302, %c0_303], %451 {strides = array<i32>} : memref<16x64xf32, #tpu.memory_space<vmem>>, vector<2x32xf32>,
    %c3_304 = arith.constant 3 : index
    %c0_305 = arith.constant 0 : index
    %c0_306 = arith.constant 0 : index
    %453 = vector.load %arg2[%c3_304, %c0_305, %c0_306] : memref<6x32x32xf32, #tpu.memory_space<vmem>>, vector<1x32x32xf32>
    %454 = vector.shape_cast %453 : vector<1x32x32xf32> to vector<32x32xf32>
    %cst_307 = arith.constant dense<0.000000e+00> : vector<2x32xf32>
    %455 = tpu.matmul %413, %454, %cst_307 {dimension_numbers = #tpu.dot_dimension_numbers<[1], [0], [0], [1], [0, 0, 1, 1], [], []>} : vector<2x32xf32>, vector<32x32xf32>, vector<2x32xf32> -> vector<2x32xf32>
    %c4_308 = arith.constant 4 : index
    %c0_309 = arith.constant 0 : index
    %c0_310 = arith.constant 0 : index
    %456 = vector.load %arg2[%c4_308, %c0_309, %c0_310] : memref<6x32x32xf32, #tpu.memory_space<vmem>>, vector<1x32x32xf32>
    %457 = vector.shape_cast %456 : vector<1x32x32xf32> to vector<32x32xf32>
    %cst_311 = arith.constant dense<0.000000e+00> : vector<2x32xf32>
    %458 = tpu.matmul %413, %457, %cst_311 {dimension_numbers = #tpu.dot_dimension_numbers<[1], [0], [0], [1], [0, 0, 1, 1], [], []>} : vector<2x32xf32>, vector<32x32xf32>, vector<2x32xf32> -> vector<2x32xf32>
    %c5_312 = arith.constant 5 : index
    %c0_313 = arith.constant 0 : index
    %c0_314 = arith.constant 0 : index
    %459 = vector.load %arg2[%c5_312, %c0_313, %c0_314] : memref<6x32x32xf32, #tpu.memory_space<vmem>>, vector<1x32x32xf32>
    %460 = vector.shape_cast %459 : vector<1x32x32xf32> to vector<32x32xf32>
    %cst_315 = arith.constant dense<0.000000e+00> : vector<2x32xf32>
    %461 = tpu.matmul %413, %460, %cst_315 {dimension_numbers = #tpu.dot_dimension_numbers<[1], [0], [0], [1], [0, 0, 1, 1], [], []>} : vector<2x32xf32>, vector<32x32xf32>, vector<2x32xf32> -> vector<2x32xf32>
    %c3_316 = arith.constant 3 : index
    %c4_317 = arith.constant 4 : index
    %c0_318 = arith.constant 0 : index
    %462 = vector.load %arg18[%c3_316, %c4_317, %c0_318] : memref<6x16x32xf32, #tpu.memory_space<vmem>>, vector<1x2x32xf32>
    %463 = vector.shape_cast %462 : vector<1x2x32xf32> to vector<2x32xf32>
    %464 = arith.addf %463, %455 : vector<2x32xf32>
    %465 = arith.negf %464 : vector<2x32xf32>
    %466 = math.exp %465 : vector<2x32xf32>
    %cst_319 = arith.constant 1.000000e+00 : f32
    %467 = vector.broadcast %cst_319 : f32 to vector<2x32xf32>
    %468 = arith.addf %467, %466 : vector<2x32xf32>
    %469 = arith.divf %467, %468 : vector<2x32xf32>
    %c4_320 = arith.constant 4 : index
    %c4_321 = arith.constant 4 : index
    %c0_322 = arith.constant 0 : index
    %470 = vector.load %arg18[%c4_320, %c4_321, %c0_322] : memref<6x16x32xf32, #tpu.memory_space<vmem>>, vector<1x2x32xf32>
    %471 = vector.shape_cast %470 : vector<1x2x32xf32> to vector<2x32xf32>
    %472 = arith.addf %471, %458 : vector<2x32xf32>
    %473 = arith.negf %472 : vector<2x32xf32>
    %474 = math.exp %473 : vector<2x32xf32>
    %cst_323 = arith.constant 1.000000e+00 : f32
    %475 = vector.broadcast %cst_323 : f32 to vector<2x32xf32>
    %476 = arith.addf %475, %474 : vector<2x32xf32>
    %477 = arith.divf %475, %476 : vector<2x32xf32>
    %c5_324 = arith.constant 5 : index
    %c4_325 = arith.constant 4 : index
    %c0_326 = arith.constant 0 : index
    %478 = vector.load %arg18[%c5_324, %c4_325, %c0_326] : memref<6x16x32xf32, #tpu.memory_space<vmem>>, vector<1x2x32xf32>
    %479 = vector.shape_cast %478 : vector<1x2x32xf32> to vector<2x32xf32>
    %480 = vector.broadcast %32 : vector<1x32xf32> to vector<2x32xf32>
    %481 = arith.addf %461, %480 : vector<2x32xf32>
    %482 = arith.mulf %469, %481 : vector<2x32xf32>
    %483 = arith.addf %479, %482 : vector<2x32xf32>
    %484 = math.tanh %483 : vector<2x32xf32>
    %cst_327 = arith.constant 1.000000e+00 : f32
    %485 = vector.broadcast %cst_327 : f32 to vector<2x32xf32>
    %486 = arith.subf %485, %477 : vector<2x32xf32>
    %487 = arith.mulf %486, %484 : vector<2x32xf32>
    %488 = arith.mulf %477, %413 : vector<2x32xf32>
    %489 = arith.addf %487, %488 : vector<2x32xf32>
    %c4_328 = arith.constant 4 : index
    %c32_329 = arith.constant 32 : index
    %490 = vector.load %arg19[%c4_328, %c32_329] : memref<16x64xf32, #tpu.memory_space<vmem>>, vector<2x32xf32>
    tpu.vector_store %arg19[%c4_328, %c32_329], %489 {strides = array<i32>} : memref<16x64xf32, #tpu.memory_space<vmem>>, vector<2x32xf32>,
    %c0_330 = arith.constant 0 : index
    %c0_331 = arith.constant 0 : index
    %c0_332 = arith.constant 0 : index
    %491 = vector.load %arg2[%c0_330, %c0_331, %c0_332] : memref<6x32x32xf32, #tpu.memory_space<vmem>>, vector<1x32x32xf32>
    %492 = vector.shape_cast %491 : vector<1x32x32xf32> to vector<32x32xf32>
    %cst_333 = arith.constant dense<0.000000e+00> : vector<2x32xf32>
    %493 = tpu.matmul %451, %492, %cst_333 {dimension_numbers = #tpu.dot_dimension_numbers<[1], [0], [0], [1], [0, 0, 1, 1], [], []>} : vector<2x32xf32>, vector<32x32xf32>, vector<2x32xf32> -> vector<2x32xf32>
    %c1_334 = arith.constant 1 : index
    %c0_335 = arith.constant 0 : index
    %c0_336 = arith.constant 0 : index
    %494 = vector.load %arg2[%c1_334, %c0_335, %c0_336] : memref<6x32x32xf32, #tpu.memory_space<vmem>>, vector<1x32x32xf32>
    %495 = vector.shape_cast %494 : vector<1x32x32xf32> to vector<32x32xf32>
    %cst_337 = arith.constant dense<0.000000e+00> : vector<2x32xf32>
    %496 = tpu.matmul %451, %495, %cst_337 {dimension_numbers = #tpu.dot_dimension_numbers<[1], [0], [0], [1], [0, 0, 1, 1], [], []>} : vector<2x32xf32>, vector<32x32xf32>, vector<2x32xf32> -> vector<2x32xf32>
    %c2_338 = arith.constant 2 : index
    %c0_339 = arith.constant 0 : index
    %c0_340 = arith.constant 0 : index
    %497 = vector.load %arg2[%c2_338, %c0_339, %c0_340] : memref<6x32x32xf32, #tpu.memory_space<vmem>>, vector<1x32x32xf32>
    %498 = vector.shape_cast %497 : vector<1x32x32xf32> to vector<32x32xf32>
    %cst_341 = arith.constant dense<0.000000e+00> : vector<2x32xf32>
    %499 = tpu.matmul %451, %498, %cst_341 {dimension_numbers = #tpu.dot_dimension_numbers<[1], [0], [0], [1], [0, 0, 1, 1], [], []>} : vector<2x32xf32>, vector<32x32xf32>, vector<2x32xf32> -> vector<2x32xf32>
    %c0_342 = arith.constant 0 : index
    %c12_343 = arith.constant 12 : index
    %c0_344 = arith.constant 0 : index
    %500 = vector.load %arg18[%c0_342, %c12_343, %c0_344] : memref<6x16x32xf32, #tpu.memory_space<vmem>>, vector<1x2x32xf32>
    %501 = vector.shape_cast %500 : vector<1x2x32xf32> to vector<2x32xf32>
    %502 = arith.addf %501, %493 : vector<2x32xf32>
    %503 = arith.negf %502 : vector<2x32xf32>
    %504 = math.exp %503 : vector<2x32xf32>
    %cst_345 = arith.constant 1.000000e+00 : f32
    %505 = vector.broadcast %cst_345 : f32 to vector<2x32xf32>
    %506 = arith.addf %505, %504 : vector<2x32xf32>
    %507 = arith.divf %505, %506 : vector<2x32xf32>
    %c1_346 = arith.constant 1 : index
    %c12_347 = arith.constant 12 : index
    %c0_348 = arith.constant 0 : index
    %508 = vector.load %arg18[%c1_346, %c12_347, %c0_348] : memref<6x16x32xf32, #tpu.memory_space<vmem>>, vector<1x2x32xf32>
    %509 = vector.shape_cast %508 : vector<1x2x32xf32> to vector<2x32xf32>
    %510 = arith.addf %509, %496 : vector<2x32xf32>
    %511 = arith.negf %510 : vector<2x32xf32>
    %512 = math.exp %511 : vector<2x32xf32>
    %cst_349 = arith.constant 1.000000e+00 : f32
    %513 = vector.broadcast %cst_349 : f32 to vector<2x32xf32>
    %514 = arith.addf %513, %512 : vector<2x32xf32>
    %515 = arith.divf %513, %514 : vector<2x32xf32>
    %c2_350 = arith.constant 2 : index
    %c12_351 = arith.constant 12 : index
    %c0_352 = arith.constant 0 : index
    %516 = vector.load %arg18[%c2_350, %c12_351, %c0_352] : memref<6x16x32xf32, #tpu.memory_space<vmem>>, vector<1x2x32xf32>
    %517 = vector.shape_cast %516 : vector<1x2x32xf32> to vector<2x32xf32>
    %518 = vector.broadcast %31 : vector<1x32xf32> to vector<2x32xf32>
    %519 = arith.addf %499, %518 : vector<2x32xf32>
    %520 = arith.mulf %507, %519 : vector<2x32xf32>
    %521 = arith.addf %517, %520 : vector<2x32xf32>
    %522 = math.tanh %521 : vector<2x32xf32>
    %cst_353 = arith.constant 1.000000e+00 : f32
    %523 = vector.broadcast %cst_353 : f32 to vector<2x32xf32>
    %524 = arith.subf %523, %515 : vector<2x32xf32>
    %525 = arith.mulf %524, %522 : vector<2x32xf32>
    %526 = arith.mulf %515, %451 : vector<2x32xf32>
    %527 = arith.addf %525, %526 : vector<2x32xf32>
    %c12_354 = arith.constant 12 : index
    %c0_355 = arith.constant 0 : index
    %528 = vector.load %arg19[%c12_354, %c0_355] : memref<16x64xf32, #tpu.memory_space<vmem>>, vector<2x32xf32>
    tpu.vector_store %arg19[%c12_354, %c0_355], %527 {strides = array<i32>} : memref<16x64xf32, #tpu.memory_space<vmem>>, vector<2x32xf32>,
    %c3_356 = arith.constant 3 : index
    %c0_357 = arith.constant 0 : index
    %c0_358 = arith.constant 0 : index
    %529 = vector.load %arg2[%c3_356, %c0_357, %c0_358] : memref<6x32x32xf32, #tpu.memory_space<vmem>>, vector<1x32x32xf32>
    %530 = vector.shape_cast %529 : vector<1x32x32xf32> to vector<32x32xf32>
    %cst_359 = arith.constant dense<0.000000e+00> : vector<2x32xf32>
    %531 = tpu.matmul %489, %530, %cst_359 {dimension_numbers = #tpu.dot_dimension_numbers<[1], [0], [0], [1], [0, 0, 1, 1], [], []>} : vector<2x32xf32>, vector<32x32xf32>, vector<2x32xf32> -> vector<2x32xf32>
    %c4_360 = arith.constant 4 : index
    %c0_361 = arith.constant 0 : index
    %c0_362 = arith.constant 0 : index
    %532 = vector.load %arg2[%c4_360, %c0_361, %c0_362] : memref<6x32x32xf32, #tpu.memory_space<vmem>>, vector<1x32x32xf32>
    %533 = vector.shape_cast %532 : vector<1x32x32xf32> to vector<32x32xf32>
    %cst_363 = arith.constant dense<0.000000e+00> : vector<2x32xf32>
    %534 = tpu.matmul %489, %533, %cst_363 {dimension_numbers = #tpu.dot_dimension_numbers<[1], [0], [0], [1], [0, 0, 1, 1], [], []>} : vector<2x32xf32>, vector<32x32xf32>, vector<2x32xf32> -> vector<2x32xf32>
    %c5_364 = arith.constant 5 : index
    %c0_365 = arith.constant 0 : index
    %c0_366 = arith.constant 0 : index
    %535 = vector.load %arg2[%c5_364, %c0_365, %c0_366] : memref<6x32x32xf32, #tpu.memory_space<vmem>>, vector<1x32x32xf32>
    %536 = vector.shape_cast %535 : vector<1x32x32xf32> to vector<32x32xf32>
    %cst_367 = arith.constant dense<0.000000e+00> : vector<2x32xf32>
    %537 = tpu.matmul %489, %536, %cst_367 {dimension_numbers = #tpu.dot_dimension_numbers<[1], [0], [0], [1], [0, 0, 1, 1], [], []>} : vector<2x32xf32>, vector<32x32xf32>, vector<2x32xf32> -> vector<2x32xf32>
    %c3_368 = arith.constant 3 : index
    %c2_369 = arith.constant 2 : index
    %c0_370 = arith.constant 0 : index
    %538 = vector.load %arg18[%c3_368, %c2_369, %c0_370] : memref<6x16x32xf32, #tpu.memory_space<vmem>>, vector<1x2x32xf32>
    %539 = vector.shape_cast %538 : vector<1x2x32xf32> to vector<2x32xf32>
    %540 = arith.addf %539, %531 : vector<2x32xf32>
    %541 = arith.negf %540 : vector<2x32xf32>
    %542 = math.exp %541 : vector<2x32xf32>
    %cst_371 = arith.constant 1.000000e+00 : f32
    %543 = vector.broadcast %cst_371 : f32 to vector<2x32xf32>
    %544 = arith.addf %543, %542 : vector<2x32xf32>
    %545 = arith.divf %543, %544 : vector<2x32xf32>
    %c4_372 = arith.constant 4 : index
    %c2_373 = arith.constant 2 : index
    %c0_374 = arith.constant 0 : index
    %546 = vector.load %arg18[%c4_372, %c2_373, %c0_374] : memref<6x16x32xf32, #tpu.memory_space<vmem>>, vector<1x2x32xf32>
    %547 = vector.shape_cast %546 : vector<1x2x32xf32> to vector<2x32xf32>
    %548 = arith.addf %547, %534 : vector<2x32xf32>
    %549 = arith.negf %548 : vector<2x32xf32>
    %550 = math.exp %549 : vector<2x32xf32>
    %cst_375 = arith.constant 1.000000e+00 : f32
    %551 = vector.broadcast %cst_375 : f32 to vector<2x32xf32>
    %552 = arith.addf %551, %550 : vector<2x32xf32>
    %553 = arith.divf %551, %552 : vector<2x32xf32>
    %c5_376 = arith.constant 5 : index
    %c2_377 = arith.constant 2 : index
    %c0_378 = arith.constant 0 : index
    %554 = vector.load %arg18[%c5_376, %c2_377, %c0_378] : memref<6x16x32xf32, #tpu.memory_space<vmem>>, vector<1x2x32xf32>
    %555 = vector.shape_cast %554 : vector<1x2x32xf32> to vector<2x32xf32>
    %556 = vector.broadcast %32 : vector<1x32xf32> to vector<2x32xf32>
    %557 = arith.addf %537, %556 : vector<2x32xf32>
    %558 = arith.mulf %545, %557 : vector<2x32xf32>
    %559 = arith.addf %555, %558 : vector<2x32xf32>
    %560 = math.tanh %559 : vector<2x32xf32>
    %cst_379 = arith.constant 1.000000e+00 : f32
    %561 = vector.broadcast %cst_379 : f32 to vector<2x32xf32>
    %562 = arith.subf %561, %553 : vector<2x32xf32>
    %563 = arith.mulf %562, %560 : vector<2x32xf32>
    %564 = arith.mulf %553, %489 : vector<2x32xf32>
    %565 = arith.addf %563, %564 : vector<2x32xf32>
    %c2_380 = arith.constant 2 : index
    %c32_381 = arith.constant 32 : index
    %566 = vector.load %arg19[%c2_380, %c32_381] : memref<16x64xf32, #tpu.memory_space<vmem>>, vector<2x32xf32>
    tpu.vector_store %arg19[%c2_380, %c32_381], %565 {strides = array<i32>} : memref<16x64xf32, #tpu.memory_space<vmem>>, vector<2x32xf32>,
    %c0_382 = arith.constant 0 : index
    %c0_383 = arith.constant 0 : index
    %c0_384 = arith.constant 0 : index
    %567 = vector.load %arg2[%c0_382, %c0_383, %c0_384] : memref<6x32x32xf32, #tpu.memory_space<vmem>>, vector<1x32x32xf32>
    %568 = vector.shape_cast %567 : vector<1x32x32xf32> to vector<32x32xf32>
    %cst_385 = arith.constant dense<0.000000e+00> : vector<2x32xf32>
    %569 = tpu.matmul %527, %568, %cst_385 {dimension_numbers = #tpu.dot_dimension_numbers<[1], [0], [0], [1], [0, 0, 1, 1], [], []>} : vector<2x32xf32>, vector<32x32xf32>, vector<2x32xf32> -> vector<2x32xf32>
    %c1_386 = arith.constant 1 : index
    %c0_387 = arith.constant 0 : index
    %c0_388 = arith.constant 0 : index
    %570 = vector.load %arg2[%c1_386, %c0_387, %c0_388] : memref<6x32x32xf32, #tpu.memory_space<vmem>>, vector<1x32x32xf32>
    %571 = vector.shape_cast %570 : vector<1x32x32xf32> to vector<32x32xf32>
    %cst_389 = arith.constant dense<0.000000e+00> : vector<2x32xf32>
    %572 = tpu.matmul %527, %571, %cst_389 {dimension_numbers = #tpu.dot_dimension_numbers<[1], [0], [0], [1], [0, 0, 1, 1], [], []>} : vector<2x32xf32>, vector<32x32xf32>, vector<2x32xf32> -> vector<2x32xf32>
    %c2_390 = arith.constant 2 : index
    %c0_391 = arith.constant 0 : index
    %c0_392 = arith.constant 0 : index
    %573 = vector.load %arg2[%c2_390, %c0_391, %c0_392] : memref<6x32x32xf32, #tpu.memory_space<vmem>>, vector<1x32x32xf32>
    %574 = vector.shape_cast %573 : vector<1x32x32xf32> to vector<32x32xf32>
    %cst_393 = arith.constant dense<0.000000e+00> : vector<2x32xf32>
    %575 = tpu.matmul %527, %574, %cst_393 {dimension_numbers = #tpu.dot_dimension_numbers<[1], [0], [0], [1], [0, 0, 1, 1], [], []>} : vector<2x32xf32>, vector<32x32xf32>, vector<2x32xf32> -> vector<2x32xf32>
    %c0_394 = arith.constant 0 : index
    %c14_395 = arith.constant 14 : index
    %c0_396 = arith.constant 0 : index
    %576 = vector.load %arg18[%c0_394, %c14_395, %c0_396] : memref<6x16x32xf32, #tpu.memory_space<vmem>>, vector<1x2x32xf32>
    %577 = vector.shape_cast %576 : vector<1x2x32xf32> to vector<2x32xf32>
    %578 = arith.addf %577, %569 : vector<2x32xf32>
    %579 = arith.negf %578 : vector<2x32xf32>
    %580 = math.exp %579 : vector<2x32xf32>
    %cst_397 = arith.constant 1.000000e+00 : f32
    %581 = vector.broadcast %cst_397 : f32 to vector<2x32xf32>
    %582 = arith.addf %581, %580 : vector<2x32xf32>
    %583 = arith.divf %581, %582 : vector<2x32xf32>
    %c1_398 = arith.constant 1 : index
    %c14_399 = arith.constant 14 : index
    %c0_400 = arith.constant 0 : index
    %584 = vector.load %arg18[%c1_398, %c14_399, %c0_400] : memref<6x16x32xf32, #tpu.memory_space<vmem>>, vector<1x2x32xf32>
    %585 = vector.shape_cast %584 : vector<1x2x32xf32> to vector<2x32xf32>
    %586 = arith.addf %585, %572 : vector<2x32xf32>
    %587 = arith.negf %586 : vector<2x32xf32>
    %588 = math.exp %587 : vector<2x32xf32>
    %cst_401 = arith.constant 1.000000e+00 : f32
    %589 = vector.broadcast %cst_401 : f32 to vector<2x32xf32>
    %590 = arith.addf %589, %588 : vector<2x32xf32>
    %591 = arith.divf %589, %590 : vector<2x32xf32>
    %c2_402 = arith.constant 2 : index
    %c14_403 = arith.constant 14 : index
    %c0_404 = arith.constant 0 : index
    %592 = vector.load %arg18[%c2_402, %c14_403, %c0_404] : memref<6x16x32xf32, #tpu.memory_space<vmem>>, vector<1x2x32xf32>
    %593 = vector.shape_cast %592 : vector<1x2x32xf32> to vector<2x32xf32>
    %594 = vector.broadcast %31 : vector<1x32xf32> to vector<2x32xf32>
    %595 = arith.addf %575, %594 : vector<2x32xf32>
    %596 = arith.mulf %583, %595 : vector<2x32xf32>
    %597 = arith.addf %593, %596 : vector<2x32xf32>
    %598 = math.tanh %597 : vector<2x32xf32>
    %cst_405 = arith.constant 1.000000e+00 : f32
    %599 = vector.broadcast %cst_405 : f32 to vector<2x32xf32>
    %600 = arith.subf %599, %591 : vector<2x32xf32>
    %601 = arith.mulf %600, %598 : vector<2x32xf32>
    %602 = arith.mulf %591, %527 : vector<2x32xf32>
    %603 = arith.addf %601, %602 : vector<2x32xf32>
    %c14_406 = arith.constant 14 : index
    %c0_407 = arith.constant 0 : index
    %604 = vector.load %arg19[%c14_406, %c0_407] : memref<16x64xf32, #tpu.memory_space<vmem>>, vector<2x32xf32>
    tpu.vector_store %arg19[%c14_406, %c0_407], %603 {strides = array<i32>} : memref<16x64xf32, #tpu.memory_space<vmem>>, vector<2x32xf32>,
    %c3_408 = arith.constant 3 : index
    %c0_409 = arith.constant 0 : index
    %c0_410 = arith.constant 0 : index
    %605 = vector.load %arg2[%c3_408, %c0_409, %c0_410] : memref<6x32x32xf32, #tpu.memory_space<vmem>>, vector<1x32x32xf32>
    %606 = vector.shape_cast %605 : vector<1x32x32xf32> to vector<32x32xf32>
    %cst_411 = arith.constant dense<0.000000e+00> : vector<2x32xf32>
    %607 = tpu.matmul %565, %606, %cst_411 {dimension_numbers = #tpu.dot_dimension_numbers<[1], [0], [0], [1], [0, 0, 1, 1], [], []>} : vector<2x32xf32>, vector<32x32xf32>, vector<2x32xf32> -> vector<2x32xf32>
    %c4_412 = arith.constant 4 : index
    %c0_413 = arith.constant 0 : index
    %c0_414 = arith.constant 0 : index
    %608 = vector.load %arg2[%c4_412, %c0_413, %c0_414] : memref<6x32x32xf32, #tpu.memory_space<vmem>>, vector<1x32x32xf32>
    %609 = vector.shape_cast %608 : vector<1x32x32xf32> to vector<32x32xf32>
    %cst_415 = arith.constant dense<0.000000e+00> : vector<2x32xf32>
    %610 = tpu.matmul %565, %609, %cst_415 {dimension_numbers = #tpu.dot_dimension_numbers<[1], [0], [0], [1], [0, 0, 1, 1], [], []>} : vector<2x32xf32>, vector<32x32xf32>, vector<2x32xf32> -> vector<2x32xf32>
    %c5_416 = arith.constant 5 : index
    %c0_417 = arith.constant 0 : index
    %c0_418 = arith.constant 0 : index
    %611 = vector.load %arg2[%c5_416, %c0_417, %c0_418] : memref<6x32x32xf32, #tpu.memory_space<vmem>>, vector<1x32x32xf32>
    %612 = vector.shape_cast %611 : vector<1x32x32xf32> to vector<32x32xf32>
    %cst_419 = arith.constant dense<0.000000e+00> : vector<2x32xf32>
    %613 = tpu.matmul %565, %612, %cst_419 {dimension_numbers = #tpu.dot_dimension_numbers<[1], [0], [0], [1], [0, 0, 1, 1], [], []>} : vector<2x32xf32>, vector<32x32xf32>, vector<2x32xf32> -> vector<2x32xf32>
    %c3_420 = arith.constant 3 : index
    %c0_421 = arith.constant 0 : index
    %c0_422 = arith.constant 0 : index
    %614 = vector.load %arg18[%c3_420, %c0_421, %c0_422] : memref<6x16x32xf32, #tpu.memory_space<vmem>>, vector<1x2x32xf32>
    %615 = vector.shape_cast %614 : vector<1x2x32xf32> to vector<2x32xf32>
    %616 = arith.addf %615, %607 : vector<2x32xf32>
    %617 = arith.negf %616 : vector<2x32xf32>
    %618 = math.exp %617 : vector<2x32xf32>
    %cst_423 = arith.constant 1.000000e+00 : f32
    %619 = vector.broadcast %cst_423 : f32 to vector<2x32xf32>
    %620 = arith.addf %619, %618 : vector<2x32xf32>
    %621 = arith.divf %619, %620 : vector<2x32xf32>
    %c4_424 = arith.constant 4 : index
    %c0_425 = arith.constant 0 : index
    %c0_426 = arith.constant 0 : index
    %622 = vector.load %arg18[%c4_424, %c0_425, %c0_426] : memref<6x16x32xf32, #tpu.memory_space<vmem>>, vector<1x2x32xf32>
    %623 = vector.shape_cast %622 : vector<1x2x32xf32> to vector<2x32xf32>
    %624 = arith.addf %623, %610 : vector<2x32xf32>
    %625 = arith.negf %624 : vector<2x32xf32>
    %626 = math.exp %625 : vector<2x32xf32>
    %cst_427 = arith.constant 1.000000e+00 : f32
    %627 = vector.broadcast %cst_427 : f32 to vector<2x32xf32>
    %628 = arith.addf %627, %626 : vector<2x32xf32>
    %629 = arith.divf %627, %628 : vector<2x32xf32>
    %c5_428 = arith.constant 5 : index
    %c0_429 = arith.constant 0 : index
    %c0_430 = arith.constant 0 : index
    %630 = vector.load %arg18[%c5_428, %c0_429, %c0_430] : memref<6x16x32xf32, #tpu.memory_space<vmem>>, vector<1x2x32xf32>
    %631 = vector.shape_cast %630 : vector<1x2x32xf32> to vector<2x32xf32>
    %632 = vector.broadcast %32 : vector<1x32xf32> to vector<2x32xf32>
    %633 = arith.addf %613, %632 : vector<2x32xf32>
    %634 = arith.mulf %621, %633 : vector<2x32xf32>
    %635 = arith.addf %631, %634 : vector<2x32xf32>
    %636 = math.tanh %635 : vector<2x32xf32>
    %cst_431 = arith.constant 1.000000e+00 : f32
    %637 = vector.broadcast %cst_431 : f32 to vector<2x32xf32>
    %638 = arith.subf %637, %629 : vector<2x32xf32>
    %639 = arith.mulf %638, %636 : vector<2x32xf32>
    %640 = arith.mulf %629, %565 : vector<2x32xf32>
    %641 = arith.addf %639, %640 : vector<2x32xf32>
    %c0_432 = arith.constant 0 : index
    %c32_433 = arith.constant 32 : index
    %642 = vector.load %arg19[%c0_432, %c32_433] : memref<16x64xf32, #tpu.memory_space<vmem>>, vector<2x32xf32>
    tpu.vector_store %arg19[%c0_432, %c32_433], %641 {strides = array<i32>} : memref<16x64xf32, #tpu.memory_space<vmem>>, vector<2x32xf32>,
    %c0_434 = arith.constant 0 : index
    %c0_435 = arith.constant 0 : index
    %643 = vector.load %arg19[%c0_434, %c0_435] : memref<16x64xf32, #tpu.memory_space<vmem>>, vector<16x64xf32>
    %644 = arith.truncf %643 : vector<16x64xf32> to vector<16x64xbf16>
    %c0_436 = arith.constant 0 : index
    %c0_437 = arith.constant 0 : index
    %645 = vector.load %arg5[%c0_436, %c0_437] : memref<64x192xbf16, #tpu.memory_space<vmem>>, vector<64x192xbf16>
    %cst_438 = arith.constant dense<0.000000e+00> : vector<16x192xf32>
    %646 = tpu.matmul %644, %645, %cst_438 {dimension_numbers = #tpu.dot_dimension_numbers<[1], [0], [0], [1], [0, 0, 1, 1], [], []>} : vector<16x64xbf16>, vector<64x192xbf16>, vector<16x192xf32> -> vector<16x192xf32>
    %c0_439 = arith.constant 0 : index
    %c0_440 = arith.constant 0 : index
    %647 = vector.load %arg7[%c0_439, %c0_440] : memref<1x192xf32, #tpu.memory_space<vmem>>, vector<1x192xf32>
    %648 = vector.broadcast %647 : vector<1x192xf32> to vector<16x192xf32>
    %649 = arith.addf %646, %648 : vector<16x192xf32>
    %650 = vector.extract_strided_slice %649 {offsets = [0, 0], sizes = [16, 32], strides = [1, 1]} : vector<16x192xf32> to vector<16x32xf32>
    %c0_441 = arith.constant 0 : index
    %c0_442 = arith.constant 0 : index
    %c0_443 = arith.constant 0 : index
    %651 = vector.load %arg18[%c0_441, %c0_442, %c0_443] : memref<6x16x32xf32, #tpu.memory_space<vmem>>, vector<1x16x32xf32>
    %652 = vector.shape_cast %651 : vector<1x16x32xf32> to vector<16x32xf32>
    %653 = vector.shape_cast %650 : vector<16x32xf32> to vector<1x16x32xf32>
    tpu.vector_store %arg18[%c0_441, %c0_442, %c0_443], %653 {strides = array<i32>} : memref<6x16x32xf32, #tpu.memory_space<vmem>>, vector<1x16x32xf32>,
    %654 = vector.extract_strided_slice %649 {offsets = [0, 32], sizes = [16, 32], strides = [1, 1]} : vector<16x192xf32> to vector<16x32xf32>
    %c1_444 = arith.constant 1 : index
    %c0_445 = arith.constant 0 : index
    %c0_446 = arith.constant 0 : index
    %655 = vector.load %arg18[%c1_444, %c0_445, %c0_446] : memref<6x16x32xf32, #tpu.memory_space<vmem>>, vector<1x16x32xf32>
    %656 = vector.shape_cast %655 : vector<1x16x32xf32> to vector<16x32xf32>
    %657 = vector.shape_cast %654 : vector<16x32xf32> to vector<1x16x32xf32>
    tpu.vector_store %arg18[%c1_444, %c0_445, %c0_446], %657 {strides = array<i32>} : memref<6x16x32xf32, #tpu.memory_space<vmem>>, vector<1x16x32xf32>,
    %658 = vector.extract_strided_slice %649 {offsets = [0, 64], sizes = [16, 32], strides = [1, 1]} : vector<16x192xf32> to vector<16x32xf32>
    %c2_447 = arith.constant 2 : index
    %c0_448 = arith.constant 0 : index
    %c0_449 = arith.constant 0 : index
    %659 = vector.load %arg18[%c2_447, %c0_448, %c0_449] : memref<6x16x32xf32, #tpu.memory_space<vmem>>, vector<1x16x32xf32>
    %660 = vector.shape_cast %659 : vector<1x16x32xf32> to vector<16x32xf32>
    %661 = vector.shape_cast %658 : vector<16x32xf32> to vector<1x16x32xf32>
    tpu.vector_store %arg18[%c2_447, %c0_448, %c0_449], %661 {strides = array<i32>} : memref<6x16x32xf32, #tpu.memory_space<vmem>>, vector<1x16x32xf32>,
    %662 = vector.extract_strided_slice %649 {offsets = [0, 96], sizes = [16, 32], strides = [1, 1]} : vector<16x192xf32> to vector<16x32xf32>
    %c3_450 = arith.constant 3 : index
    %c0_451 = arith.constant 0 : index
    %c0_452 = arith.constant 0 : index
    %663 = vector.load %arg18[%c3_450, %c0_451, %c0_452] : memref<6x16x32xf32, #tpu.memory_space<vmem>>, vector<1x16x32xf32>
    %664 = vector.shape_cast %663 : vector<1x16x32xf32> to vector<16x32xf32>
    %665 = vector.shape_cast %662 : vector<16x32xf32> to vector<1x16x32xf32>
    tpu.vector_store %arg18[%c3_450, %c0_451, %c0_452], %665 {strides = array<i32>} : memref<6x16x32xf32, #tpu.memory_space<vmem>>, vector<1x16x32xf32>,
    %666 = vector.extract_strided_slice %649 {offsets = [0, 128], sizes = [16, 32], strides = [1, 1]} : vector<16x192xf32> to vector<16x32xf32>
    %c4_453 = arith.constant 4 : index
    %c0_454 = arith.constant 0 : index
    %c0_455 = arith.constant 0 : index
    %667 = vector.load %arg18[%c4_453, %c0_454, %c0_455] : memref<6x16x32xf32, #tpu.memory_space<vmem>>, vector<1x16x32xf32>
    %668 = vector.shape_cast %667 : vector<1x16x32xf32> to vector<16x32xf32>
    %669 = vector.shape_cast %666 : vector<16x32xf32> to vector<1x16x32xf32>
    tpu.vector_store %arg18[%c4_453, %c0_454, %c0_455], %669 {strides = array<i32>} : memref<6x16x32xf32, #tpu.memory_space<vmem>>, vector<1x16x32xf32>,
    %670 = vector.extract_strided_slice %649 {offsets = [0, 160], sizes = [16, 32], strides = [1, 1]} : vector<16x192xf32> to vector<16x32xf32>
    %c5_456 = arith.constant 5 : index
    %c0_457 = arith.constant 0 : index
    %c0_458 = arith.constant 0 : index
    %671 = vector.load %arg18[%c5_456, %c0_457, %c0_458] : memref<6x16x32xf32, #tpu.memory_space<vmem>>, vector<1x16x32xf32>
    %672 = vector.shape_cast %671 : vector<1x16x32xf32> to vector<16x32xf32>
    %673 = vector.shape_cast %670 : vector<16x32xf32> to vector<1x16x32xf32>
    tpu.vector_store %arg18[%c5_456, %c0_457, %c0_458], %673 {strides = array<i32>} : memref<6x16x32xf32, #tpu.memory_space<vmem>>, vector<1x16x32xf32>,
    %c0_459 = arith.constant 0 : index
    %c0_460 = arith.constant 0 : index
    %674 = vector.load %arg8[%c0_459, %c0_460] : memref<2x32xf32, #tpu.memory_space<vmem>>, vector<1x32xf32>
    %c1_461 = arith.constant 1 : index
    %c0_462 = arith.constant 0 : index
    %675 = vector.load %arg8[%c1_461, %c0_462] : memref<2x32xf32, #tpu.memory_space<vmem>>, vector<1x32xf32>
    %cst_463 = arith.constant 0.000000e+00 : f32
    %676 = vector.broadcast %cst_463 : f32 to vector<2x32xf32>
    %cst_464 = arith.constant 0.000000e+00 : f32
    %677 = vector.broadcast %cst_464 : f32 to vector<2x32xf32>
    %c0_465 = arith.constant 0 : index
    %c0_466 = arith.constant 0 : index
    %c0_467 = arith.constant 0 : index
    %678 = vector.load %arg6[%c0_465, %c0_466, %c0_467] : memref<6x32x32xf32, #tpu.memory_space<vmem>>, vector<1x32x32xf32>
    %679 = vector.shape_cast %678 : vector<1x32x32xf32> to vector<32x32xf32>
    %cst_468 = arith.constant dense<0.000000e+00> : vector<2x32xf32>
    %680 = tpu.matmul %676, %679, %cst_468 {dimension_numbers = #tpu.dot_dimension_numbers<[1], [0], [0], [1], [0, 0, 1, 1], [], []>} : vector<2x32xf32>, vector<32x32xf32>, vector<2x32xf32> -> vector<2x32xf32>
    %c1_469 = arith.constant 1 : index
    %c0_470 = arith.constant 0 : index
    %c0_471 = arith.constant 0 : index
    %681 = vector.load %arg6[%c1_469, %c0_470, %c0_471] : memref<6x32x32xf32, #tpu.memory_space<vmem>>, vector<1x32x32xf32>
    %682 = vector.shape_cast %681 : vector<1x32x32xf32> to vector<32x32xf32>
    %cst_472 = arith.constant dense<0.000000e+00> : vector<2x32xf32>
    %683 = tpu.matmul %676, %682, %cst_472 {dimension_numbers = #tpu.dot_dimension_numbers<[1], [0], [0], [1], [0, 0, 1, 1], [], []>} : vector<2x32xf32>, vector<32x32xf32>, vector<2x32xf32> -> vector<2x32xf32>
    %c2_473 = arith.constant 2 : index
    %c0_474 = arith.constant 0 : index
    %c0_475 = arith.constant 0 : index
    %684 = vector.load %arg6[%c2_473, %c0_474, %c0_475] : memref<6x32x32xf32, #tpu.memory_space<vmem>>, vector<1x32x32xf32>
    %685 = vector.shape_cast %684 : vector<1x32x32xf32> to vector<32x32xf32>
    %cst_476 = arith.constant dense<0.000000e+00> : vector<2x32xf32>
    %686 = tpu.matmul %676, %685, %cst_476 {dimension_numbers = #tpu.dot_dimension_numbers<[1], [0], [0], [1], [0, 0, 1, 1], [], []>} : vector<2x32xf32>, vector<32x32xf32>, vector<2x32xf32> -> vector<2x32xf32>
    %c0_477 = arith.constant 0 : index
    %c0_478 = arith.constant 0 : index
    %c0_479 = arith.constant 0 : index
    %687 = vector.load %arg18[%c0_477, %c0_478, %c0_479] : memref<6x16x32xf32, #tpu.memory_space<vmem>>, vector<1x2x32xf32>
    %688 = vector.shape_cast %687 : vector<1x2x32xf32> to vector<2x32xf32>
    %689 = arith.addf %688, %680 : vector<2x32xf32>
    %690 = arith.negf %689 : vector<2x32xf32>
    %691 = math.exp %690 : vector<2x32xf32>
    %cst_480 = arith.constant 1.000000e+00 : f32
    %692 = vector.broadcast %cst_480 : f32 to vector<2x32xf32>
    %693 = arith.addf %692, %691 : vector<2x32xf32>
    %694 = arith.divf %692, %693 : vector<2x32xf32>
    %c1_481 = arith.constant 1 : index
    %c0_482 = arith.constant 0 : index
    %c0_483 = arith.constant 0 : index
    %695 = vector.load %arg18[%c1_481, %c0_482, %c0_483] : memref<6x16x32xf32, #tpu.memory_space<vmem>>, vector<1x2x32xf32>
    %696 = vector.shape_cast %695 : vector<1x2x32xf32> to vector<2x32xf32>
    %697 = arith.addf %696, %683 : vector<2x32xf32>
    %698 = arith.negf %697 : vector<2x32xf32>
    %699 = math.exp %698 : vector<2x32xf32>
    %cst_484 = arith.constant 1.000000e+00 : f32
    %700 = vector.broadcast %cst_484 : f32 to vector<2x32xf32>
    %701 = arith.addf %700, %699 : vector<2x32xf32>
    %702 = arith.divf %700, %701 : vector<2x32xf32>
    %c2_485 = arith.constant 2 : index
    %c0_486 = arith.constant 0 : index
    %c0_487 = arith.constant 0 : index
    %703 = vector.load %arg18[%c2_485, %c0_486, %c0_487] : memref<6x16x32xf32, #tpu.memory_space<vmem>>, vector<1x2x32xf32>
    %704 = vector.shape_cast %703 : vector<1x2x32xf32> to vector<2x32xf32>
    %705 = vector.broadcast %674 : vector<1x32xf32> to vector<2x32xf32>
    %706 = arith.addf %686, %705 : vector<2x32xf32>
    %707 = arith.mulf %694, %706 : vector<2x32xf32>
    %708 = arith.addf %704, %707 : vector<2x32xf32>
    %709 = math.tanh %708 : vector<2x32xf32>
    %cst_488 = arith.constant 1.000000e+00 : f32
    %710 = vector.broadcast %cst_488 : f32 to vector<2x32xf32>
    %711 = arith.subf %710, %702 : vector<2x32xf32>
    %712 = arith.mulf %711, %709 : vector<2x32xf32>
    %713 = arith.mulf %702, %676 : vector<2x32xf32>
    %714 = arith.addf %712, %713 : vector<2x32xf32>
    %c0_489 = arith.constant 0 : index
    %c0_490 = arith.constant 0 : index
    %715 = vector.load %arg20[%c0_489, %c0_490] : memref<16x64xf32, #tpu.memory_space<vmem>>, vector<2x32xf32>
    tpu.vector_store %arg20[%c0_489, %c0_490], %714 {strides = array<i32>} : memref<16x64xf32, #tpu.memory_space<vmem>>, vector<2x32xf32>,
    %c3_491 = arith.constant 3 : index
    %c0_492 = arith.constant 0 : index
    %c0_493 = arith.constant 0 : index
    %716 = vector.load %arg6[%c3_491, %c0_492, %c0_493] : memref<6x32x32xf32, #tpu.memory_space<vmem>>, vector<1x32x32xf32>
    %717 = vector.shape_cast %716 : vector<1x32x32xf32> to vector<32x32xf32>
    %cst_494 = arith.constant dense<0.000000e+00> : vector<2x32xf32>
    %718 = tpu.matmul %677, %717, %cst_494 {dimension_numbers = #tpu.dot_dimension_numbers<[1], [0], [0], [1], [0, 0, 1, 1], [], []>} : vector<2x32xf32>, vector<32x32xf32>, vector<2x32xf32> -> vector<2x32xf32>
    %c4_495 = arith.constant 4 : index
    %c0_496 = arith.constant 0 : index
    %c0_497 = arith.constant 0 : index
    %719 = vector.load %arg6[%c4_495, %c0_496, %c0_497] : memref<6x32x32xf32, #tpu.memory_space<vmem>>, vector<1x32x32xf32>
    %720 = vector.shape_cast %719 : vector<1x32x32xf32> to vector<32x32xf32>
    %cst_498 = arith.constant dense<0.000000e+00> : vector<2x32xf32>
    %721 = tpu.matmul %677, %720, %cst_498 {dimension_numbers = #tpu.dot_dimension_numbers<[1], [0], [0], [1], [0, 0, 1, 1], [], []>} : vector<2x32xf32>, vector<32x32xf32>, vector<2x32xf32> -> vector<2x32xf32>
    %c5_499 = arith.constant 5 : index
    %c0_500 = arith.constant 0 : index
    %c0_501 = arith.constant 0 : index
    %722 = vector.load %arg6[%c5_499, %c0_500, %c0_501] : memref<6x32x32xf32, #tpu.memory_space<vmem>>, vector<1x32x32xf32>
    %723 = vector.shape_cast %722 : vector<1x32x32xf32> to vector<32x32xf32>
    %cst_502 = arith.constant dense<0.000000e+00> : vector<2x32xf32>
    %724 = tpu.matmul %677, %723, %cst_502 {dimension_numbers = #tpu.dot_dimension_numbers<[1], [0], [0], [1], [0, 0, 1, 1], [], []>} : vector<2x32xf32>, vector<32x32xf32>, vector<2x32xf32> -> vector<2x32xf32>
    %c3_503 = arith.constant 3 : index
    %c14_504 = arith.constant 14 : index
    %c0_505 = arith.constant 0 : index
    %725 = vector.load %arg18[%c3_503, %c14_504, %c0_505] : memref<6x16x32xf32, #tpu.memory_space<vmem>>, vector<1x2x32xf32>
    %726 = vector.shape_cast %725 : vector<1x2x32xf32> to vector<2x32xf32>
    %727 = arith.addf %726, %718 : vector<2x32xf32>
    %728 = arith.negf %727 : vector<2x32xf32>
    %729 = math.exp %728 : vector<2x32xf32>
    %cst_506 = arith.constant 1.000000e+00 : f32
    %730 = vector.broadcast %cst_506 : f32 to vector<2x32xf32>
    %731 = arith.addf %730, %729 : vector<2x32xf32>
    %732 = arith.divf %730, %731 : vector<2x32xf32>
    %c4_507 = arith.constant 4 : index
    %c14_508 = arith.constant 14 : index
    %c0_509 = arith.constant 0 : index
    %733 = vector.load %arg18[%c4_507, %c14_508, %c0_509] : memref<6x16x32xf32, #tpu.memory_space<vmem>>, vector<1x2x32xf32>
    %734 = vector.shape_cast %733 : vector<1x2x32xf32> to vector<2x32xf32>
    %735 = arith.addf %734, %721 : vector<2x32xf32>
    %736 = arith.negf %735 : vector<2x32xf32>
    %737 = math.exp %736 : vector<2x32xf32>
    %cst_510 = arith.constant 1.000000e+00 : f32
    %738 = vector.broadcast %cst_510 : f32 to vector<2x32xf32>
    %739 = arith.addf %738, %737 : vector<2x32xf32>
    %740 = arith.divf %738, %739 : vector<2x32xf32>
    %c5_511 = arith.constant 5 : index
    %c14_512 = arith.constant 14 : index
    %c0_513 = arith.constant 0 : index
    %741 = vector.load %arg18[%c5_511, %c14_512, %c0_513] : memref<6x16x32xf32, #tpu.memory_space<vmem>>, vector<1x2x32xf32>
    %742 = vector.shape_cast %741 : vector<1x2x32xf32> to vector<2x32xf32>
    %743 = vector.broadcast %675 : vector<1x32xf32> to vector<2x32xf32>
    %744 = arith.addf %724, %743 : vector<2x32xf32>
    %745 = arith.mulf %732, %744 : vector<2x32xf32>
    %746 = arith.addf %742, %745 : vector<2x32xf32>
    %747 = math.tanh %746 : vector<2x32xf32>
    %cst_514 = arith.constant 1.000000e+00 : f32
    %748 = vector.broadcast %cst_514 : f32 to vector<2x32xf32>
    %749 = arith.subf %748, %740 : vector<2x32xf32>
    %750 = arith.mulf %749, %747 : vector<2x32xf32>
    %751 = arith.mulf %740, %677 : vector<2x32xf32>
    %752 = arith.addf %750, %751 : vector<2x32xf32>
    %c14_515 = arith.constant 14 : index
    %c32_516 = arith.constant 32 : index
    %753 = vector.load %arg20[%c14_515, %c32_516] : memref<16x64xf32, #tpu.memory_space<vmem>>, vector<2x32xf32>
    tpu.vector_store %arg20[%c14_515, %c32_516], %752 {strides = array<i32>} : memref<16x64xf32, #tpu.memory_space<vmem>>, vector<2x32xf32>,
    %c0_517 = arith.constant 0 : index
    %c0_518 = arith.constant 0 : index
    %c0_519 = arith.constant 0 : index
    %754 = vector.load %arg6[%c0_517, %c0_518, %c0_519] : memref<6x32x32xf32, #tpu.memory_space<vmem>>, vector<1x32x32xf32>
    %755 = vector.shape_cast %754 : vector<1x32x32xf32> to vector<32x32xf32>
    %cst_520 = arith.constant dense<0.000000e+00> : vector<2x32xf32>
    %756 = tpu.matmul %714, %755, %cst_520 {dimension_numbers = #tpu.dot_dimension_numbers<[1], [0], [0], [1], [0, 0, 1, 1], [], []>} : vector<2x32xf32>, vector<32x32xf32>, vector<2x32xf32> -> vector<2x32xf32>
    %c1_521 = arith.constant 1 : index
    %c0_522 = arith.constant 0 : index
    %c0_523 = arith.constant 0 : index
    %757 = vector.load %arg6[%c1_521, %c0_522, %c0_523] : memref<6x32x32xf32, #tpu.memory_space<vmem>>, vector<1x32x32xf32>
    %758 = vector.shape_cast %757 : vector<1x32x32xf32> to vector<32x32xf32>
    %cst_524 = arith.constant dense<0.000000e+00> : vector<2x32xf32>
    %759 = tpu.matmul %714, %758, %cst_524 {dimension_numbers = #tpu.dot_dimension_numbers<[1], [0], [0], [1], [0, 0, 1, 1], [], []>} : vector<2x32xf32>, vector<32x32xf32>, vector<2x32xf32> -> vector<2x32xf32>
    %c2_525 = arith.constant 2 : index
    %c0_526 = arith.constant 0 : index
    %c0_527 = arith.constant 0 : index
    %760 = vector.load %arg6[%c2_525, %c0_526, %c0_527] : memref<6x32x32xf32, #tpu.memory_space<vmem>>, vector<1x32x32xf32>
    %761 = vector.shape_cast %760 : vector<1x32x32xf32> to vector<32x32xf32>
    %cst_528 = arith.constant dense<0.000000e+00> : vector<2x32xf32>
    %762 = tpu.matmul %714, %761, %cst_528 {dimension_numbers = #tpu.dot_dimension_numbers<[1], [0], [0], [1], [0, 0, 1, 1], [], []>} : vector<2x32xf32>, vector<32x32xf32>, vector<2x32xf32> -> vector<2x32xf32>
    %c0_529 = arith.constant 0 : index
    %c2_530 = arith.constant 2 : index
    %c0_531 = arith.constant 0 : index
    %763 = vector.load %arg18[%c0_529, %c2_530, %c0_531] : memref<6x16x32xf32, #tpu.memory_space<vmem>>, vector<1x2x32xf32>
    %764 = vector.shape_cast %763 : vector<1x2x32xf32> to vector<2x32xf32>
    %765 = arith.addf %764, %756 : vector<2x32xf32>
    %766 = arith.negf %765 : vector<2x32xf32>
    %767 = math.exp %766 : vector<2x32xf32>
    %cst_532 = arith.constant 1.000000e+00 : f32
    %768 = vector.broadcast %cst_532 : f32 to vector<2x32xf32>
    %769 = arith.addf %768, %767 : vector<2x32xf32>
    %770 = arith.divf %768, %769 : vector<2x32xf32>
    %c1_533 = arith.constant 1 : index
    %c2_534 = arith.constant 2 : index
    %c0_535 = arith.constant 0 : index
    %771 = vector.load %arg18[%c1_533, %c2_534, %c0_535] : memref<6x16x32xf32, #tpu.memory_space<vmem>>, vector<1x2x32xf32>
    %772 = vector.shape_cast %771 : vector<1x2x32xf32> to vector<2x32xf32>
    %773 = arith.addf %772, %759 : vector<2x32xf32>
    %774 = arith.negf %773 : vector<2x32xf32>
    %775 = math.exp %774 : vector<2x32xf32>
    %cst_536 = arith.constant 1.000000e+00 : f32
    %776 = vector.broadcast %cst_536 : f32 to vector<2x32xf32>
    %777 = arith.addf %776, %775 : vector<2x32xf32>
    %778 = arith.divf %776, %777 : vector<2x32xf32>
    %c2_537 = arith.constant 2 : index
    %c2_538 = arith.constant 2 : index
    %c0_539 = arith.constant 0 : index
    %779 = vector.load %arg18[%c2_537, %c2_538, %c0_539] : memref<6x16x32xf32, #tpu.memory_space<vmem>>, vector<1x2x32xf32>
    %780 = vector.shape_cast %779 : vector<1x2x32xf32> to vector<2x32xf32>
    %781 = vector.broadcast %674 : vector<1x32xf32> to vector<2x32xf32>
    %782 = arith.addf %762, %781 : vector<2x32xf32>
    %783 = arith.mulf %770, %782 : vector<2x32xf32>
    %784 = arith.addf %780, %783 : vector<2x32xf32>
    %785 = math.tanh %784 : vector<2x32xf32>
    %cst_540 = arith.constant 1.000000e+00 : f32
    %786 = vector.broadcast %cst_540 : f32 to vector<2x32xf32>
    %787 = arith.subf %786, %778 : vector<2x32xf32>
    %788 = arith.mulf %787, %785 : vector<2x32xf32>
    %789 = arith.mulf %778, %714 : vector<2x32xf32>
    %790 = arith.addf %788, %789 : vector<2x32xf32>
    %c2_541 = arith.constant 2 : index
    %c0_542 = arith.constant 0 : index
    %791 = vector.load %arg20[%c2_541, %c0_542] : memref<16x64xf32, #tpu.memory_space<vmem>>, vector<2x32xf32>
    tpu.vector_store %arg20[%c2_541, %c0_542], %790 {strides = array<i32>} : memref<16x64xf32, #tpu.memory_space<vmem>>, vector<2x32xf32>,
    %c3_543 = arith.constant 3 : index
    %c0_544 = arith.constant 0 : index
    %c0_545 = arith.constant 0 : index
    %792 = vector.load %arg6[%c3_543, %c0_544, %c0_545] : memref<6x32x32xf32, #tpu.memory_space<vmem>>, vector<1x32x32xf32>
    %793 = vector.shape_cast %792 : vector<1x32x32xf32> to vector<32x32xf32>
    %cst_546 = arith.constant dense<0.000000e+00> : vector<2x32xf32>
    %794 = tpu.matmul %752, %793, %cst_546 {dimension_numbers = #tpu.dot_dimension_numbers<[1], [0], [0], [1], [0, 0, 1, 1], [], []>} : vector<2x32xf32>, vector<32x32xf32>, vector<2x32xf32> -> vector<2x32xf32>
    %c4_547 = arith.constant 4 : index
    %c0_548 = arith.constant 0 : index
    %c0_549 = arith.constant 0 : index
    %795 = vector.load %arg6[%c4_547, %c0_548, %c0_549] : memref<6x32x32xf32, #tpu.memory_space<vmem>>, vector<1x32x32xf32>
    %796 = vector.shape_cast %795 : vector<1x32x32xf32> to vector<32x32xf32>
    %cst_550 = arith.constant dense<0.000000e+00> : vector<2x32xf32>
    %797 = tpu.matmul %752, %796, %cst_550 {dimension_numbers = #tpu.dot_dimension_numbers<[1], [0], [0], [1], [0, 0, 1, 1], [], []>} : vector<2x32xf32>, vector<32x32xf32>, vector<2x32xf32> -> vector<2x32xf32>
    %c5_551 = arith.constant 5 : index
    %c0_552 = arith.constant 0 : index
    %c0_553 = arith.constant 0 : index
    %798 = vector.load %arg6[%c5_551, %c0_552, %c0_553] : memref<6x32x32xf32, #tpu.memory_space<vmem>>, vector<1x32x32xf32>
    %799 = vector.shape_cast %798 : vector<1x32x32xf32> to vector<32x32xf32>
    %cst_554 = arith.constant dense<0.000000e+00> : vector<2x32xf32>
    %800 = tpu.matmul %752, %799, %cst_554 {dimension_numbers = #tpu.dot_dimension_numbers<[1], [0], [0], [1], [0, 0, 1, 1], [], []>} : vector<2x32xf32>, vector<32x32xf32>, vector<2x32xf32> -> vector<2x32xf32>
    %c3_555 = arith.constant 3 : index
    %c12_556 = arith.constant 12 : index
    %c0_557 = arith.constant 0 : index
    %801 = vector.load %arg18[%c3_555, %c12_556, %c0_557] : memref<6x16x32xf32, #tpu.memory_space<vmem>>, vector<1x2x32xf32>
    %802 = vector.shape_cast %801 : vector<1x2x32xf32> to vector<2x32xf32>
    %803 = arith.addf %802, %794 : vector<2x32xf32>
    %804 = arith.negf %803 : vector<2x32xf32>
    %805 = math.exp %804 : vector<2x32xf32>
    %cst_558 = arith.constant 1.000000e+00 : f32
    %806 = vector.broadcast %cst_558 : f32 to vector<2x32xf32>
    %807 = arith.addf %806, %805 : vector<2x32xf32>
    %808 = arith.divf %806, %807 : vector<2x32xf32>
    %c4_559 = arith.constant 4 : index
    %c12_560 = arith.constant 12 : index
    %c0_561 = arith.constant 0 : index
    %809 = vector.load %arg18[%c4_559, %c12_560, %c0_561] : memref<6x16x32xf32, #tpu.memory_space<vmem>>, vector<1x2x32xf32>
    %810 = vector.shape_cast %809 : vector<1x2x32xf32> to vector<2x32xf32>
    %811 = arith.addf %810, %797 : vector<2x32xf32>
    %812 = arith.negf %811 : vector<2x32xf32>
    %813 = math.exp %812 : vector<2x32xf32>
    %cst_562 = arith.constant 1.000000e+00 : f32
    %814 = vector.broadcast %cst_562 : f32 to vector<2x32xf32>
    %815 = arith.addf %814, %813 : vector<2x32xf32>
    %816 = arith.divf %814, %815 : vector<2x32xf32>
    %c5_563 = arith.constant 5 : index
    %c12_564 = arith.constant 12 : index
    %c0_565 = arith.constant 0 : index
    %817 = vector.load %arg18[%c5_563, %c12_564, %c0_565] : memref<6x16x32xf32, #tpu.memory_space<vmem>>, vector<1x2x32xf32>
    %818 = vector.shape_cast %817 : vector<1x2x32xf32> to vector<2x32xf32>
    %819 = vector.broadcast %675 : vector<1x32xf32> to vector<2x32xf32>
    %820 = arith.addf %800, %819 : vector<2x32xf32>
    %821 = arith.mulf %808, %820 : vector<2x32xf32>
    %822 = arith.addf %818, %821 : vector<2x32xf32>
    %823 = math.tanh %822 : vector<2x32xf32>
    %cst_566 = arith.constant 1.000000e+00 : f32
    %824 = vector.broadcast %cst_566 : f32 to vector<2x32xf32>
    %825 = arith.subf %824, %816 : vector<2x32xf32>
    %826 = arith.mulf %825, %823 : vector<2x32xf32>
    %827 = arith.mulf %816, %752 : vector<2x32xf32>
    %828 = arith.addf %826, %827 : vector<2x32xf32>
    %c12_567 = arith.constant 12 : index
    %c32_568 = arith.constant 32 : index
    %829 = vector.load %arg20[%c12_567, %c32_568] : memref<16x64xf32, #tpu.memory_space<vmem>>, vector<2x32xf32>
    tpu.vector_store %arg20[%c12_567, %c32_568], %828 {strides = array<i32>} : memref<16x64xf32, #tpu.memory_space<vmem>>, vector<2x32xf32>,
    %c0_569 = arith.constant 0 : index
    %c0_570 = arith.constant 0 : index
    %c0_571 = arith.constant 0 : index
    %830 = vector.load %arg6[%c0_569, %c0_570, %c0_571] : memref<6x32x32xf32, #tpu.memory_space<vmem>>, vector<1x32x32xf32>
    %831 = vector.shape_cast %830 : vector<1x32x32xf32> to vector<32x32xf32>
    %cst_572 = arith.constant dense<0.000000e+00> : vector<2x32xf32>
    %832 = tpu.matmul %790, %831, %cst_572 {dimension_numbers = #tpu.dot_dimension_numbers<[1], [0], [0], [1], [0, 0, 1, 1], [], []>} : vector<2x32xf32>, vector<32x32xf32>, vector<2x32xf32> -> vector<2x32xf32>
    %c1_573 = arith.constant 1 : index
    %c0_574 = arith.constant 0 : index
    %c0_575 = arith.constant 0 : index
    %833 = vector.load %arg6[%c1_573, %c0_574, %c0_575] : memref<6x32x32xf32, #tpu.memory_space<vmem>>, vector<1x32x32xf32>
    %834 = vector.shape_cast %833 : vector<1x32x32xf32> to vector<32x32xf32>
    %cst_576 = arith.constant dense<0.000000e+00> : vector<2x32xf32>
    %835 = tpu.matmul %790, %834, %cst_576 {dimension_numbers = #tpu.dot_dimension_numbers<[1], [0], [0], [1], [0, 0, 1, 1], [], []>} : vector<2x32xf32>, vector<32x32xf32>, vector<2x32xf32> -> vector<2x32xf32>
    %c2_577 = arith.constant 2 : index
    %c0_578 = arith.constant 0 : index
    %c0_579 = arith.constant 0 : index
    %836 = vector.load %arg6[%c2_577, %c0_578, %c0_579] : memref<6x32x32xf32, #tpu.memory_space<vmem>>, vector<1x32x32xf32>
    %837 = vector.shape_cast %836 : vector<1x32x32xf32> to vector<32x32xf32>
    %cst_580 = arith.constant dense<0.000000e+00> : vector<2x32xf32>
    %838 = tpu.matmul %790, %837, %cst_580 {dimension_numbers = #tpu.dot_dimension_numbers<[1], [0], [0], [1], [0, 0, 1, 1], [], []>} : vector<2x32xf32>, vector<32x32xf32>, vector<2x32xf32> -> vector<2x32xf32>
    %c0_581 = arith.constant 0 : index
    %c4_582 = arith.constant 4 : index
    %c0_583 = arith.constant 0 : index
    %839 = vector.load %arg18[%c0_581, %c4_582, %c0_583] : memref<6x16x32xf32, #tpu.memory_space<vmem>>, vector<1x2x32xf32>
    %840 = vector.shape_cast %839 : vector<1x2x32xf32> to vector<2x32xf32>
    %841 = arith.addf %840, %832 : vector<2x32xf32>
    %842 = arith.negf %841 : vector<2x32xf32>
    %843 = math.exp %842 : vector<2x32xf32>
    %cst_584 = arith.constant 1.000000e+00 : f32
    %844 = vector.broadcast %cst_584 : f32 to vector<2x32xf32>
    %845 = arith.addf %844, %843 : vector<2x32xf32>
    %846 = arith.divf %844, %845 : vector<2x32xf32>
    %c1_585 = arith.constant 1 : index
    %c4_586 = arith.constant 4 : index
    %c0_587 = arith.constant 0 : index
    %847 = vector.load %arg18[%c1_585, %c4_586, %c0_587] : memref<6x16x32xf32, #tpu.memory_space<vmem>>, vector<1x2x32xf32>
    %848 = vector.shape_cast %847 : vector<1x2x32xf32> to vector<2x32xf32>
    %849 = arith.addf %848, %835 : vector<2x32xf32>
    %850 = arith.negf %849 : vector<2x32xf32>
    %851 = math.exp %850 : vector<2x32xf32>
    %cst_588 = arith.constant 1.000000e+00 : f32
    %852 = vector.broadcast %cst_588 : f32 to vector<2x32xf32>
    %853 = arith.addf %852, %851 : vector<2x32xf32>
    %854 = arith.divf %852, %853 : vector<2x32xf32>
    %c2_589 = arith.constant 2 : index
    %c4_590 = arith.constant 4 : index
    %c0_591 = arith.constant 0 : index
    %855 = vector.load %arg18[%c2_589, %c4_590, %c0_591] : memref<6x16x32xf32, #tpu.memory_space<vmem>>, vector<1x2x32xf32>
    %856 = vector.shape_cast %855 : vector<1x2x32xf32> to vector<2x32xf32>
    %857 = vector.broadcast %674 : vector<1x32xf32> to vector<2x32xf32>
    %858 = arith.addf %838, %857 : vector<2x32xf32>
    %859 = arith.mulf %846, %858 : vector<2x32xf32>
    %860 = arith.addf %856, %859 : vector<2x32xf32>
    %861 = math.tanh %860 : vector<2x32xf32>
    %cst_592 = arith.constant 1.000000e+00 : f32
    %862 = vector.broadcast %cst_592 : f32 to vector<2x32xf32>
    %863 = arith.subf %862, %854 : vector<2x32xf32>
    %864 = arith.mulf %863, %861 : vector<2x32xf32>
    %865 = arith.mulf %854, %790 : vector<2x32xf32>
    %866 = arith.addf %864, %865 : vector<2x32xf32>
    %c4_593 = arith.constant 4 : index
    %c0_594 = arith.constant 0 : index
    %867 = vector.load %arg20[%c4_593, %c0_594] : memref<16x64xf32, #tpu.memory_space<vmem>>, vector<2x32xf32>
    tpu.vector_store %arg20[%c4_593, %c0_594], %866 {strides = array<i32>} : memref<16x64xf32, #tpu.memory_space<vmem>>, vector<2x32xf32>,
    %c3_595 = arith.constant 3 : index
    %c0_596 = arith.constant 0 : index
    %c0_597 = arith.constant 0 : index
    %868 = vector.load %arg6[%c3_595, %c0_596, %c0_597] : memref<6x32x32xf32, #tpu.memory_space<vmem>>, vector<1x32x32xf32>
    %869 = vector.shape_cast %868 : vector<1x32x32xf32> to vector<32x32xf32>
    %cst_598 = arith.constant dense<0.000000e+00> : vector<2x32xf32>
    %870 = tpu.matmul %828, %869, %cst_598 {dimension_numbers = #tpu.dot_dimension_numbers<[1], [0], [0], [1], [0, 0, 1, 1], [], []>} : vector<2x32xf32>, vector<32x32xf32>, vector<2x32xf32> -> vector<2x32xf32>
    %c4_599 = arith.constant 4 : index
    %c0_600 = arith.constant 0 : index
    %c0_601 = arith.constant 0 : index
    %871 = vector.load %arg6[%c4_599, %c0_600, %c0_601] : memref<6x32x32xf32, #tpu.memory_space<vmem>>, vector<1x32x32xf32>
    %872 = vector.shape_cast %871 : vector<1x32x32xf32> to vector<32x32xf32>
    %cst_602 = arith.constant dense<0.000000e+00> : vector<2x32xf32>
    %873 = tpu.matmul %828, %872, %cst_602 {dimension_numbers = #tpu.dot_dimension_numbers<[1], [0], [0], [1], [0, 0, 1, 1], [], []>} : vector<2x32xf32>, vector<32x32xf32>, vector<2x32xf32> -> vector<2x32xf32>
    %c5_603 = arith.constant 5 : index
    %c0_604 = arith.constant 0 : index
    %c0_605 = arith.constant 0 : index
    %874 = vector.load %arg6[%c5_603, %c0_604, %c0_605] : memref<6x32x32xf32, #tpu.memory_space<vmem>>, vector<1x32x32xf32>
    %875 = vector.shape_cast %874 : vector<1x32x32xf32> to vector<32x32xf32>
    %cst_606 = arith.constant dense<0.000000e+00> : vector<2x32xf32>
    %876 = tpu.matmul %828, %875, %cst_606 {dimension_numbers = #tpu.dot_dimension_numbers<[1], [0], [0], [1], [0, 0, 1, 1], [], []>} : vector<2x32xf32>, vector<32x32xf32>, vector<2x32xf32> -> vector<2x32xf32>
    %c3_607 = arith.constant 3 : index
    %c10_608 = arith.constant 10 : index
    %c0_609 = arith.constant 0 : index
    %877 = vector.load %arg18[%c3_607, %c10_608, %c0_609] : memref<6x16x32xf32, #tpu.memory_space<vmem>>, vector<1x2x32xf32>
    %878 = vector.shape_cast %877 : vector<1x2x32xf32> to vector<2x32xf32>
    %879 = arith.addf %878, %870 : vector<2x32xf32>
    %880 = arith.negf %879 : vector<2x32xf32>
    %881 = math.exp %880 : vector<2x32xf32>
    %cst_610 = arith.constant 1.000000e+00 : f32
    %882 = vector.broadcast %cst_610 : f32 to vector<2x32xf32>
    %883 = arith.addf %882, %881 : vector<2x32xf32>
    %884 = arith.divf %882, %883 : vector<2x32xf32>
    %c4_611 = arith.constant 4 : index
    %c10_612 = arith.constant 10 : index
    %c0_613 = arith.constant 0 : index
    %885 = vector.load %arg18[%c4_611, %c10_612, %c0_613] : memref<6x16x32xf32, #tpu.memory_space<vmem>>, vector<1x2x32xf32>
    %886 = vector.shape_cast %885 : vector<1x2x32xf32> to vector<2x32xf32>
    %887 = arith.addf %886, %873 : vector<2x32xf32>
    %888 = arith.negf %887 : vector<2x32xf32>
    %889 = math.exp %888 : vector<2x32xf32>
    %cst_614 = arith.constant 1.000000e+00 : f32
    %890 = vector.broadcast %cst_614 : f32 to vector<2x32xf32>
    %891 = arith.addf %890, %889 : vector<2x32xf32>
    %892 = arith.divf %890, %891 : vector<2x32xf32>
    %c5_615 = arith.constant 5 : index
    %c10_616 = arith.constant 10 : index
    %c0_617 = arith.constant 0 : index
    %893 = vector.load %arg18[%c5_615, %c10_616, %c0_617] : memref<6x16x32xf32, #tpu.memory_space<vmem>>, vector<1x2x32xf32>
    %894 = vector.shape_cast %893 : vector<1x2x32xf32> to vector<2x32xf32>
    %895 = vector.broadcast %675 : vector<1x32xf32> to vector<2x32xf32>
    %896 = arith.addf %876, %895 : vector<2x32xf32>
    %897 = arith.mulf %884, %896 : vector<2x32xf32>
    %898 = arith.addf %894, %897 : vector<2x32xf32>
    %899 = math.tanh %898 : vector<2x32xf32>
    %cst_618 = arith.constant 1.000000e+00 : f32
    %900 = vector.broadcast %cst_618 : f32 to vector<2x32xf32>
    %901 = arith.subf %900, %892 : vector<2x32xf32>
    %902 = arith.mulf %901, %899 : vector<2x32xf32>
    %903 = arith.mulf %892, %828 : vector<2x32xf32>
    %904 = arith.addf %902, %903 : vector<2x32xf32>
    %c10_619 = arith.constant 10 : index
    %c32_620 = arith.constant 32 : index
    %905 = vector.load %arg20[%c10_619, %c32_620] : memref<16x64xf32, #tpu.memory_space<vmem>>, vector<2x32xf32>
    tpu.vector_store %arg20[%c10_619, %c32_620], %904 {strides = array<i32>} : memref<16x64xf32, #tpu.memory_space<vmem>>, vector<2x32xf32>,
    %c0_621 = arith.constant 0 : index
    %c0_622 = arith.constant 0 : index
    %c0_623 = arith.constant 0 : index
    %906 = vector.load %arg6[%c0_621, %c0_622, %c0_623] : memref<6x32x32xf32, #tpu.memory_space<vmem>>, vector<1x32x32xf32>
    %907 = vector.shape_cast %906 : vector<1x32x32xf32> to vector<32x32xf32>
    %cst_624 = arith.constant dense<0.000000e+00> : vector<2x32xf32>
    %908 = tpu.matmul %866, %907, %cst_624 {dimension_numbers = #tpu.dot_dimension_numbers<[1], [0], [0], [1], [0, 0, 1, 1], [], []>} : vector<2x32xf32>, vector<32x32xf32>, vector<2x32xf32> -> vector<2x32xf32>
    %c1_625 = arith.constant 1 : index
    %c0_626 = arith.constant 0 : index
    %c0_627 = arith.constant 0 : index
    %909 = vector.load %arg6[%c1_625, %c0_626, %c0_627] : memref<6x32x32xf32, #tpu.memory_space<vmem>>, vector<1x32x32xf32>
    %910 = vector.shape_cast %909 : vector<1x32x32xf32> to vector<32x32xf32>
    %cst_628 = arith.constant dense<0.000000e+00> : vector<2x32xf32>
    %911 = tpu.matmul %866, %910, %cst_628 {dimension_numbers = #tpu.dot_dimension_numbers<[1], [0], [0], [1], [0, 0, 1, 1], [], []>} : vector<2x32xf32>, vector<32x32xf32>, vector<2x32xf32> -> vector<2x32xf32>
    %c2_629 = arith.constant 2 : index
    %c0_630 = arith.constant 0 : index
    %c0_631 = arith.constant 0 : index
    %912 = vector.load %arg6[%c2_629, %c0_630, %c0_631] : memref<6x32x32xf32, #tpu.memory_space<vmem>>, vector<1x32x32xf32>
    %913 = vector.shape_cast %912 : vector<1x32x32xf32> to vector<32x32xf32>
    %cst_632 = arith.constant dense<0.000000e+00> : vector<2x32xf32>
    %914 = tpu.matmul %866, %913, %cst_632 {dimension_numbers = #tpu.dot_dimension_numbers<[1], [0], [0], [1], [0, 0, 1, 1], [], []>} : vector<2x32xf32>, vector<32x32xf32>, vector<2x32xf32> -> vector<2x32xf32>
    %c0_633 = arith.constant 0 : index
    %c6_634 = arith.constant 6 : index
    %c0_635 = arith.constant 0 : index
    %915 = vector.load %arg18[%c0_633, %c6_634, %c0_635] : memref<6x16x32xf32, #tpu.memory_space<vmem>>, vector<1x2x32xf32>
    %916 = vector.shape_cast %915 : vector<1x2x32xf32> to vector<2x32xf32>
    %917 = arith.addf %916, %908 : vector<2x32xf32>
    %918 = arith.negf %917 : vector<2x32xf32>
    %919 = math.exp %918 : vector<2x32xf32>
    %cst_636 = arith.constant 1.000000e+00 : f32
    %920 = vector.broadcast %cst_636 : f32 to vector<2x32xf32>
    %921 = arith.addf %920, %919 : vector<2x32xf32>
    %922 = arith.divf %920, %921 : vector<2x32xf32>
    %c1_637 = arith.constant 1 : index
    %c6_638 = arith.constant 6 : index
    %c0_639 = arith.constant 0 : index
    %923 = vector.load %arg18[%c1_637, %c6_638, %c0_639] : memref<6x16x32xf32, #tpu.memory_space<vmem>>, vector<1x2x32xf32>
    %924 = vector.shape_cast %923 : vector<1x2x32xf32> to vector<2x32xf32>
    %925 = arith.addf %924, %911 : vector<2x32xf32>
    %926 = arith.negf %925 : vector<2x32xf32>
    %927 = math.exp %926 : vector<2x32xf32>
    %cst_640 = arith.constant 1.000000e+00 : f32
    %928 = vector.broadcast %cst_640 : f32 to vector<2x32xf32>
    %929 = arith.addf %928, %927 : vector<2x32xf32>
    %930 = arith.divf %928, %929 : vector<2x32xf32>
    %c2_641 = arith.constant 2 : index
    %c6_642 = arith.constant 6 : index
    %c0_643 = arith.constant 0 : index
    %931 = vector.load %arg18[%c2_641, %c6_642, %c0_643] : memref<6x16x32xf32, #tpu.memory_space<vmem>>, vector<1x2x32xf32>
    %932 = vector.shape_cast %931 : vector<1x2x32xf32> to vector<2x32xf32>
    %933 = vector.broadcast %674 : vector<1x32xf32> to vector<2x32xf32>
    %934 = arith.addf %914, %933 : vector<2x32xf32>
    %935 = arith.mulf %922, %934 : vector<2x32xf32>
    %936 = arith.addf %932, %935 : vector<2x32xf32>
    %937 = math.tanh %936 : vector<2x32xf32>
    %cst_644 = arith.constant 1.000000e+00 : f32
    %938 = vector.broadcast %cst_644 : f32 to vector<2x32xf32>
    %939 = arith.subf %938, %930 : vector<2x32xf32>
    %940 = arith.mulf %939, %937 : vector<2x32xf32>
    %941 = arith.mulf %930, %866 : vector<2x32xf32>
    %942 = arith.addf %940, %941 : vector<2x32xf32>
    %c6_645 = arith.constant 6 : index
    %c0_646 = arith.constant 0 : index
    %943 = vector.load %arg20[%c6_645, %c0_646] : memref<16x64xf32, #tpu.memory_space<vmem>>, vector<2x32xf32>
    tpu.vector_store %arg20[%c6_645, %c0_646], %942 {strides = array<i32>} : memref<16x64xf32, #tpu.memory_space<vmem>>, vector<2x32xf32>,
    %c3_647 = arith.constant 3 : index
    %c0_648 = arith.constant 0 : index
    %c0_649 = arith.constant 0 : index
    %944 = vector.load %arg6[%c3_647, %c0_648, %c0_649] : memref<6x32x32xf32, #tpu.memory_space<vmem>>, vector<1x32x32xf32>
    %945 = vector.shape_cast %944 : vector<1x32x32xf32> to vector<32x32xf32>
    %cst_650 = arith.constant dense<0.000000e+00> : vector<2x32xf32>
    %946 = tpu.matmul %904, %945, %cst_650 {dimension_numbers = #tpu.dot_dimension_numbers<[1], [0], [0], [1], [0, 0, 1, 1], [], []>} : vector<2x32xf32>, vector<32x32xf32>, vector<2x32xf32> -> vector<2x32xf32>
    %c4_651 = arith.constant 4 : index
    %c0_652 = arith.constant 0 : index
    %c0_653 = arith.constant 0 : index
    %947 = vector.load %arg6[%c4_651, %c0_652, %c0_653] : memref<6x32x32xf32, #tpu.memory_space<vmem>>, vector<1x32x32xf32>
    %948 = vector.shape_cast %947 : vector<1x32x32xf32> to vector<32x32xf32>
    %cst_654 = arith.constant dense<0.000000e+00> : vector<2x32xf32>
    %949 = tpu.matmul %904, %948, %cst_654 {dimension_numbers = #tpu.dot_dimension_numbers<[1], [0], [0], [1], [0, 0, 1, 1], [], []>} : vector<2x32xf32>, vector<32x32xf32>, vector<2x32xf32> -> vector<2x32xf32>
    %c5_655 = arith.constant 5 : index
    %c0_656 = arith.constant 0 : index
    %c0_657 = arith.constant 0 : index
    %950 = vector.load %arg6[%c5_655, %c0_656, %c0_657] : memref<6x32x32xf32, #tpu.memory_space<vmem>>, vector<1x32x32xf32>
    %951 = vector.shape_cast %950 : vector<1x32x32xf32> to vector<32x32xf32>
    %cst_658 = arith.constant dense<0.000000e+00> : vector<2x32xf32>
    %952 = tpu.matmul %904, %951, %cst_658 {dimension_numbers = #tpu.dot_dimension_numbers<[1], [0], [0], [1], [0, 0, 1, 1], [], []>} : vector<2x32xf32>, vector<32x32xf32>, vector<2x32xf32> -> vector<2x32xf32>
    %c3_659 = arith.constant 3 : index
    %c8_660 = arith.constant 8 : index
    %c0_661 = arith.constant 0 : index
    %953 = vector.load %arg18[%c3_659, %c8_660, %c0_661] : memref<6x16x32xf32, #tpu.memory_space<vmem>>, vector<1x2x32xf32>
    %954 = vector.shape_cast %953 : vector<1x2x32xf32> to vector<2x32xf32>
    %955 = arith.addf %954, %946 : vector<2x32xf32>
    %956 = arith.negf %955 : vector<2x32xf32>
    %957 = math.exp %956 : vector<2x32xf32>
    %cst_662 = arith.constant 1.000000e+00 : f32
    %958 = vector.broadcast %cst_662 : f32 to vector<2x32xf32>
    %959 = arith.addf %958, %957 : vector<2x32xf32>
    %960 = arith.divf %958, %959 : vector<2x32xf32>
    %c4_663 = arith.constant 4 : index
    %c8_664 = arith.constant 8 : index
    %c0_665 = arith.constant 0 : index
    %961 = vector.load %arg18[%c4_663, %c8_664, %c0_665] : memref<6x16x32xf32, #tpu.memory_space<vmem>>, vector<1x2x32xf32>
    %962 = vector.shape_cast %961 : vector<1x2x32xf32> to vector<2x32xf32>
    %963 = arith.addf %962, %949 : vector<2x32xf32>
    %964 = arith.negf %963 : vector<2x32xf32>
    %965 = math.exp %964 : vector<2x32xf32>
    %cst_666 = arith.constant 1.000000e+00 : f32
    %966 = vector.broadcast %cst_666 : f32 to vector<2x32xf32>
    %967 = arith.addf %966, %965 : vector<2x32xf32>
    %968 = arith.divf %966, %967 : vector<2x32xf32>
    %c5_667 = arith.constant 5 : index
    %c8_668 = arith.constant 8 : index
    %c0_669 = arith.constant 0 : index
    %969 = vector.load %arg18[%c5_667, %c8_668, %c0_669] : memref<6x16x32xf32, #tpu.memory_space<vmem>>, vector<1x2x32xf32>
    %970 = vector.shape_cast %969 : vector<1x2x32xf32> to vector<2x32xf32>
    %971 = vector.broadcast %675 : vector<1x32xf32> to vector<2x32xf32>
    %972 = arith.addf %952, %971 : vector<2x32xf32>
    %973 = arith.mulf %960, %972 : vector<2x32xf32>
    %974 = arith.addf %970, %973 : vector<2x32xf32>
    %975 = math.tanh %974 : vector<2x32xf32>
    %cst_670 = arith.constant 1.000000e+00 : f32
    %976 = vector.broadcast %cst_670 : f32 to vector<2x32xf32>
    %977 = arith.subf %976, %968 : vector<2x32xf32>
    %978 = arith.mulf %977, %975 : vector<2x32xf32>
    %979 = arith.mulf %968, %904 : vector<2x32xf32>
    %980 = arith.addf %978, %979 : vector<2x32xf32>
    %c8_671 = arith.constant 8 : index
    %c32_672 = arith.constant 32 : index
    %981 = vector.load %arg20[%c8_671, %c32_672] : memref<16x64xf32, #tpu.memory_space<vmem>>, vector<2x32xf32>
    tpu.vector_store %arg20[%c8_671, %c32_672], %980 {strides = array<i32>} : memref<16x64xf32, #tpu.memory_space<vmem>>, vector<2x32xf32>,
    %c0_673 = arith.constant 0 : index
    %c0_674 = arith.constant 0 : index
    %c0_675 = arith.constant 0 : index
    %982 = vector.load %arg6[%c0_673, %c0_674, %c0_675] : memref<6x32x32xf32, #tpu.memory_space<vmem>>, vector<1x32x32xf32>
    %983 = vector.shape_cast %982 : vector<1x32x32xf32> to vector<32x32xf32>
    %cst_676 = arith.constant dense<0.000000e+00> : vector<2x32xf32>
    %984 = tpu.matmul %942, %983, %cst_676 {dimension_numbers = #tpu.dot_dimension_numbers<[1], [0], [0], [1], [0, 0, 1, 1], [], []>} : vector<2x32xf32>, vector<32x32xf32>, vector<2x32xf32> -> vector<2x32xf32>
    %c1_677 = arith.constant 1 : index
    %c0_678 = arith.constant 0 : index
    %c0_679 = arith.constant 0 : index
    %985 = vector.load %arg6[%c1_677, %c0_678, %c0_679] : memref<6x32x32xf32, #tpu.memory_space<vmem>>, vector<1x32x32xf32>
    %986 = vector.shape_cast %985 : vector<1x32x32xf32> to vector<32x32xf32>
    %cst_680 = arith.constant dense<0.000000e+00> : vector<2x32xf32>
    %987 = tpu.matmul %942, %986, %cst_680 {dimension_numbers = #tpu.dot_dimension_numbers<[1], [0], [0], [1], [0, 0, 1, 1], [], []>} : vector<2x32xf32>, vector<32x32xf32>, vector<2x32xf32> -> vector<2x32xf32>
    %c2_681 = arith.constant 2 : index
    %c0_682 = arith.constant 0 : index
    %c0_683 = arith.constant 0 : index
    %988 = vector.load %arg6[%c2_681, %c0_682, %c0_683] : memref<6x32x32xf32, #tpu.memory_space<vmem>>, vector<1x32x32xf32>
    %989 = vector.shape_cast %988 : vector<1x32x32xf32> to vector<32x32xf32>
    %cst_684 = arith.constant dense<0.000000e+00> : vector<2x32xf32>
    %990 = tpu.matmul %942, %989, %cst_684 {dimension_numbers = #tpu.dot_dimension_numbers<[1], [0], [0], [1], [0, 0, 1, 1], [], []>} : vector<2x32xf32>, vector<32x32xf32>, vector<2x32xf32> -> vector<2x32xf32>
    %c0_685 = arith.constant 0 : index
    %c8_686 = arith.constant 8 : index
    %c0_687 = arith.constant 0 : index
    %991 = vector.load %arg18[%c0_685, %c8_686, %c0_687] : memref<6x16x32xf32, #tpu.memory_space<vmem>>, vector<1x2x32xf32>
    %992 = vector.shape_cast %991 : vector<1x2x32xf32> to vector<2x32xf32>
    %993 = arith.addf %992, %984 : vector<2x32xf32>
    %994 = arith.negf %993 : vector<2x32xf32>
    %995 = math.exp %994 : vector<2x32xf32>
    %cst_688 = arith.constant 1.000000e+00 : f32
    %996 = vector.broadcast %cst_688 : f32 to vector<2x32xf32>
    %997 = arith.addf %996, %995 : vector<2x32xf32>
    %998 = arith.divf %996, %997 : vector<2x32xf32>
    %c1_689 = arith.constant 1 : index
    %c8_690 = arith.constant 8 : index
    %c0_691 = arith.constant 0 : index
    %999 = vector.load %arg18[%c1_689, %c8_690, %c0_691] : memref<6x16x32xf32, #tpu.memory_space<vmem>>, vector<1x2x32xf32>
    %1000 = vector.shape_cast %999 : vector<1x2x32xf32> to vector<2x32xf32>
    %1001 = arith.addf %1000, %987 : vector<2x32xf32>
    %1002 = arith.negf %1001 : vector<2x32xf32>
    %1003 = math.exp %1002 : vector<2x32xf32>
    %cst_692 = arith.constant 1.000000e+00 : f32
    %1004 = vector.broadcast %cst_692 : f32 to vector<2x32xf32>
    %1005 = arith.addf %1004, %1003 : vector<2x32xf32>
    %1006 = arith.divf %1004, %1005 : vector<2x32xf32>
    %c2_693 = arith.constant 2 : index
    %c8_694 = arith.constant 8 : index
    %c0_695 = arith.constant 0 : index
    %1007 = vector.load %arg18[%c2_693, %c8_694, %c0_695] : memref<6x16x32xf32, #tpu.memory_space<vmem>>, vector<1x2x32xf32>
    %1008 = vector.shape_cast %1007 : vector<1x2x32xf32> to vector<2x32xf32>
    %1009 = vector.broadcast %674 : vector<1x32xf32> to vector<2x32xf32>
    %1010 = arith.addf %990, %1009 : vector<2x32xf32>
    %1011 = arith.mulf %998, %1010 : vector<2x32xf32>
    %1012 = arith.addf %1008, %1011 : vector<2x32xf32>
    %1013 = math.tanh %1012 : vector<2x32xf32>
    %cst_696 = arith.constant 1.000000e+00 : f32
    %1014 = vector.broadcast %cst_696 : f32 to vector<2x32xf32>
    %1015 = arith.subf %1014, %1006 : vector<2x32xf32>
    %1016 = arith.mulf %1015, %1013 : vector<2x32xf32>
    %1017 = arith.mulf %1006, %942 : vector<2x32xf32>
    %1018 = arith.addf %1016, %1017 : vector<2x32xf32>
    %c8_697 = arith.constant 8 : index
    %c0_698 = arith.constant 0 : index
    %1019 = vector.load %arg20[%c8_697, %c0_698] : memref<16x64xf32, #tpu.memory_space<vmem>>, vector<2x32xf32>
    tpu.vector_store %arg20[%c8_697, %c0_698], %1018 {strides = array<i32>} : memref<16x64xf32, #tpu.memory_space<vmem>>, vector<2x32xf32>,
    %c3_699 = arith.constant 3 : index
    %c0_700 = arith.constant 0 : index
    %c0_701 = arith.constant 0 : index
    %1020 = vector.load %arg6[%c3_699, %c0_700, %c0_701] : memref<6x32x32xf32, #tpu.memory_space<vmem>>, vector<1x32x32xf32>
    %1021 = vector.shape_cast %1020 : vector<1x32x32xf32> to vector<32x32xf32>
    %cst_702 = arith.constant dense<0.000000e+00> : vector<2x32xf32>
    %1022 = tpu.matmul %980, %1021, %cst_702 {dimension_numbers = #tpu.dot_dimension_numbers<[1], [0], [0], [1], [0, 0, 1, 1], [], []>} : vector<2x32xf32>, vector<32x32xf32>, vector<2x32xf32> -> vector<2x32xf32>
    %c4_703 = arith.constant 4 : index
    %c0_704 = arith.constant 0 : index
    %c0_705 = arith.constant 0 : index
    %1023 = vector.load %arg6[%c4_703, %c0_704, %c0_705] : memref<6x32x32xf32, #tpu.memory_space<vmem>>, vector<1x32x32xf32>
    %1024 = vector.shape_cast %1023 : vector<1x32x32xf32> to vector<32x32xf32>
    %cst_706 = arith.constant dense<0.000000e+00> : vector<2x32xf32>
    %1025 = tpu.matmul %980, %1024, %cst_706 {dimension_numbers = #tpu.dot_dimension_numbers<[1], [0], [0], [1], [0, 0, 1, 1], [], []>} : vector<2x32xf32>, vector<32x32xf32>, vector<2x32xf32> -> vector<2x32xf32>
    %c5_707 = arith.constant 5 : index
    %c0_708 = arith.constant 0 : index
    %c0_709 = arith.constant 0 : index
    %1026 = vector.load %arg6[%c5_707, %c0_708, %c0_709] : memref<6x32x32xf32, #tpu.memory_space<vmem>>, vector<1x32x32xf32>
    %1027 = vector.shape_cast %1026 : vector<1x32x32xf32> to vector<32x32xf32>
    %cst_710 = arith.constant dense<0.000000e+00> : vector<2x32xf32>
    %1028 = tpu.matmul %980, %1027, %cst_710 {dimension_numbers = #tpu.dot_dimension_numbers<[1], [0], [0], [1], [0, 0, 1, 1], [], []>} : vector<2x32xf32>, vector<32x32xf32>, vector<2x32xf32> -> vector<2x32xf32>
    %c3_711 = arith.constant 3 : index
    %c6_712 = arith.constant 6 : index
    %c0_713 = arith.constant 0 : index
    %1029 = vector.load %arg18[%c3_711, %c6_712, %c0_713] : memref<6x16x32xf32, #tpu.memory_space<vmem>>, vector<1x2x32xf32>
    %1030 = vector.shape_cast %1029 : vector<1x2x32xf32> to vector<2x32xf32>
    %1031 = arith.addf %1030, %1022 : vector<2x32xf32>
    %1032 = arith.negf %1031 : vector<2x32xf32>
    %1033 = math.exp %1032 : vector<2x32xf32>
    %cst_714 = arith.constant 1.000000e+00 : f32
    %1034 = vector.broadcast %cst_714 : f32 to vector<2x32xf32>
    %1035 = arith.addf %1034, %1033 : vector<2x32xf32>
    %1036 = arith.divf %1034, %1035 : vector<2x32xf32>
    %c4_715 = arith.constant 4 : index
    %c6_716 = arith.constant 6 : index
    %c0_717 = arith.constant 0 : index
    %1037 = vector.load %arg18[%c4_715, %c6_716, %c0_717] : memref<6x16x32xf32, #tpu.memory_space<vmem>>, vector<1x2x32xf32>
    %1038 = vector.shape_cast %1037 : vector<1x2x32xf32> to vector<2x32xf32>
    %1039 = arith.addf %1038, %1025 : vector<2x32xf32>
    %1040 = arith.negf %1039 : vector<2x32xf32>
    %1041 = math.exp %1040 : vector<2x32xf32>
    %cst_718 = arith.constant 1.000000e+00 : f32
    %1042 = vector.broadcast %cst_718 : f32 to vector<2x32xf32>
    %1043 = arith.addf %1042, %1041 : vector<2x32xf32>
    %1044 = arith.divf %1042, %1043 : vector<2x32xf32>
    %c5_719 = arith.constant 5 : index
    %c6_720 = arith.constant 6 : index
    %c0_721 = arith.constant 0 : index
    %1045 = vector.load %arg18[%c5_719, %c6_720, %c0_721] : memref<6x16x32xf32, #tpu.memory_space<vmem>>, vector<1x2x32xf32>
    %1046 = vector.shape_cast %1045 : vector<1x2x32xf32> to vector<2x32xf32>
    %1047 = vector.broadcast %675 : vector<1x32xf32> to vector<2x32xf32>
    %1048 = arith.addf %1028, %1047 : vector<2x32xf32>
    %1049 = arith.mulf %1036, %1048 : vector<2x32xf32>
    %1050 = arith.addf %1046, %1049 : vector<2x32xf32>
    %1051 = math.tanh %1050 : vector<2x32xf32>
    %cst_722 = arith.constant 1.000000e+00 : f32
    %1052 = vector.broadcast %cst_722 : f32 to vector<2x32xf32>
    %1053 = arith.subf %1052, %1044 : vector<2x32xf32>
    %1054 = arith.mulf %1053, %1051 : vector<2x32xf32>
    %1055 = arith.mulf %1044, %980 : vector<2x32xf32>
    %1056 = arith.addf %1054, %1055 : vector<2x32xf32>
    %c6_723 = arith.constant 6 : index
    %c32_724 = arith.constant 32 : index
    %1057 = vector.load %arg20[%c6_723, %c32_724] : memref<16x64xf32, #tpu.memory_space<vmem>>, vector<2x32xf32>
    tpu.vector_store %arg20[%c6_723, %c32_724], %1056 {strides = array<i32>} : memref<16x64xf32, #tpu.memory_space<vmem>>, vector<2x32xf32>,
    %c0_725 = arith.constant 0 : index
    %c0_726 = arith.constant 0 : index
    %c0_727 = arith.constant 0 : index
    %1058 = vector.load %arg6[%c0_725, %c0_726, %c0_727] : memref<6x32x32xf32, #tpu.memory_space<vmem>>, vector<1x32x32xf32>
    %1059 = vector.shape_cast %1058 : vector<1x32x32xf32> to vector<32x32xf32>
    %cst_728 = arith.constant dense<0.000000e+00> : vector<2x32xf32>
    %1060 = tpu.matmul %1018, %1059, %cst_728 {dimension_numbers = #tpu.dot_dimension_numbers<[1], [0], [0], [1], [0, 0, 1, 1], [], []>} : vector<2x32xf32>, vector<32x32xf32>, vector<2x32xf32> -> vector<2x32xf32>
    %c1_729 = arith.constant 1 : index
    %c0_730 = arith.constant 0 : index
    %c0_731 = arith.constant 0 : index
    %1061 = vector.load %arg6[%c1_729, %c0_730, %c0_731] : memref<6x32x32xf32, #tpu.memory_space<vmem>>, vector<1x32x32xf32>
    %1062 = vector.shape_cast %1061 : vector<1x32x32xf32> to vector<32x32xf32>
    %cst_732 = arith.constant dense<0.000000e+00> : vector<2x32xf32>
    %1063 = tpu.matmul %1018, %1062, %cst_732 {dimension_numbers = #tpu.dot_dimension_numbers<[1], [0], [0], [1], [0, 0, 1, 1], [], []>} : vector<2x32xf32>, vector<32x32xf32>, vector<2x32xf32> -> vector<2x32xf32>
    %c2_733 = arith.constant 2 : index
    %c0_734 = arith.constant 0 : index
    %c0_735 = arith.constant 0 : index
    %1064 = vector.load %arg6[%c2_733, %c0_734, %c0_735] : memref<6x32x32xf32, #tpu.memory_space<vmem>>, vector<1x32x32xf32>
    %1065 = vector.shape_cast %1064 : vector<1x32x32xf32> to vector<32x32xf32>
    %cst_736 = arith.constant dense<0.000000e+00> : vector<2x32xf32>
    %1066 = tpu.matmul %1018, %1065, %cst_736 {dimension_numbers = #tpu.dot_dimension_numbers<[1], [0], [0], [1], [0, 0, 1, 1], [], []>} : vector<2x32xf32>, vector<32x32xf32>, vector<2x32xf32> -> vector<2x32xf32>
    %c0_737 = arith.constant 0 : index
    %c10_738 = arith.constant 10 : index
    %c0_739 = arith.constant 0 : index
    %1067 = vector.load %arg18[%c0_737, %c10_738, %c0_739] : memref<6x16x32xf32, #tpu.memory_space<vmem>>, vector<1x2x32xf32>
    %1068 = vector.shape_cast %1067 : vector<1x2x32xf32> to vector<2x32xf32>
    %1069 = arith.addf %1068, %1060 : vector<2x32xf32>
    %1070 = arith.negf %1069 : vector<2x32xf32>
    %1071 = math.exp %1070 : vector<2x32xf32>
    %cst_740 = arith.constant 1.000000e+00 : f32
    %1072 = vector.broadcast %cst_740 : f32 to vector<2x32xf32>
    %1073 = arith.addf %1072, %1071 : vector<2x32xf32>
    %1074 = arith.divf %1072, %1073 : vector<2x32xf32>
    %c1_741 = arith.constant 1 : index
    %c10_742 = arith.constant 10 : index
    %c0_743 = arith.constant 0 : index
    %1075 = vector.load %arg18[%c1_741, %c10_742, %c0_743] : memref<6x16x32xf32, #tpu.memory_space<vmem>>, vector<1x2x32xf32>
    %1076 = vector.shape_cast %1075 : vector<1x2x32xf32> to vector<2x32xf32>
    %1077 = arith.addf %1076, %1063 : vector<2x32xf32>
    %1078 = arith.negf %1077 : vector<2x32xf32>
    %1079 = math.exp %1078 : vector<2x32xf32>
    %cst_744 = arith.constant 1.000000e+00 : f32
    %1080 = vector.broadcast %cst_744 : f32 to vector<2x32xf32>
    %1081 = arith.addf %1080, %1079 : vector<2x32xf32>
    %1082 = arith.divf %1080, %1081 : vector<2x32xf32>
    %c2_745 = arith.constant 2 : index
    %c10_746 = arith.constant 10 : index
    %c0_747 = arith.constant 0 : index
    %1083 = vector.load %arg18[%c2_745, %c10_746, %c0_747] : memref<6x16x32xf32, #tpu.memory_space<vmem>>, vector<1x2x32xf32>
    %1084 = vector.shape_cast %1083 : vector<1x2x32xf32> to vector<2x32xf32>
    %1085 = vector.broadcast %674 : vector<1x32xf32> to vector<2x32xf32>
    %1086 = arith.addf %1066, %1085 : vector<2x32xf32>
    %1087 = arith.mulf %1074, %1086 : vector<2x32xf32>
    %1088 = arith.addf %1084, %1087 : vector<2x32xf32>
    %1089 = math.tanh %1088 : vector<2x32xf32>
    %cst_748 = arith.constant 1.000000e+00 : f32
    %1090 = vector.broadcast %cst_748 : f32 to vector<2x32xf32>
    %1091 = arith.subf %1090, %1082 : vector<2x32xf32>
    %1092 = arith.mulf %1091, %1089 : vector<2x32xf32>
    %1093 = arith.mulf %1082, %1018 : vector<2x32xf32>
    %1094 = arith.addf %1092, %1093 : vector<2x32xf32>
    %c10_749 = arith.constant 10 : index
    %c0_750 = arith.constant 0 : index
    %1095 = vector.load %arg20[%c10_749, %c0_750] : memref<16x64xf32, #tpu.memory_space<vmem>>, vector<2x32xf32>
    tpu.vector_store %arg20[%c10_749, %c0_750], %1094 {strides = array<i32>} : memref<16x64xf32, #tpu.memory_space<vmem>>, vector<2x32xf32>,
    %c3_751 = arith.constant 3 : index
    %c0_752 = arith.constant 0 : index
    %c0_753 = arith.constant 0 : index
    %1096 = vector.load %arg6[%c3_751, %c0_752, %c0_753] : memref<6x32x32xf32, #tpu.memory_space<vmem>>, vector<1x32x32xf32>
    %1097 = vector.shape_cast %1096 : vector<1x32x32xf32> to vector<32x32xf32>
    %cst_754 = arith.constant dense<0.000000e+00> : vector<2x32xf32>
    %1098 = tpu.matmul %1056, %1097, %cst_754 {dimension_numbers = #tpu.dot_dimension_numbers<[1], [0], [0], [1], [0, 0, 1, 1], [], []>} : vector<2x32xf32>, vector<32x32xf32>, vector<2x32xf32> -> vector<2x32xf32>
    %c4_755 = arith.constant 4 : index
    %c0_756 = arith.constant 0 : index
    %c0_757 = arith.constant 0 : index
    %1099 = vector.load %arg6[%c4_755, %c0_756, %c0_757] : memref<6x32x32xf32, #tpu.memory_space<vmem>>, vector<1x32x32xf32>
    %1100 = vector.shape_cast %1099 : vector<1x32x32xf32> to vector<32x32xf32>
    %cst_758 = arith.constant dense<0.000000e+00> : vector<2x32xf32>
    %1101 = tpu.matmul %1056, %1100, %cst_758 {dimension_numbers = #tpu.dot_dimension_numbers<[1], [0], [0], [1], [0, 0, 1, 1], [], []>} : vector<2x32xf32>, vector<32x32xf32>, vector<2x32xf32> -> vector<2x32xf32>
    %c5_759 = arith.constant 5 : index
    %c0_760 = arith.constant 0 : index
    %c0_761 = arith.constant 0 : index
    %1102 = vector.load %arg6[%c5_759, %c0_760, %c0_761] : memref<6x32x32xf32, #tpu.memory_space<vmem>>, vector<1x32x32xf32>
    %1103 = vector.shape_cast %1102 : vector<1x32x32xf32> to vector<32x32xf32>
    %cst_762 = arith.constant dense<0.000000e+00> : vector<2x32xf32>
    %1104 = tpu.matmul %1056, %1103, %cst_762 {dimension_numbers = #tpu.dot_dimension_numbers<[1], [0], [0], [1], [0, 0, 1, 1], [], []>} : vector<2x32xf32>, vector<32x32xf32>, vector<2x32xf32> -> vector<2x32xf32>
    %c3_763 = arith.constant 3 : index
    %c4_764 = arith.constant 4 : index
    %c0_765 = arith.constant 0 : index
    %1105 = vector.load %arg18[%c3_763, %c4_764, %c0_765] : memref<6x16x32xf32, #tpu.memory_space<vmem>>, vector<1x2x32xf32>
    %1106 = vector.shape_cast %1105 : vector<1x2x32xf32> to vector<2x32xf32>
    %1107 = arith.addf %1106, %1098 : vector<2x32xf32>
    %1108 = arith.negf %1107 : vector<2x32xf32>
    %1109 = math.exp %1108 : vector<2x32xf32>
    %cst_766 = arith.constant 1.000000e+00 : f32
    %1110 = vector.broadcast %cst_766 : f32 to vector<2x32xf32>
    %1111 = arith.addf %1110, %1109 : vector<2x32xf32>
    %1112 = arith.divf %1110, %1111 : vector<2x32xf32>
    %c4_767 = arith.constant 4 : index
    %c4_768 = arith.constant 4 : index
    %c0_769 = arith.constant 0 : index
    %1113 = vector.load %arg18[%c4_767, %c4_768, %c0_769] : memref<6x16x32xf32, #tpu.memory_space<vmem>>, vector<1x2x32xf32>
    %1114 = vector.shape_cast %1113 : vector<1x2x32xf32> to vector<2x32xf32>
    %1115 = arith.addf %1114, %1101 : vector<2x32xf32>
    %1116 = arith.negf %1115 : vector<2x32xf32>
    %1117 = math.exp %1116 : vector<2x32xf32>
    %cst_770 = arith.constant 1.000000e+00 : f32
    %1118 = vector.broadcast %cst_770 : f32 to vector<2x32xf32>
    %1119 = arith.addf %1118, %1117 : vector<2x32xf32>
    %1120 = arith.divf %1118, %1119 : vector<2x32xf32>
    %c5_771 = arith.constant 5 : index
    %c4_772 = arith.constant 4 : index
    %c0_773 = arith.constant 0 : index
    %1121 = vector.load %arg18[%c5_771, %c4_772, %c0_773] : memref<6x16x32xf32, #tpu.memory_space<vmem>>, vector<1x2x32xf32>
    %1122 = vector.shape_cast %1121 : vector<1x2x32xf32> to vector<2x32xf32>
    %1123 = vector.broadcast %675 : vector<1x32xf32> to vector<2x32xf32>
    %1124 = arith.addf %1104, %1123 : vector<2x32xf32>
    %1125 = arith.mulf %1112, %1124 : vector<2x32xf32>
    %1126 = arith.addf %1122, %1125 : vector<2x32xf32>
    %1127 = math.tanh %1126 : vector<2x32xf32>
    %cst_774 = arith.constant 1.000000e+00 : f32
    %1128 = vector.broadcast %cst_774 : f32 to vector<2x32xf32>
    %1129 = arith.subf %1128, %1120 : vector<2x32xf32>
    %1130 = arith.mulf %1129, %1127 : vector<2x32xf32>
    %1131 = arith.mulf %1120, %1056 : vector<2x32xf32>
    %1132 = arith.addf %1130, %1131 : vector<2x32xf32>
    %c4_775 = arith.constant 4 : index
    %c32_776 = arith.constant 32 : index
    %1133 = vector.load %arg20[%c4_775, %c32_776] : memref<16x64xf32, #tpu.memory_space<vmem>>, vector<2x32xf32>
    tpu.vector_store %arg20[%c4_775, %c32_776], %1132 {strides = array<i32>} : memref<16x64xf32, #tpu.memory_space<vmem>>, vector<2x32xf32>,
    %c0_777 = arith.constant 0 : index
    %c0_778 = arith.constant 0 : index
    %c0_779 = arith.constant 0 : index
    %1134 = vector.load %arg6[%c0_777, %c0_778, %c0_779] : memref<6x32x32xf32, #tpu.memory_space<vmem>>, vector<1x32x32xf32>
    %1135 = vector.shape_cast %1134 : vector<1x32x32xf32> to vector<32x32xf32>
    %cst_780 = arith.constant dense<0.000000e+00> : vector<2x32xf32>
    %1136 = tpu.matmul %1094, %1135, %cst_780 {dimension_numbers = #tpu.dot_dimension_numbers<[1], [0], [0], [1], [0, 0, 1, 1], [], []>} : vector<2x32xf32>, vector<32x32xf32>, vector<2x32xf32> -> vector<2x32xf32>
    %c1_781 = arith.constant 1 : index
    %c0_782 = arith.constant 0 : index
    %c0_783 = arith.constant 0 : index
    %1137 = vector.load %arg6[%c1_781, %c0_782, %c0_783] : memref<6x32x32xf32, #tpu.memory_space<vmem>>, vector<1x32x32xf32>
    %1138 = vector.shape_cast %1137 : vector<1x32x32xf32> to vector<32x32xf32>
    %cst_784 = arith.constant dense<0.000000e+00> : vector<2x32xf32>
    %1139 = tpu.matmul %1094, %1138, %cst_784 {dimension_numbers = #tpu.dot_dimension_numbers<[1], [0], [0], [1], [0, 0, 1, 1], [], []>} : vector<2x32xf32>, vector<32x32xf32>, vector<2x32xf32> -> vector<2x32xf32>
    %c2_785 = arith.constant 2 : index
    %c0_786 = arith.constant 0 : index
    %c0_787 = arith.constant 0 : index
    %1140 = vector.load %arg6[%c2_785, %c0_786, %c0_787] : memref<6x32x32xf32, #tpu.memory_space<vmem>>, vector<1x32x32xf32>
    %1141 = vector.shape_cast %1140 : vector<1x32x32xf32> to vector<32x32xf32>
    %cst_788 = arith.constant dense<0.000000e+00> : vector<2x32xf32>
    %1142 = tpu.matmul %1094, %1141, %cst_788 {dimension_numbers = #tpu.dot_dimension_numbers<[1], [0], [0], [1], [0, 0, 1, 1], [], []>} : vector<2x32xf32>, vector<32x32xf32>, vector<2x32xf32> -> vector<2x32xf32>
    %c0_789 = arith.constant 0 : index
    %c12_790 = arith.constant 12 : index
    %c0_791 = arith.constant 0 : index
    %1143 = vector.load %arg18[%c0_789, %c12_790, %c0_791] : memref<6x16x32xf32, #tpu.memory_space<vmem>>, vector<1x2x32xf32>
    %1144 = vector.shape_cast %1143 : vector<1x2x32xf32> to vector<2x32xf32>
    %1145 = arith.addf %1144, %1136 : vector<2x32xf32>
    %1146 = arith.negf %1145 : vector<2x32xf32>
    %1147 = math.exp %1146 : vector<2x32xf32>
    %cst_792 = arith.constant 1.000000e+00 : f32
    %1148 = vector.broadcast %cst_792 : f32 to vector<2x32xf32>
    %1149 = arith.addf %1148, %1147 : vector<2x32xf32>
    %1150 = arith.divf %1148, %1149 : vector<2x32xf32>
    %c1_793 = arith.constant 1 : index
    %c12_794 = arith.constant 12 : index
    %c0_795 = arith.constant 0 : index
    %1151 = vector.load %arg18[%c1_793, %c12_794, %c0_795] : memref<6x16x32xf32, #tpu.memory_space<vmem>>, vector<1x2x32xf32>
    %1152 = vector.shape_cast %1151 : vector<1x2x32xf32> to vector<2x32xf32>
    %1153 = arith.addf %1152, %1139 : vector<2x32xf32>
    %1154 = arith.negf %1153 : vector<2x32xf32>
    %1155 = math.exp %1154 : vector<2x32xf32>
    %cst_796 = arith.constant 1.000000e+00 : f32
    %1156 = vector.broadcast %cst_796 : f32 to vector<2x32xf32>
    %1157 = arith.addf %1156, %1155 : vector<2x32xf32>
    %1158 = arith.divf %1156, %1157 : vector<2x32xf32>
    %c2_797 = arith.constant 2 : index
    %c12_798 = arith.constant 12 : index
    %c0_799 = arith.constant 0 : index
    %1159 = vector.load %arg18[%c2_797, %c12_798, %c0_799] : memref<6x16x32xf32, #tpu.memory_space<vmem>>, vector<1x2x32xf32>
    %1160 = vector.shape_cast %1159 : vector<1x2x32xf32> to vector<2x32xf32>
    %1161 = vector.broadcast %674 : vector<1x32xf32> to vector<2x32xf32>
    %1162 = arith.addf %1142, %1161 : vector<2x32xf32>
    %1163 = arith.mulf %1150, %1162 : vector<2x32xf32>
    %1164 = arith.addf %1160, %1163 : vector<2x32xf32>
    %1165 = math.tanh %1164 : vector<2x32xf32>
    %cst_800 = arith.constant 1.000000e+00 : f32
    %1166 = vector.broadcast %cst_800 : f32 to vector<2x32xf32>
    %1167 = arith.subf %1166, %1158 : vector<2x32xf32>
    %1168 = arith.mulf %1167, %1165 : vector<2x32xf32>
    %1169 = arith.mulf %1158, %1094 : vector<2x32xf32>
    %1170 = arith.addf %1168, %1169 : vector<2x32xf32>
    %c12_801 = arith.constant 12 : index
    %c0_802 = arith.constant 0 : index
    %1171 = vector.load %arg20[%c12_801, %c0_802] : memref<16x64xf32, #tpu.memory_space<vmem>>, vector<2x32xf32>
    tpu.vector_store %arg20[%c12_801, %c0_802], %1170 {strides = array<i32>} : memref<16x64xf32, #tpu.memory_space<vmem>>, vector<2x32xf32>,
    %c3_803 = arith.constant 3 : index
    %c0_804 = arith.constant 0 : index
    %c0_805 = arith.constant 0 : index
    %1172 = vector.load %arg6[%c3_803, %c0_804, %c0_805] : memref<6x32x32xf32, #tpu.memory_space<vmem>>, vector<1x32x32xf32>
    %1173 = vector.shape_cast %1172 : vector<1x32x32xf32> to vector<32x32xf32>
    %cst_806 = arith.constant dense<0.000000e+00> : vector<2x32xf32>
    %1174 = tpu.matmul %1132, %1173, %cst_806 {dimension_numbers = #tpu.dot_dimension_numbers<[1], [0], [0], [1], [0, 0, 1, 1], [], []>} : vector<2x32xf32>, vector<32x32xf32>, vector<2x32xf32> -> vector<2x32xf32>
    %c4_807 = arith.constant 4 : index
    %c0_808 = arith.constant 0 : index
    %c0_809 = arith.constant 0 : index
    %1175 = vector.load %arg6[%c4_807, %c0_808, %c0_809] : memref<6x32x32xf32, #tpu.memory_space<vmem>>, vector<1x32x32xf32>
    %1176 = vector.shape_cast %1175 : vector<1x32x32xf32> to vector<32x32xf32>
    %cst_810 = arith.constant dense<0.000000e+00> : vector<2x32xf32>
    %1177 = tpu.matmul %1132, %1176, %cst_810 {dimension_numbers = #tpu.dot_dimension_numbers<[1], [0], [0], [1], [0, 0, 1, 1], [], []>} : vector<2x32xf32>, vector<32x32xf32>, vector<2x32xf32> -> vector<2x32xf32>
    %c5_811 = arith.constant 5 : index
    %c0_812 = arith.constant 0 : index
    %c0_813 = arith.constant 0 : index
    %1178 = vector.load %arg6[%c5_811, %c0_812, %c0_813] : memref<6x32x32xf32, #tpu.memory_space<vmem>>, vector<1x32x32xf32>
    %1179 = vector.shape_cast %1178 : vector<1x32x32xf32> to vector<32x32xf32>
    %cst_814 = arith.constant dense<0.000000e+00> : vector<2x32xf32>
    %1180 = tpu.matmul %1132, %1179, %cst_814 {dimension_numbers = #tpu.dot_dimension_numbers<[1], [0], [0], [1], [0, 0, 1, 1], [], []>} : vector<2x32xf32>, vector<32x32xf32>, vector<2x32xf32> -> vector<2x32xf32>
    %c3_815 = arith.constant 3 : index
    %c2_816 = arith.constant 2 : index
    %c0_817 = arith.constant 0 : index
    %1181 = vector.load %arg18[%c3_815, %c2_816, %c0_817] : memref<6x16x32xf32, #tpu.memory_space<vmem>>, vector<1x2x32xf32>
    %1182 = vector.shape_cast %1181 : vector<1x2x32xf32> to vector<2x32xf32>
    %1183 = arith.addf %1182, %1174 : vector<2x32xf32>
    %1184 = arith.negf %1183 : vector<2x32xf32>
    %1185 = math.exp %1184 : vector<2x32xf32>
    %cst_818 = arith.constant 1.000000e+00 : f32
    %1186 = vector.broadcast %cst_818 : f32 to vector<2x32xf32>
    %1187 = arith.addf %1186, %1185 : vector<2x32xf32>
    %1188 = arith.divf %1186, %1187 : vector<2x32xf32>
    %c4_819 = arith.constant 4 : index
    %c2_820 = arith.constant 2 : index
    %c0_821 = arith.constant 0 : index
    %1189 = vector.load %arg18[%c4_819, %c2_820, %c0_821] : memref<6x16x32xf32, #tpu.memory_space<vmem>>, vector<1x2x32xf32>
    %1190 = vector.shape_cast %1189 : vector<1x2x32xf32> to vector<2x32xf32>
    %1191 = arith.addf %1190, %1177 : vector<2x32xf32>
    %1192 = arith.negf %1191 : vector<2x32xf32>
    %1193 = math.exp %1192 : vector<2x32xf32>
    %cst_822 = arith.constant 1.000000e+00 : f32
    %1194 = vector.broadcast %cst_822 : f32 to vector<2x32xf32>
    %1195 = arith.addf %1194, %1193 : vector<2x32xf32>
    %1196 = arith.divf %1194, %1195 : vector<2x32xf32>
    %c5_823 = arith.constant 5 : index
    %c2_824 = arith.constant 2 : index
    %c0_825 = arith.constant 0 : index
    %1197 = vector.load %arg18[%c5_823, %c2_824, %c0_825] : memref<6x16x32xf32, #tpu.memory_space<vmem>>, vector<1x2x32xf32>
    %1198 = vector.shape_cast %1197 : vector<1x2x32xf32> to vector<2x32xf32>
    %1199 = vector.broadcast %675 : vector<1x32xf32> to vector<2x32xf32>
    %1200 = arith.addf %1180, %1199 : vector<2x32xf32>
    %1201 = arith.mulf %1188, %1200 : vector<2x32xf32>
    %1202 = arith.addf %1198, %1201 : vector<2x32xf32>
    %1203 = math.tanh %1202 : vector<2x32xf32>
    %cst_826 = arith.constant 1.000000e+00 : f32
    %1204 = vector.broadcast %cst_826 : f32 to vector<2x32xf32>
    %1205 = arith.subf %1204, %1196 : vector<2x32xf32>
    %1206 = arith.mulf %1205, %1203 : vector<2x32xf32>
    %1207 = arith.mulf %1196, %1132 : vector<2x32xf32>
    %1208 = arith.addf %1206, %1207 : vector<2x32xf32>
    %c2_827 = arith.constant 2 : index
    %c32_828 = arith.constant 32 : index
    %1209 = vector.load %arg20[%c2_827, %c32_828] : memref<16x64xf32, #tpu.memory_space<vmem>>, vector<2x32xf32>
    tpu.vector_store %arg20[%c2_827, %c32_828], %1208 {strides = array<i32>} : memref<16x64xf32, #tpu.memory_space<vmem>>, vector<2x32xf32>,
    %c0_829 = arith.constant 0 : index
    %c0_830 = arith.constant 0 : index
    %c0_831 = arith.constant 0 : index
    %1210 = vector.load %arg6[%c0_829, %c0_830, %c0_831] : memref<6x32x32xf32, #tpu.memory_space<vmem>>, vector<1x32x32xf32>
    %1211 = vector.shape_cast %1210 : vector<1x32x32xf32> to vector<32x32xf32>
    %cst_832 = arith.constant dense<0.000000e+00> : vector<2x32xf32>
    %1212 = tpu.matmul %1170, %1211, %cst_832 {dimension_numbers = #tpu.dot_dimension_numbers<[1], [0], [0], [1], [0, 0, 1, 1], [], []>} : vector<2x32xf32>, vector<32x32xf32>, vector<2x32xf32> -> vector<2x32xf32>
    %c1_833 = arith.constant 1 : index
    %c0_834 = arith.constant 0 : index
    %c0_835 = arith.constant 0 : index
    %1213 = vector.load %arg6[%c1_833, %c0_834, %c0_835] : memref<6x32x32xf32, #tpu.memory_space<vmem>>, vector<1x32x32xf32>
    %1214 = vector.shape_cast %1213 : vector<1x32x32xf32> to vector<32x32xf32>
    %cst_836 = arith.constant dense<0.000000e+00> : vector<2x32xf32>
    %1215 = tpu.matmul %1170, %1214, %cst_836 {dimension_numbers = #tpu.dot_dimension_numbers<[1], [0], [0], [1], [0, 0, 1, 1], [], []>} : vector<2x32xf32>, vector<32x32xf32>, vector<2x32xf32> -> vector<2x32xf32>
    %c2_837 = arith.constant 2 : index
    %c0_838 = arith.constant 0 : index
    %c0_839 = arith.constant 0 : index
    %1216 = vector.load %arg6[%c2_837, %c0_838, %c0_839] : memref<6x32x32xf32, #tpu.memory_space<vmem>>, vector<1x32x32xf32>
    %1217 = vector.shape_cast %1216 : vector<1x32x32xf32> to vector<32x32xf32>
    %cst_840 = arith.constant dense<0.000000e+00> : vector<2x32xf32>
    %1218 = tpu.matmul %1170, %1217, %cst_840 {dimension_numbers = #tpu.dot_dimension_numbers<[1], [0], [0], [1], [0, 0, 1, 1], [], []>} : vector<2x32xf32>, vector<32x32xf32>, vector<2x32xf32> -> vector<2x32xf32>
    %c0_841 = arith.constant 0 : index
    %c14_842 = arith.constant 14 : index
    %c0_843 = arith.constant 0 : index
    %1219 = vector.load %arg18[%c0_841, %c14_842, %c0_843] : memref<6x16x32xf32, #tpu.memory_space<vmem>>, vector<1x2x32xf32>
    %1220 = vector.shape_cast %1219 : vector<1x2x32xf32> to vector<2x32xf32>
    %1221 = arith.addf %1220, %1212 : vector<2x32xf32>
    %1222 = arith.negf %1221 : vector<2x32xf32>
    %1223 = math.exp %1222 : vector<2x32xf32>
    %cst_844 = arith.constant 1.000000e+00 : f32
    %1224 = vector.broadcast %cst_844 : f32 to vector<2x32xf32>
    %1225 = arith.addf %1224, %1223 : vector<2x32xf32>
    %1226 = arith.divf %1224, %1225 : vector<2x32xf32>
    %c1_845 = arith.constant 1 : index
    %c14_846 = arith.constant 14 : index
    %c0_847 = arith.constant 0 : index
    %1227 = vector.load %arg18[%c1_845, %c14_846, %c0_847] : memref<6x16x32xf32, #tpu.memory_space<vmem>>, vector<1x2x32xf32>
    %1228 = vector.shape_cast %1227 : vector<1x2x32xf32> to vector<2x32xf32>
    %1229 = arith.addf %1228, %1215 : vector<2x32xf32>
    %1230 = arith.negf %1229 : vector<2x32xf32>
    %1231 = math.exp %1230 : vector<2x32xf32>
    %cst_848 = arith.constant 1.000000e+00 : f32
    %1232 = vector.broadcast %cst_848 : f32 to vector<2x32xf32>
    %1233 = arith.addf %1232, %1231 : vector<2x32xf32>
    %1234 = arith.divf %1232, %1233 : vector<2x32xf32>
    %c2_849 = arith.constant 2 : index
    %c14_850 = arith.constant 14 : index
    %c0_851 = arith.constant 0 : index
    %1235 = vector.load %arg18[%c2_849, %c14_850, %c0_851] : memref<6x16x32xf32, #tpu.memory_space<vmem>>, vector<1x2x32xf32>
    %1236 = vector.shape_cast %1235 : vector<1x2x32xf32> to vector<2x32xf32>
    %1237 = vector.broadcast %674 : vector<1x32xf32> to vector<2x32xf32>
    %1238 = arith.addf %1218, %1237 : vector<2x32xf32>
    %1239 = arith.mulf %1226, %1238 : vector<2x32xf32>
    %1240 = arith.addf %1236, %1239 : vector<2x32xf32>
    %1241 = math.tanh %1240 : vector<2x32xf32>
    %cst_852 = arith.constant 1.000000e+00 : f32
    %1242 = vector.broadcast %cst_852 : f32 to vector<2x32xf32>
    %1243 = arith.subf %1242, %1234 : vector<2x32xf32>
    %1244 = arith.mulf %1243, %1241 : vector<2x32xf32>
    %1245 = arith.mulf %1234, %1170 : vector<2x32xf32>
    %1246 = arith.addf %1244, %1245 : vector<2x32xf32>
    %c14_853 = arith.constant 14 : index
    %c0_854 = arith.constant 0 : index
    %1247 = vector.load %arg20[%c14_853, %c0_854] : memref<16x64xf32, #tpu.memory_space<vmem>>, vector<2x32xf32>
    tpu.vector_store %arg20[%c14_853, %c0_854], %1246 {strides = array<i32>} : memref<16x64xf32, #tpu.memory_space<vmem>>, vector<2x32xf32>,
    %c3_855 = arith.constant 3 : index
    %c0_856 = arith.constant 0 : index
    %c0_857 = arith.constant 0 : index
    %1248 = vector.load %arg6[%c3_855, %c0_856, %c0_857] : memref<6x32x32xf32, #tpu.memory_space<vmem>>, vector<1x32x32xf32>
    %1249 = vector.shape_cast %1248 : vector<1x32x32xf32> to vector<32x32xf32>
    %cst_858 = arith.constant dense<0.000000e+00> : vector<2x32xf32>
    %1250 = tpu.matmul %1208, %1249, %cst_858 {dimension_numbers = #tpu.dot_dimension_numbers<[1], [0], [0], [1], [0, 0, 1, 1], [], []>} : vector<2x32xf32>, vector<32x32xf32>, vector<2x32xf32> -> vector<2x32xf32>
    %c4_859 = arith.constant 4 : index
    %c0_860 = arith.constant 0 : index
    %c0_861 = arith.constant 0 : index
    %1251 = vector.load %arg6[%c4_859, %c0_860, %c0_861] : memref<6x32x32xf32, #tpu.memory_space<vmem>>, vector<1x32x32xf32>
    %1252 = vector.shape_cast %1251 : vector<1x32x32xf32> to vector<32x32xf32>
    %cst_862 = arith.constant dense<0.000000e+00> : vector<2x32xf32>
    %1253 = tpu.matmul %1208, %1252, %cst_862 {dimension_numbers = #tpu.dot_dimension_numbers<[1], [0], [0], [1], [0, 0, 1, 1], [], []>} : vector<2x32xf32>, vector<32x32xf32>, vector<2x32xf32> -> vector<2x32xf32>
    %c5_863 = arith.constant 5 : index
    %c0_864 = arith.constant 0 : index
    %c0_865 = arith.constant 0 : index
    %1254 = vector.load %arg6[%c5_863, %c0_864, %c0_865] : memref<6x32x32xf32, #tpu.memory_space<vmem>>, vector<1x32x32xf32>
    %1255 = vector.shape_cast %1254 : vector<1x32x32xf32> to vector<32x32xf32>
    %cst_866 = arith.constant dense<0.000000e+00> : vector<2x32xf32>
    %1256 = tpu.matmul %1208, %1255, %cst_866 {dimension_numbers = #tpu.dot_dimension_numbers<[1], [0], [0], [1], [0, 0, 1, 1], [], []>} : vector<2x32xf32>, vector<32x32xf32>, vector<2x32xf32> -> vector<2x32xf32>
    %c3_867 = arith.constant 3 : index
    %c0_868 = arith.constant 0 : index
    %c0_869 = arith.constant 0 : index
    %1257 = vector.load %arg18[%c3_867, %c0_868, %c0_869] : memref<6x16x32xf32, #tpu.memory_space<vmem>>, vector<1x2x32xf32>
    %1258 = vector.shape_cast %1257 : vector<1x2x32xf32> to vector<2x32xf32>
    %1259 = arith.addf %1258, %1250 : vector<2x32xf32>
    %1260 = arith.negf %1259 : vector<2x32xf32>
    %1261 = math.exp %1260 : vector<2x32xf32>
    %cst_870 = arith.constant 1.000000e+00 : f32
    %1262 = vector.broadcast %cst_870 : f32 to vector<2x32xf32>
    %1263 = arith.addf %1262, %1261 : vector<2x32xf32>
    %1264 = arith.divf %1262, %1263 : vector<2x32xf32>
    %c4_871 = arith.constant 4 : index
    %c0_872 = arith.constant 0 : index
    %c0_873 = arith.constant 0 : index
    %1265 = vector.load %arg18[%c4_871, %c0_872, %c0_873] : memref<6x16x32xf32, #tpu.memory_space<vmem>>, vector<1x2x32xf32>
    %1266 = vector.shape_cast %1265 : vector<1x2x32xf32> to vector<2x32xf32>
    %1267 = arith.addf %1266, %1253 : vector<2x32xf32>
    %1268 = arith.negf %1267 : vector<2x32xf32>
    %1269 = math.exp %1268 : vector<2x32xf32>
    %cst_874 = arith.constant 1.000000e+00 : f32
    %1270 = vector.broadcast %cst_874 : f32 to vector<2x32xf32>
    %1271 = arith.addf %1270, %1269 : vector<2x32xf32>
    %1272 = arith.divf %1270, %1271 : vector<2x32xf32>
    %c5_875 = arith.constant 5 : index
    %c0_876 = arith.constant 0 : index
    %c0_877 = arith.constant 0 : index
    %1273 = vector.load %arg18[%c5_875, %c0_876, %c0_877] : memref<6x16x32xf32, #tpu.memory_space<vmem>>, vector<1x2x32xf32>
    %1274 = vector.shape_cast %1273 : vector<1x2x32xf32> to vector<2x32xf32>
    %1275 = vector.broadcast %675 : vector<1x32xf32> to vector<2x32xf32>
    %1276 = arith.addf %1256, %1275 : vector<2x32xf32>
    %1277 = arith.mulf %1264, %1276 : vector<2x32xf32>
    %1278 = arith.addf %1274, %1277 : vector<2x32xf32>
    %1279 = math.tanh %1278 : vector<2x32xf32>
    %cst_878 = arith.constant 1.000000e+00 : f32
    %1280 = vector.broadcast %cst_878 : f32 to vector<2x32xf32>
    %1281 = arith.subf %1280, %1272 : vector<2x32xf32>
    %1282 = arith.mulf %1281, %1279 : vector<2x32xf32>
    %1283 = arith.mulf %1272, %1208 : vector<2x32xf32>
    %1284 = arith.addf %1282, %1283 : vector<2x32xf32>
    %c0_879 = arith.constant 0 : index
    %c32_880 = arith.constant 32 : index
    %1285 = vector.load %arg20[%c0_879, %c32_880] : memref<16x64xf32, #tpu.memory_space<vmem>>, vector<2x32xf32>
    tpu.vector_store %arg20[%c0_879, %c32_880], %1284 {strides = array<i32>} : memref<16x64xf32, #tpu.memory_space<vmem>>, vector<2x32xf32>,
    %c0_881 = arith.constant 0 : index
    %c0_882 = arith.constant 0 : index
    %1286 = vector.load %arg19[%c0_881, %c0_882] : memref<16x64xf32, #tpu.memory_space<vmem>>, vector<16x64xf32>
    %c0_883 = arith.constant 0 : index
    %c0_884 = arith.constant 0 : index
    %1287 = vector.load %arg20[%c0_883, %c0_884] : memref<16x64xf32, #tpu.memory_space<vmem>>, vector<16x64xf32>
    %c0_885 = arith.constant 0 : index
    %c0_886 = arith.constant 0 : index
    %1288 = vector.load %arg9[%c0_885, %c0_886] : memref<1x64xf32, #tpu.memory_space<vmem>>, vector<1x64xf32>
    %1289 = vector.broadcast %1288 : vector<1x64xf32> to vector<16x64xf32>
    %1290 = arith.mulf %1286, %1289 : vector<16x64xf32>
    %cst_887 = arith.constant dense<0.000000e+00> : vector<16xf32>
    %1291 = vector.multi_reduction <add>, %1290, %cst_887 [1] : vector<16x64xf32> to vector<16xf32>
    %1292 = vector.shape_cast %1291 : vector<16xf32> to vector<16x1xf32>
    %c0_888 = arith.constant 0 : index
    %c0_889 = arith.constant 0 : index
    %1293 = vector.load %arg10[%c0_888, %c0_889] : memref<16x1xf32, #tpu.memory_space<vmem>>, vector<16x1xf32>
    %1294 = arith.addf %1292, %1293 : vector<16x1xf32>
    %1295 = math.tanh %1294 : vector<16x1xf32>
    %1296 = math.exp %1295 : vector<16x1xf32>
    %1297 = vector.extract_strided_slice %1296 {offsets = [0, 0], sizes = [2, 1], strides = [1, 1]} : vector<16x1xf32> to vector<2x1xf32>
    %1298 = vector.extract_strided_slice %1296 {offsets = [2, 0], sizes = [2, 1], strides = [1, 1]} : vector<16x1xf32> to vector<2x1xf32>
    %1299 = arith.addf %1297, %1298 : vector<2x1xf32>
    %1300 = vector.extract_strided_slice %1296 {offsets = [4, 0], sizes = [2, 1], strides = [1, 1]} : vector<16x1xf32> to vector<2x1xf32>
    %1301 = arith.addf %1299, %1300 : vector<2x1xf32>
    %1302 = vector.extract_strided_slice %1296 {offsets = [6, 0], sizes = [2, 1], strides = [1, 1]} : vector<16x1xf32> to vector<2x1xf32>
    %1303 = arith.addf %1301, %1302 : vector<2x1xf32>
    %1304 = vector.extract_strided_slice %1296 {offsets = [8, 0], sizes = [2, 1], strides = [1, 1]} : vector<16x1xf32> to vector<2x1xf32>
    %1305 = arith.addf %1303, %1304 : vector<2x1xf32>
    %1306 = vector.extract_strided_slice %1296 {offsets = [10, 0], sizes = [2, 1], strides = [1, 1]} : vector<16x1xf32> to vector<2x1xf32>
    %1307 = arith.addf %1305, %1306 : vector<2x1xf32>
    %1308 = vector.extract_strided_slice %1296 {offsets = [12, 0], sizes = [2, 1], strides = [1, 1]} : vector<16x1xf32> to vector<2x1xf32>
    %1309 = arith.addf %1307, %1308 : vector<2x1xf32>
    %1310 = vector.extract_strided_slice %1296 {offsets = [14, 0], sizes = [2, 1], strides = [1, 1]} : vector<16x1xf32> to vector<2x1xf32>
    %1311 = arith.addf %1309, %1310 : vector<2x1xf32>
    %1312 = tpu.reciprocal %1311 {approx = true} : vector<2x1xf32> -> vector<2x1xf32>
    %cst_890 = arith.constant 0.000000e+00 : f32
    %1313 = vector.broadcast %cst_890 : f32 to vector<2x64xf32>
    %1314 = vector.extract_strided_slice %1296 {offsets = [0, 0], sizes = [2, 1], strides = [1, 1]} : vector<16x1xf32> to vector<2x1xf32>
    %1315 = arith.mulf %1314, %1312 : vector<2x1xf32>
    %cst_891 = arith.constant 1.000000e-10 : f32
    %1316 = vector.broadcast %cst_891 : f32 to vector<2x1xf32>
    %1317 = arith.addf %1315, %1316 : vector<2x1xf32>
    %1318 = vector.extract_strided_slice %1286 {offsets = [0, 0], sizes = [2, 64], strides = [1, 1]} : vector<16x64xf32> to vector<2x64xf32>
    %1319 = vector.broadcast %1317 : vector<2x1xf32> to vector<2x64xf32>
    %1320 = arith.mulf %1318, %1319 : vector<2x64xf32>
    %1321 = arith.addf %1313, %1320 : vector<2x64xf32>
    %1322 = vector.extract_strided_slice %1296 {offsets = [2, 0], sizes = [2, 1], strides = [1, 1]} : vector<16x1xf32> to vector<2x1xf32>
    %1323 = arith.mulf %1322, %1312 : vector<2x1xf32>
    %cst_892 = arith.constant 1.000000e-10 : f32
    %1324 = vector.broadcast %cst_892 : f32 to vector<2x1xf32>
    %1325 = arith.addf %1323, %1324 : vector<2x1xf32>
    %1326 = vector.extract_strided_slice %1286 {offsets = [2, 0], sizes = [2, 64], strides = [1, 1]} : vector<16x64xf32> to vector<2x64xf32>
    %1327 = vector.broadcast %1325 : vector<2x1xf32> to vector<2x64xf32>
    %1328 = arith.mulf %1326, %1327 : vector<2x64xf32>
    %1329 = arith.addf %1321, %1328 : vector<2x64xf32>
    %1330 = vector.extract_strided_slice %1296 {offsets = [4, 0], sizes = [2, 1], strides = [1, 1]} : vector<16x1xf32> to vector<2x1xf32>
    %1331 = arith.mulf %1330, %1312 : vector<2x1xf32>
    %cst_893 = arith.constant 1.000000e-10 : f32
    %1332 = vector.broadcast %cst_893 : f32 to vector<2x1xf32>
    %1333 = arith.addf %1331, %1332 : vector<2x1xf32>
    %1334 = vector.extract_strided_slice %1286 {offsets = [4, 0], sizes = [2, 64], strides = [1, 1]} : vector<16x64xf32> to vector<2x64xf32>
    %1335 = vector.broadcast %1333 : vector<2x1xf32> to vector<2x64xf32>
    %1336 = arith.mulf %1334, %1335 : vector<2x64xf32>
    %1337 = arith.addf %1329, %1336 : vector<2x64xf32>
    %1338 = vector.extract_strided_slice %1296 {offsets = [6, 0], sizes = [2, 1], strides = [1, 1]} : vector<16x1xf32> to vector<2x1xf32>
    %1339 = arith.mulf %1338, %1312 : vector<2x1xf32>
    %cst_894 = arith.constant 1.000000e-10 : f32
    %1340 = vector.broadcast %cst_894 : f32 to vector<2x1xf32>
    %1341 = arith.addf %1339, %1340 : vector<2x1xf32>
    %1342 = vector.extract_strided_slice %1286 {offsets = [6, 0], sizes = [2, 64], strides = [1, 1]} : vector<16x64xf32> to vector<2x64xf32>
    %1343 = vector.broadcast %1341 : vector<2x1xf32> to vector<2x64xf32>
    %1344 = arith.mulf %1342, %1343 : vector<2x64xf32>
    %1345 = arith.addf %1337, %1344 : vector<2x64xf32>
    %1346 = vector.extract_strided_slice %1296 {offsets = [8, 0], sizes = [2, 1], strides = [1, 1]} : vector<16x1xf32> to vector<2x1xf32>
    %1347 = arith.mulf %1346, %1312 : vector<2x1xf32>
    %cst_895 = arith.constant 1.000000e-10 : f32
    %1348 = vector.broadcast %cst_895 : f32 to vector<2x1xf32>
    %1349 = arith.addf %1347, %1348 : vector<2x1xf32>
    %1350 = vector.extract_strided_slice %1286 {offsets = [8, 0], sizes = [2, 64], strides = [1, 1]} : vector<16x64xf32> to vector<2x64xf32>
    %1351 = vector.broadcast %1349 : vector<2x1xf32> to vector<2x64xf32>
    %1352 = arith.mulf %1350, %1351 : vector<2x64xf32>
    %1353 = arith.addf %1345, %1352 : vector<2x64xf32>
    %1354 = vector.extract_strided_slice %1296 {offsets = [10, 0], sizes = [2, 1], strides = [1, 1]} : vector<16x1xf32> to vector<2x1xf32>
    %1355 = arith.mulf %1354, %1312 : vector<2x1xf32>
    %cst_896 = arith.constant 1.000000e-10 : f32
    %1356 = vector.broadcast %cst_896 : f32 to vector<2x1xf32>
    %1357 = arith.addf %1355, %1356 : vector<2x1xf32>
    %1358 = vector.extract_strided_slice %1286 {offsets = [10, 0], sizes = [2, 64], strides = [1, 1]} : vector<16x64xf32> to vector<2x64xf32>
    %1359 = vector.broadcast %1357 : vector<2x1xf32> to vector<2x64xf32>
    %1360 = arith.mulf %1358, %1359 : vector<2x64xf32>
    %1361 = arith.addf %1353, %1360 : vector<2x64xf32>
    %1362 = vector.extract_strided_slice %1296 {offsets = [12, 0], sizes = [2, 1], strides = [1, 1]} : vector<16x1xf32> to vector<2x1xf32>
    %1363 = arith.mulf %1362, %1312 : vector<2x1xf32>
    %cst_897 = arith.constant 1.000000e-10 : f32
    %1364 = vector.broadcast %cst_897 : f32 to vector<2x1xf32>
    %1365 = arith.addf %1363, %1364 : vector<2x1xf32>
    %1366 = vector.extract_strided_slice %1286 {offsets = [12, 0], sizes = [2, 64], strides = [1, 1]} : vector<16x64xf32> to vector<2x64xf32>
    %1367 = vector.broadcast %1365 : vector<2x1xf32> to vector<2x64xf32>
    %1368 = arith.mulf %1366, %1367 : vector<2x64xf32>
    %1369 = arith.addf %1361, %1368 : vector<2x64xf32>
    %1370 = vector.extract_strided_slice %1296 {offsets = [14, 0], sizes = [2, 1], strides = [1, 1]} : vector<16x1xf32> to vector<2x1xf32>
    %1371 = arith.mulf %1370, %1312 : vector<2x1xf32>
    %cst_898 = arith.constant 1.000000e-10 : f32
    %1372 = vector.broadcast %cst_898 : f32 to vector<2x1xf32>
    %1373 = arith.addf %1371, %1372 : vector<2x1xf32>
    %1374 = vector.extract_strided_slice %1286 {offsets = [14, 0], sizes = [2, 64], strides = [1, 1]} : vector<16x64xf32> to vector<2x64xf32>
    %1375 = vector.broadcast %1373 : vector<2x1xf32> to vector<2x64xf32>
    %1376 = arith.mulf %1374, %1375 : vector<2x64xf32>
    %1377 = arith.addf %1369, %1376 : vector<2x64xf32>
    %c0_899 = arith.constant 0 : index
    %c0_900 = arith.constant 0 : index
    %1378 = vector.load %arg11[%c0_899, %c0_900] : memref<1x64xf32, #tpu.memory_space<vmem>>, vector<1x64xf32>
    %1379 = vector.broadcast %1378 : vector<1x64xf32> to vector<16x64xf32>
    %1380 = arith.mulf %1287, %1379 : vector<16x64xf32>
    %cst_901 = arith.constant dense<0.000000e+00> : vector<16xf32>
    %1381 = vector.multi_reduction <add>, %1380, %cst_901 [1] : vector<16x64xf32> to vector<16xf32>
    %1382 = vector.shape_cast %1381 : vector<16xf32> to vector<16x1xf32>
    %c0_902 = arith.constant 0 : index
    %c0_903 = arith.constant 0 : index
    %1383 = vector.load %arg12[%c0_902, %c0_903] : memref<16x1xf32, #tpu.memory_space<vmem>>, vector<16x1xf32>
    %1384 = arith.addf %1382, %1383 : vector<16x1xf32>
    %1385 = math.tanh %1384 : vector<16x1xf32>
    %1386 = math.exp %1385 : vector<16x1xf32>
    %1387 = vector.extract_strided_slice %1386 {offsets = [0, 0], sizes = [2, 1], strides = [1, 1]} : vector<16x1xf32> to vector<2x1xf32>
    %1388 = vector.extract_strided_slice %1386 {offsets = [2, 0], sizes = [2, 1], strides = [1, 1]} : vector<16x1xf32> to vector<2x1xf32>
    %1389 = arith.addf %1387, %1388 : vector<2x1xf32>
    %1390 = vector.extract_strided_slice %1386 {offsets = [4, 0], sizes = [2, 1], strides = [1, 1]} : vector<16x1xf32> to vector<2x1xf32>
    %1391 = arith.addf %1389, %1390 : vector<2x1xf32>
    %1392 = vector.extract_strided_slice %1386 {offsets = [6, 0], sizes = [2, 1], strides = [1, 1]} : vector<16x1xf32> to vector<2x1xf32>
    %1393 = arith.addf %1391, %1392 : vector<2x1xf32>
    %1394 = vector.extract_strided_slice %1386 {offsets = [8, 0], sizes = [2, 1], strides = [1, 1]} : vector<16x1xf32> to vector<2x1xf32>
    %1395 = arith.addf %1393, %1394 : vector<2x1xf32>
    %1396 = vector.extract_strided_slice %1386 {offsets = [10, 0], sizes = [2, 1], strides = [1, 1]} : vector<16x1xf32> to vector<2x1xf32>
    %1397 = arith.addf %1395, %1396 : vector<2x1xf32>
    %1398 = vector.extract_strided_slice %1386 {offsets = [12, 0], sizes = [2, 1], strides = [1, 1]} : vector<16x1xf32> to vector<2x1xf32>
    %1399 = arith.addf %1397, %1398 : vector<2x1xf32>
    %1400 = vector.extract_strided_slice %1386 {offsets = [14, 0], sizes = [2, 1], strides = [1, 1]} : vector<16x1xf32> to vector<2x1xf32>
    %1401 = arith.addf %1399, %1400 : vector<2x1xf32>
    %1402 = tpu.reciprocal %1401 {approx = true} : vector<2x1xf32> -> vector<2x1xf32>
    %cst_904 = arith.constant 0.000000e+00 : f32
    %1403 = vector.broadcast %cst_904 : f32 to vector<2x64xf32>
    %1404 = vector.extract_strided_slice %1386 {offsets = [0, 0], sizes = [2, 1], strides = [1, 1]} : vector<16x1xf32> to vector<2x1xf32>
    %1405 = arith.mulf %1404, %1402 : vector<2x1xf32>
    %cst_905 = arith.constant 1.000000e-10 : f32
    %1406 = vector.broadcast %cst_905 : f32 to vector<2x1xf32>
    %1407 = arith.addf %1405, %1406 : vector<2x1xf32>
    %1408 = vector.extract_strided_slice %1287 {offsets = [0, 0], sizes = [2, 64], strides = [1, 1]} : vector<16x64xf32> to vector<2x64xf32>
    %1409 = vector.broadcast %1407 : vector<2x1xf32> to vector<2x64xf32>
    %1410 = arith.mulf %1408, %1409 : vector<2x64xf32>
    %1411 = arith.addf %1403, %1410 : vector<2x64xf32>
    %1412 = vector.extract_strided_slice %1386 {offsets = [2, 0], sizes = [2, 1], strides = [1, 1]} : vector<16x1xf32> to vector<2x1xf32>
    %1413 = arith.mulf %1412, %1402 : vector<2x1xf32>
    %cst_906 = arith.constant 1.000000e-10 : f32
    %1414 = vector.broadcast %cst_906 : f32 to vector<2x1xf32>
    %1415 = arith.addf %1413, %1414 : vector<2x1xf32>
    %1416 = vector.extract_strided_slice %1287 {offsets = [2, 0], sizes = [2, 64], strides = [1, 1]} : vector<16x64xf32> to vector<2x64xf32>
    %1417 = vector.broadcast %1415 : vector<2x1xf32> to vector<2x64xf32>
    %1418 = arith.mulf %1416, %1417 : vector<2x64xf32>
    %1419 = arith.addf %1411, %1418 : vector<2x64xf32>
    %1420 = vector.extract_strided_slice %1386 {offsets = [4, 0], sizes = [2, 1], strides = [1, 1]} : vector<16x1xf32> to vector<2x1xf32>
    %1421 = arith.mulf %1420, %1402 : vector<2x1xf32>
    %cst_907 = arith.constant 1.000000e-10 : f32
    %1422 = vector.broadcast %cst_907 : f32 to vector<2x1xf32>
    %1423 = arith.addf %1421, %1422 : vector<2x1xf32>
    %1424 = vector.extract_strided_slice %1287 {offsets = [4, 0], sizes = [2, 64], strides = [1, 1]} : vector<16x64xf32> to vector<2x64xf32>
    %1425 = vector.broadcast %1423 : vector<2x1xf32> to vector<2x64xf32>
    %1426 = arith.mulf %1424, %1425 : vector<2x64xf32>
    %1427 = arith.addf %1419, %1426 : vector<2x64xf32>
    %1428 = vector.extract_strided_slice %1386 {offsets = [6, 0], sizes = [2, 1], strides = [1, 1]} : vector<16x1xf32> to vector<2x1xf32>
    %1429 = arith.mulf %1428, %1402 : vector<2x1xf32>
    %cst_908 = arith.constant 1.000000e-10 : f32
    %1430 = vector.broadcast %cst_908 : f32 to vector<2x1xf32>
    %1431 = arith.addf %1429, %1430 : vector<2x1xf32>
    %1432 = vector.extract_strided_slice %1287 {offsets = [6, 0], sizes = [2, 64], strides = [1, 1]} : vector<16x64xf32> to vector<2x64xf32>
    %1433 = vector.broadcast %1431 : vector<2x1xf32> to vector<2x64xf32>
    %1434 = arith.mulf %1432, %1433 : vector<2x64xf32>
    %1435 = arith.addf %1427, %1434 : vector<2x64xf32>
    %1436 = vector.extract_strided_slice %1386 {offsets = [8, 0], sizes = [2, 1], strides = [1, 1]} : vector<16x1xf32> to vector<2x1xf32>
    %1437 = arith.mulf %1436, %1402 : vector<2x1xf32>
    %cst_909 = arith.constant 1.000000e-10 : f32
    %1438 = vector.broadcast %cst_909 : f32 to vector<2x1xf32>
    %1439 = arith.addf %1437, %1438 : vector<2x1xf32>
    %1440 = vector.extract_strided_slice %1287 {offsets = [8, 0], sizes = [2, 64], strides = [1, 1]} : vector<16x64xf32> to vector<2x64xf32>
    %1441 = vector.broadcast %1439 : vector<2x1xf32> to vector<2x64xf32>
    %1442 = arith.mulf %1440, %1441 : vector<2x64xf32>
    %1443 = arith.addf %1435, %1442 : vector<2x64xf32>
    %1444 = vector.extract_strided_slice %1386 {offsets = [10, 0], sizes = [2, 1], strides = [1, 1]} : vector<16x1xf32> to vector<2x1xf32>
    %1445 = arith.mulf %1444, %1402 : vector<2x1xf32>
    %cst_910 = arith.constant 1.000000e-10 : f32
    %1446 = vector.broadcast %cst_910 : f32 to vector<2x1xf32>
    %1447 = arith.addf %1445, %1446 : vector<2x1xf32>
    %1448 = vector.extract_strided_slice %1287 {offsets = [10, 0], sizes = [2, 64], strides = [1, 1]} : vector<16x64xf32> to vector<2x64xf32>
    %1449 = vector.broadcast %1447 : vector<2x1xf32> to vector<2x64xf32>
    %1450 = arith.mulf %1448, %1449 : vector<2x64xf32>
    %1451 = arith.addf %1443, %1450 : vector<2x64xf32>
    %1452 = vector.extract_strided_slice %1386 {offsets = [12, 0], sizes = [2, 1], strides = [1, 1]} : vector<16x1xf32> to vector<2x1xf32>
    %1453 = arith.mulf %1452, %1402 : vector<2x1xf32>
    %cst_911 = arith.constant 1.000000e-10 : f32
    %1454 = vector.broadcast %cst_911 : f32 to vector<2x1xf32>
    %1455 = arith.addf %1453, %1454 : vector<2x1xf32>
    %1456 = vector.extract_strided_slice %1287 {offsets = [12, 0], sizes = [2, 64], strides = [1, 1]} : vector<16x64xf32> to vector<2x64xf32>
    %1457 = vector.broadcast %1455 : vector<2x1xf32> to vector<2x64xf32>
    %1458 = arith.mulf %1456, %1457 : vector<2x64xf32>
    %1459 = arith.addf %1451, %1458 : vector<2x64xf32>
    %1460 = vector.extract_strided_slice %1386 {offsets = [14, 0], sizes = [2, 1], strides = [1, 1]} : vector<16x1xf32> to vector<2x1xf32>
    %1461 = arith.mulf %1460, %1402 : vector<2x1xf32>
    %cst_912 = arith.constant 1.000000e-10 : f32
    %1462 = vector.broadcast %cst_912 : f32 to vector<2x1xf32>
    %1463 = arith.addf %1461, %1462 : vector<2x1xf32>
    %1464 = vector.extract_strided_slice %1287 {offsets = [14, 0], sizes = [2, 64], strides = [1, 1]} : vector<16x64xf32> to vector<2x64xf32>
    %1465 = vector.broadcast %1463 : vector<2x1xf32> to vector<2x64xf32>
    %1466 = arith.mulf %1464, %1465 : vector<2x64xf32>
    %1467 = arith.addf %1459, %1466 : vector<2x64xf32>
    %1468 = vector.extract_strided_slice %1287 {offsets = [0, 0], sizes = [2, 64], strides = [1, 1]} : vector<16x64xf32> to vector<2x64xf32>
    %1469 = vector.extract_strided_slice %1287 {offsets = [0, 0], sizes = [2, 64], strides = [1, 1]} : vector<16x64xf32> to vector<2x64xf32>
    %1470 = vector.extract_strided_slice %1287 {offsets = [2, 0], sizes = [2, 64], strides = [1, 1]} : vector<16x64xf32> to vector<2x64xf32>
    %1471 = arith.addf %1468, %1470 : vector<2x64xf32>
    %1472 = arith.maximumf %1469, %1470 : vector<2x64xf32>
    %1473 = vector.extract_strided_slice %1287 {offsets = [4, 0], sizes = [2, 64], strides = [1, 1]} : vector<16x64xf32> to vector<2x64xf32>
    %1474 = arith.addf %1471, %1473 : vector<2x64xf32>
    %1475 = arith.maximumf %1472, %1473 : vector<2x64xf32>
    %1476 = vector.extract_strided_slice %1287 {offsets = [6, 0], sizes = [2, 64], strides = [1, 1]} : vector<16x64xf32> to vector<2x64xf32>
    %1477 = arith.addf %1474, %1476 : vector<2x64xf32>
    %1478 = arith.maximumf %1475, %1476 : vector<2x64xf32>
    %1479 = vector.extract_strided_slice %1287 {offsets = [8, 0], sizes = [2, 64], strides = [1, 1]} : vector<16x64xf32> to vector<2x64xf32>
    %1480 = arith.addf %1477, %1479 : vector<2x64xf32>
    %1481 = arith.maximumf %1478, %1479 : vector<2x64xf32>
    %1482 = vector.extract_strided_slice %1287 {offsets = [10, 0], sizes = [2, 64], strides = [1, 1]} : vector<16x64xf32> to vector<2x64xf32>
    %1483 = arith.addf %1480, %1482 : vector<2x64xf32>
    %1484 = arith.maximumf %1481, %1482 : vector<2x64xf32>
    %1485 = vector.extract_strided_slice %1287 {offsets = [12, 0], sizes = [2, 64], strides = [1, 1]} : vector<16x64xf32> to vector<2x64xf32>
    %1486 = arith.addf %1483, %1485 : vector<2x64xf32>
    %1487 = arith.maximumf %1484, %1485 : vector<2x64xf32>
    %1488 = vector.extract_strided_slice %1287 {offsets = [14, 0], sizes = [2, 64], strides = [1, 1]} : vector<16x64xf32> to vector<2x64xf32>
    %1489 = arith.addf %1486, %1488 : vector<2x64xf32>
    %1490 = arith.maximumf %1487, %1488 : vector<2x64xf32>
    %cst_913 = arith.constant 1.250000e-01 : f32
    %1491 = vector.broadcast %cst_913 : f32 to vector<2x64xf32>
    %1492 = arith.mulf %1489, %1491 : vector<2x64xf32>
    %c0_914 = arith.constant 0 : index
    %c0_915 = arith.constant 0 : index
    %1493 = vector.load %arg13[%c0_914, %c0_915] : memref<256x16xf32, #tpu.memory_space<vmem>>, vector<64x16xf32>
    %cst_916 = arith.constant dense<0.000000e+00> : vector<2x16xf32>
    %1494 = tpu.matmul %1377, %1493, %cst_916 {dimension_numbers = #tpu.dot_dimension_numbers<[1], [0], [0], [1], [0, 0, 1, 1], [], []>} : vector<2x64xf32>, vector<64x16xf32>, vector<2x16xf32> -> vector<2x16xf32>
    %c64 = arith.constant 64 : index
    %c0_917 = arith.constant 0 : index
    %1495 = vector.load %arg13[%c64, %c0_917] : memref<256x16xf32, #tpu.memory_space<vmem>>, vector<64x16xf32>
    %cst_918 = arith.constant dense<0.000000e+00> : vector<2x16xf32>
    %1496 = tpu.matmul %1467, %1495, %cst_918 {dimension_numbers = #tpu.dot_dimension_numbers<[1], [0], [0], [1], [0, 0, 1, 1], [], []>} : vector<2x64xf32>, vector<64x16xf32>, vector<2x16xf32> -> vector<2x16xf32>
    %1497 = arith.addf %1494, %1496 : vector<2x16xf32>
    %c128 = arith.constant 128 : index
    %c0_919 = arith.constant 0 : index
    %1498 = vector.load %arg13[%c128, %c0_919] : memref<256x16xf32, #tpu.memory_space<vmem>>, vector<64x16xf32>
    %cst_920 = arith.constant dense<0.000000e+00> : vector<2x16xf32>
    %1499 = tpu.matmul %1492, %1498, %cst_920 {dimension_numbers = #tpu.dot_dimension_numbers<[1], [0], [0], [1], [0, 0, 1, 1], [], []>} : vector<2x64xf32>, vector<64x16xf32>, vector<2x16xf32> -> vector<2x16xf32>
    %1500 = arith.addf %1497, %1499 : vector<2x16xf32>
    %c192 = arith.constant 192 : index
    %c0_921 = arith.constant 0 : index
    %1501 = vector.load %arg13[%c192, %c0_921] : memref<256x16xf32, #tpu.memory_space<vmem>>, vector<64x16xf32>
    %cst_922 = arith.constant dense<0.000000e+00> : vector<2x16xf32>
    %1502 = tpu.matmul %1490, %1501, %cst_922 {dimension_numbers = #tpu.dot_dimension_numbers<[1], [0], [0], [1], [0, 0, 1, 1], [], []>} : vector<2x64xf32>, vector<64x16xf32>, vector<2x16xf32> -> vector<2x16xf32>
    %1503 = arith.addf %1500, %1502 : vector<2x16xf32>
    %c0_923 = arith.constant 0 : index
    %c0_924 = arith.constant 0 : index
    %1504 = vector.load %arg14[%c0_923, %c0_924] : memref<1x16xf32, #tpu.memory_space<vmem>>, vector<1x16xf32>
    %1505 = vector.broadcast %1504 : vector<1x16xf32> to vector<2x16xf32>
    %1506 = arith.addf %1503, %1505 : vector<2x16xf32>
    %cst_925 = arith.constant 0.000000e+00 : f32
    %1507 = vector.broadcast %cst_925 : f32 to vector<2x16xf32>
    %1508 = arith.maximumf %1506, %1507 : vector<2x16xf32>
    %c0_926 = arith.constant 0 : index
    %c0_927 = arith.constant 0 : index
    %1509 = vector.load %arg15[%c0_926, %c0_927] : memref<16x1xf32, #tpu.memory_space<vmem>>, vector<16x1xf32>
    %cst_928 = arith.constant dense<0.000000e+00> : vector<2x1xf32>
    %1510 = tpu.matmul %1508, %1509, %cst_928 {dimension_numbers = #tpu.dot_dimension_numbers<[1], [0], [0], [1], [0, 0, 1, 1], [], []>} : vector<2x16xf32>, vector<16x1xf32>, vector<2x1xf32> -> vector<2x1xf32>
    %c0_929 = arith.constant 0 : index
    %c0_930 = arith.constant 0 : index
    %1511 = vector.load %arg16[%c0_929, %c0_930] : memref<1x1xf32, #tpu.memory_space<vmem>>, vector<1x1xf32>
    %1512 = vector.broadcast %1511 : vector<1x1xf32> to vector<2x1xf32>
    %1513 = arith.addf %1510, %1512 : vector<2x1xf32>
    %1514 = arith.negf %1513 : vector<2x1xf32>
    %1515 = math.exp %1514 : vector<2x1xf32>
    %cst_931 = arith.constant 1.000000e+00 : f32
    %1516 = vector.broadcast %cst_931 : f32 to vector<2x1xf32>
    %1517 = arith.addf %1516, %1515 : vector<2x1xf32>
    %1518 = arith.divf %1516, %1517 : vector<2x1xf32>
    %c0_932 = arith.constant 0 : index
    %c0_933 = arith.constant 0 : index
    %1519 = vector.load %arg17[%c0_932, %c0_933] : memref<2x1xf32, #tpu.memory_space<vmem>>, vector<2x1xf32>
    tpu.vector_store %arg17[%c0_932, %c0_933], %1518 {strides = array<i32>} : memref<2x1xf32, #tpu.memory_space<vmem>>, vector<2x1xf32>,
    return
  }
}

</mosaic_0001>

<bundles_post_ra>
// kernel: neural_net_forward.1
= control target key start
LH: loop header
LB: loop body
LE: loop exit
PB: predicated region body
PF: predicated region fallthrough
CT: control target
= control target key end

     0   :  { %v12320_v0 = vmov 0.0|0.0   ;;  %v12321_v2 = vmov 0   ;;  %vm12322_vm0 = vmmov 0   ;;  %v12323_v6 = vmov 0.0   ;;  %s12326_s30 = smov 96   ;;  %s14134_s1 = inlined_call_operand.vmem [shape: bf16[32,192], index: 1, kind: input, shape index: {}]   ;;  %s14135_s2 = inlined_call_operand.vmem [shape: f32[6,32,32], index: 2, kind: input, shape index: {}]   ;;  %s14136_s0 = inlined_call_operand.vmem [shape: f32[16,32], index: 0, kind: input, shape index: {}]   ;;  %s14137_s3 = inlined_call_operand.vmem [shape: f32[1,192], index: 3, kind: input, shape index: {}]   ;;  %s14138_s4 = inlined_call_operand.vmem [shape: f32[2,32], index: 4, kind: input, shape index: {}]   ;;  %s14139_s5 = inlined_call_operand.vmem [shape: bf16[64,192], index: 5, kind: input, shape index: {}]   ;;  %s14140_s6 = inlined_call_operand.vmem [shape: f32[6,32,32], index: 6, kind: input, shape index: {}]   ;;  %s14141_s7 = inlined_call_operand.vmem [shape: f32[1,192], index: 7, kind: input, shape index: {}]   ;;  %s14142_s8 = inlined_call_operand.vmem [shape: f32[2,32], index: 8, kind: input, shape index: {}]   ;;  %s14143_s9 = inlined_call_operand.vmem [shape: f32[1,64], index: 9, kind: input, shape index: {}]   ;;  %s14144_s11 = inlined_call_operand.vmem [shape: f32[1,64], index: 11, kind: input, shape index: {}]   ;;  %s14145_s10 = inlined_call_operand.vmem [shape: f32[16,1], index: 10, kind: input, shape index: {}]   ;;  %s14146_s12 = inlined_call_operand.vmem [shape: f32[16,1], index: 12, kind: input, shape index: {}]   ;;  %s14147_s13 = inlined_call_operand.vmem [shape: f32[256,16], index: 13, kind: input, shape index: {}]   ;;  %s14148_s15 = inlined_call_operand.vmem [shape: f32[16,1], index: 15, kind: input, shape index: {}]   ;;  %s14149_s16 = inlined_call_operand.<no memory space> [shape: f32[1,1], index: 16, kind: input, shape index: {}]   ;;  %s14150_s14 = inlined_call_operand.vmem [shape: f32[1,16], index: 14, kind: input, shape index: {}]   ;;  %s14151_s17 = inlined_call_operand.vmem [shape: f32[2,1], index: 17, kind: output, shape index: {}]  }
   0x1   :  { %14154 = sst [smem:[#allocation6_spill]] %s14134_s1  ;;  %11318 = vmatprep.subr.bf16.mxu1 %v12320_v0  ;;  %134 = vmatprep.mubr.bf16.mxu0 %v12321_v2  ;;  %v59_v13 = vld [vmem:[%s14136_s0] sm:$0xff]  ;;  %v60_v14 = vld [vmem:[%s14136_s0 + $0x8] sm:$0xff]  ;;  %vm98_vm1 = vcmask 261120   ;;  %v68_v46 = vlaneseq  ;;  %s12325_s1 = smov 32   ;;  %vm447_vm2 = vcmask 254976  }
   0x2   :  { %14155 = sst [smem:[#allocation7_spill]] %s14135_s2  ;;  %s14156_s26 = sld [smem:[#allocation6_spill]]  ;;  %10187 = vmatprep.mubr.msk.f32.mxu1 %vm12322_vm0, %v12323_v6  ;;  %11953 = vset.pattern.permute.xlu1 %v12321_v2  ;;  %v61_v17 = vpack.c.bf16 %v60_v14, %v59_v13  ;;  %v66_v49 = vld [vmem:[%s14137_s3] sm:$0x3]  ;;  %vm706_vm3 = vcmask 517376   ;;  %vm4292_vm4 = vcmask 523264  }
   0x3   :  { %s14157_s29 = sld [smem:[#allocation7_spill]]  ;;  %11952 = vset.pattern.permute.xlu0 %v12321_v2  ;;  %v12591_v47 = vshrl.u32 %v68_v46, 7  ;;  %s12324_s3 = smov 64   ;;  %vm9078_vm5 = vcmask 130048   ;;  %vm9158_vm6 = vcmask 1024  }
   0x5   :  { %v70_v48 = vsub.s32 0, %v12591_v47  ;;  %v74_v50 = vsub.s32 1, %v12591_v47 }
   0x7   :  { %v71_v51 = vrot.slane %v66_v49, %v70_v48  ;;  %v75_v52 = vrot.slane %v66_v49, %v74_v50 }
   0x8   :  { %v11954_v1 = vld [vmem:[%s14156_s26 + $0x4] ss:$8 sps:$4 sm:$0xff]   ;;  %v11956_v5 = vld [vmem:[%s14156_s26] ss:$8 sps:$4 sm:$0xff]   ;;  %v11957_v8 = vld [vmem:[%s14156_s26 + $0x14] ss:$8 sps:$4 sm:$0xff]  }
   0x9   :  { %v192_v3 = vld [vmem:[%s14157_s29] sm:$0xff]  ;;  %v193_v4 = vld [vmem:[%s14157_s29 + $0x8] sm:$0xff]  ;;  %102 = vmatprep.subr.bf16.mxu0 %v11954_v1  ;;  %v194_v9 = vld [vmem:[%s14157_s29 + $0x10] sm:$0xff] }
   0xa   :  { %v12434_v7 = vpack.c.bf16 %v193_v4, %v192_v3  ;;  %103 = vmatpush1.bf16.msra.mxu0 %v11956_v5  ;;  %v195_v10 = vld [vmem:[%s14157_s29 + $0x18] sm:$0xff]  ;;  %v9173_v15 = vld [vmem:[%s14157_s29 + $0x40] sm:$0xff]  ;;  %v9174_v16 = vld [vmem:[%s14157_s29 + $0x48] sm:$0xff] }
   0xb   :  { %v11959_v11 = vld [vmem:[%s14156_s26 + $0x10] ss:$8 sps:$4 sm:$0xff]   ;;  %104 = vmatprep.subr.bf16.mxu0 %v11957_v8  ;;  %v12450_v12 = vpack.c.bf16 %v195_v10, %v194_v9  ;;  %v9169_v18 = vld [vmem:[%s14157_s29 + $0x20] sm:$0xff]  ;;  %v9170_v19 = vld [vmem:[%s14157_s29 + $0x28] sm:$0xff]  ;;  %v12472_v20 = vpack.c.bf16 %v9174_v16, %v9173_v15 }
   0xc   :  { %11320 = vmatpush3.bf16.msra.mxu1 %v12434_v7  ;;  %v12475_v21 = vpack.c.bf16 %v9170_v19, %v9169_v18  ;;  %v9171_v22 = vld [vmem:[%s14157_s29 + $0x30] sm:$0xff]  ;;  %v9172_v23 = vld [vmem:[%s14157_s29 + $0x38] sm:$0xff]  ;;  %v9180_v28 = vld [vmem:[%s14157_s29 + $0x60] sm:$0xff] }
   0xd   :  { %11321 = vmatprep.subr.bf16.mxu1 %v12320_v0  ;;  %v9175_v24 = vld [vmem:[%s14157_s29 + $0x50] sm:$0xff]  ;;  %v9176_v25 = vld [vmem:[%s14157_s29 + $0x58] sm:$0xff]  ;;  %v12493_v26 = vpack.c.bf16 %v9172_v23, %v9171_v22  ;;  %v9181_v29 = vld [vmem:[%s14157_s29 + $0x68] sm:$0xff] }
   0xe   :  { %105 = vmatpush1.bf16.msra.mxu0 %v11959_v11  ;;  %v12496_v27 = vpack.c.bf16 %v9176_v25, %v9175_v24  ;;  %v9184_v30 = vld [vmem:[%s14157_s29 + $0x80] sm:$0xff]  ;;  %v9185_v31 = vld [vmem:[%s14157_s29 + $0x88] sm:$0xff]  ;;  %v12517_v32 = vpack.c.bf16 %v9181_v29, %v9180_v28  ;;  %v9182_v34 = vld [vmem:[%s14157_s29 + $0x70] sm:$0xff] }
   0xf   :  { %11324 = vmatprep.subr.bf16.mxu0 %v12320_v0  ;;  %v12520_v33 = vpack.c.bf16 %v9185_v31, %v9184_v30  ;;  %v9183_v35 = vld [vmem:[%s14157_s29 + $0x78] sm:$0xff]  ;;  %v9186_v36 = vld [vmem:[%s14157_s29 + $0x90] sm:$0xff]  ;;  %v9188_v40 = vld [vmem:[%s14157_s29 + $0xa0] sm:$0xff] }
  0x10   :  { %11323 = vmatpush3.bf16.msra.mxu1 %v12450_v12  ;;  %v9187_v37 = vld [vmem:[%s14157_s29 + $0x98] sm:$0xff]  ;;  %v12539_v38 = vpack.c.bf16 %v9183_v35, %v9182_v34  ;;  %v9189_v41 = vld [vmem:[%s14157_s29 + $0xa8] sm:$0xff]  ;;  %v9190_v43 = vld [vmem:[%s14157_s29 + $0xb0] sm:$0xff] }
  0x11   :  { %11330 = vmatprep.subr.bf16.mxu1 %v12320_v0  ;;  %9168 = vmatmul.mubr.msk.bf16.vlgmr.msra.gmra.mrb[0].mxu0 %vm98_vm1, %v61_v17  ;;  %v12542_v39 = vpack.c.bf16 %v9187_v37, %v9186_v36  ;;  %v12557_v42 = vpack.c.bf16 %v9189_v41, %v9188_v40  ;;  %v9191_v44 = vld [vmem:[%s14157_s29 + $0xb8] sm:$0xff]  ;;  %v12617_v19 = vld [vmem:[%s14138_s4] ss:$0 sm:$0xff] }
  0x12   :  { %11326 = vmatpush3.bf16.msra.mxu0 %v12475_v21  ;;  %10198 = vmatprep.mubr.msk.f32.mxu0 %vm12322_vm0, %v12323_v6  ;;  %v12571_v45 = vpack.c.bf16 %v9191_v44, %v9190_v43 }
  0x13   :  { %10188 = vmatmul.mubr.f32.vlgmr.msra.gmra.mrb[0].mxu1 %v12323_v6  ;;  %11327 = vmatprep.subr.bf16.mxu0 %v12320_v0 }
  0x14   :  { %11332 = vmatpush3.bf16.msra.mxu1 %v12472_v20  ;;  %10209 = vmatprep.mubr.msk.f32.mxu1 %vm12322_vm0, %v12323_v6 }
  0x15   :  { %11333 = vmatprep.subr.bf16.mxu1 %v12320_v0 }
  0x16   :  { %11329 = vmatpush3.bf16.msra.mxu0 %v12493_v26 }
  0x17   :  { %11336 = vmatprep.subr.bf16.mxu0 %v12320_v0 }
  0x18   :  { %11335 = vmatpush3.bf16.msra.mxu1 %v12496_v27 }
  0x19   :  { %11342 = vmatprep.subr.bf16.mxu1 %v12320_v0  ;;  %10199 = vmatmul.mubr.f32.vlgmr.msra.gmra.mrb[4].mxu0 %v12323_v6 }
  0x1a   :  { %11338 = vmatpush3.bf16.msra.mxu0 %v12517_v32  ;;  %10220 = vmatprep.mubr.msk.f32.mxu0 %vm12322_vm0, %v12323_v6 }
  0x1b   :  { %10210 = vmatmul.mubr.f32.vlgmr.msra.gmra.mrb[2].mxu1 %v12323_v6  ;;  %11339 = vmatprep.subr.bf16.mxu0 %v12320_v0 }
  0x1c   :  { %11344 = vmatpush3.bf16.msra.mxu1 %v12520_v33  ;;  %10231 = vmatprep.mubr.msk.f32.mxu1 %vm12322_vm0, %v12323_v6 }
  0x1d   :  { %11345 = vmatprep.subr.bf16.mxu1 %v12320_v0 }
  0x1e   :  { %11341 = vmatpush3.bf16.msra.mxu0 %v12539_v38 }
  0x1f   :  { %11348 = vmatprep.subr.bf16.mxu0 %v12320_v0 }
  0x20   :  { %11347 = vmatpush3.bf16.msra.mxu1 %v12542_v39 }
  0x21   :  { %11354 = vmatprep.subr.bf16.mxu1 %v12320_v0  ;;  %10221 = vmatmul.mubr.f32.vlgmr.msra.gmra.mrb[6].mxu0 %v12323_v6 }
  0x22   :  { %11350 = vmatpush3.bf16.msra.mxu0 %v12557_v42  ;;  %10242 = vmatprep.mubr.msk.f32.mxu0 %vm12322_vm0, %v12323_v6 }
  0x23   :  { %10232 = vmatmul.mubr.f32.vlgmr.msra.gmra.mrb[4].mxu1 %v12323_v6  ;;  %11351 = vmatprep.subr.bf16.mxu0 %v12320_v0 }
  0x24   :  { %11356 = vmatpush3.bf16.msra.mxu1 %v12434_v7  ;;  %10253 = vmatprep.mubr.msk.f32.mxu1 %vm12322_vm0, %v12323_v6 }
  0x25   :  { %11357 = vmatprep.subr.bf16.mxu1 %v12320_v0 }
  0x26   :  { %11353 = vmatpush3.bf16.msra.mxu0 %v12571_v45 }
  0x27   :  { %11360 = vmatprep.subr.bf16.mxu0 %v12320_v0 }
  0x28   :  { %11359 = vmatpush3.bf16.msra.mxu1 %v12450_v12 }
  0x29   :  { %10243 = vmatmul.mubr.f32.vlgmr.msra.gmra.mrb[8].mxu0 %v12323_v6  ;;  %11366 = vmatprep.subr.bf16.mxu1 %v12320_v0 }
  0x2a   :  { %11362 = vmatpush3.bf16.msra.mxu0 %v12475_v21  ;;  %10264 = vmatprep.mubr.msk.f32.mxu0 %vm12322_vm0, %v12323_v6 }
  0x2b   :  { %11363 = vmatprep.subr.bf16.mxu0 %v12320_v0 }
  0x2e   :  { %11365 = vmatpush3.bf16.msra.mxu0 %v12493_v26 }
  0x2f   :  { %11372 = vmatprep.subr.bf16.mxu0 %v12320_v0 }
  0xe4   :  { %v136_v53 = vpop.f32.mrb[0].mxu0 }
  0xe5   :  { %v137_v54 = vadd.f32 %v136_v53, %v71_v51  ;;  %v138_v55 = vpop.f32.mrb[1].mxu0 }
  0xe6   :  { %v265_v56 = vpop.f32.mrb[0].mxu1  ;;  %v139_v57 = vadd.f32 %v138_v55, %v75_v52  ;;  %v140_v58 = vpop.f32.mrb[2].mxu0 }
  0xe7   :  { %v10189_v59 = vpop.f32.mrb[1].mxu1  ;;  %145 = vst.msk [vmem:[#allocation2] sm:$0xff] %vm98_vm1, %v137_v54  ;;  %v141_v60 = vadd.f32 %v140_v58, %v71_v51  ;;  %v142_v61 = vpop.f32.mrb[3].mxu0  ;;  %158 = vrot.lane.b32.xlu1 %v137_v54, %s12324_s3 }
  0xe8   :  { %177 = vst.msk [vmem:[#allocation2 + $0x40] sm:$0xff] %vm98_vm1, %v139_v57  ;;  %v143_v62 = vadd.f32 %v142_v61, %v75_v52 }
  0xe9   :  { %146 = vst.msk [vmem:[#allocation2 + $0x8] sm:$0xff] %vm98_vm1, %v141_v60  ;;  %169 = vrot.lane.b32.xlu0 %v141_v60, %s12325_s1 }
  0xea   :  { %178 = vst.msk [vmem:[#allocation2 + $0x48] sm:$0xff] %vm98_vm1, %v143_v62 }
  0xeb   :  { %183 = vrot.lane.b32.xlu1 %v143_v62, %s12326_s30 }
  0xec   :  { %v340_v63 = vpop.f32.mrb[4].mxu0 }
  0xed   :  { %149 = vrot.lane.b32.xlu0 %v137_v54, %s12326_s30  ;;  %v10200_v3 = vpop.f32.mrb[5].mxu0 }
  0xee   :  { %v436_v1 = vpop.f32.mrb[2].mxu1  ;;  %v349_v4 = vld [vmem:[#allocation2] sm:$0x3] }
  0xef   :  { %v10211_v5 = vpop.f32.mrb[3].mxu1  ;;  %v350_v8 = vadd.f32 %v349_v4, %v265_v56  ;;  %151 = vrot.lane.b32.xlu1 %v141_v60, %s12326_s30  ;;  %v437_v22 = vadd.f32 %v12617_v19, %v436_v1 }
  0xf1   :  { %v9177_v9 = vmul.f32 -1.442695, %v350_v8  ;;  %167 = vrot.lane.b32.xlu0 %v137_v54, %s12325_s1  ;;  %v612_v40 = vld [vmem:[#allocation2 + $0x4e] sm:$0x3] }
  0xf3   :  { %11972 = vpow2.f32 %v9177_v9  ;;  %181 = vrot.lane.b32.xlu1 %v139_v57, %s12326_s30 }
  0xf4   :  { %v520_v10 = vpop.f32.mrb[6].mxu0 }
  0xf5   :  { %160 = vrot.lane.b32.xlu0 %v141_v60, %s12324_s3  ;;  %v10222_v13 = vpop.f32.mrb[7].mxu0  ;;  %v12631_v60 = vld [vmem:[%s14138_s4 + $0x1] ss:$0 sm:$0xff] }
  0xf6   :  { %v595_v11 = vpop.f32.mrb[4].mxu1 }
  0xf7   :  { %v10233_v14 = vpop.f32.mrb[5].mxu1  ;;  %v613_v43 = vadd.f32 %v612_v40, %v595_v11 }
  0xf9   :  { %v9193_v52 = vmul.f32 -1.442695, %v613_v43 }
  0xfc   :  { %v691_v15 = vpop.f32.mrb[8].mxu0 }
  0xfd   :  { %v11973_v16 = vpop.eup %11972  ;;  %v10244_v17 = vpop.f32.mrb[9].mxu0  ;;  %v692_v62 = vadd.f32 %v12631_v60, %v691_v15 }
  0xfe   :  { %v354_v18 = vadd.f32 1.0, %v11973_v16 }
 0x100   :  { %11974 = vrcp.f32 %v354_v18 }
 0x10a   :  { %v11975_v23 = vpop.eup %11974 }
 0x10b   :  { %v440_v24 = vmul.f32 %v11975_v23, %v437_v22 }
 0x159   :  { %v159_v25 = vpop.permute.xlu1 %158 }
 0x15a   :  { %165 = vst.msk [vmem:[#allocation2 + $0x20] sm:$0xff] %vm98_vm1, %v159_v25  ;;  %v863_v25 = vld [vmem:[#allocation2 + $0x2] sm:$0x3] }
 0x15b   :  { %v170_v28 = vpop.permute.xlu0 %169 }
 0x15c   :  { %175 = vst.msk [vmem:[#allocation2 + $0x38] sm:$0xff] %vm98_vm1, %v170_v28 }
 0x15d   :  { %v184_v29 = vpop.permute.xlu1 %183 }
 0x15e   :  { %189 = vst.msk [vmem:[#allocation2 + $0x58] sm:$0xff] %vm98_vm1, %v184_v29 }
 0x15f   :  { %v150_v30 = vpop.permute.xlu0 %149 }
 0x160   :  { %156 = vst.msk [vmem:[#allocation2 + $0x10] sm:$0xff] %vm98_vm1, %v150_v30 }
 0x161   :  { %v152_v31 = vpop.permute.xlu1 %151  ;;  %v365_v55 = vld [vmem:[#allocation2 + $0x20] sm:$0x3] }
 0x162   :  { %157 = vst.msk [vmem:[#allocation2 + $0x18] sm:$0xff] %vm98_vm1, %v152_v31  ;;  %v441_v58 = vadd.f32 %v440_v24, %v365_v55  ;;  %v1120_v55 = vld [vmem:[#allocation2 + $0x4c] sm:$0x3] }
 0x163   :  { %v604_v34 = vld [vmem:[#allocation2 + $0x3e] sm:$0x3]  ;;  %v168_v35 = vpop.permute.xlu0 %167 }
 0x164   :  { %v605_v36 = vadd.f32 %v604_v34, %v520_v10  ;;  %174 = vst.msk [vmem:[#allocation2 + $0x30] sm:$0xff] %vm98_vm1, %v168_v35 }
 0x165   :  { %v182_v37 = vpop.permute.xlu1 %181  ;;  %v620_v3 = vld [vmem:[#allocation2 + $0x5e] sm:$0x3] }
 0x166   :  { %v9192_v41 = vmul.f32 -1.442695, %v605_v36  ;;  %188 = vst.msk [vmem:[#allocation2 + $0x50] sm:$0xff] %vm98_vm1, %v182_v37 }
 0x167   :  { %v161_v44 = vpop.permute.xlu0 %160  ;;  %v357_v46 = vld [vmem:[#allocation2 + $0x10] sm:$0x3]  ;;  %v871_v35 = vld [vmem:[#allocation2 + $0x12] sm:$0x3] }
 0x168   :  { %11976 = vpow2.f32 %v9192_v41  ;;  %166 = vst.msk [vmem:[#allocation2 + $0x28] sm:$0xff] %vm98_vm1, %v161_v44  ;;  %v358_v49 = vadd.f32 %v357_v46, %v340_v63  ;;  %v1112_v44 = vld [vmem:[#allocation2 + $0x3c] sm:$0x3] }
 0x16a   :  { %v9178_v51 = vmul.f32 -1.442695, %v358_v49 }
 0x16c   :  { %11978 = vpow2.f32 %v9178_v51 }
 0x16d   :  { %11980 = vpow2.f32 %v9193_v52 }
 0x172   :  { %v11977_v53 = vpop.eup %11976 }
 0x173   :  { %v609_v54 = vadd.f32 1.0, %v11977_v53 }
 0x175   :  { %11982 = vrcp.f32 %v609_v54 }
 0x176   :  { %v11979_v56 = vpop.eup %11978 }
 0x177   :  { %v362_v57 = vadd.f32 1.0, %v11979_v56  ;;  %v11981_v59 = vpop.eup %11980 }
 0x178   :  { %v617_v61 = vadd.f32 1.0, %v11981_v59 }
 0x179   :  { %11984 = vrcp.f32 %v362_v57 }
 0x17a   :  { %11986 = vtanh.f32 %v441_v58 }
 0x17b   :  { %11988 = vrcp.f32 %v617_v61 }
 0x17f   :  { %v11983_v63 = vpop.eup %11982 }
 0x180   :  { %v695_v1 = vmul.f32 %v11983_v63, %v692_v62 }
 0x182   :  { %v696_v4 = vadd.f32 %v695_v1, %v620_v3 }
 0x183   :  { %v11985_v5 = vpop.eup %11984 }
 0x184   :  { %11990 = vtanh.f32 %v696_v4  ;;  %v443_v8 = vsub.f32 1.0, %v11985_v5  ;;  %v11987_v9 = vpop.eup %11986  ;;  %v445_v11 = vmul.f32 0.0, %v11985_v5 }
 0x185   :  { %v11989_v14 = vpop.eup %11988 }
 0x186   :  { %v444_v10 = vmul.f32 %v11987_v9, %v443_v8  ;;  %v698_v15 = vsub.f32 1.0, %v11989_v14  ;;  %v700_v18 = vmul.f32 0.0, %v11989_v14  ;;  %v879_v9 = vld [vmem:[#allocation2 + $0x22] sm:$0x3] }
 0x188   :  { %v12634_v13 = vadd.f32 %v445_v11, %v444_v10 }
 0x18a   :  { %10254 = vmatmul.mubr.msk.f32.vlgmr.msra.gmra.mrb[6].mxu1 %vm98_vm1, %v12634_v13  ;;  %10265 = vmatmul.mubr.msk.f32.vlgmr.msra.gmra.mrb[10].mxu0 %vm98_vm1, %v12634_v13  ;;  %448 = vst.msk [vmem:[#allocation3] sm:$0x3] %vm447_vm2, %v12634_v13 }
 0x18b   :  { %11368 = vmatpush3.bf16.msra.mxu1 %v12472_v20  ;;  %11374 = vmatpush3.bf16.msra.mxu0 %v12517_v32 }
 0x18c   :  { %11369 = vmatprep.subr.bf16.mxu1 %v12320_v0  ;;  %11375 = vmatprep.subr.bf16.mxu0 %v12320_v0 }
 0x18d   :  { %10275 = vmatprep.mubr.msk.f32.mxu1 %vm12322_vm0, %v12323_v6  ;;  %10286 = vmatprep.mubr.msk.f32.mxu0 %vm12322_vm0, %v12323_v6 }
 0x18e   :  { %v11991_v16 = vpop.eup %11990 }
 0x18f   :  { %11371 = vmatpush3.bf16.msra.mxu1 %v12496_v27  ;;  %11377 = vmatpush3.bf16.msra.mxu0 %v12539_v38  ;;  %v699_v17 = vmul.f32 %v11991_v16, %v698_v15 }
 0x190   :  { %11378 = vmatprep.subr.bf16.mxu1 %v12320_v0  ;;  %11384 = vmatprep.subr.bf16.mxu0 %v12320_v0 }
 0x191   :  { %v12654_v22 = vadd.f32 %v700_v18, %v699_v17 }
 0x192   :  { %10276 = vmatmul.mubr.msk.f32.vlgmr.msra.gmra.mrb[8].mxu1 %vm98_vm1, %v12634_v13 }
 0x193   :  { %11380 = vmatpush3.bf16.msra.mxu1 %v12520_v33  ;;  %703 = vrot.lane.b32.xlu0 %v12654_v22, %s12325_s1 }
 0x194   :  { %10287 = vmatmul.mubr.msk.f32.vlgmr.msra.gmra.mrb[12].mxu0 %vm98_vm1, %v12654_v22  ;;  %11381 = vmatprep.subr.bf16.mxu1 %v12320_v0 }
 0x195   :  { %11386 = vmatpush3.bf16.msra.mxu0 %v12557_v42  ;;  %10297 = vmatprep.mubr.msk.f32.mxu1 %vm12322_vm0, %v12323_v6 }
 0x196   :  { %11387 = vmatprep.subr.bf16.mxu0 %v12320_v0  ;;  %10308 = vmatprep.mubr.msk.f32.mxu0 %vm12322_vm0, %v12323_v6 }
 0x197   :  { %11383 = vmatpush3.bf16.msra.mxu1 %v12542_v39 }
 0x198   :  { %11390 = vmatprep.subr.bf16.mxu1 %v12320_v0 }
 0x199   :  { %11389 = vmatpush3.bf16.msra.mxu0 %v12571_v45 }
 0x19a   :  { %10298 = vmatmul.mubr.msk.f32.vlgmr.msra.gmra.mrb[10].mxu1 %vm98_vm1, %v12654_v22  ;;  %11396 = vmatprep.subr.bf16.mxu0 %v12320_v0 }
 0x19b   :  { %11392 = vmatpush3.bf16.msra.mxu1 %v12434_v7  ;;  %10319 = vmatprep.mubr.msk.f32.mxu1 %vm12322_vm0, %v12323_v6 }
 0x19c   :  { %10309 = vmatmul.mubr.msk.f32.vlgmr.msra.gmra.mrb[14].mxu0 %vm98_vm1, %v12654_v22  ;;  %11393 = vmatprep.subr.bf16.mxu1 %v12320_v0 }
 0x19d   :  { %11398 = vmatpush3.bf16.msra.mxu0 %v12475_v21  ;;  %10330 = vmatprep.mubr.msk.f32.mxu0 %vm12322_vm0, %v12323_v6 }
 0x19e   :  { %11399 = vmatprep.subr.bf16.mxu0 %v12320_v0 }
 0x19f   :  { %11395 = vmatpush3.bf16.msra.mxu1 %v12450_v12 }
 0x1a0   :  { %11402 = vmatprep.subr.bf16.mxu1 %v12320_v0 }
 0x1a1   :  { %11401 = vmatpush3.bf16.msra.mxu0 %v12493_v26 }
 0x1a2   :  { %11408 = vmatprep.subr.bf16.mxu0 %v12320_v0 }
 0x205   :  { %v704_v23 = vpop.permute.xlu0 %703 }
 0x206   :  { %707 = vst.msk [vmem:[#allocation3 + $0xe] sm:$0x3] %vm706_vm3, %v704_v23  ;;  %v1128_v23 = vld [vmem:[#allocation2 + $0x5c] sm:$0x3] }
 0x25d   :  { %v781_v24 = vpop.f32.mrb[6].mxu1  ;;  %v855_v28 = vpop.f32.mrb[10].mxu0 }
 0x25e   :  { %v864_v29 = vadd.f32 %v863_v25, %v781_v24  ;;  %v10255_v30 = vpop.f32.mrb[7].mxu1  ;;  %v10266_v31 = vpop.f32.mrb[11].mxu0  ;;  %v872_v36 = vadd.f32 %v871_v35, %v855_v28 }
 0x260   :  { %v9205_v34 = vmul.f32 -1.442695, %v864_v29  ;;  %v9206_v37 = vmul.f32 -1.442695, %v872_v36 }
 0x262   :  { %11992 = vpow2.f32 %v9205_v34 }
 0x263   :  { %11994 = vpow2.f32 %v9206_v37 }
 0x265   :  { %v946_v40 = vpop.f32.mrb[8].mxu1 }
 0x266   :  { %v10277_v41 = vpop.f32.mrb[9].mxu1  ;;  %v947_v4 = vadd.f32 %v12617_v19, %v946_v40 }
 0x267   :  { %v1030_v43 = vpop.f32.mrb[12].mxu0  ;;  %v1366_v41 = vld [vmem:[#allocation2 + $0x4] sm:$0x3] }
 0x268   :  { %v1113_v46 = vadd.f32 %v1112_v44, %v1030_v43  ;;  %v10288_v49 = vpop.f32.mrb[13].mxu0 }
 0x26a   :  { %v9222_v51 = vmul.f32 -1.442695, %v1113_v46 }
 0x26c   :  { %v11993_v52 = vpop.eup %11992  ;;  %11996 = vpow2.f32 %v9222_v51  ;;  %v1374_v51 = vld [vmem:[#allocation2 + $0x14] sm:$0x3] }
 0x26d   :  { %v868_v53 = vadd.f32 1.0, %v11993_v52  ;;  %v1104_v54 = vpop.f32.mrb[10].mxu1  ;;  %v11995_v62 = vpop.eup %11994 }
 0x26e   :  { %v1121_v56 = vadd.f32 %v1120_v55, %v1104_v54  ;;  %v10299_v57 = vpop.f32.mrb[11].mxu1  ;;  %v876_v1 = vadd.f32 1.0, %v11995_v62 }
 0x26f   :  { %11998 = vrcp.f32 %v868_v53  ;;  %v1195_v58 = vpop.f32.mrb[14].mxu0 }
 0x270   :  { %v9223_v59 = vmul.f32 -1.442695, %v1121_v56  ;;  %v10310_v61 = vpop.f32.mrb[15].mxu0  ;;  %v1196_v15 = vadd.f32 %v12631_v60, %v1195_v58 }
 0x272   :  { %12000 = vpow2.f32 %v9223_v59 }
 0x276   :  { %v11997_v63 = vpop.eup %11996 }
 0x277   :  { %v1117_v3 = vadd.f32 1.0, %v11997_v63  ;;  %v1623_v63 = vld [vmem:[#allocation2 + $0x4a] sm:$0x3] }
 0x279   :  { %v11999_v5 = vpop.eup %11998  ;;  %12002 = vrcp.f32 %v1117_v3 }
 0x27a   :  { %12004 = vrcp.f32 %v876_v1  ;;  %v950_v8 = vmul.f32 %v11999_v5, %v947_v4 }
 0x27c   :  { %v951_v10 = vadd.f32 %v950_v8, %v879_v9  ;;  %v12001_v11 = vpop.eup %12000 }
 0x27d   :  { %v1125_v14 = vadd.f32 1.0, %v12001_v11 }
 0x27e   :  { %12006 = vtanh.f32 %v951_v10 }
 0x27f   :  { %12008 = vrcp.f32 %v1125_v14 }
 0x283   :  { %v12003_v16 = vpop.eup %12002 }
 0x284   :  { %v12005_v17 = vpop.eup %12004  ;;  %v1199_v18 = vmul.f32 %v12003_v16, %v1196_v15 }
 0x285   :  { %v953_v25 = vsub.f32 1.0, %v12005_v17  ;;  %v955_v30 = vmul.f32 %v12005_v17, %v12634_v13 }
 0x286   :  { %v1200_v24 = vadd.f32 %v1199_v18, %v1128_v23  ;;  %v1382_v18 = vld [vmem:[#allocation2 + $0x24] sm:$0x3] }
 0x288   :  { %v12007_v28 = vpop.eup %12006  ;;  %12010 = vtanh.f32 %v1200_v24 }
 0x289   :  { %v954_v29 = vmul.f32 %v12007_v28, %v953_v25  ;;  %v12009_v34 = vpop.eup %12008 }
 0x28a   :  { %v1202_v13 = vsub.f32 1.0, %v12009_v34  ;;  %v1204_v37 = vmul.f32 %v12009_v34, %v12654_v22 }
 0x28b   :  { %v12694_v31 = vadd.f32 %v955_v30, %v954_v29 }
 0x28d   :  { %10320 = vmatmul.mubr.msk.f32.vlgmr.msra.gmra.mrb[12].mxu1 %vm98_vm1, %v12694_v31  ;;  %10331 = vmatmul.mubr.msk.f32.vlgmr.msra.gmra.mrb[16].mxu0 %vm98_vm1, %v12694_v31  ;;  %957 = vst.msk [vmem:[#allocation3 + $0x2] sm:$0x3] %vm447_vm2, %v12694_v31 }
 0x28e   :  { %11404 = vmatpush3.bf16.msra.mxu1 %v12472_v20  ;;  %11410 = vmatpush3.bf16.msra.mxu0 %v12517_v32 }
 0x28f   :  { %11405 = vmatprep.subr.bf16.mxu1 %v12320_v0  ;;  %11411 = vmatprep.subr.bf16.mxu0 %v12320_v0 }
 0x290   :  { %10341 = vmatprep.mubr.msk.f32.mxu1 %vm12322_vm0, %v12323_v6  ;;  %10352 = vmatprep.mubr.msk.f32.mxu0 %vm12322_vm0, %v12323_v6 }
 0x292   :  { %v12011_v35 = vpop.eup %12010  ;;  %11407 = vmatpush3.bf16.msra.mxu1 %v12496_v27  ;;  %11413 = vmatpush3.bf16.msra.mxu0 %v12539_v38 }
 0x293   :  { %11414 = vmatprep.subr.bf16.mxu1 %v12320_v0  ;;  %11420 = vmatprep.subr.bf16.mxu0 %v12320_v0  ;;  %v1203_v36 = vmul.f32 %v12011_v35, %v1202_v13  ;;  %v1631_v13 = vld [vmem:[#allocation2 + $0x5a] sm:$0x3] }
 0x295   :  { %10342 = vmatmul.mubr.msk.f32.vlgmr.msra.gmra.mrb[14].mxu1 %vm98_vm1, %v12694_v31  ;;  %v12717_v40 = vadd.f32 %v1204_v37, %v1203_v36 }
 0x296   :  { %11416 = vmatpush3.bf16.msra.mxu1 %v12520_v33  ;;  %10363 = vmatprep.mubr.msk.f32.mxu1 %vm12322_vm0, %v12323_v6 }
 0x297   :  { %1207 = vrot.lane.b32.xlu1 %v12717_v40, %s12325_s1  ;;  %10353 = vmatmul.mubr.msk.f32.vlgmr.msra.gmra.mrb[18].mxu0 %vm98_vm1, %v12717_v40 }
 0x298   :  { %11422 = vmatpush3.bf16.msra.mxu0 %v12557_v42  ;;  %11417 = vmatprep.subr.bf16.mxu1 %v12320_v0 }
 0x299   :  { %11423 = vmatprep.subr.bf16.mxu0 %v12320_v0  ;;  %10374 = vmatprep.mubr.msk.f32.mxu0 %vm12322_vm0, %v12323_v6 }
 0x29a   :  { %11419 = vmatpush3.bf16.msra.mxu1 %v12542_v39 }
 0x29b   :  { %11426 = vmatprep.subr.bf16.mxu1 %v12320_v0 }
 0x29c   :  { %11425 = vmatpush3.bf16.msra.mxu0 %v12571_v45 }
 0x29d   :  { %10364 = vmatmul.mubr.msk.f32.vlgmr.msra.gmra.mrb[16].mxu1 %vm98_vm1, %v12717_v40  ;;  %11432 = vmatprep.subr.bf16.mxu0 %v12320_v0 }
 0x29e   :  { %11428 = vmatpush3.bf16.msra.mxu1 %v12434_v7  ;;  %10385 = vmatprep.mubr.msk.f32.mxu1 %vm12322_vm0, %v12323_v6 }
 0x29f   :  { %10375 = vmatmul.mubr.msk.f32.vlgmr.msra.gmra.mrb[20].mxu0 %vm98_vm1, %v12717_v40  ;;  %11429 = vmatprep.subr.bf16.mxu1 %v12320_v0 }
 0x2a0   :  { %11434 = vmatpush3.bf16.msra.mxu0 %v12475_v21  ;;  %10396 = vmatprep.mubr.msk.f32.mxu0 %vm12322_vm0, %v12323_v6 }
 0x2a1   :  { %11435 = vmatprep.subr.bf16.mxu0 %v12320_v0 }
 0x2a2   :  { %11431 = vmatpush3.bf16.msra.mxu1 %v12450_v12 }
 0x2a3   :  { %11438 = vmatprep.subr.bf16.mxu1 %v12320_v0 }
 0x2a4   :  { %11437 = vmatpush3.bf16.msra.mxu0 %v12493_v26  ;;  %v1615_v26 = vld [vmem:[#allocation2 + $0x3a] sm:$0x3] }
 0x2a5   :  { %11444 = vmatprep.subr.bf16.mxu0 %v12320_v0 }
 0x309   :  { %v1208_v7 = vpop.permute.xlu1 %1207 }
 0x30a   :  { %1210 = vst.msk [vmem:[#allocation3 + $0xc] sm:$0x3] %vm706_vm3, %v1208_v7 }
 0x360   :  { %v1284_v22 = vpop.f32.mrb[12].mxu1  ;;  %v1358_v43 = vpop.f32.mrb[16].mxu0 }
 0x361   :  { %v1367_v21 = vadd.f32 %v1366_v41, %v1284_v22  ;;  %v10321_v44 = vpop.f32.mrb[13].mxu1  ;;  %v10332_v46 = vpop.f32.mrb[17].mxu0  ;;  %v1375_v52 = vadd.f32 %v1374_v51, %v1358_v43 }
 0x362   :  { %v2219_v46 = vld [vmem:[%s14157_s29 + $0x10] sm:$0xff] }
 0x363   :  { %v9235_v49 = vmul.f32 -1.442695, %v1367_v21  ;;  %v9236_v12 = vmul.f32 -1.442695, %v1375_v52  ;;  %v9288_v52 = vld [vmem:[%s14157_s29 + $0x30] sm:$0xff] }
 0x365   :  { %12012 = vpow2.f32 %v9235_v49  ;;  %v2220_v49 = vld [vmem:[%s14157_s29 + $0x18] sm:$0xff] }
 0x366   :  { %12014 = vpow2.f32 %v9236_v12  ;;  %v12830_v51 = vpack.c.bf16 %v2220_v49, %v2219_v46  ;;  %v9289_v12 = vld [vmem:[%s14157_s29 + $0x38] sm:$0xff]  ;;  %v9298_v46 = vld [vmem:[%s14157_s29 + $0x60] sm:$0xff]  ;;  %v9299_v49 = vld [vmem:[%s14157_s29 + $0x68] sm:$0xff] }
 0x368   :  { %v1449_v53 = vpop.f32.mrb[14].mxu1 }
 0x369   :  { %v10343_v54 = vpop.f32.mrb[15].mxu1  ;;  %v1450_v15 = vadd.f32 %v12617_v19, %v1449_v53  ;;  %v12839_v53 = vpack.c.bf16 %v9289_v12, %v9288_v52 }
 0x36a   :  { %v1533_v55 = vpop.f32.mrb[18].mxu0 }
 0x36b   :  { %v1616_v56 = vadd.f32 %v1615_v26, %v1533_v55  ;;  %v10354_v57 = vpop.f32.mrb[19].mxu0  ;;  %v1869_v55 = vld [vmem:[#allocation2 + $0x6] sm:$0x3] }
 0x36d   :  { %v9252_v58 = vmul.f32 -1.442695, %v1616_v56 }
 0x36f   :  { %v12013_v59 = vpop.eup %12012  ;;  %12016 = vpow2.f32 %v9252_v58 }
 0x370   :  { %v1371_v61 = vadd.f32 1.0, %v12013_v59  ;;  %v1607_v62 = vpop.f32.mrb[16].mxu1  ;;  %v12015_v9 = vpop.eup %12014 }
 0x371   :  { %v1624_v1 = vadd.f32 %v1623_v63, %v1607_v62  ;;  %v10365_v3 = vpop.f32.mrb[17].mxu1  ;;  %v1379_v11 = vadd.f32 1.0, %v12015_v9 }
 0x372   :  { %12018 = vrcp.f32 %v1371_v61  ;;  %v1698_v4 = vpop.f32.mrb[20].mxu0  ;;  %v1877_v61 = vld [vmem:[#allocation2 + $0x16] sm:$0x3] }
 0x373   :  { %v9253_v5 = vmul.f32 -1.442695, %v1624_v1  ;;  %v10376_v8 = vpop.f32.mrb[21].mxu0  ;;  %v1699_v28 = vadd.f32 %v12631_v60, %v1698_v4 }
 0x375   :  { %12020 = vpow2.f32 %v9253_v5  ;;  %v2118_v5 = vld [vmem:[#allocation2 + $0x38] sm:$0x3] }
 0x379   :  { %v12017_v10 = vpop.eup %12016 }
 0x37a   :  { %v1620_v14 = vadd.f32 1.0, %v12017_v10 }
 0x37c   :  { %v12019_v16 = vpop.eup %12018  ;;  %12022 = vrcp.f32 %v1620_v14 }
 0x37d   :  { %12024 = vrcp.f32 %v1379_v11  ;;  %v1453_v17 = vmul.f32 %v12019_v16, %v1450_v15  ;;  %v2126_v16 = vld [vmem:[#allocation2 + $0x48] sm:$0x3] }
 0x37f   :  { %v1454_v23 = vadd.f32 %v1453_v17, %v1382_v18  ;;  %v12021_v24 = vpop.eup %12020 }
 0x380   :  { %v1628_v25 = vadd.f32 1.0, %v12021_v24 }
 0x381   :  { %12026 = vtanh.f32 %v1454_v23 }
 0x382   :  { %12028 = vrcp.f32 %v1628_v25 }
 0x386   :  { %v12023_v29 = vpop.eup %12022 }
 0x387   :  { %v12025_v30 = vpop.eup %12024  ;;  %v1702_v34 = vmul.f32 %v12023_v29, %v1699_v28 }
 0x388   :  { %v1456_v36 = vsub.f32 1.0, %v12025_v30  ;;  %v1458_v22 = vmul.f32 %v12025_v30, %v12694_v31 }
 0x389   :  { %v1703_v35 = vadd.f32 %v1702_v34, %v1631_v13 }
 0x38b   :  { %v12027_v37 = vpop.eup %12026  ;;  %12030 = vtanh.f32 %v1703_v35 }
 0x38c   :  { %v1457_v7 = vmul.f32 %v12027_v37, %v1456_v36  ;;  %v12029_v43 = vpop.eup %12028  ;;  %v1885_v37 = vld [vmem:[#allocation2 + $0x26] sm:$0x3] }
 0x38d   :  { %v1705_v31 = vsub.f32 1.0, %v12029_v43 }
 0x38e   :  { %v12755_v41 = vadd.f32 %v1458_v22, %v1457_v7 }
 0x390   :  { %10386 = vmatmul.mubr.msk.f32.vlgmr.msra.gmra.mrb[18].mxu1 %vm98_vm1, %v12755_v41  ;;  %10397 = vmatmul.mubr.msk.f32.vlgmr.msra.gmra.mrb[22].mxu0 %vm98_vm1, %v12755_v41  ;;  %1460 = vst.msk [vmem:[#allocation3 + $0x4] sm:$0x3] %vm447_vm2, %v12755_v41 }
 0x391   :  { %11440 = vmatpush3.bf16.msra.mxu1 %v12472_v20  ;;  %11446 = vmatpush3.bf16.msra.mxu0 %v12517_v32  ;;  %v1707_v32 = vmul.f32 %v12029_v43, %v12717_v40 }
 0x392   :  { %11441 = vmatprep.subr.bf16.mxu1 %v12320_v0  ;;  %11447 = vmatprep.subr.bf16.mxu0 %v12320_v0 }
 0x393   :  { %10407 = vmatprep.mubr.msk.f32.mxu1 %vm12322_vm0, %v12323_v6  ;;  %10418 = vmatprep.mubr.msk.f32.mxu0 %vm12322_vm0, %v12323_v6 }
 0x395   :  { %v12031_v21 = vpop.eup %12030  ;;  %11443 = vmatpush3.bf16.msra.mxu1 %v12496_v27  ;;  %11449 = vmatpush3.bf16.msra.mxu0 %v12539_v38  ;;  %v2217_v27 = vld [vmem:[%s14157_s29] sm:$0xff] }
 0x396   :  { %11450 = vmatprep.subr.bf16.mxu1 %v12320_v0  ;;  %11456 = vmatprep.subr.bf16.mxu0 %v12320_v0  ;;  %v1706_v20 = vmul.f32 %v12031_v21, %v1705_v31 }
 0x398   :  { %10408 = vmatmul.mubr.msk.f32.vlgmr.msra.gmra.mrb[20].mxu1 %vm98_vm1, %v12755_v41  ;;  %v12778_v44 = vadd.f32 %v1707_v32, %v1706_v20 }
 0x399   :  { %11452 = vmatpush3.bf16.msra.mxu1 %v12520_v33  ;;  %10429 = vmatprep.mubr.msk.f32.mxu1 %vm12322_vm0, %v12323_v6  ;;  %v2218_v33 = vld [vmem:[%s14157_s29 + $0x8] sm:$0xff] }
 0x39a   :  { %1710 = vrot.lane.b32.xlu0 %v12778_v44, %s12325_s1  ;;  %10419 = vmatmul.mubr.msk.f32.vlgmr.msra.gmra.mrb[24].mxu0 %vm98_vm1, %v12778_v44  ;;  %v12810_v38 = vpack.c.bf16 %v2218_v33, %v2217_v27  ;;  %v2134_v27 = vld [vmem:[#allocation2 + $0x58] sm:$0x3] }
 0x39b   :  { %11458 = vmatpush3.bf16.msra.mxu0 %v12557_v42  ;;  %11453 = vmatprep.subr.bf16.mxu1 %v12320_v0  ;;  %v9287_v42 = vld [vmem:[%s14157_s29 + $0x28] sm:$0xff] }
 0x39c   :  { %11459 = vmatprep.subr.bf16.mxu0 %v12320_v0  ;;  %10440 = vmatprep.mubr.msk.f32.mxu0 %vm12322_vm0, %v12323_v6 }
 0x39d   :  { %11455 = vmatpush3.bf16.msra.mxu1 %v12542_v39  ;;  %v9286_v39 = vld [vmem:[%s14157_s29 + $0x20] sm:$0xff] }
 0x39e   :  { %11462 = vmatprep.subr.bf16.mxu1 %v12320_v0  ;;  %v12818_v40 = vpack.c.bf16 %v9287_v42, %v9286_v39  ;;  %v9291_v39 = vld [vmem:[%s14157_s29 + $0x40] sm:$0xff] }
 0x39f   :  { %11461 = vmatpush3.bf16.msra.mxu0 %v12571_v45 }
 0x3a0   :  { %10430 = vmatmul.mubr.msk.f32.vlgmr.msra.gmra.mrb[22].mxu1 %vm98_vm1, %v12778_v44  ;;  %11468 = vmatprep.subr.bf16.mxu0 %v12320_v0 }
 0x3a1   :  { %10451 = vmatprep.mubr.msk.f32.mxu1 %vm12322_vm0, %v12323_v6  ;;  %11464 = vmatpush3.bf16.msra.mxu1 %v12810_v38 }
 0x3a2   :  { %10441 = vmatmul.mubr.msk.f32.vlgmr.msra.gmra.mrb[26].mxu0 %vm98_vm1, %v12778_v44  ;;  %11465 = vmatprep.subr.bf16.mxu1 %v12320_v0 }
 0x3a3   :  { %10462 = vmatprep.mubr.msk.f32.mxu0 %vm12322_vm0, %v12323_v6  ;;  %11470 = vmatpush3.bf16.msra.mxu0 %v12818_v40 }
 0x3a4   :  { %11471 = vmatprep.subr.bf16.mxu0 %v12320_v0 }
 0x3a5   :  { %11467 = vmatpush3.bf16.msra.mxu1 %v12830_v51 }
 0x3a6   :  { %11474 = vmatprep.subr.bf16.mxu1 %v12320_v0 }
 0x3a7   :  { %11473 = vmatpush3.bf16.msra.mxu0 %v12839_v53 }
 0x3a8   :  { %11480 = vmatprep.subr.bf16.mxu0 %v12320_v0 }
 0x40c   :  { %v1711_v45 = vpop.permute.xlu0 %1710 }
 0x40d   :  { %1713 = vst.msk [vmem:[#allocation3 + $0xa] sm:$0x3] %vm706_vm3, %v1711_v45  ;;  %v9292_v45 = vld [vmem:[%s14157_s29 + $0x48] sm:$0xff] }
 0x463   :  { %v1787_v54 = vpop.f32.mrb[18].mxu1  ;;  %v1861_v26 = vpop.f32.mrb[22].mxu0 }
 0x464   :  { %v1870_v56 = vadd.f32 %v1869_v55, %v1787_v54  ;;  %v10387_v57 = vpop.f32.mrb[19].mxu1  ;;  %v10398_v58 = vpop.f32.mrb[23].mxu0  ;;  %v1878_v62 = vadd.f32 %v1877_v61, %v1861_v26  ;;  %v12860_v55 = vpack.c.bf16 %v9292_v45, %v9291_v39  ;;  %v12862_v26 = vpack.c.bf16 %v9299_v49, %v9298_v46  ;;  %v2629_v49 = vld [vmem:[#allocation2 + $0x46] sm:$0x3] }
 0x465   :  { %v9294_v58 = vld [vmem:[%s14157_s29 + $0x58] sm:$0xff] }
 0x466   :  { %v9265_v59 = vmul.f32 -1.442695, %v1870_v56  ;;  %v9266_v63 = vmul.f32 -1.442695, %v1878_v62  ;;  %v9293_v56 = vld [vmem:[%s14157_s29 + $0x50] sm:$0xff] }
 0x467   :  { %v12886_v62 = vpack.c.bf16 %v9294_v58, %v9293_v56 }
 0x468   :  { %12032 = vpow2.f32 %v9265_v59  ;;  %v9300_v59 = vld [vmem:[%s14157_s29 + $0x70] sm:$0xff] }
 0x469   :  { %12034 = vpow2.f32 %v9266_v63 }
 0x46b   :  { %v1952_v1 = vpop.f32.mrb[20].mxu1 }
 0x46c   :  { %v10409_v3 = vpop.f32.mrb[21].mxu1  ;;  %v1953_v13 = vadd.f32 %v12617_v19, %v1952_v1  ;;  %v9303_v1 = vld [vmem:[%s14157_s29 + $0x80] sm:$0xff] }
 0x46d   :  { %v2036_v4 = vpop.f32.mrb[24].mxu0  ;;  %v9304_v3 = vld [vmem:[%s14157_s29 + $0x88] sm:$0xff] }
 0x46e   :  { %v2119_v8 = vadd.f32 %v2118_v5, %v2036_v4  ;;  %v10420_v9 = vpop.f32.mrb[25].mxu0  ;;  %v9308_v5 = vld [vmem:[%s14157_s29 + $0xa0] sm:$0xff] }
 0x470   :  { %v9282_v10 = vmul.f32 -1.442695, %v2119_v8  ;;  %v9309_v8 = vld [vmem:[%s14157_s29 + $0xa8] sm:$0xff] }
 0x472   :  { %v12033_v11 = vpop.eup %12032  ;;  %12036 = vpow2.f32 %v9282_v10  ;;  %v12910_v10 = vpack.c.bf16 %v9304_v3, %v9303_v1 }
 0x473   :  { %v1874_v14 = vadd.f32 1.0, %v12033_v11  ;;  %v2110_v15 = vpop.f32.mrb[22].mxu1  ;;  %v12035_v28 = vpop.eup %12034 }
 0x474   :  { %v2127_v17 = vadd.f32 %v2126_v16, %v2110_v15  ;;  %v10431_v18 = vpop.f32.mrb[23].mxu1  ;;  %v1882_v30 = vadd.f32 1.0, %v12035_v28  ;;  %v9305_v15 = vld [vmem:[%s14157_s29 + $0x90] sm:$0xff]  ;;  %v9306_v16 = vld [vmem:[%s14157_s29 + $0x98] sm:$0xff] }
 0x475   :  { %12038 = vrcp.f32 %v1874_v14  ;;  %v2201_v23 = vpop.f32.mrb[26].mxu0 }
 0x476   :  { %v9283_v24 = vmul.f32 -1.442695, %v2127_v17  ;;  %v10442_v25 = vpop.f32.mrb[27].mxu0  ;;  %v2202_v31 = vadd.f32 %v12631_v60, %v2201_v23  ;;  %v12921_v17 = vpack.c.bf16 %v9309_v8, %v9308_v5  ;;  %v9310_v23 = vld [vmem:[%s14157_s29 + $0xb0] sm:$0xff]  ;;  %v2388_v8 = vld [vmem:[#allocation2 + $0x28] sm:$0x3] }
 0x478   :  { %12040 = vpow2.f32 %v9283_v24  ;;  %v12934_v24 = vpack.c.bf16 %v9306_v16, %v9305_v15 }
 0x47c   :  { %v12037_v29 = vpop.eup %12036 }
 0x47d   :  { %v2123_v34 = vadd.f32 1.0, %v12037_v29 }
 0x47f   :  { %v12039_v35 = vpop.eup %12038  ;;  %12042 = vrcp.f32 %v2123_v34 }
 0x480   :  { %12044 = vrcp.f32 %v1882_v30  ;;  %v1956_v36 = vmul.f32 %v12039_v35, %v1953_v13  ;;  %v2372_v30 = vld [vmem:[#allocation2 + $0x8] sm:$0x3] }
 0x482   :  { %v1957_v7 = vadd.f32 %v1956_v36, %v1885_v37  ;;  %v12041_v22 = vpop.eup %12040 }
 0x483   :  { %v2131_v43 = vadd.f32 1.0, %v12041_v22 }
 0x484   :  { %12046 = vtanh.f32 %v1957_v7  ;;  %v2380_v7 = vld [vmem:[#allocation2 + $0x18] sm:$0x3] }
 0x485   :  { %12048 = vrcp.f32 %v2131_v43 }
 0x489   :  { %v12043_v21 = vpop.eup %12042 }
 0x48a   :  { %v12045_v20 = vpop.eup %12044  ;;  %v2205_v32 = vmul.f32 %v12043_v21, %v2202_v31 }
 0x48b   :  { %v1959_v42 = vsub.f32 1.0, %v12045_v20  ;;  %v1961_v54 = vmul.f32 %v12045_v20, %v12755_v41  ;;  %v9301_v41 = vld [vmem:[%s14157_s29 + $0x78] sm:$0xff] }
 0x48c   :  { %v2206_v33 = vadd.f32 %v2205_v32, %v2134_v27  ;;  %v12888_v63 = vpack.c.bf16 %v9301_v41, %v9300_v59  ;;  %v2621_v32 = vld [vmem:[#allocation2 + $0x36] sm:$0x3] }
 0x48e   :  { %v12047_v52 = vpop.eup %12046  ;;  %12050 = vtanh.f32 %v2206_v33 }
 0x48f   :  { %v1960_v12 = vmul.f32 %v12047_v52, %v1959_v42  ;;  %v12049_v61 = vpop.eup %12048 }
 0x490   :  { %v2208_v4 = vsub.f32 1.0, %v12049_v61  ;;  %v2210_v14 = vmul.f32 %v12049_v61, %v12778_v44  ;;  %v9311_v44 = vld [vmem:[%s14157_s29 + $0xb8] sm:$0xff] }
 0x491   :  { %v12867_v57 = vadd.f32 %v1961_v54, %v1960_v12  ;;  %v12944_v25 = vpack.c.bf16 %v9311_v44, %v9310_v23 }
 0x493   :  { %10452 = vmatmul.mubr.msk.f32.vlgmr.msra.gmra.mrb[24].mxu1 %vm98_vm1, %v12867_v57  ;;  %10463 = vmatmul.mubr.msk.f32.vlgmr.msra.gmra.mrb[28].mxu0 %vm98_vm1, %v12867_v57  ;;  %1963 = vst.msk [vmem:[#allocation3 + $0x6] sm:$0x3] %vm447_vm2, %v12867_v57 }
 0x494   :  { %11476 = vmatpush3.bf16.msra.mxu1 %v12860_v55  ;;  %11482 = vmatpush3.bf16.msra.mxu0 %v12862_v26 }
 0x495   :  { %11477 = vmatprep.subr.bf16.mxu1 %v12320_v0  ;;  %11483 = vmatprep.subr.bf16.mxu0 %v12320_v0 }
 0x496   :  { %10473 = vmatprep.mubr.msk.f32.mxu1 %vm12322_vm0, %v12323_v6  ;;  %10484 = vmatprep.mubr.msk.f32.mxu0 %vm12322_vm0, %v12323_v6 }
 0x498   :  { %v12051_v9 = vpop.eup %12050  ;;  %11479 = vmatpush3.bf16.msra.mxu1 %v12886_v62  ;;  %11485 = vmatpush3.bf16.msra.mxu0 %v12888_v63 }
 0x499   :  { %11486 = vmatprep.subr.bf16.mxu1 %v12320_v0  ;;  %11492 = vmatprep.subr.bf16.mxu0 %v12320_v0  ;;  %v2209_v11 = vmul.f32 %v12051_v9, %v2208_v4 }
 0x49b   :  { %10474 = vmatmul.mubr.msk.f32.vlgmr.msra.gmra.mrb[26].mxu1 %vm98_vm1, %v12867_v57  ;;  %v12925_v18 = vadd.f32 %v2210_v14, %v2209_v11 }
 0x49c   :  { %11488 = vmatpush3.bf16.msra.mxu1 %v12910_v10  ;;  %10495 = vmatprep.mubr.msk.f32.mxu1 %vm12322_vm0, %v12323_v6 }
 0x49d   :  { %2213 = vrot.lane.b32.xlu1 %v12925_v18, %s12325_s1  ;;  %10485 = vmatmul.mubr.msk.f32.vlgmr.msra.gmra.mrb[30].mxu0 %vm98_vm1, %v12925_v18 }
 0x49e   :  { %11494 = vmatpush3.bf16.msra.mxu0 %v12921_v17  ;;  %11489 = vmatprep.subr.bf16.mxu1 %v12320_v0 }
 0x49f   :  { %11495 = vmatprep.subr.bf16.mxu0 %v12320_v0  ;;  %10506 = vmatprep.mubr.msk.f32.mxu0 %vm12322_vm0, %v12323_v6 }
 0x4a0   :  { %11491 = vmatpush3.bf16.msra.mxu1 %v12934_v24 }
 0x4a1   :  { %11498 = vmatprep.subr.bf16.mxu1 %v12320_v0 }
 0x4a2   :  { %11497 = vmatpush3.bf16.msra.mxu0 %v12944_v25 }
 0x4a3   :  { %10496 = vmatmul.mubr.msk.f32.vlgmr.msra.gmra.mrb[28].mxu1 %vm98_vm1, %v12925_v18  ;;  %11504 = vmatprep.subr.bf16.mxu0 %v12320_v0 }
 0x4a4   :  { %11500 = vmatpush3.bf16.msra.mxu1 %v12810_v38  ;;  %10517 = vmatprep.mubr.msk.f32.mxu1 %vm12322_vm0, %v12323_v6 }
 0x4a5   :  { %10507 = vmatmul.mubr.msk.f32.vlgmr.msra.gmra.mrb[32].mxu0 %vm98_vm1, %v12925_v18  ;;  %11501 = vmatprep.subr.bf16.mxu1 %v12320_v0 }
 0x4a6   :  { %11506 = vmatpush3.bf16.msra.mxu0 %v12818_v40  ;;  %10528 = vmatprep.mubr.msk.f32.mxu0 %vm12322_vm0, %v12323_v6 }
 0x4a7   :  { %11507 = vmatprep.subr.bf16.mxu0 %v12320_v0 }
 0x4a8   :  { %11503 = vmatpush3.bf16.msra.mxu1 %v12830_v51 }
 0x4a9   :  { %11510 = vmatprep.subr.bf16.mxu1 %v12320_v0 }
 0x4aa   :  { %11509 = vmatpush3.bf16.msra.mxu0 %v12839_v53 }
 0x4ab   :  { %11516 = vmatprep.subr.bf16.mxu0 %v12320_v0 }
 0x50f   :  { %v2214_v28 = vpop.permute.xlu1 %2213 }
 0x510   :  { %2216 = vst.msk [vmem:[#allocation3 + $0x8] sm:$0x3] %vm706_vm3, %v2214_v28  ;;  %v2637_v28 = vld [vmem:[#allocation2 + $0x56] sm:$0x3] }
 0x566   :  { %v2290_v29 = vpop.f32.mrb[24].mxu1  ;;  %v2364_v34 = vpop.f32.mrb[28].mxu0 }
 0x567   :  { %v2373_v13 = vadd.f32 %v2372_v30, %v2290_v29  ;;  %v10453_v35 = vpop.f32.mrb[25].mxu1  ;;  %v10464_v36 = vpop.f32.mrb[29].mxu0  ;;  %v2381_v22 = vadd.f32 %v2380_v7, %v2364_v34 }
 0x569   :  { %v9295_v37 = vmul.f32 -1.442695, %v2373_v13  ;;  %v9296_v43 = vmul.f32 -1.442695, %v2381_v22 }
 0x56b   :  { %12052 = vpow2.f32 %v9295_v37 }
 0x56c   :  { %12054 = vpow2.f32 %v9296_v43 }
 0x56e   :  { %v2455_v31 = vpop.f32.mrb[26].mxu1 }
 0x56f   :  { %v10475_v21 = vpop.f32.mrb[27].mxu1  ;;  %v2456_v3 = vadd.f32 %v12617_v19, %v2455_v31  ;;  %v2875_v31 = vld [vmem:[#allocation2 + $0xa] sm:$0x3] }
 0x570   :  { %v2539_v20 = vpop.f32.mrb[30].mxu0 }
 0x571   :  { %v2622_v27 = vadd.f32 %v2621_v32, %v2539_v20  ;;  %v10486_v33 = vpop.f32.mrb[31].mxu0 }
 0x573   :  { %v9312_v39 = vmul.f32 -1.442695, %v2622_v27 }
 0x575   :  { %v12053_v42 = vpop.eup %12052  ;;  %12056 = vpow2.f32 %v9312_v39  ;;  %v2883_v39 = vld [vmem:[#allocation2 + $0x1a] sm:$0x3] }
 0x576   :  { %v2377_v45 = vadd.f32 1.0, %v12053_v42  ;;  %v2613_v46 = vpop.f32.mrb[28].mxu1  ;;  %v12055_v59 = vpop.eup %12054 }
 0x577   :  { %v2630_v52 = vadd.f32 %v2629_v49, %v2613_v46  ;;  %v10497_v12 = vpop.f32.mrb[29].mxu1  ;;  %v2385_v61 = vadd.f32 1.0, %v12055_v59 }
 0x578   :  { %12058 = vrcp.f32 %v2377_v45  ;;  %v2704_v54 = vpop.f32.mrb[32].mxu0  ;;  %v3124_v12 = vld [vmem:[#allocation2 + $0x34] sm:$0x3] }
 0x579   :  { %v9313_v56 = vmul.f32 -1.442695, %v2630_v52  ;;  %v10508_v58 = vpop.f32.mrb[33].mxu0  ;;  %v2705_v15 = vadd.f32 %v12631_v60, %v2704_v54 }
 0x57b   :  { %12060 = vpow2.f32 %v9313_v56 }
 0x57f   :  { %v12057_v41 = vpop.eup %12056 }
 0x580   :  { %v2626_v1 = vadd.f32 1.0, %v12057_v41 }
 0x582   :  { %v12059_v4 = vpop.eup %12058  ;;  %12062 = vrcp.f32 %v2626_v1  ;;  %v3132_v1 = vld [vmem:[#allocation2 + $0x44] sm:$0x3] }
 0x583   :  { %12064 = vrcp.f32 %v2385_v61  ;;  %v2459_v5 = vmul.f32 %v12059_v4, %v2456_v3 }
 0x585   :  { %v2460_v9 = vadd.f32 %v2459_v5, %v2388_v8  ;;  %v12061_v11 = vpop.eup %12060 }
 0x586   :  { %v2634_v14 = vadd.f32 1.0, %v12061_v11 }
 0x587   :  { %12066 = vtanh.f32 %v2460_v9 }
 0x588   :  { %12068 = vrcp.f32 %v2634_v14 }
 0x58c   :  { %v12063_v16 = vpop.eup %12062 }
 0x58d   :  { %v12065_v23 = vpop.eup %12064  ;;  %v2708_v44 = vmul.f32 %v12063_v16, %v2705_v15 }
 0x58e   :  { %v2462_v30 = vsub.f32 1.0, %v12065_v23  ;;  %v2464_v13 = vmul.f32 %v12065_v23, %v12867_v57  ;;  %v13034_v23 = vld [vmem:[%s14138_s4] ss:$0 sm:$0xff] }
 0x58f   :  { %v2709_v29 = vadd.f32 %v2708_v44, %v2637_v28 }
 0x591   :  { %v12067_v34 = vpop.eup %12066  ;;  %12070 = vtanh.f32 %v2709_v29 }
 0x592   :  { %v2463_v19 = vmul.f32 %v12067_v34, %v2462_v30  ;;  %v12069_v60 = vpop.eup %12068  ;;  %v2891_v30 = vld [vmem:[#allocation2 + $0x2a] sm:$0x3] }
 0x593   :  { %v2711_v57 = vsub.f32 1.0, %v12069_v60  ;;  %v2713_v7 = vmul.f32 %v12069_v60, %v12925_v18  ;;  %v13040_v60 = vld [vmem:[%s14138_s4 + $0x1] ss:$0 sm:$0xff] }
 0x594   :  { %v12973_v35 = vadd.f32 %v2464_v13, %v2463_v19 }
 0x596   :  { %2466 = vst.msk [vmem:[#allocation3 + $0x8] sm:$0x3] %vm447_vm2, %v12973_v35  ;;  %10518 = vmatmul.mubr.msk.f32.vlgmr.msra.gmra.mrb[30].mxu1 %vm98_vm1, %v12973_v35  ;;  %10529 = vmatmul.mubr.msk.f32.vlgmr.msra.gmra.mrb[34].mxu0 %vm98_vm1, %v12973_v35 }
 0x597   :  { %11512 = vmatpush3.bf16.msra.mxu1 %v12860_v55  ;;  %11518 = vmatpush3.bf16.msra.mxu0 %v12862_v26 }
 0x598   :  { %11513 = vmatprep.subr.bf16.mxu1 %v12320_v0  ;;  %11519 = vmatprep.subr.bf16.mxu0 %v12320_v0 }
 0x599   :  { %10539 = vmatprep.mubr.msk.f32.mxu1 %vm12322_vm0, %v12323_v6  ;;  %10550 = vmatprep.mubr.msk.f32.mxu0 %vm12322_vm0, %v12323_v6 }
 0x59b   :  { %v12071_v36 = vpop.eup %12070  ;;  %11515 = vmatpush3.bf16.msra.mxu1 %v12886_v62  ;;  %11521 = vmatpush3.bf16.msra.mxu0 %v12888_v63 }
 0x59c   :  { %11522 = vmatprep.subr.bf16.mxu1 %v12320_v0  ;;  %11528 = vmatprep.subr.bf16.mxu0 %v12320_v0  ;;  %v2712_v37 = vmul.f32 %v12071_v36, %v2711_v57 }
 0x59e   :  { %10540 = vmatmul.mubr.msk.f32.vlgmr.msra.gmra.mrb[32].mxu1 %vm98_vm1, %v12973_v35  ;;  %v12996_v22 = vadd.f32 %v2713_v7, %v2712_v37 }
 0x59f   :  { %11524 = vmatpush3.bf16.msra.mxu1 %v12910_v10  ;;  %10561 = vmatprep.mubr.msk.f32.mxu1 %vm12322_vm0, %v12323_v6 }
 0x5a0   :  { %2716 = vrot.lane.b32.xlu0 %v12996_v22, %s12325_s1  ;;  %10551 = vmatmul.mubr.msk.f32.vlgmr.msra.gmra.mrb[36].mxu0 %vm98_vm1, %v12996_v22 }
 0x5a1   :  { %11530 = vmatpush3.bf16.msra.mxu0 %v12921_v17  ;;  %11525 = vmatprep.subr.bf16.mxu1 %v12320_v0 }
 0x5a2   :  { %11531 = vmatprep.subr.bf16.mxu0 %v12320_v0  ;;  %10572 = vmatprep.mubr.msk.f32.mxu0 %vm12322_vm0, %v12323_v6 }
 0x5a3   :  { %11527 = vmatpush3.bf16.msra.mxu1 %v12934_v24 }
 0x5a4   :  { %11534 = vmatprep.subr.bf16.mxu1 %v12320_v0 }
 0x5a5   :  { %11533 = vmatpush3.bf16.msra.mxu0 %v12944_v25 }
 0x5a6   :  { %10562 = vmatmul.mubr.msk.f32.vlgmr.msra.gmra.mrb[34].mxu1 %vm98_vm1, %v12996_v22  ;;  %11540 = vmatprep.subr.bf16.mxu0 %v12320_v0 }
 0x5a7   :  { %11536 = vmatpush3.bf16.msra.mxu1 %v12810_v38  ;;  %10583 = vmatprep.mubr.msk.f32.mxu1 %vm12322_vm0, %v12323_v6 }
 0x5a8   :  { %10573 = vmatmul.mubr.msk.f32.vlgmr.msra.gmra.mrb[38].mxu0 %vm98_vm1, %v12996_v22  ;;  %11537 = vmatprep.subr.bf16.mxu1 %v12320_v0 }
 0x5a9   :  { %11542 = vmatpush3.bf16.msra.mxu0 %v12818_v40  ;;  %10594 = vmatprep.mubr.msk.f32.mxu0 %vm12322_vm0, %v12323_v6 }
 0x5aa   :  { %11543 = vmatprep.subr.bf16.mxu0 %v12320_v0 }
 0x5ab   :  { %11539 = vmatpush3.bf16.msra.mxu1 %v12830_v51 }
 0x5ac   :  { %11546 = vmatprep.subr.bf16.mxu1 %v12320_v0 }
 0x5ad   :  { %11545 = vmatpush3.bf16.msra.mxu0 %v12839_v53 }
 0x5ae   :  { %11552 = vmatprep.subr.bf16.mxu0 %v12320_v0 }
 0x612   :  { %v2717_v18 = vpop.permute.xlu0 %2716 }
 0x613   :  { %2719 = vst.msk [vmem:[#allocation3 + $0x6] sm:$0x3] %vm706_vm3, %v2717_v18  ;;  %v3140_v18 = vld [vmem:[#allocation2 + $0x54] sm:$0x3] }
 0x669   :  { %v2793_v43 = vpop.f32.mrb[30].mxu1  ;;  %v2867_v21 = vpop.f32.mrb[34].mxu0 }
 0x66a   :  { %v2876_v20 = vadd.f32 %v2875_v31, %v2793_v43  ;;  %v10519_v32 = vpop.f32.mrb[31].mxu1  ;;  %v10530_v27 = vpop.f32.mrb[35].mxu0  ;;  %v2884_v42 = vadd.f32 %v2883_v39, %v2867_v21 }
 0x66c   :  { %v9325_v33 = vmul.f32 -1.442695, %v2876_v20  ;;  %v9326_v45 = vmul.f32 -1.442695, %v2884_v42 }
 0x66e   :  { %12072 = vpow2.f32 %v9325_v33 }
 0x66f   :  { %12074 = vpow2.f32 %v9326_v45 }
 0x671   :  { %v2958_v46 = vpop.f32.mrb[32].mxu1 }
 0x672   :  { %v10541_v49 = vpop.f32.mrb[33].mxu1  ;;  %v2959_v44 = vadd.f32 %v13034_v23, %v2958_v46 }
 0x673   :  { %v3042_v52 = vpop.f32.mrb[36].mxu0  ;;  %v3378_v49 = vld [vmem:[#allocation2 + $0xc] sm:$0x3] }
 0x674   :  { %v3125_v54 = vadd.f32 %v3124_v12, %v3042_v52  ;;  %v10552_v56 = vpop.f32.mrb[37].mxu0 }
 0x676   :  { %v9342_v58 = vmul.f32 -1.442695, %v3125_v54 }
 0x678   :  { %v12073_v59 = vpop.eup %12072  ;;  %12076 = vpow2.f32 %v9342_v58  ;;  %v3386_v58 = vld [vmem:[#allocation2 + $0x1c] sm:$0x3] }
 0x679   :  { %v2880_v41 = vadd.f32 1.0, %v12073_v59  ;;  %v3116_v61 = vpop.f32.mrb[34].mxu1  ;;  %v12075_v11 = vpop.eup %12074 }
 0x67a   :  { %v3133_v3 = vadd.f32 %v3132_v1, %v3116_v61  ;;  %v10563_v4 = vpop.f32.mrb[35].mxu1  ;;  %v2888_v15 = vadd.f32 1.0, %v12075_v11 }
 0x67b   :  { %12078 = vrcp.f32 %v2880_v41  ;;  %v3207_v5 = vpop.f32.mrb[38].mxu0 }
 0x67c   :  { %v9343_v8 = vmul.f32 -1.442695, %v3133_v3  ;;  %v10574_v9 = vpop.f32.mrb[39].mxu0  ;;  %v3208_v57 = vadd.f32 %v13040_v60, %v3207_v5 }
 0x67e   :  { %12080 = vpow2.f32 %v9343_v8 }
 0x682   :  { %v12077_v14 = vpop.eup %12076 }
 0x683   :  { %v3129_v16 = vadd.f32 1.0, %v12077_v14  ;;  %v3635_v14 = vld [vmem:[#allocation2 + $0x42] sm:$0x3] }
 0x685   :  { %v12079_v28 = vpop.eup %12078  ;;  %12082 = vrcp.f32 %v3129_v16 }
 0x686   :  { %12084 = vrcp.f32 %v2888_v15  ;;  %v2962_v29 = vmul.f32 %v12079_v28, %v2959_v44 }
 0x688   :  { %v2963_v34 = vadd.f32 %v2962_v29, %v2891_v30  ;;  %v12081_v19 = vpop.eup %12080 }
 0x689   :  { %v3137_v13 = vadd.f32 1.0, %v12081_v19 }
 0x68a   :  { %12086 = vtanh.f32 %v2963_v34 }
 0x68b   :  { %12088 = vrcp.f32 %v3137_v13 }
 0x68f   :  { %v12083_v36 = vpop.eup %12082 }
 0x690   :  { %v12085_v37 = vpop.eup %12084  ;;  %v3211_v7 = vmul.f32 %v12083_v36, %v3208_v57 }
 0x691   :  { %v2965_v31 = vsub.f32 1.0, %v12085_v37  ;;  %v2967_v32 = vmul.f32 %v12085_v37, %v12973_v35 }
 0x692   :  { %v3212_v43 = vadd.f32 %v3211_v7, %v3140_v18  ;;  %v3394_v7 = vld [vmem:[#allocation2 + $0x2c] sm:$0x3] }
 0x694   :  { %v12087_v21 = vpop.eup %12086  ;;  %12090 = vtanh.f32 %v3212_v43 }
 0x695   :  { %v2966_v20 = vmul.f32 %v12087_v21, %v2965_v31  ;;  %v12089_v33 = vpop.eup %12088 }
 0x696   :  { %v3214_v35 = vsub.f32 1.0, %v12089_v33  ;;  %v3216_v45 = vmul.f32 %v12089_v33, %v12996_v22 }
 0x697   :  { %v13044_v27 = vadd.f32 %v2967_v32, %v2966_v20 }
 0x699   :  { %2969 = vst.msk [vmem:[#allocation3 + $0xa] sm:$0x3] %vm447_vm2, %v13044_v27  ;;  %10584 = vmatmul.mubr.msk.f32.vlgmr.msra.gmra.mrb[36].mxu1 %vm98_vm1, %v13044_v27  ;;  %10595 = vmatmul.mubr.msk.f32.vlgmr.msra.gmra.mrb[40].mxu0 %vm98_vm1, %v13044_v27 }
 0x69a   :  { %11548 = vmatpush3.bf16.msra.mxu1 %v12860_v55  ;;  %11554 = vmatpush3.bf16.msra.mxu0 %v12862_v26 }
 0x69b   :  { %11549 = vmatprep.subr.bf16.mxu1 %v12320_v0  ;;  %11555 = vmatprep.subr.bf16.mxu0 %v12320_v0 }
 0x69c   :  { %10605 = vmatprep.mubr.msk.f32.mxu1 %vm12322_vm0, %v12323_v6  ;;  %10616 = vmatprep.mubr.msk.f32.mxu0 %vm12322_vm0, %v12323_v6 }
 0x69e   :  { %v12091_v39 = vpop.eup %12090  ;;  %11551 = vmatpush3.bf16.msra.mxu1 %v12886_v62  ;;  %11557 = vmatpush3.bf16.msra.mxu0 %v12888_v63 }
 0x69f   :  { %11558 = vmatprep.subr.bf16.mxu1 %v12320_v0  ;;  %11564 = vmatprep.subr.bf16.mxu0 %v12320_v0  ;;  %v3215_v42 = vmul.f32 %v12091_v39, %v3214_v35  ;;  %v3643_v35 = vld [vmem:[#allocation2 + $0x52] sm:$0x3] }
 0x6a1   :  { %10606 = vmatmul.mubr.msk.f32.vlgmr.msra.gmra.mrb[38].mxu1 %vm98_vm1, %v13044_v27  ;;  %v13067_v46 = vadd.f32 %v3216_v45, %v3215_v42 }
 0x6a2   :  { %11560 = vmatpush3.bf16.msra.mxu1 %v12910_v10  ;;  %10627 = vmatprep.mubr.msk.f32.mxu1 %vm12322_vm0, %v12323_v6 }
 0x6a3   :  { %3219 = vrot.lane.b32.xlu1 %v13067_v46, %s12325_s1  ;;  %10617 = vmatmul.mubr.msk.f32.vlgmr.msra.gmra.mrb[42].mxu0 %vm98_vm1, %v13067_v46 }
 0x6a4   :  { %11566 = vmatpush3.bf16.msra.mxu0 %v12921_v17  ;;  %11561 = vmatprep.subr.bf16.mxu1 %v12320_v0 }
 0x6a5   :  { %11567 = vmatprep.subr.bf16.mxu0 %v12320_v0  ;;  %10638 = vmatprep.mubr.msk.f32.mxu0 %vm12322_vm0, %v12323_v6 }
 0x6a6   :  { %11563 = vmatpush3.bf16.msra.mxu1 %v12934_v24 }
 0x6a7   :  { %11570 = vmatprep.subr.bf16.mxu1 %v12320_v0 }
 0x6a8   :  { %11569 = vmatpush3.bf16.msra.mxu0 %v12944_v25 }
 0x6a9   :  { %10628 = vmatmul.mubr.msk.f32.vlgmr.msra.gmra.mrb[40].mxu1 %vm98_vm1, %v13067_v46  ;;  %11576 = vmatprep.subr.bf16.mxu0 %v12320_v0 }
 0x6aa   :  { %11572 = vmatpush3.bf16.msra.mxu1 %v12810_v38  ;;  %10649 = vmatprep.mubr.msk.f32.mxu1 %vm12322_vm0, %v12323_v6 }
 0x6ab   :  { %10639 = vmatmul.mubr.msk.f32.vlgmr.msra.gmra.mrb[44].mxu0 %vm98_vm1, %v13067_v46  ;;  %11573 = vmatprep.subr.bf16.mxu1 %v12320_v0 }
 0x6ac   :  { %11578 = vmatpush3.bf16.msra.mxu0 %v12818_v40  ;;  %10660 = vmatprep.mubr.msk.f32.mxu0 %vm12322_vm0, %v12323_v6 }
 0x6ad   :  { %11579 = vmatprep.subr.bf16.mxu0 %v12320_v0 }
 0x6ae   :  { %11575 = vmatpush3.bf16.msra.mxu1 %v12830_v51 }
 0x6af   :  { %11582 = vmatprep.subr.bf16.mxu1 %v12320_v0 }
 0x6b0   :  { %11581 = vmatpush3.bf16.msra.mxu0 %v12839_v53  ;;  %v3627_v53 = vld [vmem:[#allocation2 + $0x32] sm:$0x3] }
 0x6b1   :  { %11588 = vmatprep.subr.bf16.mxu0 %v12320_v0 }
 0x715   :  { %v3220_v38 = vpop.permute.xlu1 %3219 }
 0x716   :  { %3222 = vst.msk [vmem:[#allocation3 + $0x4] sm:$0x3] %vm706_vm3, %v3220_v38 }
 0x76c   :  { %v3296_v22 = vpop.f32.mrb[36].mxu1  ;;  %v3370_v52 = vpop.f32.mrb[40].mxu0 }
 0x76d   :  { %v3379_v40 = vadd.f32 %v3378_v49, %v3296_v22  ;;  %v10585_v12 = vpop.f32.mrb[37].mxu1  ;;  %v10596_v54 = vpop.f32.mrb[41].mxu0  ;;  %v3387_v59 = vadd.f32 %v3386_v58, %v3370_v52 }
 0x76f   :  { %v9355_v56 = vmul.f32 -1.442695, %v3379_v40  ;;  %v9356_v51 = vmul.f32 -1.442695, %v3387_v59 }
 0x771   :  { %12092 = vpow2.f32 %v9355_v56 }
 0x772   :  { %12094 = vpow2.f32 %v9356_v51  ;;  %v3889_v51 = vld [vmem:[#allocation2 + $0x1e] sm:$0x3] }
 0x774   :  { %v3461_v41 = vpop.f32.mrb[38].mxu1 }
 0x775   :  { %v10607_v61 = vpop.f32.mrb[39].mxu1  ;;  %v3462_v57 = vadd.f32 %v13034_v23, %v3461_v41 }
 0x776   :  { %v3545_v1 = vpop.f32.mrb[42].mxu0 }
 0x777   :  { %v3628_v3 = vadd.f32 %v3627_v53, %v3545_v1  ;;  %v10618_v4 = vpop.f32.mrb[43].mxu0 }
 0x778   :  { %v4130_v4 = vld [vmem:[#allocation2 + $0x30] sm:$0x3] }
 0x779   :  { %v9372_v5 = vmul.f32 -1.442695, %v3628_v3 }
 0x77b   :  { %v12093_v8 = vpop.eup %12092  ;;  %12096 = vpow2.f32 %v9372_v5 }
 0x77c   :  { %v3383_v9 = vadd.f32 1.0, %v12093_v8  ;;  %v3619_v11 = vpop.f32.mrb[40].mxu1  ;;  %v12095_v30 = vpop.eup %12094 }
 0x77d   :  { %v3636_v15 = vadd.f32 %v3635_v14, %v3619_v11  ;;  %v10629_v16 = vpop.f32.mrb[41].mxu1  ;;  %v3391_v19 = vadd.f32 1.0, %v12095_v30 }
 0x77e   :  { %12098 = vrcp.f32 %v3383_v9  ;;  %v3710_v44 = vpop.f32.mrb[44].mxu0  ;;  %v4138_v16 = vld [vmem:[#allocation2 + $0x40] sm:$0x3] }
 0x77f   :  { %v9373_v28 = vmul.f32 -1.442695, %v3636_v15  ;;  %v10640_v29 = vpop.f32.mrb[45].mxu0  ;;  %v3711_v21 = vadd.f32 %v13040_v60, %v3710_v44 }
 0x781   :  { %12100 = vpow2.f32 %v9373_v28 }
 0x785   :  { %v12097_v34 = vpop.eup %12096 }
 0x786   :  { %v3632_v13 = vadd.f32 1.0, %v12097_v34 }
 0x788   :  { %v12099_v36 = vpop.eup %12098  ;;  %12102 = vrcp.f32 %v3632_v13 }
 0x789   :  { %12104 = vrcp.f32 %v3391_v19  ;;  %v3465_v37 = vmul.f32 %v12099_v36, %v3462_v57 }
 0x78b   :  { %v3466_v18 = vadd.f32 %v3465_v37, %v3394_v7  ;;  %v12101_v43 = vpop.eup %12100 }
 0x78c   :  { %v3640_v31 = vadd.f32 1.0, %v12101_v43  ;;  %v3897_v43 = vld [vmem:[#allocation2 + $0x2e] sm:$0x3] }
 0x78d   :  { %12106 = vtanh.f32 %v3466_v18 }
 0x78e   :  { %12108 = vrcp.f32 %v3640_v31 }
 0x792   :  { %v12103_v20 = vpop.eup %12102 }
 0x793   :  { %v12105_v32 = vpop.eup %12104  ;;  %v3714_v33 = vmul.f32 %v12103_v20, %v3711_v21 }
 0x794   :  { %v3468_v42 = vsub.f32 1.0, %v12105_v32  ;;  %v3470_v22 = vmul.f32 %v12105_v32, %v13044_v27 }
 0x795   :  { %v3715_v39 = vadd.f32 %v3714_v33, %v3643_v35 }
 0x797   :  { %v12107_v45 = vpop.eup %12106  ;;  %12110 = vtanh.f32 %v3715_v39 }
 0x798   :  { %v3469_v38 = vmul.f32 %v12107_v45, %v3468_v42  ;;  %v12109_v52 = vpop.eup %12108  ;;  %v4146_v42 = vld [vmem:[#allocation2 + $0x50] sm:$0x3] }
 0x799   :  { %v3717_v27 = vsub.f32 1.0, %v12109_v52 }
 0x79a   :  { %v13105_v49 = vadd.f32 %v3470_v22, %v3469_v38 }
 0x79c   :  { %3472 = vst.msk [vmem:[#allocation3 + $0xc] sm:$0x3] %vm447_vm2, %v13105_v49  ;;  %10650 = vmatmul.mubr.msk.f32.vlgmr.msra.gmra.mrb[42].mxu1 %vm98_vm1, %v13105_v49  ;;  %10661 = vmatmul.mubr.msk.f32.vlgmr.msra.gmra.mrb[46].mxu0 %vm98_vm1, %v13105_v49 }
 0x79d   :  { %11584 = vmatpush3.bf16.msra.mxu1 %v12860_v55  ;;  %11590 = vmatpush3.bf16.msra.mxu0 %v12862_v26  ;;  %v3719_v26 = vmul.f32 %v12109_v52, %v13067_v46 }
 0x79e   :  { %11585 = vmatprep.subr.bf16.mxu1 %v12320_v0  ;;  %11591 = vmatprep.subr.bf16.mxu0 %v12320_v0 }
 0x79f   :  { %10671 = vmatprep.mubr.msk.f32.mxu1 %vm12322_vm0, %v12323_v6  ;;  %10682 = vmatprep.mubr.msk.f32.mxu0 %vm12322_vm0, %v12323_v6 }
 0x7a1   :  { %v12111_v40 = vpop.eup %12110  ;;  %11587 = vmatpush3.bf16.msra.mxu1 %v12886_v62  ;;  %11593 = vmatpush3.bf16.msra.mxu0 %v12888_v63  ;;  %v11960_v63 = vld [vmem:[%s14139_s5] ss:$8 sps:$4 sm:$0xff]  }
 0x7a2   :  { %11594 = vmatprep.subr.bf16.mxu1 %v12320_v0  ;;  %11600 = vmatprep.subr.bf16.mxu0 %v12320_v0  ;;  %v3718_v55 = vmul.f32 %v12111_v40, %v3717_v27  ;;  %v11966_v27 = vld [vmem:[%s14139_s5 + $0x20] ss:$8 sps:$4 sm:$0xff]  }
 0x7a4   :  { %10672 = vmatmul.mubr.msk.f32.vlgmr.msra.gmra.mrb[44].mxu1 %vm98_vm1, %v13105_v49  ;;  %v13128_v12 = vadd.f32 %v3719_v26, %v3718_v55  ;;  %v11971_v55 = vld [vmem:[%s14139_s5 + $0x34] ss:$8 sps:$4 sm:$0xff]  }
 0x7a5   :  { %11596 = vmatpush3.bf16.msra.mxu1 %v12910_v10  ;;  %10693 = vmatprep.mubr.msk.f32.mxu1 %vm12322_vm0, %v12323_v6  ;;  %v11962_v10 = vld [vmem:[%s14139_s5 + $0x4] ss:$8 sps:$4 sm:$0xff]  }
 0x7a6   :  { %3722 = vrot.lane.b32.xlu0 %v13128_v12, %s12325_s1  ;;  %10683 = vmatmul.mubr.msk.f32.vlgmr.msra.gmra.mrb[48].mxu0 %vm98_vm1, %v13128_v12 }
 0x7a7   :  { %11602 = vmatpush3.bf16.msra.mxu0 %v12921_v17  ;;  %11597 = vmatprep.subr.bf16.mxu1 %v12320_v0  ;;  %v11963_v17 = vld [vmem:[%s14139_s5 + $0x10] ss:$8 sps:$4 sm:$0xff]  }
 0x7a8   :  { %11603 = vmatprep.subr.bf16.mxu0 %v12320_v0  ;;  %10704 = vmatprep.mubr.msk.f32.mxu0 %vm12322_vm0, %v12323_v6 }
 0x7a9   :  { %11599 = vmatpush3.bf16.msra.mxu1 %v12934_v24 }
 0x7aa   :  { %4296 = vmatprep.subr.bf16.mxu1 %v11962_v10 }
 0x7ab   :  { %11605 = vmatpush3.bf16.msra.mxu0 %v12944_v25  ;;  %v3881_v25 = vld [vmem:[#allocation2 + $0xe] sm:$0x3] }
 0x7ac   :  { %10694 = vmatmul.mubr.msk.f32.vlgmr.msra.gmra.mrb[46].mxu1 %vm98_vm1, %v13128_v12  ;;  %11606 = vmatprep.subr.bf16.mxu0 %v12320_v0 }
 0x7ad   :  { %4328 = vmatprep.mubr.bf16.mxu1 %v12321_v2  ;;  %v11965_v2 = vld [vmem:[%s14139_s5 + $0x14] ss:$8 sps:$4 sm:$0xff]   ;;  %4297 = vmatpush1.bf16.msra.mxu1 %v11960_v63 }
 0x7ae   :  { %10705 = vmatmul.mubr.msk.f32.vlgmr.msra.gmra.mrb[50].mxu0 %vm98_vm1, %v13128_v12  ;;  %4298 = vmatprep.subr.bf16.mxu1 %v11965_v2 }
 0x7af   :  { %10715 = vmatprep.mubr.msk.f32.mxu0 %vm12322_vm0, %v12323_v6 }
 0x7b1   :  { %4299 = vmatpush1.bf16.msra.mxu1 %v11963_v17 }
 0x818   :  { %v3723_v62 = vpop.permute.xlu0 %3722 }
 0x819   :  { %3725 = vst.msk [vmem:[#allocation3 + $0x2] sm:$0x3] %vm706_vm3, %v3723_v62 }
 0x86f   :  { %v3799_v24 = vpop.f32.mrb[42].mxu1  ;;  %v3873_v46 = vpop.f32.mrb[46].mxu0 }
 0x870   :  { %v3882_v54 = vadd.f32 %v3881_v25, %v3799_v24  ;;  %v10651_v56 = vpop.f32.mrb[43].mxu1  ;;  %v10662_v58 = vpop.f32.mrb[47].mxu0  ;;  %v3890_v41 = vadd.f32 %v3889_v51, %v3873_v46  ;;  %v4381_v24 = vld [vmem:[%s14140_s6] sm:$0xff]  ;;  %v4382_v25 = vld [vmem:[%s14140_s6 + $0x8] sm:$0xff]  ;;  %v9416_v51 = vld [vmem:[%s14140_s6 + $0x30] sm:$0xff] }
 0x871   :  { %v13189_v46 = vpack.c.bf16 %v4382_v25, %v4381_v24  ;;  %v9414_v58 = vld [vmem:[%s14140_s6 + $0x20] sm:$0xff] }
 0x872   :  { %v9385_v59 = vmul.f32 -1.442695, %v3882_v54  ;;  %v9386_v61 = vmul.f32 -1.442695, %v3890_v41  ;;  %v4384_v54 = vld [vmem:[%s14140_s6 + $0x18] sm:$0xff] }
 0x873   :  { %11608 = vmatpush3.bf16.msra.mxu0 %v13189_v46 }
 0x874   :  { %12112 = vpow2.f32 %v9385_v59  ;;  %11609 = vmatprep.subr.bf16.mxu0 %v12320_v0  ;;  %v9415_v59 = vld [vmem:[%s14140_s6 + $0x28] sm:$0xff] }
 0x875   :  { %12114 = vpow2.f32 %v9386_v61  ;;  %v13216_v41 = vpack.c.bf16 %v9415_v59, %v9414_v58  ;;  %v9417_v61 = vld [vmem:[%s14140_s6 + $0x38] sm:$0xff] }
 0x877   :  { %v3964_v1 = vpop.f32.mrb[44].mxu1 }
 0x878   :  { %v10673_v53 = vpop.f32.mrb[45].mxu1  ;;  %v3965_v37 = vadd.f32 %v13034_v23, %v3964_v1  ;;  %v13222_v1 = vpack.c.bf16 %v9417_v61, %v9416_v51  ;;  %v13356_v51 = vld [vmem:[%s14142_s8] ss:$0 sm:$0xff] }
 0x879   :  { %v4048_v3 = vpop.f32.mrb[48].mxu0  ;;  %v9425_v53 = vld [vmem:[%s14140_s6 + $0x60] sm:$0xff] }
 0x87a   :  { %v4131_v5 = vadd.f32 %v4130_v4, %v4048_v3  ;;  %v10684_v8 = vpop.f32.mrb[49].mxu0  ;;  %v9426_v3 = vld [vmem:[%s14140_s6 + $0x68] sm:$0xff] }
 0x87b   :  { %v13232_v4 = vpack.c.bf16 %v9426_v3, %v9425_v53  ;;  %v9428_v8 = vld [vmem:[%s14140_s6 + $0x78] sm:$0xff] }
 0x87c   :  { %v9402_v9 = vmul.f32 -1.442695, %v4131_v5  ;;  %v9427_v5 = vld [vmem:[%s14140_s6 + $0x70] sm:$0xff] }
 0x87e   :  { %v12113_v11 = vpop.eup %12112  ;;  %12116 = vpow2.f32 %v9402_v9  ;;  %v13243_v9 = vpack.c.bf16 %v9428_v8, %v9427_v5 }
 0x87f   :  { %v3886_v14 = vadd.f32 1.0, %v12113_v11  ;;  %v4122_v15 = vpop.f32.mrb[46].mxu1  ;;  %v12115_v19 = vpop.eup %12114  ;;  %v9433_v11 = vld [vmem:[%s14140_s6 + $0xa0] sm:$0xff] }
 0x880   :  { %v4139_v44 = vadd.f32 %v4138_v16, %v4122_v15  ;;  %v10695_v28 = vpop.f32.mrb[47].mxu1  ;;  %v3894_v57 = vadd.f32 1.0, %v12115_v19  ;;  %v9435_v16 = vld [vmem:[%s14140_s6 + $0xb0] sm:$0xff] }
 0x881   :  { %12118 = vrcp.f32 %v3886_v14  ;;  %v4213_v29 = vpop.f32.mrb[50].mxu0  ;;  %v9434_v14 = vld [vmem:[%s14140_s6 + $0xa8] sm:$0xff] }
 0x882   :  { %v9403_v30 = vmul.f32 -1.442695, %v4139_v44  ;;  %v10706_v34 = vpop.f32.mrb[51].mxu0  ;;  %v4214_v32 = vadd.f32 %v13040_v60, %v4213_v29  ;;  %v11968_v60 = vld [vmem:[%s14139_s5 + $0x24] ss:$8 sps:$4 sm:$0xff]   ;;  %v13255_v15 = vpack.c.bf16 %v9434_v14, %v9433_v11  ;;  %v9436_v44 = vld [vmem:[%s14140_s6 + $0xb8] sm:$0xff] }
 0x883   :  { %4300 = vmatprep.subr.bf16.mxu1 %v11968_v60  ;;  %v13266_v28 = vpack.c.bf16 %v9436_v44, %v9435_v16  ;;  %v9419_v34 = vld [vmem:[%s14140_s6 + $0x48] sm:$0xff] }
 0x884   :  { %12120 = vpow2.f32 %v9403_v30  ;;  %4301 = vmatpush1.bf16.msra.mxu1 %v11966_v27  ;;  %v9418_v30 = vld [vmem:[%s14140_s6 + $0x40] sm:$0xff] }
 0x885   :  { %4302 = vmatprep.subr.bf16.mxu1 %v11971_v55 }
 0x888   :  { %v12117_v13 = vpop.eup %12116 }
 0x889   :  { %v4135_v36 = vadd.f32 1.0, %v12117_v13 }
 0x88b   :  { %v12119_v7 = vpop.eup %12118  ;;  %12122 = vrcp.f32 %v4135_v36 }
 0x88c   :  { %12124 = vrcp.f32 %v3894_v57  ;;  %v3968_v18 = vmul.f32 %v12119_v7, %v3965_v37  ;;  %v13287_v57 = vpack.c.bf16 %v9419_v34, %v9418_v30  ;;  %v9420_v37 = vld [vmem:[%s14140_s6 + $0x50] sm:$0xff]  ;;  %v9421_v7 = vld [vmem:[%s14140_s6 + $0x58] sm:$0xff] }
 0x88e   :  { %v3969_v31 = vadd.f32 %v3968_v18, %v3897_v43  ;;  %v12121_v21 = vpop.eup %12120  ;;  %v13297_v18 = vpack.c.bf16 %v9421_v7, %v9420_v37  ;;  %v9429_v43 = vld [vmem:[%s14140_s6 + $0x80] sm:$0xff] }
 0x88f   :  { %v4143_v20 = vadd.f32 1.0, %v12121_v21 }
 0x890   :  { %12126 = vtanh.f32 %v3969_v31  ;;  %v9430_v31 = vld [vmem:[%s14140_s6 + $0x88] sm:$0xff] }
 0x891   :  { %12128 = vrcp.f32 %v4143_v20  ;;  %v13309_v21 = vpack.c.bf16 %v9430_v31, %v9429_v43  ;;  %v9431_v20 = vld [vmem:[%s14140_s6 + $0x90] sm:$0xff] }
 0x895   :  { %v12123_v33 = vpop.eup %12122 }
 0x896   :  { %v12125_v35 = vpop.eup %12124  ;;  %v4217_v39 = vmul.f32 %v12123_v33, %v4214_v32  ;;  %v9432_v32 = vld [vmem:[%s14140_s6 + $0x98] sm:$0xff] }
 0x897   :  { %v3971_v38 = vsub.f32 1.0, %v12125_v35  ;;  %v3973_v23 = vmul.f32 %v12125_v35, %v13105_v49  ;;  %v11969_v49 = vld [vmem:[%s14139_s5 + $0x30] ss:$8 sps:$4 sm:$0xff]   ;;  %v13320_v33 = vpack.c.bf16 %v9432_v32, %v9431_v20 }
 0x898   :  { %v4218_v45 = vadd.f32 %v4217_v39, %v4146_v42  ;;  %4303 = vmatpush1.bf16.msra.mxu1 %v11969_v49 }
 0x899   :  { %11618 = vmatprep.subr.bf16.mxu1 %v12320_v0 }
 0x89a   :  { %v12127_v22 = vpop.eup %12126  ;;  %12130 = vtanh.f32 %v4218_v45 }
 0x89b   :  { %v3972_v52 = vmul.f32 %v12127_v22, %v3971_v38  ;;  %v12129_v26 = vpop.eup %12128  ;;  %v4240_v38 = vld [vmem:[%s14141_s7] sm:$0x3] }
 0x89c   :  { %v4220_v62 = vsub.f32 1.0, %v12129_v26  ;;  %v4222_v2 = vmul.f32 %v12129_v26, %v13128_v12  ;;  %v4383_v12 = vld [vmem:[%s14140_s6 + $0x10] sm:$0xff]  ;;  %v4245_v22 = vrot.slane %v4240_v38, %v70_v48 }
 0x89d   :  { %v3974_v40 = vadd.f32 %v3973_v23, %v3972_v52  ;;  %v13200_v56 = vpack.c.bf16 %v4384_v54, %v4383_v12  ;;  %v4249_v23 = vrot.slane %v4240_v38, %v74_v50 }
 0x89f   :  { %3975 = vst.msk [vmem:[#allocation3 + $0xe] sm:$0x3] %vm447_vm2, %v3974_v40  ;;  %11611 = vmatpush3.bf16.msra.mxu0 %v13200_v56 }
 0x8a0   :  { %11612 = vmatprep.subr.bf16.mxu0 %v12320_v0 }
 0x8a2   :  { %10716 = vmatmul.mubr.f32.vlgmr.msra.gmra.mrb[52].mxu0 %v12323_v6 }
 0x8a3   :  { %10726 = vmatprep.mubr.msk.f32.mxu0 %vm12322_vm0, %v12323_v6  ;;  %11614 = vmatpush3.bf16.msra.mxu0 %v13216_v41 }
 0x8a4   :  { %v12131_v63 = vpop.eup %12130  ;;  %11615 = vmatprep.subr.bf16.mxu0 %v12320_v0 }
 0x8a5   :  { %v4221_v10 = vmul.f32 %v12131_v63, %v4220_v62 }
 0x8a6   :  { %v4230_v13 = vld [vmem:[#allocation3 + $0x8] sm:$0xff] }
 0x8a7   :  { %v4223_v17 = vadd.f32 %v4222_v2, %v4221_v10  ;;  %11617 = vmatpush3.bf16.msra.mxu0 %v13222_v1 }
 0x8a8   :  { %11624 = vmatprep.subr.bf16.mxu0 %v12320_v0 }
 0x8a9   :  { %4225 = vrot.lane.b32.xlu1 %v4223_v17, %s12325_s1 }
 0x8aa   :  { %10727 = vmatmul.mubr.f32.vlgmr.msra.gmra.mrb[54].mxu0 %v12323_v6 }
 0x8ab   :  { %11626 = vmatpush3.bf16.msra.mxu0 %v13232_v4  ;;  %10748 = vmatprep.mubr.msk.f32.mxu0 %vm12322_vm0, %v12323_v6 }
 0x8ac   :  { %11627 = vmatprep.subr.bf16.mxu0 %v12320_v0 }
 0x8af   :  { %11629 = vmatpush3.bf16.msra.mxu0 %v13243_v9 }
 0x8b0   :  { %11636 = vmatprep.subr.bf16.mxu0 %v12320_v0 }
 0x8b2   :  { %10749 = vmatmul.mubr.f32.vlgmr.msra.gmra.mrb[56].mxu0 %v12323_v6 }
 0x8b3   :  { %11638 = vmatpush3.bf16.msra.mxu0 %v13255_v15  ;;  %10770 = vmatprep.mubr.msk.f32.mxu0 %vm12322_vm0, %v12323_v6 }
 0x8b4   :  { %11639 = vmatprep.subr.bf16.mxu0 %v12320_v0 }
 0x8b7   :  { %11641 = vmatpush3.bf16.msra.mxu0 %v13266_v28 }
 0x8b8   :  { %11648 = vmatprep.subr.bf16.mxu0 %v12320_v0 }
 0x8ba   :  { %10771 = vmatmul.mubr.f32.vlgmr.msra.gmra.mrb[58].mxu0 %v12323_v6 }
 0x8bb   :  { %11650 = vmatpush3.bf16.msra.mxu0 %v13216_v41  ;;  %10792 = vmatprep.mubr.msk.f32.mxu0 %vm12322_vm0, %v12323_v6 }
 0x8bc   :  { %11651 = vmatprep.subr.bf16.mxu0 %v12320_v0 }
 0x8bf   :  { %11653 = vmatpush3.bf16.msra.mxu0 %v13222_v1 }
 0x8c0   :  { %11660 = vmatprep.subr.bf16.mxu0 %v12320_v0 }
 0x91b   :  { %v4226_v29 = vpop.permute.xlu1 %4225 }
 0x91c   :  { %4228 = vst.msk [vmem:[#allocation3] sm:$0x3] %vm706_vm3, %v4226_v29 }
 0x923   :  { %v4229_v19 = vld [vmem:[#allocation3] sm:$0xff] }
 0x924   :  { %v4231_v36 = vpack.c.bf16 %v4230_v13, %v4229_v19 }
 0x926   :  { %9413 = vmatmul.mubr.msk.bf16.vlgmr.msra.gmra.mrb[48].mxu1 %vm4292_vm4, %v4231_v36 }
 0x927   :  { %11620 = vmatpush3.bf16.msra.mxu1 %v13287_v57  ;;  %10737 = vmatprep.mubr.msk.f32.mxu1 %vm12322_vm0, %v12323_v6 }
 0x928   :  { %11621 = vmatprep.subr.bf16.mxu1 %v12320_v0 }
 0x92b   :  { %11623 = vmatpush3.bf16.msra.mxu1 %v13297_v18 }
 0x92c   :  { %11630 = vmatprep.subr.bf16.mxu1 %v12320_v0 }
 0x92e   :  { %10738 = vmatmul.mubr.f32.vlgmr.msra.gmra.mrb[52].mxu1 %v12323_v6 }
 0x92f   :  { %11632 = vmatpush3.bf16.msra.mxu1 %v13309_v21  ;;  %10759 = vmatprep.mubr.msk.f32.mxu1 %vm12322_vm0, %v12323_v6 }
 0x930   :  { %11633 = vmatprep.subr.bf16.mxu1 %v12320_v0 }
 0x933   :  { %11635 = vmatpush3.bf16.msra.mxu1 %v13320_v33 }
 0x934   :  { %11642 = vmatprep.subr.bf16.mxu1 %v12320_v0 }
 0x936   :  { %10760 = vmatmul.mubr.f32.vlgmr.msra.gmra.mrb[54].mxu1 %v12323_v6 }
 0x937   :  { %11644 = vmatpush3.bf16.msra.mxu1 %v13189_v46  ;;  %10781 = vmatprep.mubr.msk.f32.mxu1 %vm12322_vm0, %v12323_v6 }
 0x938   :  { %11645 = vmatprep.subr.bf16.mxu1 %v12320_v0 }
 0x93b   :  { %11647 = vmatpush3.bf16.msra.mxu1 %v13200_v56 }
 0x93c   :  { %11654 = vmatprep.subr.bf16.mxu1 %v12320_v0 }
 0x975   :  { %v4451_v35 = vpop.f32.mrb[52].mxu0 }
 0x976   :  { %v10717_v39 = vpop.f32.mrb[53].mxu0 }
 0x97d   :  { %v4526_v42 = vpop.f32.mrb[54].mxu0 }
 0x97e   :  { %v10728_v45 = vpop.f32.mrb[55].mxu0 }
 0x985   :  { %v4705_v40 = vpop.f32.mrb[56].mxu0 }
 0x986   :  { %v10750_v26 = vpop.f32.mrb[57].mxu0 }
 0x98d   :  { %v4876_v58 = vpop.f32.mrb[58].mxu0 }
 0x98e   :  { %v10772_v59 = vpop.f32.mrb[59].mxu0 }
 0x9f9   :  { %v4330_v52 = vpop.f32.mrb[48].mxu1 }
 0x9fa   :  { %v4331_v27 = vadd.f32 %v4330_v52, %v4245_v22  ;;  %v4332_v60 = vpop.f32.mrb[49].mxu1 }
 0x9fb   :  { %v4333_v55 = vadd.f32 %v4332_v60, %v4249_v23  ;;  %v4334_v49 = vpop.f32.mrb[50].mxu1 }
 0x9fc   :  { %4339 = vst.msk [vmem:[#allocation2] sm:$0xff] %vm98_vm1, %v4331_v27  ;;  %v4335_v62 = vadd.f32 %v4334_v49, %v4245_v22  ;;  %v4336_v63 = vpop.f32.mrb[51].mxu1  ;;  %4343 = vrot.lane.b32.xlu1 %v4331_v27, %s12326_s30 }
 0x9fd   :  { %4367 = vst.msk [vmem:[#allocation2 + $0x40] sm:$0xff] %vm98_vm1, %v4333_v55  ;;  %v4337_v10 = vadd.f32 %v4336_v63, %v4249_v23  ;;  %v13370_v23 = vld [vmem:[%s14142_s8 + $0x1] ss:$0 sm:$0xff] }
 0x9fe   :  { %4340 = vst.msk [vmem:[#allocation2 + $0x8] sm:$0xff] %vm98_vm1, %v4335_v62  ;;  %4361 = vrot.lane.b32.xlu0 %v4335_v62, %s12325_s1 }
 0x9ff   :  { %4368 = vst.msk [vmem:[#allocation2 + $0x48] sm:$0xff] %vm98_vm1, %v4337_v10 }
 0xa00   :  { %4373 = vrot.lane.b32.xlu1 %v4337_v10, %s12326_s30 }
 0xa01   :  { %v4622_v47 = vpop.f32.mrb[52].mxu1 }
 0xa02   :  { %4351 = vrot.lane.b32.xlu0 %v4331_v27, %s12324_s3  ;;  %v10739_v48 = vpop.f32.mrb[53].mxu1  ;;  %v4623_v61 = vadd.f32 %v13356_v51, %v4622_v47 }
 0xa03   :  { %v4535_v50 = vld [vmem:[#allocation2] sm:$0x3] }
 0xa04   :  { %v4536_v2 = vadd.f32 %v4535_v50, %v4451_v35  ;;  %4345 = vrot.lane.b32.xlu1 %v4335_v62, %s12326_s30 }
 0xa06   :  { %v9422_v17 = vmul.f32 -1.442695, %v4536_v2  ;;  %4359 = vrot.lane.b32.xlu0 %v4331_v27, %s12325_s1  ;;  %v4797_v37 = vld [vmem:[#allocation2 + $0x4e] sm:$0x3]  ;;  %v4877_v27 = vadd.f32 %v13370_v23, %v4876_v58  ;;  %v5047_v58 = vld [vmem:[#allocation2 + $0x2] sm:$0x3] }
 0xa08   :  { %12132 = vpow2.f32 %v9422_v17  ;;  %4371 = vrot.lane.b32.xlu1 %v4333_v55, %s12326_s30 }
 0xa09   :  { %v4780_v24 = vpop.f32.mrb[54].mxu1 }
 0xa0a   :  { %4353 = vrot.lane.b32.xlu0 %v4335_v62, %s12324_s3  ;;  %v10761_v25 = vpop.f32.mrb[55].mxu1  ;;  %v4798_v43 = vadd.f32 %v4797_v37, %v4780_v24 }
 0xa0c   :  { %v9438_v20 = vmul.f32 -1.442695, %v4798_v43 }
 0xa12   :  { %v12133_v12 = vpop.eup %12132 }
 0xa13   :  { %v4540_v54 = vadd.f32 1.0, %v12133_v12 }
 0xa15   :  { %12134 = vrcp.f32 %v4540_v54 }
 0xa1f   :  { %v12135_v53 = vpop.eup %12134 }
 0xa20   :  { %v4626_v3 = vmul.f32 %v12135_v53, %v4623_v61 }
 0xa6e   :  { %v4344_v5 = vpop.permute.xlu1 %4343 }
 0xa6f   :  { %4349 = vst.msk [vmem:[#allocation2 + $0x10] sm:$0xff] %vm98_vm1, %v4344_v5 }
 0xa70   :  { %v4362_v8 = vpop.permute.xlu0 %4361 }
 0xa71   :  { %4366 = vst.msk [vmem:[#allocation2 + $0x38] sm:$0xff] %vm98_vm1, %v4362_v8 }
 0xa72   :  { %v4374_v11 = vpop.permute.xlu1 %4373 }
 0xa73   :  { %4378 = vst.msk [vmem:[#allocation2 + $0x58] sm:$0xff] %vm98_vm1, %v4374_v11 }
 0xa74   :  { %v4352_v14 = vpop.permute.xlu0 %4351 }
 0xa75   :  { %4357 = vst.msk [vmem:[#allocation2 + $0x20] sm:$0xff] %vm98_vm1, %v4352_v14 }
 0xa76   :  { %v4543_v16 = vld [vmem:[#allocation2 + $0x10] sm:$0x3]  ;;  %v4346_v44 = vpop.permute.xlu1 %4345  ;;  %v5055_v8 = vld [vmem:[#allocation2 + $0x12] sm:$0x3] }
 0xa77   :  { %v4544_v29 = vadd.f32 %v4543_v16, %v4526_v42  ;;  %4350 = vst.msk [vmem:[#allocation2 + $0x18] sm:$0xff] %vm98_vm1, %v4346_v44 }
 0xa78   :  { %v4789_v30 = vld [vmem:[#allocation2 + $0x3e] sm:$0x3]  ;;  %v4360_v34 = vpop.permute.xlu0 %4359 }
 0xa79   :  { %v9423_v19 = vmul.f32 -1.442695, %v4544_v29  ;;  %v4790_v13 = vadd.f32 %v4789_v30, %v4705_v40  ;;  %4365 = vst.msk [vmem:[#allocation2 + $0x30] sm:$0xff] %vm98_vm1, %v4360_v34  ;;  %v5296_v34 = vld [vmem:[#allocation2 + $0x3c] sm:$0x3] }
 0xa7a   :  { %v4372_v36 = vpop.permute.xlu1 %4371  ;;  %v4805_v10 = vld [vmem:[#allocation2 + $0x5e] sm:$0x3] }
 0xa7b   :  { %12136 = vpow2.f32 %v9423_v19  ;;  %v9437_v7 = vmul.f32 -1.442695, %v4790_v13  ;;  %4377 = vst.msk [vmem:[#allocation2 + $0x50] sm:$0xff] %vm98_vm1, %v4372_v36 }
 0xa7c   :  { %v4354_v31 = vpop.permute.xlu0 %4353  ;;  %v4551_v32 = vld [vmem:[#allocation2 + $0x20] sm:$0x3] }
 0xa7d   :  { %12138 = vpow2.f32 %v9437_v7  ;;  %4358 = vst.msk [vmem:[#allocation2 + $0x28] sm:$0xff] %vm98_vm1, %v4354_v31  ;;  %v4627_v39 = vadd.f32 %v4626_v3, %v4551_v32  ;;  %v5304_v31 = vld [vmem:[#allocation2 + $0x4c] sm:$0x3] }
 0xa7e   :  { %12140 = vpow2.f32 %v9438_v20 }
 0xa85   :  { %v12137_v35 = vpop.eup %12136 }
 0xa86   :  { %v4548_v42 = vadd.f32 1.0, %v12137_v35 }
 0xa87   :  { %v12139_v45 = vpop.eup %12138 }
 0xa88   :  { %12142 = vrcp.f32 %v4548_v42  ;;  %v4794_v38 = vadd.f32 1.0, %v12139_v45  ;;  %v12141_v22 = vpop.eup %12140 }
 0xa89   :  { %12144 = vtanh.f32 %v4627_v39  ;;  %v4802_v52 = vadd.f32 1.0, %v12141_v22 }
 0xa8a   :  { %12146 = vrcp.f32 %v4794_v38 }
 0xa8b   :  { %12148 = vrcp.f32 %v4802_v52 }
 0xa92   :  { %v12143_v60 = vpop.eup %12142 }
 0xa93   :  { %v12145_v40 = vpop.eup %12144  ;;  %v4629_v55 = vsub.f32 1.0, %v12143_v60  ;;  %v4631_v63 = vmul.f32 0.0, %v12143_v60  ;;  %v5063_v60 = vld [vmem:[#allocation2 + $0x22] sm:$0x3] }
 0xa94   :  { %v12147_v49 = vpop.eup %12146 }
 0xa95   :  { %v4880_v26 = vmul.f32 %v12147_v49, %v4877_v27  ;;  %v4630_v62 = vmul.f32 %v12145_v40, %v4629_v55  ;;  %v12149_v50 = vpop.eup %12148 }
 0xa96   :  { %v4883_v2 = vsub.f32 1.0, %v12149_v50  ;;  %v4885_v25 = vmul.f32 0.0, %v12149_v50 }
 0xa97   :  { %v4881_v47 = vadd.f32 %v4880_v26, %v4805_v10  ;;  %v13373_v48 = vadd.f32 %v4631_v63, %v4630_v62 }
 0xa99   :  { %12150 = vtanh.f32 %v4881_v47  ;;  %10782 = vmatmul.mubr.msk.f32.vlgmr.msra.gmra.mrb[56].mxu1 %vm98_vm1, %v13373_v48  ;;  %4633 = vst.msk [vmem:[#allocation4] sm:$0x3] %vm447_vm2, %v13373_v48  ;;  %10793 = vmatmul.mubr.msk.f32.vlgmr.msra.gmra.mrb[60].mxu0 %vm98_vm1, %v13373_v48 }
 0xa9a   :  { %11656 = vmatpush3.bf16.msra.mxu1 %v13287_v57  ;;  %10803 = vmatprep.mubr.msk.f32.mxu1 %vm12322_vm0, %v12323_v6 }
 0xa9b   :  { %11657 = vmatprep.subr.bf16.mxu1 %v12320_v0  ;;  %11662 = vmatpush3.bf16.msra.mxu0 %v13232_v4 }
 0xa9c   :  { %11663 = vmatprep.subr.bf16.mxu0 %v12320_v0  ;;  %10814 = vmatprep.mubr.msk.f32.mxu0 %vm12322_vm0, %v12323_v6 }
 0xa9e   :  { %11659 = vmatpush3.bf16.msra.mxu1 %v13297_v18 }
 0xa9f   :  { %11666 = vmatprep.subr.bf16.mxu1 %v12320_v0  ;;  %11665 = vmatpush3.bf16.msra.mxu0 %v13243_v9 }
 0xaa0   :  { %11672 = vmatprep.subr.bf16.mxu0 %v12320_v0 }
 0xaa1   :  { %10804 = vmatmul.mubr.msk.f32.vlgmr.msra.gmra.mrb[58].mxu1 %vm98_vm1, %v13373_v48 }
 0xaa2   :  { %11668 = vmatpush3.bf16.msra.mxu1 %v13309_v21  ;;  %10825 = vmatprep.mubr.msk.f32.mxu1 %vm12322_vm0, %v12323_v6 }
 0xaa3   :  { %v12151_v17 = vpop.eup %12150  ;;  %11669 = vmatprep.subr.bf16.mxu1 %v12320_v0 }
 0xaa4   :  { %v4884_v24 = vmul.f32 %v12151_v17, %v4883_v2 }
 0xaa6   :  { %11671 = vmatpush3.bf16.msra.mxu1 %v13320_v33  ;;  %v13400_v12 = vadd.f32 %v4885_v25, %v4884_v24  ;;  %v5312_v25 = vld [vmem:[#allocation2 + $0x5c] sm:$0x3] }
 0xaa7   :  { %11678 = vmatprep.subr.bf16.mxu1 %v12320_v0 }
 0xaa8   :  { %10815 = vmatmul.mubr.msk.f32.vlgmr.msra.gmra.mrb[62].mxu0 %vm98_vm1, %v13400_v12 }
 0xaa9   :  { %10826 = vmatmul.mubr.msk.f32.vlgmr.msra.gmra.mrb[60].mxu1 %vm98_vm1, %v13400_v12  ;;  %11674 = vmatpush3.bf16.msra.mxu0 %v13255_v15 }
 0xaaa   :  { %11675 = vmatprep.subr.bf16.mxu0 %v12320_v0  ;;  %10836 = vmatprep.mubr.msk.f32.mxu0 %vm12322_vm0, %v12323_v6 }
 0xaab   :  { %11680 = vmatpush3.bf16.msra.mxu1 %v13189_v46  ;;  %10847 = vmatprep.mubr.msk.f32.mxu1 %vm12322_vm0, %v12323_v6 }
 0xaac   :  { %11681 = vmatprep.subr.bf16.mxu1 %v12320_v0 }
 0xaad   :  { %11677 = vmatpush3.bf16.msra.mxu0 %v13266_v28 }
 0xaae   :  { %11684 = vmatprep.subr.bf16.mxu0 %v12320_v0 }
 0xaaf   :  { %11683 = vmatpush3.bf16.msra.mxu1 %v13200_v56 }
 0xab0   :  { %10837 = vmatmul.mubr.msk.f32.vlgmr.msra.gmra.mrb[64].mxu0 %vm98_vm1, %v13400_v12  ;;  %11690 = vmatprep.subr.bf16.mxu1 %v12320_v0 }
 0xab1   :  { %11686 = vmatpush3.bf16.msra.mxu0 %v13216_v41  ;;  %10858 = vmatprep.mubr.msk.f32.mxu0 %vm12322_vm0, %v12323_v6 }
 0xab2   :  { %11687 = vmatprep.subr.bf16.mxu0 %v12320_v0 }
 0xab5   :  { %11689 = vmatpush3.bf16.msra.mxu0 %v13222_v1 }
 0xab6   :  { %11696 = vmatprep.subr.bf16.mxu0 %v12320_v0 }
 0xb6c   :  { %v4965_v54 = vpop.f32.mrb[56].mxu1  ;;  %v5039_v59 = vpop.f32.mrb[60].mxu0 }
 0xb6d   :  { %v5048_v61 = vadd.f32 %v5047_v58, %v4965_v54  ;;  %v10783_v53 = vpop.f32.mrb[57].mxu1  ;;  %v10794_v3 = vpop.f32.mrb[61].mxu0  ;;  %v5056_v11 = vadd.f32 %v5055_v8, %v5039_v59  ;;  %v5550_v8 = vld [vmem:[#allocation2 + $0x4] sm:$0x3] }
 0xb6f   :  { %v9450_v5 = vmul.f32 -1.442695, %v5048_v61  ;;  %v9451_v14 = vmul.f32 -1.442695, %v5056_v11 }
 0xb71   :  { %12152 = vpow2.f32 %v9450_v5 }
 0xb72   :  { %12154 = vpow2.f32 %v9451_v14 }
 0xb74   :  { %v5130_v16 = vpop.f32.mrb[58].mxu1 }
 0xb75   :  { %v10805_v44 = vpop.f32.mrb[59].mxu1  ;;  %v5131_v38 = vadd.f32 %v13356_v51, %v5130_v16 }
 0xb7b   :  { %v12153_v29 = vpop.eup %12152  ;;  %v5214_v30 = vpop.f32.mrb[62].mxu0 }
 0xb7c   :  { %v5052_v19 = vadd.f32 1.0, %v12153_v29  ;;  %v5297_v13 = vadd.f32 %v5296_v34, %v5214_v30  ;;  %v5288_v36 = vpop.f32.mrb[60].mxu1  ;;  %v10816_v37 = vpop.f32.mrb[63].mxu0  ;;  %v5558_v29 = vld [vmem:[#allocation2 + $0x14] sm:$0x3] }
 0xb7d   :  { %v10827_v7 = vpop.f32.mrb[61].mxu1  ;;  %v5305_v20 = vadd.f32 %v5304_v31, %v5288_v36  ;;  %v12155_v32 = vpop.eup %12154 }
 0xb7e   :  { %12156 = vrcp.f32 %v5052_v19  ;;  %v9467_v43 = vmul.f32 -1.442695, %v5297_v13  ;;  %v5060_v45 = vadd.f32 1.0, %v12155_v32 }
 0xb7f   :  { %v9468_v39 = vmul.f32 -1.442695, %v5305_v20 }
 0xb80   :  { %12158 = vpow2.f32 %v9467_v43 }
 0xb81   :  { %12160 = vpow2.f32 %v9468_v39 }
 0xb82   :  { %12162 = vrcp.f32 %v5060_v45 }
 0xb83   :  { %v5379_v35 = vpop.f32.mrb[64].mxu0 }
 0xb84   :  { %v10838_v42 = vpop.f32.mrb[65].mxu0  ;;  %v5380_v47 = vadd.f32 %v13370_v23, %v5379_v35  ;;  %v5807_v35 = vld [vmem:[#allocation2 + $0x4a] sm:$0x3] }
 0xb88   :  { %v12157_v22 = vpop.eup %12156 }
 0xb89   :  { %v5134_v52 = vmul.f32 %v12157_v22, %v5131_v38 }
 0xb8a   :  { %v12159_v27 = vpop.eup %12158 }
 0xb8b   :  { %v5135_v40 = vadd.f32 %v5134_v52, %v5063_v60  ;;  %v5301_v55 = vadd.f32 1.0, %v12159_v27  ;;  %v12161_v49 = vpop.eup %12160 }
 0xb8c   :  { %v12163_v26 = vpop.eup %12162  ;;  %v5309_v62 = vadd.f32 1.0, %v12161_v49 }
 0xb8d   :  { %12164 = vtanh.f32 %v5135_v40  ;;  %v5137_v63 = vsub.f32 1.0, %v12163_v26  ;;  %v5139_v17 = vmul.f32 %v12163_v26, %v13373_v48 }
 0xb8e   :  { %12166 = vrcp.f32 %v5301_v55  ;;  %v5566_v55 = vld [vmem:[#allocation2 + $0x24] sm:$0x3] }
 0xb8f   :  { %12168 = vrcp.f32 %v5309_v62 }
 0xb97   :  { %v12165_v10 = vpop.eup %12164 }
 0xb98   :  { %v12167_v50 = vpop.eup %12166  ;;  %v5138_v2 = vmul.f32 %v12165_v10, %v5137_v63 }
 0xb99   :  { %v5383_v24 = vmul.f32 %v12167_v50, %v5380_v47  ;;  %v12169_v48 = vpop.eup %12168 }
 0xb9a   :  { %v13430_v54 = vadd.f32 %v5139_v17, %v5138_v2  ;;  %v5386_v59 = vsub.f32 1.0, %v12169_v48  ;;  %v5388_v3 = vmul.f32 %v12169_v48, %v13400_v12 }
 0xb9b   :  { %v5384_v58 = vadd.f32 %v5383_v24, %v5312_v25 }
 0xb9c   :  { %10848 = vmatmul.mubr.msk.f32.vlgmr.msra.gmra.mrb[62].mxu1 %vm98_vm1, %v13430_v54  ;;  %5141 = vst.msk [vmem:[#allocation4 + $0x2] sm:$0x3] %vm447_vm2, %v13430_v54  ;;  %10859 = vmatmul.mubr.msk.f32.vlgmr.msra.gmra.mrb[66].mxu0 %vm98_vm1, %v13430_v54 }
 0xb9d   :  { %12170 = vtanh.f32 %v5384_v58  ;;  %11692 = vmatpush3.bf16.msra.mxu1 %v13287_v57  ;;  %10869 = vmatprep.mubr.msk.f32.mxu1 %vm12322_vm0, %v12323_v6 }
 0xb9e   :  { %11693 = vmatprep.subr.bf16.mxu1 %v12320_v0  ;;  %11698 = vmatpush3.bf16.msra.mxu0 %v13232_v4 }
 0xb9f   :  { %11699 = vmatprep.subr.bf16.mxu0 %v12320_v0  ;;  %10880 = vmatprep.mubr.msk.f32.mxu0 %vm12322_vm0, %v12323_v6 }
 0xba1   :  { %11695 = vmatpush3.bf16.msra.mxu1 %v13297_v18 }
 0xba2   :  { %11702 = vmatprep.subr.bf16.mxu1 %v12320_v0  ;;  %11701 = vmatpush3.bf16.msra.mxu0 %v13243_v9 }
 0xba3   :  { %11708 = vmatprep.subr.bf16.mxu0 %v12320_v0 }
 0xba4   :  { %10870 = vmatmul.mubr.msk.f32.vlgmr.msra.gmra.mrb[64].mxu1 %vm98_vm1, %v13430_v54 }
 0xba5   :  { %11704 = vmatpush3.bf16.msra.mxu1 %v13309_v21  ;;  %10891 = vmatprep.mubr.msk.f32.mxu1 %vm12322_vm0, %v12323_v6 }
 0xba6   :  { %11705 = vmatprep.subr.bf16.mxu1 %v12320_v0 }
 0xba7   :  { %v12171_v61 = vpop.eup %12170 }
 0xba8   :  { %v5387_v53 = vmul.f32 %v12171_v61, %v5386_v59  ;;  %v5815_v59 = vld [vmem:[#allocation2 + $0x5a] sm:$0x3] }
 0xba9   :  { %11707 = vmatpush3.bf16.msra.mxu1 %v13320_v33 }
 0xbaa   :  { %v13458_v5 = vadd.f32 %v5388_v3, %v5387_v53  ;;  %11714 = vmatprep.subr.bf16.mxu1 %v12320_v0 }
 0xbac   :  { %10881 = vmatmul.mubr.msk.f32.vlgmr.msra.gmra.mrb[68].mxu0 %vm98_vm1, %v13458_v5  ;;  %10892 = vmatmul.mubr.msk.f32.vlgmr.msra.gmra.mrb[66].mxu1 %vm98_vm1, %v13458_v5 }
 0xbad   :  { %11710 = vmatpush3.bf16.msra.mxu0 %v13255_v15  ;;  %10902 = vmatprep.mubr.msk.f32.mxu0 %vm12322_vm0, %v12323_v6 }
 0xbae   :  { %11711 = vmatprep.subr.bf16.mxu0 %v12320_v0  ;;  %11716 = vmatpush3.bf16.msra.mxu1 %v13189_v46 }
 0xbaf   :  { %11717 = vmatprep.subr.bf16.mxu1 %v12320_v0  ;;  %10913 = vmatprep.mubr.msk.f32.mxu1 %vm12322_vm0, %v12323_v6 }
 0xbb1   :  { %11713 = vmatpush3.bf16.msra.mxu0 %v13266_v28 }
 0xbb2   :  { %11720 = vmatprep.subr.bf16.mxu0 %v12320_v0  ;;  %11719 = vmatpush3.bf16.msra.mxu1 %v13200_v56 }
 0xbb3   :  { %11726 = vmatprep.subr.bf16.mxu1 %v12320_v0 }
 0xbb4   :  { %10903 = vmatmul.mubr.msk.f32.vlgmr.msra.gmra.mrb[70].mxu0 %vm98_vm1, %v13458_v5 }
 0xbb5   :  { %11722 = vmatpush3.bf16.msra.mxu0 %v13216_v41  ;;  %10924 = vmatprep.mubr.msk.f32.mxu0 %vm12322_vm0, %v12323_v6 }
 0xbb6   :  { %11723 = vmatprep.subr.bf16.mxu0 %v12320_v0 }
 0xbb9   :  { %11725 = vmatpush3.bf16.msra.mxu0 %v13222_v1  ;;  %v5799_v1 = vld [vmem:[#allocation2 + $0x3a] sm:$0x3] }
 0xbba   :  { %11732 = vmatprep.subr.bf16.mxu0 %v12320_v0 }
 0xc6f   :  { %v5468_v46 = vpop.f32.mrb[62].mxu1  ;;  %v5542_v11 = vpop.f32.mrb[66].mxu0 }
 0xc70   :  { %v5551_v56 = vadd.f32 %v5550_v8, %v5468_v46  ;;  %v10849_v14 = vpop.f32.mrb[63].mxu1  ;;  %v10860_v16 = vpop.f32.mrb[67].mxu0  ;;  %v5559_v30 = vadd.f32 %v5558_v29, %v5542_v11  ;;  %v9532_v46 = vld [vmem:[%s14140_s6 + $0x28] sm:$0xff]  ;;  %v6403_v11 = vld [vmem:[%s14140_s6 + $0x10] sm:$0xff] }
 0xc71   :  { %v9533_v16 = vld [vmem:[%s14140_s6 + $0x30] sm:$0xff] }
 0xc72   :  { %v9480_v44 = vmul.f32 -1.442695, %v5551_v56  ;;  %v9481_v41 = vmul.f32 -1.442695, %v5559_v30  ;;  %v6404_v56 = vld [vmem:[%s14140_s6 + $0x18] sm:$0xff] }
 0xc73   :  { %v13560_v14 = vpack.c.bf16 %v6404_v56, %v6403_v11 }
 0xc74   :  { %12172 = vpow2.f32 %v9480_v44  ;;  %v9534_v44 = vld [vmem:[%s14140_s6 + $0x38] sm:$0xff] }
 0xc75   :  { %12174 = vpow2.f32 %v9481_v41  ;;  %v13569_v29 = vpack.c.bf16 %v9534_v44, %v9533_v16  ;;  %v6053_v41 = vld [vmem:[#allocation2 + $0x6] sm:$0x3]  ;;  %v6318_v16 = vld [vmem:[#allocation2 + $0x58] sm:$0x3] }
 0xc77   :  { %v5633_v34 = vpop.f32.mrb[64].mxu1 }
 0xc78   :  { %v10871_v19 = vpop.f32.mrb[65].mxu1  ;;  %v5634_v27 = vadd.f32 %v13356_v51, %v5633_v34 }
 0xc7e   :  { %v12173_v13 = vpop.eup %12172 }
 0xc7f   :  { %v5555_v36 = vadd.f32 1.0, %v12173_v13  ;;  %v5717_v37 = vpop.f32.mrb[68].mxu0  ;;  %v5791_v7 = vpop.f32.mrb[66].mxu1 }
 0xc80   :  { %v5800_v43 = vadd.f32 %v5799_v1, %v5717_v37  ;;  %v10882_v31 = vpop.f32.mrb[69].mxu0  ;;  %v10893_v20 = vpop.f32.mrb[67].mxu1  ;;  %v5808_v39 = vadd.f32 %v5807_v35, %v5791_v7  ;;  %v6061_v1 = vld [vmem:[#allocation2 + $0x16] sm:$0x3] }
 0xc81   :  { %12176 = vrcp.f32 %v5555_v36  ;;  %v12175_v42 = vpop.eup %12174 }
 0xc82   :  { %v9497_v32 = vmul.f32 -1.442695, %v5800_v43  ;;  %v9498_v45 = vmul.f32 -1.442695, %v5808_v39  ;;  %v5563_v22 = vadd.f32 1.0, %v12175_v42 }
 0xc83   :  { %v6302_v42 = vld [vmem:[#allocation2 + $0x38] sm:$0x3] }
 0xc84   :  { %12178 = vpow2.f32 %v9497_v32 }
 0xc85   :  { %12180 = vpow2.f32 %v9498_v45 }
 0xc86   :  { %12182 = vrcp.f32 %v5563_v22 }
 0xc87   :  { %v5882_v38 = vpop.f32.mrb[70].mxu0 }
 0xc88   :  { %v10904_v52 = vpop.f32.mrb[71].mxu0  ;;  %v5883_v17 = vadd.f32 %v13370_v23, %v5882_v38 }
 0xc8b   :  { %v12177_v60 = vpop.eup %12176 }
 0xc8c   :  { %v5637_v40 = vmul.f32 %v12177_v60, %v5634_v27  ;;  %v6310_v60 = vld [vmem:[#allocation2 + $0x48] sm:$0x3] }
 0xc8e   :  { %v12179_v49 = vpop.eup %12178  ;;  %v5638_v26 = vadd.f32 %v5637_v40, %v5566_v55 }
 0xc8f   :  { %v5804_v62 = vadd.f32 1.0, %v12179_v49  ;;  %v12181_v63 = vpop.eup %12180 }
 0xc90   :  { %12184 = vtanh.f32 %v5638_v26  ;;  %v12183_v10 = vpop.eup %12182  ;;  %v5812_v47 = vadd.f32 1.0, %v12181_v63 }
 0xc91   :  { %12186 = vrcp.f32 %v5804_v62  ;;  %v5640_v50 = vsub.f32 1.0, %v12183_v10  ;;  %v5642_v58 = vmul.f32 %v12183_v10, %v13430_v54 }
 0xc92   :  { %12188 = vrcp.f32 %v5812_v47 }
 0xc9a   :  { %v12185_v2 = vpop.eup %12184 }
 0xc9b   :  { %v12187_v24 = vpop.eup %12186  ;;  %v5641_v25 = vmul.f32 %v12185_v2, %v5640_v50  ;;  %v6069_v2 = vld [vmem:[#allocation2 + $0x26] sm:$0x3] }
 0xc9c   :  { %v5886_v48 = vmul.f32 %v12187_v24, %v5883_v17  ;;  %v12189_v54 = vpop.eup %12188 }
 0xc9d   :  { %v13488_v61 = vadd.f32 %v5642_v58, %v5641_v25  ;;  %v5891_v3 = vmul.f32 %v12189_v54, %v13458_v5 }
 0xc9e   :  { %v5887_v53 = vadd.f32 %v5886_v48, %v5815_v59 }
 0xc9f   :  { %10914 = vmatmul.mubr.msk.f32.vlgmr.msra.gmra.mrb[68].mxu1 %vm98_vm1, %v13488_v61  ;;  %5644 = vst.msk [vmem:[#allocation4 + $0x4] sm:$0x3] %vm447_vm2, %v13488_v61  ;;  %10925 = vmatmul.mubr.msk.f32.vlgmr.msra.gmra.mrb[72].mxu0 %vm98_vm1, %v13488_v61 }
 0xca0   :  { %12190 = vtanh.f32 %v5887_v53  ;;  %11728 = vmatpush3.bf16.msra.mxu1 %v13287_v57  ;;  %10935 = vmatprep.mubr.msk.f32.mxu1 %vm12322_vm0, %v12323_v6 }
 0xca1   :  { %11729 = vmatprep.subr.bf16.mxu1 %v12320_v0  ;;  %11734 = vmatpush3.bf16.msra.mxu0 %v13232_v4  ;;  %v5889_v4 = vsub.f32 1.0, %v12189_v54  ;;  %v9536_v54 = vld [vmem:[%s14140_s6 + $0x40] sm:$0xff] }
 0xca2   :  { %11735 = vmatprep.subr.bf16.mxu0 %v12320_v0  ;;  %10946 = vmatprep.mubr.msk.f32.mxu0 %vm12322_vm0, %v12323_v6 }
 0xca4   :  { %11731 = vmatpush3.bf16.msra.mxu1 %v13297_v18 }
 0xca5   :  { %11738 = vmatprep.subr.bf16.mxu1 %v12320_v0  ;;  %11737 = vmatpush3.bf16.msra.mxu0 %v13243_v9 }
 0xca6   :  { %11744 = vmatprep.subr.bf16.mxu0 %v12320_v0 }
 0xca7   :  { %10936 = vmatmul.mubr.msk.f32.vlgmr.msra.gmra.mrb[70].mxu1 %vm98_vm1, %v13488_v61 }
 0xca8   :  { %11740 = vmatpush3.bf16.msra.mxu1 %v13309_v21  ;;  %10957 = vmatprep.mubr.msk.f32.mxu1 %vm12322_vm0, %v12323_v6  ;;  %v6402_v21 = vld [vmem:[%s14140_s6 + $0x8] sm:$0xff] }
 0xca9   :  { %11741 = vmatprep.subr.bf16.mxu1 %v12320_v0 }
 0xcaa   :  { %v12191_v57 = vpop.eup %12190 }
 0xcab   :  { %v5890_v18 = vmul.f32 %v12191_v57, %v5889_v4  ;;  %v9537_v4 = vld [vmem:[%s14140_s6 + $0x48] sm:$0xff] }
 0xcac   :  { %11743 = vmatpush3.bf16.msra.mxu1 %v13320_v33  ;;  %v13590_v56 = vpack.c.bf16 %v9537_v4, %v9536_v54  ;;  %v6805_v4 = vld [vmem:[#allocation2 + $0x36] sm:$0x3] }
 0xcad   :  { %v13516_v9 = vadd.f32 %v5891_v3, %v5890_v18  ;;  %11750 = vmatprep.subr.bf16.mxu1 %v12320_v0  ;;  %v9543_v3 = vld [vmem:[%s14140_s6 + $0x60] sm:$0xff] }
 0xcaf   :  { %10947 = vmatmul.mubr.msk.f32.vlgmr.msra.gmra.mrb[74].mxu0 %vm98_vm1, %v13516_v9  ;;  %10958 = vmatmul.mubr.msk.f32.vlgmr.msra.gmra.mrb[72].mxu1 %vm98_vm1, %v13516_v9 }
 0xcb0   :  { %11746 = vmatpush3.bf16.msra.mxu0 %v13255_v15  ;;  %10968 = vmatprep.mubr.msk.f32.mxu0 %vm12322_vm0, %v12323_v6  ;;  %v6401_v15 = vld [vmem:[%s14140_s6] sm:$0xff] }
 0xcb1   :  { %11747 = vmatprep.subr.bf16.mxu0 %v12320_v0  ;;  %10979 = vmatprep.mubr.msk.f32.mxu1 %vm12322_vm0, %v12323_v6  ;;  %v13541_v33 = vpack.c.bf16 %v6402_v21, %v6401_v15  ;;  %v9544_v15 = vld [vmem:[%s14140_s6 + $0x68] sm:$0xff] }
 0xcb3   :  { %11752 = vmatpush3.bf16.msra.mxu1 %v13541_v33 }
 0xcb4   :  { %11749 = vmatpush3.bf16.msra.mxu0 %v13266_v28  ;;  %v9531_v28 = vld [vmem:[%s14140_s6 + $0x20] sm:$0xff]  ;;  %11753 = vmatprep.subr.bf16.mxu1 %v12320_v0 }
 0xcb5   :  { %11756 = vmatprep.subr.bf16.mxu0 %v12320_v0  ;;  %v13549_v8 = vpack.c.bf16 %v9532_v46, %v9531_v28 }
 0xcb7   :  { %10969 = vmatmul.mubr.msk.f32.vlgmr.msra.gmra.mrb[76].mxu0 %vm98_vm1, %v13516_v9  ;;  %11755 = vmatpush3.bf16.msra.mxu1 %v13560_v14 }
 0xcb8   :  { %10990 = vmatprep.mubr.msk.f32.mxu0 %vm12322_vm0, %v12323_v6  ;;  %11758 = vmatpush3.bf16.msra.mxu0 %v13549_v8 }
 0xcb9   :  { %11759 = vmatprep.subr.bf16.mxu0 %v12320_v0  ;;  %11762 = vmatprep.subr.bf16.mxu1 %v12320_v0 }
 0xcbc   :  { %11761 = vmatpush3.bf16.msra.mxu0 %v13569_v29 }
 0xcbd   :  { %11768 = vmatprep.subr.bf16.mxu0 %v12320_v0 }
 0xd72   :  { %v5971_v30 = vpop.f32.mrb[68].mxu1  ;;  %v6045_v34 = vpop.f32.mrb[72].mxu0 }
 0xd73   :  { %v6054_v19 = vadd.f32 %v6053_v41, %v5971_v30  ;;  %v10915_v13 = vpop.f32.mrb[69].mxu1  ;;  %v10926_v36 = vpop.f32.mrb[73].mxu0  ;;  %v6062_v7 = vadd.f32 %v6061_v1, %v6045_v34  ;;  %v9538_v30 = vld [vmem:[%s14140_s6 + $0x50] sm:$0xff]  ;;  %v9539_v41 = vld [vmem:[%s14140_s6 + $0x58] sm:$0xff]  ;;  %v13600_v34 = vpack.c.bf16 %v9544_v15, %v9543_v3  ;;  %v9549_v1 = vld [vmem:[%s14140_s6 + $0x88] sm:$0xff] }
 0xd74   :  { %v9546_v13 = vld [vmem:[%s14140_s6 + $0x78] sm:$0xff]  ;;  %v13615_v36 = vpack.c.bf16 %v9539_v41, %v9538_v30 }
 0xd75   :  { %v9510_v37 = vmul.f32 -1.442695, %v6054_v19  ;;  %v9511_v43 = vmul.f32 -1.442695, %v6062_v7 }
 0xd77   :  { %12192 = vpow2.f32 %v9510_v37  ;;  %v9548_v37 = vld [vmem:[%s14140_s6 + $0x80] sm:$0xff] }
 0xd78   :  { %12194 = vpow2.f32 %v9511_v43  ;;  %v13633_v43 = vpack.c.bf16 %v9549_v1, %v9548_v37  ;;  %v6572_v1 = vld [vmem:[#allocation2 + $0x28] sm:$0x3] }
 0xd7a   :  { %v6136_v31 = vpop.f32.mrb[70].mxu1 }
 0xd7b   :  { %v10937_v20 = vpop.f32.mrb[71].mxu1  ;;  %v6137_v10 = vadd.f32 %v13356_v51, %v6136_v31  ;;  %v9550_v31 = vld [vmem:[%s14140_s6 + $0x90] sm:$0xff] }
 0xd7c   :  { %v9551_v20 = vld [vmem:[%s14140_s6 + $0x98] sm:$0xff] }
 0xd81   :  { %v12193_v32 = vpop.eup %12192 }
 0xd82   :  { %v6058_v35 = vadd.f32 1.0, %v12193_v32  ;;  %v6220_v39 = vpop.f32.mrb[74].mxu0  ;;  %v6294_v45 = vpop.f32.mrb[72].mxu1 }
 0xd83   :  { %v6303_v38 = vadd.f32 %v6302_v42, %v6220_v39  ;;  %v10948_v22 = vpop.f32.mrb[75].mxu0  ;;  %v10959_v52 = vpop.f32.mrb[73].mxu1  ;;  %v6311_v40 = vadd.f32 %v6310_v60, %v6294_v45  ;;  %v9553_v42 = vld [vmem:[%s14140_s6 + $0xa0] sm:$0xff]  ;;  %v9554_v45 = vld [vmem:[%s14140_s6 + $0xa8] sm:$0xff] }
 0xd84   :  { %12196 = vrcp.f32 %v6058_v35  ;;  %v12195_v55 = vpop.eup %12194  ;;  %v13647_v35 = vpack.c.bf16 %v9551_v20, %v9550_v31 }
 0xd85   :  { %v9527_v27 = vmul.f32 -1.442695, %v6303_v38  ;;  %v9528_v49 = vmul.f32 -1.442695, %v6311_v40  ;;  %v6066_v62 = vadd.f32 1.0, %v12195_v55  ;;  %v9555_v40 = vld [vmem:[%s14140_s6 + $0xb0] sm:$0xff] }
 0xd86   :  { %v9556_v55 = vld [vmem:[%s14140_s6 + $0xb8] sm:$0xff] }
 0xd87   :  { %12198 = vpow2.f32 %v9527_v27  ;;  %v13660_v27 = vpack.c.bf16 %v9554_v45, %v9553_v42 }
 0xd88   :  { %12200 = vpow2.f32 %v9528_v49  ;;  %v13676_v49 = vpack.c.bf16 %v9556_v55, %v9555_v40 }
 0xd89   :  { %12202 = vrcp.f32 %v6066_v62  ;;  %v6556_v62 = vld [vmem:[#allocation2 + $0x8] sm:$0x3] }
 0xd8a   :  { %v6385_v26 = vpop.f32.mrb[76].mxu0 }
 0xd8b   :  { %v10970_v63 = vpop.f32.mrb[77].mxu0  ;;  %v6386_v18 = vadd.f32 %v13370_v23, %v6385_v26 }
 0xd8e   :  { %v12197_v47 = vpop.eup %12196 }
 0xd8f   :  { %v6140_v50 = vmul.f32 %v12197_v47, %v6137_v10 }
 0xd91   :  { %v12199_v17 = vpop.eup %12198  ;;  %v6141_v24 = vadd.f32 %v6140_v50, %v6069_v2 }
 0xd92   :  { %v6307_v25 = vadd.f32 1.0, %v12199_v17  ;;  %v12201_v58 = vpop.eup %12200  ;;  %v6564_v17 = vld [vmem:[#allocation2 + $0x18] sm:$0x3] }
 0xd93   :  { %12204 = vtanh.f32 %v6141_v24  ;;  %v12203_v48 = vpop.eup %12202  ;;  %v6315_v59 = vadd.f32 1.0, %v12201_v58 }
 0xd94   :  { %12206 = vrcp.f32 %v6307_v25  ;;  %v6143_v53 = vsub.f32 1.0, %v12203_v48  ;;  %v6145_v46 = vmul.f32 %v12203_v48, %v13488_v61  ;;  %v9545_v61 = vld [vmem:[%s14140_s6 + $0x70] sm:$0xff] }
 0xd95   :  { %12208 = vrcp.f32 %v6315_v59  ;;  %v13627_v7 = vpack.c.bf16 %v9546_v13, %v9545_v61 }
 0xd9d   :  { %v12205_v57 = vpop.eup %12204 }
 0xd9e   :  { %v12207_v21 = vpop.eup %12206  ;;  %v6144_v28 = vmul.f32 %v12205_v57, %v6143_v53 }
 0xd9f   :  { %v6389_v11 = vmul.f32 %v12207_v21, %v6386_v18  ;;  %v12209_v32 = vpop.eup %12208 }
 0xda0   :  { %v13592_v44 = vadd.f32 %v6145_v46, %v6144_v28  ;;  %v6392_v39 = vsub.f32 1.0, %v12209_v32  ;;  %v6394_v52 = vmul.f32 %v12209_v32, %v13516_v9  ;;  %v6813_v28 = vld [vmem:[#allocation2 + $0x46] sm:$0x3] }
 0xda1   :  { %v6390_v19 = vadd.f32 %v6389_v11, %v6318_v16 }
 0xda2   :  { %10980 = vmatmul.mubr.msk.f32.vlgmr.msra.gmra.mrb[74].mxu1 %vm98_vm1, %v13592_v44  ;;  %6147 = vst.msk [vmem:[#allocation4 + $0x6] sm:$0x3] %vm447_vm2, %v13592_v44  ;;  %10991 = vmatmul.mubr.msk.f32.vlgmr.msra.gmra.mrb[78].mxu0 %vm98_vm1, %v13592_v44 }
 0xda3   :  { %12210 = vtanh.f32 %v6390_v19  ;;  %11764 = vmatpush3.bf16.msra.mxu1 %v13590_v56  ;;  %11001 = vmatprep.mubr.msk.f32.mxu1 %vm12322_vm0, %v12323_v6 }
 0xda4   :  { %11765 = vmatprep.subr.bf16.mxu1 %v12320_v0  ;;  %11770 = vmatpush3.bf16.msra.mxu0 %v13600_v34 }
 0xda5   :  { %11771 = vmatprep.subr.bf16.mxu0 %v12320_v0  ;;  %11012 = vmatprep.mubr.msk.f32.mxu0 %vm12322_vm0, %v12323_v6 }
 0xda7   :  { %11767 = vmatpush3.bf16.msra.mxu1 %v13615_v36 }
 0xda8   :  { %11774 = vmatprep.subr.bf16.mxu1 %v12320_v0  ;;  %11773 = vmatpush3.bf16.msra.mxu0 %v13627_v7 }
 0xda9   :  { %11780 = vmatprep.subr.bf16.mxu0 %v12320_v0 }
 0xdaa   :  { %11002 = vmatmul.mubr.msk.f32.vlgmr.msra.gmra.mrb[76].mxu1 %vm98_vm1, %v13592_v44 }
 0xdab   :  { %11776 = vmatpush3.bf16.msra.mxu1 %v13633_v43  ;;  %11023 = vmatprep.mubr.msk.f32.mxu1 %vm12322_vm0, %v12323_v6 }
 0xdac   :  { %11777 = vmatprep.subr.bf16.mxu1 %v12320_v0 }
 0xdad   :  { %v12211_v38 = vpop.eup %12210 }
 0xdae   :  { %v6393_v22 = vmul.f32 %v12211_v38, %v6392_v39 }
 0xdaf   :  { %11779 = vmatpush3.bf16.msra.mxu1 %v13647_v35 }
 0xdb0   :  { %v13662_v60 = vadd.f32 %v6394_v52, %v6393_v22  ;;  %11786 = vmatprep.subr.bf16.mxu1 %v12320_v0 }
 0xdb2   :  { %11013 = vmatmul.mubr.msk.f32.vlgmr.msra.gmra.mrb[80].mxu0 %vm98_vm1, %v13662_v60  ;;  %11024 = vmatmul.mubr.msk.f32.vlgmr.msra.gmra.mrb[78].mxu1 %vm98_vm1, %v13662_v60 }
 0xdb3   :  { %11782 = vmatpush3.bf16.msra.mxu0 %v13660_v27  ;;  %11034 = vmatprep.mubr.msk.f32.mxu0 %vm12322_vm0, %v12323_v6 }
 0xdb4   :  { %11783 = vmatprep.subr.bf16.mxu0 %v12320_v0  ;;  %11788 = vmatpush3.bf16.msra.mxu1 %v13541_v33 }
 0xdb5   :  { %11789 = vmatprep.subr.bf16.mxu1 %v12320_v0  ;;  %11045 = vmatprep.mubr.msk.f32.mxu1 %vm12322_vm0, %v12323_v6 }
 0xdb7   :  { %11785 = vmatpush3.bf16.msra.mxu0 %v13676_v49 }
 0xdb8   :  { %11792 = vmatprep.subr.bf16.mxu0 %v12320_v0  ;;  %11791 = vmatpush3.bf16.msra.mxu1 %v13560_v14 }
 0xdb9   :  { %11798 = vmatprep.subr.bf16.mxu1 %v12320_v0 }
 0xdba   :  { %11035 = vmatmul.mubr.msk.f32.vlgmr.msra.gmra.mrb[82].mxu0 %vm98_vm1, %v13662_v60 }
 0xdbb   :  { %11794 = vmatpush3.bf16.msra.mxu0 %v13549_v8  ;;  %11056 = vmatprep.mubr.msk.f32.mxu0 %vm12322_vm0, %v12323_v6 }
 0xdbc   :  { %11795 = vmatprep.subr.bf16.mxu0 %v12320_v0 }
 0xdbf   :  { %11797 = vmatpush3.bf16.msra.mxu0 %v13569_v29 }
 0xdc0   :  { %11804 = vmatprep.subr.bf16.mxu0 %v12320_v0 }
 0xe75   :  { %v6474_v26 = vpop.f32.mrb[74].mxu1  ;;  %v6548_v63 = vpop.f32.mrb[78].mxu0 }
 0xe76   :  { %v6557_v10 = vadd.f32 %v6556_v62, %v6474_v26  ;;  %v10981_v47 = vpop.f32.mrb[75].mxu1  ;;  %v10992_v50 = vpop.f32.mrb[79].mxu0  ;;  %v6565_v24 = vadd.f32 %v6564_v17, %v6548_v63  ;;  %v6821_v62 = vld [vmem:[#allocation2 + $0x56] sm:$0x3] }
 0xe78   :  { %v9540_v2 = vmul.f32 -1.442695, %v6557_v10  ;;  %v9541_v25 = vmul.f32 -1.442695, %v6565_v24 }
 0xe7a   :  { %12212 = vpow2.f32 %v9540_v2 }
 0xe7b   :  { %12214 = vpow2.f32 %v9541_v25 }
 0xe7d   :  { %v6639_v58 = vpop.f32.mrb[76].mxu1 }
 0xe7e   :  { %v11003_v48 = vpop.f32.mrb[77].mxu1  ;;  %v6640_v61 = vadd.f32 %v13356_v51, %v6639_v58  ;;  %v7059_v58 = vld [vmem:[#allocation2 + $0xa] sm:$0x3] }
 0xe84   :  { %v12213_v59 = vpop.eup %12212 }
 0xe85   :  { %v6561_v53 = vadd.f32 1.0, %v12213_v59  ;;  %v6723_v54 = vpop.f32.mrb[80].mxu0  ;;  %v6797_v57 = vpop.f32.mrb[78].mxu1 }
 0xe86   :  { %v6806_v18 = vadd.f32 %v6805_v4, %v6723_v54  ;;  %v11014_v3 = vpop.f32.mrb[81].mxu0  ;;  %v11025_v15 = vpop.f32.mrb[79].mxu1  ;;  %v6814_v46 = vadd.f32 %v6813_v28, %v6797_v57  ;;  %v7067_v57 = vld [vmem:[#allocation2 + $0x1a] sm:$0x3] }
 0xe87   :  { %12216 = vrcp.f32 %v6561_v53  ;;  %v12215_v11 = vpop.eup %12214 }
 0xe88   :  { %v9557_v21 = vmul.f32 -1.442695, %v6806_v18  ;;  %v9558_v16 = vmul.f32 -1.442695, %v6814_v46  ;;  %v6569_v41 = vadd.f32 1.0, %v12215_v11 }
 0xe8a   :  { %12218 = vpow2.f32 %v9557_v21 }
 0xe8b   :  { %12220 = vpow2.f32 %v9558_v16  ;;  %v7308_v16 = vld [vmem:[#allocation2 + $0x34] sm:$0x3] }
 0xe8c   :  { %12222 = vrcp.f32 %v6569_v41 }
 0xe8d   :  { %v6888_v30 = vpop.f32.mrb[82].mxu0 }
 0xe8e   :  { %v11036_v19 = vpop.f32.mrb[83].mxu0  ;;  %v6889_v52 = vadd.f32 %v13370_v23, %v6888_v30 }
 0xe91   :  { %v12217_v13 = vpop.eup %12216 }
 0xe92   :  { %v6643_v37 = vmul.f32 %v12217_v13, %v6640_v61 }
 0xe94   :  { %v12219_v31 = vpop.eup %12218  ;;  %v6644_v20 = vadd.f32 %v6643_v37, %v6572_v1  ;;  %v7316_v37 = vld [vmem:[#allocation2 + $0x44] sm:$0x3] }
 0xe95   :  { %v6810_v32 = vadd.f32 1.0, %v12219_v31  ;;  %v12221_v39 = vpop.eup %12220 }
 0xe96   :  { %12224 = vtanh.f32 %v6644_v20  ;;  %v12223_v42 = vpop.eup %12222  ;;  %v6818_v45 = vadd.f32 1.0, %v12221_v39 }
 0xe97   :  { %12226 = vrcp.f32 %v6810_v32  ;;  %v6646_v38 = vsub.f32 1.0, %v12223_v42  ;;  %v6648_v51 = vmul.f32 %v12223_v42, %v13592_v44 }
 0xe98   :  { %12228 = vrcp.f32 %v6818_v45  ;;  %v13759_v45 = vld [vmem:[%s14142_s8] ss:$0 sm:$0xff] }
 0xea0   :  { %v12225_v22 = vpop.eup %12224 }
 0xea1   :  { %v12227_v40 = vpop.eup %12226  ;;  %v6647_v55 = vmul.f32 %v12225_v22, %v6646_v38 }
 0xea2   :  { %v6892_v26 = vmul.f32 %v12227_v40, %v6889_v52  ;;  %v12229_v23 = vpop.eup %12228  ;;  %v7075_v40 = vld [vmem:[#allocation2 + $0x2a] sm:$0x3] }
 0xea3   :  { %v13700_v63 = vadd.f32 %v6648_v51, %v6647_v55  ;;  %v6895_v44 = vsub.f32 1.0, %v12229_v23  ;;  %v6897_v2 = vmul.f32 %v12229_v23, %v13662_v60 }
 0xea4   :  { %v6893_v10 = vadd.f32 %v6892_v26, %v6821_v62 }
 0xea5   :  { %11046 = vmatmul.mubr.msk.f32.vlgmr.msra.gmra.mrb[80].mxu1 %vm98_vm1, %v13700_v63  ;;  %11057 = vmatmul.mubr.msk.f32.vlgmr.msra.gmra.mrb[84].mxu0 %vm98_vm1, %v13700_v63 }
 0xea6   :  { %12230 = vtanh.f32 %v6893_v10  ;;  %11800 = vmatpush3.bf16.msra.mxu1 %v13590_v56  ;;  %11067 = vmatprep.mubr.msk.f32.mxu1 %vm12322_vm0, %v12323_v6 }
 0xea7   :  { %11801 = vmatprep.subr.bf16.mxu1 %v12320_v0  ;;  %11806 = vmatpush3.bf16.msra.mxu0 %v13600_v34 }
 0xea8   :  { %11807 = vmatprep.subr.bf16.mxu0 %v12320_v0  ;;  %11078 = vmatprep.mubr.msk.f32.mxu0 %vm12322_vm0, %v12323_v6 }
 0xeaa   :  { %11803 = vmatpush3.bf16.msra.mxu1 %v13615_v36 }
 0xeab   :  { %11810 = vmatprep.subr.bf16.mxu1 %v12320_v0  ;;  %11809 = vmatpush3.bf16.msra.mxu0 %v13627_v7 }
 0xeac   :  { %11816 = vmatprep.subr.bf16.mxu0 %v12320_v0 }
 0xead   :  { %11068 = vmatmul.mubr.msk.f32.vlgmr.msra.gmra.mrb[82].mxu1 %vm98_vm1, %v13700_v63 }
 0xeae   :  { %11812 = vmatpush3.bf16.msra.mxu1 %v13633_v43  ;;  %11089 = vmatprep.mubr.msk.f32.mxu1 %vm12322_vm0, %v12323_v6 }
 0xeaf   :  { %11813 = vmatprep.subr.bf16.mxu1 %v12320_v0 }
 0xeb0   :  { %v12231_v47 = vpop.eup %12230 }
 0xeb1   :  { %v6896_v50 = vmul.f32 %v12231_v47, %v6895_v44 }
 0xeb2   :  { %11815 = vmatpush3.bf16.msra.mxu1 %v13647_v35 }
 0xeb3   :  { %v13726_v17 = vadd.f32 %v6897_v2, %v6896_v50  ;;  %11822 = vmatprep.subr.bf16.mxu1 %v12320_v0  ;;  %v13765_v50 = vld [vmem:[%s14142_s8 + $0x1] ss:$0 sm:$0xff] }
 0xeb5   :  { %6900 = vrot.lane.b32.xlu0 %v13726_v17, %s12325_s1  ;;  %11079 = vmatmul.mubr.msk.f32.vlgmr.msra.gmra.mrb[86].mxu0 %vm98_vm1, %v13726_v17 }
 0xeb6   :  { %11090 = vmatmul.mubr.msk.f32.vlgmr.msra.gmra.mrb[84].mxu1 %vm98_vm1, %v13726_v17  ;;  %11818 = vmatpush3.bf16.msra.mxu0 %v13660_v27 }
 0xeb7   :  { %11819 = vmatprep.subr.bf16.mxu0 %v12320_v0  ;;  %11100 = vmatprep.mubr.msk.f32.mxu0 %vm12322_vm0, %v12323_v6 }
 0xeb8   :  { %11824 = vmatpush3.bf16.msra.mxu1 %v13541_v33  ;;  %11111 = vmatprep.mubr.msk.f32.mxu1 %vm12322_vm0, %v12323_v6 }
 0xeb9   :  { %11825 = vmatprep.subr.bf16.mxu1 %v12320_v0 }
 0xeba   :  { %11821 = vmatpush3.bf16.msra.mxu0 %v13676_v49 }
 0xebb   :  { %11828 = vmatprep.subr.bf16.mxu0 %v12320_v0 }
 0xebc   :  { %11827 = vmatpush3.bf16.msra.mxu1 %v13560_v14 }
 0xebd   :  { %11101 = vmatmul.mubr.msk.f32.vlgmr.msra.gmra.mrb[88].mxu0 %vm98_vm1, %v13726_v17  ;;  %11834 = vmatprep.subr.bf16.mxu1 %v12320_v0 }
 0xebe   :  { %11830 = vmatpush3.bf16.msra.mxu0 %v13549_v8  ;;  %11122 = vmatprep.mubr.msk.f32.mxu0 %vm12322_vm0, %v12323_v6 }
 0xebf   :  { %11831 = vmatprep.subr.bf16.mxu0 %v12320_v0 }
 0xec2   :  { %11833 = vmatpush3.bf16.msra.mxu0 %v13569_v29 }
 0xec3   :  { %11840 = vmatprep.subr.bf16.mxu0 %v12320_v0 }
 0xf27   :  { %v6901_v24 = vpop.permute.xlu0 %6900 }
 0xf28   :  { %6903 = vst.msk [vmem:[#allocation4 + $0x6] sm:$0x3] %vm706_vm3, %v6901_v24 }
 0xf78   :  { %v6977_v25 = vpop.f32.mrb[80].mxu1  ;;  %v7051_v48 = vpop.f32.mrb[84].mxu0 }
 0xf79   :  { %v7060_v59 = vadd.f32 %v7059_v58, %v6977_v25  ;;  %v11047_v53 = vpop.f32.mrb[81].mxu1  ;;  %v11058_v54 = vpop.f32.mrb[85].mxu0  ;;  %v7068_v18 = vadd.f32 %v7067_v57, %v7051_v48 }
 0xf7b   :  { %v9570_v4 = vmul.f32 -1.442695, %v7060_v59  ;;  %v9571_v3 = vmul.f32 -1.442695, %v7068_v18  ;;  %v7324_v59 = vld [vmem:[#allocation2 + $0x54] sm:$0x3] }
 0xf7d   :  { %12232 = vpow2.f32 %v9570_v4 }
 0xf7e   :  { %12234 = vpow2.f32 %v9571_v3 }
 0xf80   :  { %v7142_v15 = vpop.f32.mrb[82].mxu1 }
 0xf81   :  { %v11069_v21 = vpop.f32.mrb[83].mxu1  ;;  %v7143_v38 = vadd.f32 %v13759_v45, %v7142_v15 }
 0xf87   :  { %v12233_v28 = vpop.eup %12232 }
 0xf88   :  { %v7064_v46 = vadd.f32 1.0, %v12233_v28  ;;  %v7226_v11 = vpop.f32.mrb[86].mxu0  ;;  %v12235_v31 = vpop.eup %12234 }
 0xf89   :  { %v7309_v30 = vadd.f32 %v7308_v16, %v7226_v11  ;;  %v7300_v41 = vpop.f32.mrb[84].mxu1  ;;  %v11080_v19 = vpop.f32.mrb[87].mxu0  ;;  %v7072_v39 = vadd.f32 1.0, %v12235_v31  ;;  %v7811_v31 = vld [vmem:[#allocation2 + $0x32] sm:$0x3] }
 0xf8a   :  { %12236 = vrcp.f32 %v7064_v46  ;;  %v11091_v61 = vpop.f32.mrb[85].mxu1  ;;  %v7317_v1 = vadd.f32 %v7316_v37, %v7300_v41 }
 0xf8b   :  { %v9587_v13 = vmul.f32 -1.442695, %v7309_v30 }
 0xf8c   :  { %v9588_v20 = vmul.f32 -1.442695, %v7317_v1 }
 0xf8d   :  { %12238 = vpow2.f32 %v9587_v13 }
 0xf8e   :  { %12240 = vpow2.f32 %v9588_v20 }
 0xf8f   :  { %12242 = vrcp.f32 %v7072_v39 }
 0xf90   :  { %v7391_v32 = vpop.f32.mrb[88].mxu0 }
 0xf91   :  { %v11102_v42 = vpop.f32.mrb[89].mxu0  ;;  %v7392_v2 = vadd.f32 %v13765_v50, %v7391_v32 }
 0xf94   :  { %v12237_v22 = vpop.eup %12236 }
 0xf95   :  { %v7146_v52 = vmul.f32 %v12237_v22, %v7143_v38  ;;  %v7819_v22 = vld [vmem:[#allocation2 + $0x42] sm:$0x3] }
 0xf97   :  { %v12239_v55 = vpop.eup %12238  ;;  %v7147_v51 = vadd.f32 %v7146_v52, %v7075_v40 }
 0xf98   :  { %v7313_v26 = vadd.f32 1.0, %v12239_v55  ;;  %v12241_v62 = vpop.eup %12240 }
 0xf99   :  { %12244 = vtanh.f32 %v7147_v51  ;;  %v12243_v10 = vpop.eup %12242  ;;  %v7321_v23 = vadd.f32 1.0, %v12241_v62 }
 0xf9a   :  { %12246 = vrcp.f32 %v7313_v26  ;;  %v7149_v44 = vsub.f32 1.0, %v12243_v10  ;;  %v7151_v58 = vmul.f32 %v12243_v10, %v13700_v63 }
 0xf9b   :  { %12248 = vrcp.f32 %v7321_v23 }
 0xfa3   :  { %v12245_v47 = vpop.eup %12244 }
 0xfa4   :  { %v12247_v24 = vpop.eup %12246  ;;  %v7150_v25 = vmul.f32 %v12245_v47, %v7149_v44  ;;  %v7578_v47 = vld [vmem:[#allocation2 + $0x2c] sm:$0x3] }
 0xfa5   :  { %v7395_v48 = vmul.f32 %v12247_v24, %v7392_v2  ;;  %v12249_v4 = vpop.eup %12248 }
 0xfa6   :  { %v13769_v53 = vadd.f32 %v7151_v58, %v7150_v25  ;;  %v7398_v57 = vsub.f32 1.0, %v12249_v4  ;;  %v7400_v15 = vmul.f32 %v12249_v4, %v13726_v17  ;;  %v7562_v17 = vld [vmem:[#allocation2 + $0xc] sm:$0x3] }
 0xfa7   :  { %v7396_v54 = vadd.f32 %v7395_v48, %v7324_v59 }
 0xfa8   :  { %11112 = vmatmul.mubr.msk.f32.vlgmr.msra.gmra.mrb[86].mxu1 %vm98_vm1, %v13769_v53  ;;  %11123 = vmatmul.mubr.msk.f32.vlgmr.msra.gmra.mrb[90].mxu0 %vm98_vm1, %v13769_v53 }
 0xfa9   :  { %12250 = vtanh.f32 %v7396_v54  ;;  %11836 = vmatpush3.bf16.msra.mxu1 %v13590_v56  ;;  %11133 = vmatprep.mubr.msk.f32.mxu1 %vm12322_vm0, %v12323_v6 }
 0xfaa   :  { %11837 = vmatprep.subr.bf16.mxu1 %v12320_v0  ;;  %11842 = vmatpush3.bf16.msra.mxu0 %v13600_v34 }
 0xfab   :  { %11843 = vmatprep.subr.bf16.mxu0 %v12320_v0  ;;  %11144 = vmatprep.mubr.msk.f32.mxu0 %vm12322_vm0, %v12323_v6 }
 0xfad   :  { %11839 = vmatpush3.bf16.msra.mxu1 %v13615_v36 }
 0xfae   :  { %11846 = vmatprep.subr.bf16.mxu1 %v12320_v0  ;;  %11845 = vmatpush3.bf16.msra.mxu0 %v13627_v7 }
 0xfaf   :  { %11852 = vmatprep.subr.bf16.mxu0 %v12320_v0 }
 0xfb0   :  { %11134 = vmatmul.mubr.msk.f32.vlgmr.msra.gmra.mrb[88].mxu1 %vm98_vm1, %v13769_v53 }
 0xfb1   :  { %11848 = vmatpush3.bf16.msra.mxu1 %v13633_v43  ;;  %11155 = vmatprep.mubr.msk.f32.mxu1 %vm12322_vm0, %v12323_v6 }
 0xfb2   :  { %11849 = vmatprep.subr.bf16.mxu1 %v12320_v0 }
 0xfb3   :  { %v12251_v18 = vpop.eup %12250 }
 0xfb4   :  { %v7399_v3 = vmul.f32 %v12251_v18, %v7398_v57 }
 0xfb5   :  { %11851 = vmatpush3.bf16.msra.mxu1 %v13647_v35 }
 0xfb6   :  { %v13795_v21 = vadd.f32 %v7400_v15, %v7399_v3  ;;  %11858 = vmatprep.subr.bf16.mxu1 %v12320_v0 }
 0xfb8   :  { %7403 = vrot.lane.b32.xlu1 %v13795_v21, %s12325_s1  ;;  %11145 = vmatmul.mubr.msk.f32.vlgmr.msra.gmra.mrb[92].mxu0 %vm98_vm1, %v13795_v21 }
 0xfb9   :  { %11156 = vmatmul.mubr.msk.f32.vlgmr.msra.gmra.mrb[90].mxu1 %vm98_vm1, %v13795_v21  ;;  %11854 = vmatpush3.bf16.msra.mxu0 %v13660_v27 }
 0xfba   :  { %11855 = vmatprep.subr.bf16.mxu0 %v12320_v0  ;;  %11166 = vmatprep.mubr.msk.f32.mxu0 %vm12322_vm0, %v12323_v6 }
 0xfbb   :  { %11860 = vmatpush3.bf16.msra.mxu1 %v13541_v33  ;;  %11177 = vmatprep.mubr.msk.f32.mxu1 %vm12322_vm0, %v12323_v6 }
 0xfbc   :  { %11861 = vmatprep.subr.bf16.mxu1 %v12320_v0 }
 0xfbd   :  { %11857 = vmatpush3.bf16.msra.mxu0 %v13676_v49 }
 0xfbe   :  { %11864 = vmatprep.subr.bf16.mxu0 %v12320_v0 }
 0xfbf   :  { %11863 = vmatpush3.bf16.msra.mxu1 %v13560_v14 }
 0xfc0   :  { %11167 = vmatmul.mubr.msk.f32.vlgmr.msra.gmra.mrb[94].mxu0 %vm98_vm1, %v13795_v21  ;;  %11870 = vmatprep.subr.bf16.mxu1 %v12320_v0 }
 0xfc1   :  { %11866 = vmatpush3.bf16.msra.mxu0 %v13549_v8  ;;  %11188 = vmatprep.mubr.msk.f32.mxu0 %vm12322_vm0, %v12323_v6  ;;  %v7570_v8 = vld [vmem:[#allocation2 + $0x1c] sm:$0x3] }
 0xfc2   :  { %11867 = vmatprep.subr.bf16.mxu0 %v12320_v0 }
 0xfc5   :  { %11869 = vmatpush3.bf16.msra.mxu0 %v13569_v29 }
 0xfc6   :  { %11876 = vmatprep.subr.bf16.mxu0 %v12320_v0 }
0x102a   :  { %v7404_v33 = vpop.permute.xlu1 %7403 }
0x102b   :  { %7406 = vst.msk [vmem:[#allocation4 + $0x4] sm:$0x3] %vm706_vm3, %v7404_v33 }
0x107b   :  { %v7480_v14 = vpop.f32.mrb[86].mxu1  ;;  %v7554_v28 = vpop.f32.mrb[90].mxu0 }
0x107c   :  { %v7563_v46 = vadd.f32 %v7562_v17, %v7480_v14  ;;  %v11113_v11 = vpop.f32.mrb[87].mxu1  ;;  %v11124_v16 = vpop.f32.mrb[91].mxu0  ;;  %v7571_v41 = vadd.f32 %v7570_v8, %v7554_v28  ;;  %v7827_v14 = vld [vmem:[#allocation2 + $0x52] sm:$0x3] }
0x107e   :  { %v9600_v30 = vmul.f32 -1.442695, %v7563_v46  ;;  %v9601_v19 = vmul.f32 -1.442695, %v7571_v41  ;;  %v8073_v41 = vld [vmem:[#allocation2 + $0x1e] sm:$0x3] }
0x1080   :  { %12252 = vpow2.f32 %v9600_v30 }
0x1081   :  { %12254 = vpow2.f32 %v9601_v19 }
0x1083   :  { %v7645_v61 = vpop.f32.mrb[88].mxu1 }
0x1084   :  { %v11135_v13 = vpop.f32.mrb[89].mxu1  ;;  %v7646_v10 = vadd.f32 %v13759_v45, %v7645_v61 }
0x108a   :  { %v12253_v29 = vpop.eup %12252 }
0x108b   :  { %v7567_v37 = vadd.f32 1.0, %v12253_v29  ;;  %v7729_v1 = vpop.f32.mrb[92].mxu0  ;;  %v12255_v40 = vpop.eup %12254 }
0x108c   :  { %v7812_v20 = vadd.f32 %v7811_v31, %v7729_v1  ;;  %v7803_v32 = vpop.f32.mrb[90].mxu1  ;;  %v11146_v39 = vpop.f32.mrb[93].mxu0  ;;  %v7575_v26 = vadd.f32 1.0, %v12255_v40 }
0x108d   :  { %12256 = vrcp.f32 %v7567_v37  ;;  %v11157_v42 = vpop.f32.mrb[91].mxu1  ;;  %v7820_v52 = vadd.f32 %v7819_v22, %v7803_v32  ;;  %v8322_v22 = vld [vmem:[#allocation2 + $0x40] sm:$0x3] }
0x108e   :  { %v9617_v38 = vmul.f32 -1.442695, %v7812_v20  ;;  %v8314_v20 = vld [vmem:[#allocation2 + $0x30] sm:$0x3] }
0x108f   :  { %v9618_v55 = vmul.f32 -1.442695, %v7820_v52 }
0x1090   :  { %12258 = vpow2.f32 %v9617_v38 }
0x1091   :  { %12260 = vpow2.f32 %v9618_v55 }
0x1092   :  { %12262 = vrcp.f32 %v7575_v26 }
0x1093   :  { %v7894_v51 = vpop.f32.mrb[94].mxu0 }
0x1094   :  { %v11168_v62 = vpop.f32.mrb[95].mxu0  ;;  %v7895_v57 = vadd.f32 %v13765_v50, %v7894_v51 }
0x1097   :  { %v12257_v23 = vpop.eup %12256 }
0x1098   :  { %v7649_v44 = vmul.f32 %v12257_v23, %v7646_v10 }
0x109a   :  { %v12259_v2 = vpop.eup %12258  ;;  %v7650_v24 = vadd.f32 %v7649_v44, %v7578_v47  ;;  %v8081_v47 = vld [vmem:[#allocation2 + $0x2e] sm:$0x3] }
0x109b   :  { %v7816_v25 = vadd.f32 1.0, %v12259_v2  ;;  %v12261_v58 = vpop.eup %12260 }
0x109c   :  { %12264 = vtanh.f32 %v7650_v24  ;;  %v12263_v48 = vpop.eup %12262  ;;  %v7824_v59 = vadd.f32 1.0, %v12261_v58 }
0x109d   :  { %12266 = vrcp.f32 %v7816_v25  ;;  %v7652_v54 = vsub.f32 1.0, %v12263_v48  ;;  %v7654_v15 = vmul.f32 %v12263_v48, %v13769_v53 }
0x109e   :  { %12268 = vrcp.f32 %v7824_v59 }
0x10a6   :  { %v12265_v4 = vpop.eup %12264 }
0x10a7   :  { %v12267_v18 = vpop.eup %12266  ;;  %v7653_v3 = vmul.f32 %v12265_v4, %v7652_v54 }
0x10a8   :  { %v7898_v33 = vmul.f32 %v12267_v18, %v7895_v57  ;;  %v12269_v46 = vpop.eup %12268 }
0x10a9   :  { %v13828_v17 = vadd.f32 %v7654_v15, %v7653_v3  ;;  %v7903_v11 = vmul.f32 %v12269_v46, %v13795_v21 }
0x10aa   :  { %v7899_v28 = vadd.f32 %v7898_v33, %v7827_v14  ;;  %v8330_v14 = vld [vmem:[#allocation2 + $0x50] sm:$0x3] }
0x10ab   :  { %11178 = vmatmul.mubr.msk.f32.vlgmr.msra.gmra.mrb[92].mxu1 %vm98_vm1, %v13828_v17  ;;  %11189 = vmatmul.mubr.msk.f32.vlgmr.msra.gmra.mrb[96].mxu0 %vm98_vm1, %v13828_v17 }
0x10ac   :  { %12270 = vtanh.f32 %v7899_v28  ;;  %11872 = vmatpush3.bf16.msra.mxu1 %v13590_v56  ;;  %11199 = vmatprep.mubr.msk.f32.mxu1 %vm12322_vm0, %v12323_v6  ;;  %v7901_v56 = vsub.f32 1.0, %v12269_v46 }
0x10ad   :  { %11873 = vmatprep.subr.bf16.mxu1 %v12320_v0  ;;  %11878 = vmatpush3.bf16.msra.mxu0 %v13600_v34 }
0x10ae   :  { %11879 = vmatprep.subr.bf16.mxu0 %v12320_v0  ;;  %11210 = vmatprep.mubr.msk.f32.mxu0 %vm12322_vm0, %v12323_v6 }
0x10b0   :  { %11875 = vmatpush3.bf16.msra.mxu1 %v13615_v36 }
0x10b1   :  { %11882 = vmatprep.subr.bf16.mxu1 %v12320_v0  ;;  %11881 = vmatpush3.bf16.msra.mxu0 %v13627_v7 }
0x10b2   :  { %11888 = vmatprep.subr.bf16.mxu0 %v12320_v0 }
0x10b3   :  { %11200 = vmatmul.mubr.msk.f32.vlgmr.msra.gmra.mrb[94].mxu1 %vm98_vm1, %v13828_v17 }
0x10b4   :  { %11884 = vmatpush3.bf16.msra.mxu1 %v13633_v43  ;;  %11221 = vmatprep.mubr.msk.f32.mxu1 %vm12322_vm0, %v12323_v6 }
0x10b5   :  { %11885 = vmatprep.subr.bf16.mxu1 %v12320_v0 }
0x10b6   :  { %v12271_v34 = vpop.eup %12270 }
0x10b7   :  { %v7902_v36 = vmul.f32 %v12271_v34, %v7901_v56 }
0x10b8   :  { %11887 = vmatpush3.bf16.msra.mxu1 %v13647_v35 }
0x10b9   :  { %v13854_v7 = vadd.f32 %v7903_v11, %v7902_v36  ;;  %11894 = vmatprep.subr.bf16.mxu1 %v12320_v0 }
0x10bb   :  { %7906 = vrot.lane.b32.xlu0 %v13854_v7, %s12325_s1  ;;  %11211 = vmatmul.mubr.msk.f32.vlgmr.msra.gmra.mrb[98].mxu0 %vm98_vm1, %v13854_v7 }
0x10bc   :  { %11222 = vmatmul.mubr.msk.f32.vlgmr.msra.gmra.mrb[96].mxu1 %vm98_vm1, %v13854_v7  ;;  %11890 = vmatpush3.bf16.msra.mxu0 %v13660_v27 }
0x10bd   :  { %11891 = vmatprep.subr.bf16.mxu0 %v12320_v0  ;;  %11232 = vmatprep.mubr.msk.f32.mxu0 %vm12322_vm0, %v12323_v6 }
0x10be   :  { %11251 = vmatprep.mubr.msk.f32.mxu1 %vm12322_vm0, %v12323_v6 }
0x10bf   :  { %4888 = vrot.lane.b32.xlu0 %v13400_v12, %s12325_s1 }
0x10c0   :  { %11893 = vmatpush3.bf16.msra.mxu0 %v13676_v49  ;;  %v8065_v49 = vld [vmem:[#allocation2 + $0xe] sm:$0x3] }
0x10c1   :  { %11906 = vmatprep.subr.bf16.mxu0 %v12320_v0 }
0x10c3   :  { %11233 = vmatmul.mubr.msk.f32.vlgmr.msra.gmra.mrb[100].mxu0 %vm98_vm1, %v13854_v7  ;;  %5894 = vrot.lane.b32.xlu0 %v13516_v9, %s12325_s1 }
0x10c4   :  { %11270 = vmatprep.mubr.msk.f32.mxu0 %vm12322_vm0, %v12323_v6 }
0x112d   :  { %v7907_v43 = vpop.permute.xlu0 %7906 }
0x112e   :  { %7909 = vst.msk [vmem:[#allocation4 + $0x2] sm:$0x3] %vm706_vm3, %v7907_v43 }
0x1131   :  { %v4889_v35 = vpop.permute.xlu0 %4888 }
0x1132   :  { %4891 = vst.msk [vmem:[#allocation4 + $0xe] sm:$0x3] %vm706_vm3, %v4889_v35  ;;  %v9650_v35 = vld [vmem:[%s14143_s9] ss:$0 sm:$0xff] }
0x1135   :  { %v5895_v12 = vpop.permute.xlu0 %5894 }
0x1136   :  { %5897 = vst.msk [vmem:[#allocation4 + $0xa] sm:$0x3] %vm706_vm3, %v5895_v12 }
0x1137   :  { %7153 = vst.msk [vmem:[#allocation4 + $0xa] sm:$0x3] %vm447_vm2, %v13769_v53 }
0x117e   :  { %v7983_v27 = vpop.f32.mrb[92].mxu1  ;;  %v8057_v21 = vpop.f32.mrb[96].mxu0 }
0x117f   :  { %v8066_v16 = vadd.f32 %v8065_v49, %v7983_v27  ;;  %v11179_v9 = vpop.f32.mrb[93].mxu1  ;;  %v11190_v30 = vpop.f32.mrb[97].mxu0  ;;  %v8074_v19 = vadd.f32 %v8073_v41, %v8057_v21 }
0x1181   :  { %v9630_v8 = vmul.f32 -1.442695, %v8066_v16  ;;  %v9631_v61 = vmul.f32 -1.442695, %v8074_v19 }
0x1183   :  { %12272 = vpow2.f32 %v9630_v8 }
0x1184   :  { %12274 = vpow2.f32 %v9631_v61 }
0x1186   :  { %v8148_v13 = vpop.f32.mrb[94].mxu1 }
0x1187   :  { %v11201_v29 = vpop.f32.mrb[95].mxu1  ;;  %v8149_v10 = vadd.f32 %v13759_v45, %v8148_v13 }
0x118d   :  { %v12273_v37 = vpop.eup %12272 }
0x118e   :  { %v8070_v1 = vadd.f32 1.0, %v12273_v37  ;;  %v8232_v31 = vpop.f32.mrb[98].mxu0  ;;  %v12275_v40 = vpop.eup %12274  ;;  %v8576_v37 = vld [vmem:[%s14146_s12] sm:$0xff] }
0x118f   :  { %v8315_v32 = vadd.f32 %v8314_v20, %v8232_v31  ;;  %v8306_v53 = vpop.f32.mrb[96].mxu1  ;;  %v11212_v39 = vpop.f32.mrb[99].mxu0  ;;  %v8078_v26 = vadd.f32 1.0, %v12275_v40 }
0x1190   :  { %12276 = vrcp.f32 %v8070_v1  ;;  %v11223_v42 = vpop.f32.mrb[97].mxu1  ;;  %v8323_v52 = vadd.f32 %v8322_v22, %v8306_v53 }
0x1191   :  { %v9647_v38 = vmul.f32 -1.442695, %v8315_v32  ;;  %v8577_v32 = vld [vmem:[%s14146_s12 + $0x8] sm:$0xff] }
0x1192   :  { %v9648_v55 = vmul.f32 -1.442695, %v8323_v52 }
0x1193   :  { %12278 = vpow2.f32 %v9647_v38  ;;  %v8433_v38 = vld [vmem:[%s14145_s10 + $0x8] sm:$0xff] }
0x1194   :  { %12280 = vpow2.f32 %v9648_v55 }
0x1195   :  { %12282 = vrcp.f32 %v8078_v26 }
0x1196   :  { %v8397_v51 = vpop.f32.mrb[100].mxu0 }
0x1197   :  { %v11234_v62 = vpop.f32.mrb[101].mxu0  ;;  %v8398_v57 = vadd.f32 %v13765_v50, %v8397_v51  ;;  %v13894_v50 = vld [vmem:[#allocation3] sm:$0xff] }
0x1198   :  { %v8424_v12 = vmul.f32 %v9650_v35, %v13894_v50 }
0x119a   :  { %v12277_v23 = vpop.eup %12276  ;;  %v8426_v27 = vsel %vm4292_vm4, %v8424_v12, 0.0 }
0x119b   :  { %v8152_v44 = vmul.f32 %v12277_v23, %v8149_v10 }
0x119d   :  { %v12279_v2 = vpop.eup %12278  ;;  %v8153_v24 = vadd.f32 %v8152_v44, %v8081_v47 }
0x119e   :  { %v8319_v25 = vadd.f32 1.0, %v12279_v2  ;;  %v12281_v58 = vpop.eup %12280 }
0x119f   :  { %12284 = vtanh.f32 %v8153_v24  ;;  %v12283_v48 = vpop.eup %12282  ;;  %v8327_v59 = vadd.f32 1.0, %v12281_v58 }
0x11a0   :  { %12286 = vrcp.f32 %v8319_v25  ;;  %v8155_v54 = vsub.f32 1.0, %v12283_v48  ;;  %v8157_v45 = vmul.f32 %v12283_v48, %v13828_v17 }
0x11a1   :  { %12288 = vrcp.f32 %v8327_v59 }
0x11a9   :  { %v12285_v4 = vpop.eup %12284 }
0x11aa   :  { %v12287_v18 = vpop.eup %12286  ;;  %v8156_v3 = vmul.f32 %v12285_v4, %v8155_v54 }
0x11ab   :  { %v8401_v15 = vmul.f32 %v12287_v18, %v8398_v57  ;;  %v12289_v46 = vpop.eup %12288 }
0x11ac   :  { %v8158_v33 = vadd.f32 %v8157_v45, %v8156_v3  ;;  %v8404_v56 = vsub.f32 1.0, %v12289_v46  ;;  %v8406_v11 = vmul.f32 %v12289_v46, %v13854_v7 }
0x11ad   :  { %v8402_v28 = vadd.f32 %v8401_v15, %v8330_v14 }
0x11ae   :  { %8159 = vst.msk [vmem:[#allocation4 + $0xe] sm:$0x3] %vm447_vm2, %v8158_v33 }
0x11af   :  { %12290 = vtanh.f32 %v8402_v28 }
0x11b9   :  { %v12291_v34 = vpop.eup %12290 }
0x11ba   :  { %v8405_v36 = vmul.f32 %v12291_v34, %v8404_v56 }
0x11bc   :  { %v8407_v43 = vadd.f32 %v8406_v11, %v8405_v36 }
0x11be   :  { %8409 = vrot.lane.b32.xlu1 %v8407_v43, %s12325_s1 }
0x11c2   :  { %5391 = vrot.lane.b32.xlu1 %v13458_v5, %s12325_s1  ;;  %v9651_v5 = vld [vmem:[%s14144_s11] ss:$0 sm:$0xff] }
0x11c6   :  { %6397 = vrot.lane.b32.xlu1 %v13662_v60, %s12325_s1 }
0x11ea   :  { %8427 = vadd.xlane.f32.xlu1 %v8426_v27 }
0x1230   :  { %v8410_v7 = vpop.permute.xlu1 %8409 }
0x1231   :  { %8412 = vst.msk [vmem:[#allocation4] sm:$0x3] %vm706_vm3, %v8410_v7 }
0x1234   :  { %v5392_v49 = vpop.permute.xlu1 %5391 }
0x1235   :  { %5394 = vst.msk [vmem:[#allocation4 + $0xc] sm:$0x3] %vm706_vm3, %v5392_v49 }
0x1236   :  { %7656 = vst.msk [vmem:[#allocation4 + $0xc] sm:$0x3] %vm447_vm2, %v13828_v17  ;;  %v13917_v17 = vld [vmem:[#allocation3 + $0x8] sm:$0xff] }
0x1237   :  { %v8425_v19 = vmul.f32 %v9650_v35, %v13917_v17 }
0x1238   :  { %v6398_v60 = vpop.permute.xlu1 %6397  ;;  %v13908_v21 = vld [vmem:[#allocation4] sm:$0xff] }
0x1239   :  { %6400 = vst.msk [vmem:[#allocation4 + $0x8] sm:$0x3] %vm706_vm3, %v6398_v60  ;;  %v8568_v16 = vmul.f32 %v9651_v5, %v13908_v21  ;;  %v8429_v61 = vsel %vm4292_vm4, %v8425_v19, 0.0 }
0x123a   :  { %6650 = vst.msk [vmem:[#allocation4 + $0x8] sm:$0x3] %vm447_vm2, %v13700_v63  ;;  %v8432_v63 = vld [vmem:[%s14145_s10] sm:$0xff] }
0x123b   :  { %v8570_v9 = vsel %vm4292_vm4, %v8568_v16, 0.0 }
0x123c   :  { %8571 = vadd.xlane.f32.xlu0 %v8570_v9 }
0x1241   :  { %v13915_v30 = vld [vmem:[#allocation4 + $0x8] sm:$0xff] }
0x1242   :  { %v8569_v8 = vmul.f32 %v9651_v5, %v13915_v30 }
0x1244   :  { %v8573_v41 = vsel %vm4292_vm4, %v8569_v8, 0.0 }
0x1245   :  { %8574 = vadd.xlane.f32.xlu0 %v8573_v41 }
0x1249   :  { %8430 = vadd.xlane.f32.xlu0 %v8429_v61 }
0x1277   :  { %v8428_v13 = vpop.xlane.xlu1 %8427 }
0x1278   :  { %v8434_v29 = vadd.f32 %v8432_v63, %v8428_v13 }
0x127a   :  { %12292 = vtanh.f32 %v8434_v29 }
0x1284   :  { %v12293_v20 = vpop.eup %12292 }
0x1285   :  { %v8438_v39 = vmul.f32 1.442695, %v12293_v20 }
0x12c9   :  { %v8572_v1 = vpop.xlane.xlu0 %8571 }
0x12ca   :  { %v8578_v31 = vadd.f32 %v8576_v37, %v8572_v1 }
0x12cc   :  { %12294 = vtanh.f32 %v8578_v31 }
0x12d2   :  { %v8575_v53 = vpop.xlane.xlu0 %8574 }
0x12d3   :  { %v8579_v42 = vadd.f32 %v8577_v32, %v8575_v53 }
0x12d5   :  { %12296 = vtanh.f32 %v8579_v42 }
0x12d6   :  { %v12295_v22 = vpop.eup %12294  ;;  %v8431_v52 = vpop.xlane.xlu0 %8430  ;;  %12298 = vpow2.f32 %v8438_v39 }
0x12d7   :  { %v8582_v40 = vmul.f32 1.442695, %v12295_v22  ;;  %v8435_v55 = vadd.f32 %v8433_v38, %v8431_v52 }
0x12d9   :  { %12300 = vpow2.f32 %v8582_v40 }
0x12da   :  { %12302 = vtanh.f32 %v8435_v55 }
0x12df   :  { %v12297_v51 = vpop.eup %12296 }
0x12e0   :  { %v8584_v26 = vmul.f32 1.442695, %v12297_v51  ;;  %v12299_v62 = vpop.eup %12298 }
0x12e1   :  { %v8443_v44 = vrot.slane %v12299_v62, 2  ;;  %v8446_v54 = vrot.slane %v12299_v62, 4  ;;  %v8449_v15 = vrot.slane %v12299_v62, 6 }
0x12e2   :  { %12304 = vpow2.f32 %v8584_v26 }
0x12e3   :  { %v13935_v10 = vpop.eup %12300  ;;  %v8445_v58 = vadd.f32 %v12299_v62, %v8443_v44 }
0x12e4   :  { %v12303_v23 = vpop.eup %12302  ;;  %v8587_v47 = vrot.slane %v13935_v10, 2  ;;  %v8590_v25 = vrot.slane %v13935_v10, 4  ;;  %v8593_v59 = vrot.slane %v13935_v10, 6 }
0x12e5   :  { %v8440_v2 = vmul.f32 1.442695, %v12303_v23  ;;  %v8448_v18 = vadd.f32 %v8446_v54, %v8445_v58  ;;  %v8743_v54 = vld [vmem:[%s14147_s13 + $0x48] sm:$0xff] }
0x12e6   :  { %v8589_v24 = vadd.f32 %v13935_v10, %v8587_v47 }
0x12e7   :  { %12306 = vpow2.f32 %v8440_v2  ;;  %v8451_v33 = vadd.f32 %v8449_v15, %v8448_v18 }
0x12e8   :  { %v8592_v48 = vadd.f32 %v8590_v25, %v8589_v24 }
0x12ea   :  { %v8595_v4 = vadd.f32 %v8593_v59, %v8592_v48  ;;  %v8742_v59 = vld [vmem:[%s14147_s13 + $0x40] sm:$0xff] }
0x12ec   :  { %v13941_v57 = vpop.eup %12304 }
0x12ed   :  { %v8596_v45 = vadd.f32 %v13941_v57, %v8595_v4  ;;  %v8598_v3 = vrot.slane %v13941_v57, 2  ;;  %v8601_v34 = vrot.slane %v13941_v57, 4  ;;  %v8604_v27 = vrot.slane %v13941_v57, 6 }
0x12ee   :  { %v11895_v4 = vpack.c.bf16 %v8743_v54, %v8742_v59  ;;  %v8710_v59 = vrot.slane %v13908_v21, 4 }
0x12ef   :  { %v8600_v14 = vadd.f32 %v8598_v3, %v8596_v45  ;;  %v8734_v3 = vld [vmem:[%s14147_s13] sm:$0xff] }
0x12f0   :  { %11896 = vmatpush3.bf16.msra.mxu1 %v11895_v4 }
0x12f1   :  { %v13945_v28 = vpop.eup %12306  ;;  %v8603_v43 = vadd.f32 %v8601_v34, %v8600_v14  ;;  %11897 = vmatprep.subr.bf16.mxu1 %v12320_v0  ;;  %v8746_v34 = vld [vmem:[%s14147_s13 + $0x60] sm:$0xff] }
0x12f2   :  { %v8452_v46 = vadd.f32 %v13945_v28, %v8451_v33  ;;  %v8454_v56 = vrot.slane %v13945_v28, 2  ;;  %v8457_v11 = vrot.slane %v13945_v28, 4  ;;  %v8460_v12 = vrot.slane %v13945_v28, 6  ;;  %v8735_v33 = vld [vmem:[%s14147_s13 + $0x8] sm:$0xff] }
0x12f3   :  { %v8606_v49 = vadd.f32 %v8604_v27, %v8603_v43  ;;  %v11907_v14 = vpack.c.bf16 %v8735_v33, %v8734_v3  ;;  %v8748_v27 = vld [vmem:[%s14147_s13 + $0x70] sm:$0xff] }
0x12f4   :  { %v8456_v36 = vadd.f32 %v8454_v56, %v8452_v46 }
0x12f5   :  { %11908 = vmatpush3.bf16.msra.mxu0 %v11907_v14 }
0x12f6   :  { %v8459_v35 = vadd.f32 %v8457_v11, %v8456_v36  ;;  %v8747_v36 = vld [vmem:[%s14147_s13 + $0x68] sm:$0xff]  ;;  %v8736_v11 = vld [vmem:[%s14147_s13 + $0x10] sm:$0xff]  ;;  %11909 = vmatprep.subr.bf16.mxu0 %v12320_v0 }
0x12f7   :  { %v11901_v43 = vpack.c.bf16 %v8747_v36, %v8746_v34 }
0x12f8   :  { %v8462_v7 = vadd.f32 %v8460_v12, %v8459_v35 }
0x12fa   :  { %12308 = vrcp.f32 %v8462_v7  ;;  %v8749_v7 = vld [vmem:[%s14147_s13 + $0x78] sm:$0xff] }
0x12fb   :  { %12310 = vrcp.f32 %v8606_v49  ;;  %v8738_v49 = vld [vmem:[%s14147_s13 + $0x20] sm:$0xff] }
0x1304   :  { %v13953_v5 = vpop.eup %12308 }
0x1305   :  { %v8464_v60 = vmul.f32 %v13953_v5, %v12299_v62  ;;  %v8474_v16 = vrot.slane %v13953_v5, 6  ;;  %v8488_v9 = vrot.slane %v13953_v5, 4  ;;  %v12311_v8 = vpop.eup %12310  ;;  %v8502_v63 = vrot.slane %v13953_v5, 2 }
0x1306   :  { %v8516_v29 = vmul.f32 %v13953_v5, %v13945_v28  ;;  %v8632_v37 = vrot.slane %v12311_v8, 4  ;;  %v8646_v53 = vrot.slane %v12311_v8, 2  ;;  %v8608_v40 = vmul.f32 %v12311_v8, %v13935_v10 }
0x1307   :  { %v8465_v41 = vadd.f32 1e-10, %v8464_v60  ;;  %v8476_v19 = vmul.f32 %v12299_v62, %v8474_v16  ;;  %v8490_v61 = vmul.f32 %v12299_v62, %v8488_v9  ;;  %v8504_v31 = vmul.f32 %v12299_v62, %v8502_v63  ;;  %v8739_v60 = vld [vmem:[%s14147_s13 + $0x28] sm:$0xff] }
0x1308   :  { %v8517_v20 = vadd.f32 1e-10, %v8516_v29  ;;  %v8681_v32 = vmul.f32 %v13941_v57, %v8632_v37  ;;  %v8525_v42 = vmul.f32 %v13945_v28, %v8474_v16  ;;  %v8693_v22 = vmul.f32 %v13941_v57, %v8646_v53 }
0x1309   :  { %8468 = vperm.xlu1 %11953, %v8465_v41   ;;  %v8477_v13 = vadd.f32 1e-10, %v8476_v19  ;;  %v8491_v1 = vadd.f32 1e-10, %v8490_v61  ;;  %v8505_v39 = vadd.f32 1e-10, %v8504_v31  ;;  %v8660_v26 = vmul.f32 %v12311_v8, %v13941_v57 }
0x130a   :  { %v8682_v38 = vadd.f32 1e-10, %v8681_v32  ;;  %v8526_v52 = vadd.f32 1e-10, %v8525_v42  ;;  %v8694_v55 = vadd.f32 1e-10, %v8693_v22  ;;  %v8634_v2 = vmul.f32 %v13935_v10, %v8632_v37 }
0x130b   :  { %8480 = vperm.xlu0 %11952, %v8477_v13   ;;  %v8609_v51 = vadd.f32 1e-10, %v8608_v40  ;;  %v8618_v62 = vrot.slane %v12311_v8, 6  ;;  %v8661_v23 = vadd.f32 1e-10, %v8660_v26  ;;  %v8648_v25 = vmul.f32 %v13935_v10, %v8646_v53  ;;  %v8741_v8 = vld [vmem:[%s14147_s13 + $0x38] sm:$0xff] }
0x130c   :  { %v8635_v24 = vadd.f32 1e-10, %v8634_v2  ;;  %v8537_v45 = vmul.f32 %v13945_v28, %v8488_v9  ;;  %v8549_v56 = vmul.f32 %v13945_v28, %v8502_v63  ;;  %v8737_v28 = vld [vmem:[%s14147_s13 + $0x18] sm:$0xff]  ;;  %v11904_v5 = vpack.c.bf16 %v8749_v7, %v8748_v27  ;;  %v8740_v9 = vld [vmem:[%s14147_s13 + $0x30] sm:$0xff] }
0x130d   :  { %8494 = vperm.xlu1 %11953, %v8491_v1   ;;  %v8620_v44 = vmul.f32 %v13935_v10, %v8618_v62  ;;  %v8649_v58 = vadd.f32 1e-10, %v8648_v25  ;;  %v8669_v48 = vmul.f32 %v13941_v57, %v8618_v62  ;;  %v8744_v10 = vld [vmem:[%s14147_s13 + $0x50] sm:$0xff]  ;;  %v8745_v57 = vld [vmem:[%s14147_s13 + $0x58] sm:$0xff]  ;;  %v11910_v35 = vpack.c.bf16 %v8737_v28, %v8736_v11 }
0x130e   :  { %v11898_v15 = vpack.c.bf16 %v8745_v57, %v8744_v10  ;;  %v8538_v46 = vadd.f32 1e-10, %v8537_v45  ;;  %v8550_v12 = vadd.f32 1e-10, %v8549_v56  ;;  %v11913_v16 = vpack.c.bf16 %v8739_v60, %v8738_v49 }
0x130f   :  { %8520 = vperm.xlu0 %11952, %v8517_v20   ;;  %v8621_v47 = vadd.f32 1e-10, %v8620_v44  ;;  %v8670_v18 = vadd.f32 1e-10, %v8669_v48  ;;  %11911 = vmatpush3.bf16.msra.mxu0 %v11910_v35  ;;  %v11916_v41 = vpack.c.bf16 %v8741_v8, %v8740_v9  ;;  %v8706_v40 = vrot.slane %v13908_v21, 2  ;;  %v8897_v9 = vld [vmem:[%s14147_s13 + $0x88] sm:$0xff] }
0x1310   :  { %11899 = vmatpush3.bf16.msra.mxu1 %v11898_v15  ;;  %11912 = vmatprep.subr.bf16.mxu0 %v12320_v0  ;;  %v8714_v56 = vrot.slane %v13908_v21, 6 }
0x1311   :  { %8508 = vperm.xlu1 %11953, %v8505_v39   ;;  %11900 = vmatprep.subr.bf16.mxu1 %v12320_v0  ;;  %v8708_v25 = vadd.f32 %v8706_v40, %v13908_v21  ;;  %v8709_v27 = vmax.f32 %v13908_v21, %v8706_v40 }
0x1313   :  { %8685 = vperm.xlu0 %11952, %v8682_v38   ;;  %11914 = vmatpush3.bf16.msra.mxu0 %v11913_v16  ;;  %v8712_v3 = vadd.f32 %v8710_v59, %v8708_v25  ;;  %v8896_v16 = vld [vmem:[%s14147_s13 + $0x80] sm:$0xff]  ;;  %v8903_v25 = vld [vmem:[%s14147_s13 + $0xb8] sm:$0xff] }
0x1314   :  { %11902 = vmatpush3.bf16.msra.mxu1 %v11901_v43  ;;  %11915 = vmatprep.subr.bf16.mxu0 %v12320_v0 }
0x1315   :  { %8529 = vperm.xlu1 %11953, %v8526_v52   ;;  %11903 = vmatprep.subr.bf16.mxu1 %v12320_v0 }
0x1317   :  { %8697 = vperm.xlu0 %11952, %v8694_v55   ;;  %11917 = vmatpush3.bf16.msra.mxu0 %v11916_v41 }
0x1318   :  { %11905 = vmatpush3.bf16.msra.mxu1 %v11904_v5  ;;  %11930 = vmatprep.subr.bf16.mxu0 %v12320_v0 }
0x1319   :  { %8612 = vperm.xlu1 %11953, %v8609_v51   ;;  %11918 = vmatprep.subr.bf16.mxu1 %v12320_v0 }
0x131d   :  { %8664 = vperm.xlu1 %11953, %v8661_v23  }
0x1321   :  { %8624 = vperm.xlu1 %11953, %v8621_v47  }
0x1325   :  { %8638 = vperm.xlu1 %11953, %v8635_v24  }
0x1329   :  { %8652 = vperm.xlu1 %11953, %v8649_v58  }
0x132d   :  { %8673 = vperm.xlu1 %11953, %v8670_v18  }
0x1331   :  { %8541 = vperm.xlu1 %11953, %v8538_v46  }
0x1335   :  { %8553 = vperm.xlu1 %11953, %v8550_v12   ;;  %v8716_v12 = vadd.f32 %v8714_v56, %v8712_v3 }
0x1388   :  { %v8469_v19 = vpop.permute.xlu1 %8468 }
0x1389   :  { %v8471_v38 = vmul.f32 %v8469_v19, %v13894_v50 }
0x138a   :  { %v8481_v37 = vpop.permute.xlu0 %8480 }
0x138b   :  { %v8483_v31 = vmul.f32 %v8481_v37, %v13894_v50 }
0x138c   :  { %v8495_v61 = vpop.permute.xlu1 %8494 }
0x138d   :  { %v8485_v39 = vrot.slane %v8483_v31, 2  ;;  %v8497_v42 = vmul.f32 %v8495_v61, %v13894_v50 }
0x138e   :  { %v8521_v20 = vpop.permute.xlu0 %8520 }
0x138f   :  { %v8487_v26 = vadd.f32 %v8485_v39, %v8471_v38  ;;  %v8499_v62 = vrot.slane %v8497_v42, 4  ;;  %v8523_v34 = vmul.f32 %v8521_v20, %v13917_v17  ;;  %v8899_v20 = vld [vmem:[%s14147_s13 + $0x98] sm:$0xff]  ;;  %v8721_v39 = vrot.slane %v13915_v30, 2 }
0x1390   :  { %v8509_v63 = vpop.permute.xlu1 %8508 }
0x1391   :  { %v8511_v22 = vmul.f32 %v8509_v63, %v13894_v50  ;;  %v8501_v50 = vadd.f32 %v8499_v62, %v8487_v26  ;;  %v11919_v63 = vpack.c.bf16 %v8897_v9, %v8896_v16  ;;  %v8981_v26 = vld [vmem:[%s14147_s13 + $0xd8] sm:$0xff] }
0x1392   :  { %v8686_v23 = vpop.permute.xlu0 %8685 }
0x1393   :  { %v8513_v2 = vrot.slane %v8511_v22, 6  ;;  %v8688_v45 = vmul.f32 %v8686_v23, %v13915_v30 }
0x1394   :  { %v8530_v13 = vpop.permute.xlu1 %8529 }
0x1395   :  { %v8515_v18 = vadd.f32 %v8513_v2, %v8501_v50  ;;  %v8532_v15 = vmul.f32 %v8530_v13, %v13917_v17  ;;  %v8690_v28 = vrot.slane %v8688_v45, 4  ;;  %v8718_v13 = vadd.f32 %v8716_v12, %v13915_v30 }
0x1396   :  { %v8698_v10 = vpop.permute.xlu0 %8697 }
0x1397   :  { %v8700_v36 = vmul.f32 %v8698_v10, %v13915_v30  ;;  %v8524_v7 = vadd.f32 %v8523_v34, %v8515_v18  ;;  %v8534_v49 = vrot.slane %v8532_v15, 2  ;;  %v8723_v62 = vadd.f32 %v8721_v39, %v8718_v13  ;;  %v8984_v10 = vld [vmem:[%s14147_s13 + $0xf0] sm:$0xff] }
0x1398   :  { %v8613_v29 = vpop.permute.xlu1 %8612 }
0x1399   :  { %v8615_v44 = vmul.f32 %v8613_v29, %v13908_v21  ;;  %v8702_v8 = vrot.slane %v8700_v36, 6  ;;  %v8713_v29 = vmax.f32 %v8709_v27, %v8710_v59  ;;  %v8536_v37 = vadd.f32 %v8534_v49, %v8524_v7  ;;  %v9656_v49 = vld [vmem:[%s14150_s14] ss:$0 sm:$0xff] }
0x139b   :  { %v8717_v23 = vmax.f32 %v8713_v29, %v8714_v56  ;;  %v9070_v56 = vld [vmem:[%s14148_s15 + $0x8] sm:$0xff] }
0x139c   :  { %v8665_v1 = vpop.permute.xlu1 %8664 }
0x139d   :  { %v8667_v33 = vmul.f32 %v8665_v1, %v13915_v30  ;;  %v8719_v59 = vmax.f32 %v8717_v23, %v13915_v30 }
0x139f   :  { %v8724_v3 = vmax.f32 %v8719_v59, %v8721_v39 }
0x13a0   :  { %v8625_v32 = vpop.permute.xlu1 %8624 }
0x13a1   :  { %v8627_v53 = vmul.f32 %v8625_v32, %v13908_v21  ;;  %v8978_v32 = vld [vmem:[%s14147_s13 + $0xc0] sm:$0xff] }
0x13a3   :  { %v8629_v55 = vrot.slane %v8627_v53, 2  ;;  %v8979_v53 = vld [vmem:[%s14147_s13 + $0xc8] sm:$0xff] }
0x13a4   :  { %v8639_v52 = vpop.permute.xlu1 %8638  ;;  %v11931_v22 = vpack.c.bf16 %v8979_v53, %v8978_v32 }
0x13a5   :  { %v8641_v51 = vmul.f32 %v8639_v52, %v13908_v21  ;;  %v8631_v58 = vadd.f32 %v8629_v55, %v8615_v44  ;;  %v8900_v52 = vld [vmem:[%s14147_s13 + $0xa0] sm:$0xff]  ;;  %v8901_v55 = vld [vmem:[%s14147_s13 + $0xa8] sm:$0xff]  ;;  %v8725_v44 = vrot.slane %v13915_v30, 4 }
0x13a7   :  { %v8643_v47 = vrot.slane %v8641_v51, 4  ;;  %v8980_v51 = vld [vmem:[%s14147_s13 + $0xd0] sm:$0xff]  ;;  %v8727_v50 = vadd.f32 %v8725_v44, %v8723_v62 }
0x13a8   :  { %v8653_v24 = vpop.permute.xlu1 %8652  ;;  %v11934_v2 = vpack.c.bf16 %v8981_v26, %v8980_v51 }
0x13a9   :  { %v8655_v48 = vmul.f32 %v8653_v24, %v13908_v21  ;;  %v8645_v54 = vadd.f32 %v8643_v47, %v8631_v58  ;;  %v8898_v21 = vld [vmem:[%s14147_s13 + $0x90] sm:$0xff]  ;;  %v11925_v47 = vpack.c.bf16 %v8901_v55, %v8900_v52  ;;  %v8982_v58 = vld [vmem:[%s14147_s13 + $0xe0] sm:$0xff] }
0x13aa   :  { %v8902_v24 = vld [vmem:[%s14147_s13 + $0xb0] sm:$0xff] }
0x13ab   :  { %v8657_v4 = vrot.slane %v8655_v48, 6  ;;  %v8983_v48 = vld [vmem:[%s14147_s13 + $0xe8] sm:$0xff] }
0x13ac   :  { %v8674_v57 = vpop.permute.xlu1 %8673  ;;  %v11937_v18 = vpack.c.bf16 %v8983_v48, %v8982_v58 }
0x13ad   :  { %v8659_v14 = vadd.f32 %v8657_v4, %v8645_v54  ;;  %v8676_v46 = vmul.f32 %v8674_v57, %v13915_v30  ;;  %v8729_v54 = vrot.slane %v13915_v30, 6  ;;  %v11928_v4 = vpack.c.bf16 %v8903_v25, %v8902_v24  ;;  %v8985_v57 = vld [vmem:[%s14147_s13 + $0xf8] sm:$0xff] }
0x13ae   :  { %v11940_v30 = vpack.c.bf16 %v8985_v57, %v8984_v10 }
0x13af   :  { %v8668_v11 = vadd.f32 %v8667_v33, %v8659_v14  ;;  %v8678_v43 = vrot.slane %v8676_v46, 2  ;;  %v8731_v45 = vadd.f32 %v8729_v54, %v8727_v50  ;;  %v8728_v33 = vmax.f32 %v8724_v3, %v8725_v44  ;;  %v9069_v46 = vld [vmem:[%s14148_s15] sm:$0xff] }
0x13b0   :  { %v8542_v35 = vpop.permute.xlu1 %8541  ;;  %v11943_v34 = vpack.c.bf16 %v9070_v56, %v9069_v46 }
0x13b1   :  { %v8680_v5 = vadd.f32 %v8678_v43, %v8668_v11  ;;  %v8544_v60 = vmul.f32 %v8542_v35, %v13917_v17  ;;  %v8733_v15 = vmul.f32 0.125, %v8731_v45  ;;  %v8732_v14 = vmax.f32 %v8728_v33, %v8729_v54 }
0x13b3   :  { %v8692_v41 = vadd.f32 %v8690_v28, %v8680_v5  ;;  %v8546_v19 = vrot.slane %v8544_v60, 4 }
0x13b4   :  { %v8554_v61 = vpop.permute.xlu1 %8553 }
0x13b5   :  { %v8704_v1 = vadd.f32 %v8702_v8, %v8692_v41  ;;  %v8556_v31 = vmul.f32 %v8554_v61, %v13917_v17  ;;  %v8548_v42 = vadd.f32 %v8546_v19, %v8536_v37  ;;  %v11922_v17 = vpack.c.bf16 %v8899_v20, %v8898_v21 }
0x13b7   :  { %v8558_v38 = vrot.slane %v8556_v31, 6  ;;  %11252 = vmatmul.mubr.msk.f32.vlgmr.msra.gmra.mrb[98].mxu1 %vm4292_vm4, %v8704_v1 }
0x13b8   :  { %11920 = vmatpush3.bf16.msra.mxu1 %v11919_v63  ;;  %11289 = vmatprep.mubr.msk.f32.mxu1 %vm12322_vm0, %v12323_v6 }
0x13b9   :  { %v8560_v40 = vadd.f32 %v8558_v38, %v8548_v42  ;;  %11921 = vmatprep.subr.bf16.mxu1 %v12320_v0 }
0x13bb   :  { %11271 = vmatmul.mubr.msk.f32.vlgmr.msra.gmra.mrb[102].mxu0 %vm4292_vm4, %v8560_v40 }
0x13bc   :  { %11923 = vmatpush3.bf16.msra.mxu1 %v11922_v17  ;;  %11932 = vmatpush3.bf16.msra.mxu0 %v11931_v22 }
0x13bd   :  { %11924 = vmatprep.subr.bf16.mxu1 %v12320_v0  ;;  %11933 = vmatprep.subr.bf16.mxu0 %v12320_v0 }
0x13be   :  { %11308 = vmatprep.mubr.msk.f32.mxu0 %vm12322_vm0, %v12323_v6 }
0x13c0   :  { %11926 = vmatpush3.bf16.msra.mxu1 %v11925_v47  ;;  %11935 = vmatpush3.bf16.msra.mxu0 %v11934_v2 }
0x13c1   :  { %11927 = vmatprep.subr.bf16.mxu1 %v12320_v0  ;;  %11936 = vmatprep.subr.bf16.mxu0 %v12320_v0 }
0x13c4   :  { %11929 = vmatpush3.bf16.msra.mxu1 %v11928_v4  ;;  %11938 = vmatpush3.bf16.msra.mxu0 %v11937_v18 }
0x13c5   :  { %11939 = vmatprep.subr.bf16.mxu0 %v12320_v0  ;;  %11942 = vmatprep.subr.bf16.mxu1 %v12320_v0  ;;  %v22_v0 = vstv %s14149_s16 }
0x13c6   :  { %23 = vst [vmem:[#allocation5] sm:$0x1] %v22_v0 }
0x13c7   :  { %11290 = vmatmul.mubr.msk.f32.vlgmr.msra.gmra.mrb[100].mxu1 %vm4292_vm4, %v8733_v15 }
0x13c8   :  { %11941 = vmatpush3.bf16.msra.mxu0 %v11940_v30  ;;  %11315 = vmatprep.mubr.msk.f32.mxu1 %vm12322_vm0, %v12323_v6 }
0x13c9   :  { %11944 = vmatpush3.bf16.msra.mxu1 %v11943_v34 }
0x13cb   :  { %11309 = vmatmul.mubr.msk.f32.vlgmr.msra.gmra.mrb[104].mxu0 %vm4292_vm4, %v8732_v14 }
0x13cd   :  { %v9657_v8 = vld [vmem:[#allocation5] ss:$0 sm:$0xff] }
0x148a   :  { %v8819_v36 = vpop.f32.mrb[98].mxu1 }
0x148b   :  { %v11253_v6 = vpop.f32.mrb[99].mxu1 }
0x148e   :  { %v8892_v11 = vpop.f32.mrb[102].mxu0 }
0x148f   :  { %v8893_v43 = vadd.f32 %v8892_v11, %v8819_v36  ;;  %v11272_v28 = vpop.f32.mrb[103].mxu0 }
0x149a   :  { %v8973_v35 = vpop.f32.mrb[100].mxu1 }
0x149b   :  { %v8977_v12 = vadd.f32 %v8973_v35, %v8893_v43  ;;  %v11291_v27 = vpop.f32.mrb[101].mxu1 }
0x149e   :  { %v9055_v7 = vpop.f32.mrb[104].mxu0 }
0x149f   :  { %v9059_v5 = vadd.f32 %v9055_v7, %v8977_v12  ;;  %v11310_v60 = vpop.f32.mrb[105].mxu0 }
0x14a1   :  { %v9067_v16 = vadd.f32 %v9656_v49, %v9059_v5 }
0x14a3   :  { %v9068_v9 = vmax.f32 %v9067_v16, 0.0 }
0x14a5   :  { %11316 = vmatmul.mubr.msk.f32.vlgmr.msra.gmra.mrb[102].mxu1 %vm9078_vm5, %v9068_v9 }
0x1578   :  { %v9148_v41 = vpop.f32.mrb[102].mxu1 }
0x1579   :  { %v9149_v19 = vadd.f32 %v9657_v8, %v9148_v41  ;;  %v11317_v61 = vpop.f32.mrb[103].mxu1 }
0x157b   :  { %v9659_v63 = vmul.f32 -1.442695, %v9149_v19 }
0x157d   :  { %12312 = vpow2.f32 %v9659_v63 }
0x1587   :  { %v12313_v21 = vpop.eup %12312 }
0x1588   :  { %v9155_v13 = vadd.f32 1.0, %v12313_v21 }
0x158a   :  { %12314 = vrcp.f32 %v9155_v13 }
0x1594   :  { %v12315_v29 = vpop.eup %12314 }
0x1595   :  { %9159 = vst.msk [vmem:[%s14151_s17] sm:$0x3] %vm9158_vm6, %v12315_v29 }

</bundles_post_ra>
